<compile_context>
chip_gen: v5e
topology: v5e:2x2
jax: 0.10.0
libtpu: 0.0.40
codegen_flags: <defaults>
</compile_context>

<pallas_src>
import jax
import jax.numpy as jnp
from jax.experimental import pallas as pl
from jax.experimental.pallas import tpu as pltpu

SELU_ALPHA = 1.6732632423543772
SELU_SCALE = 1.0507009873554805

MXU_DTYPE = jnp.bfloat16  # matmul operand dtype (accumulation is always f32)


def _selu(x):
    # exp(min(x,0)) keeps the negative branch finite and never evaluates exp() of
    # large positives (avoids discarded inf / NaN-grad pattern flagged in review).
    neg = SELU_ALPHA * (jnp.exp(jnp.minimum(x, 0.0)) - 1.0)
    return SELU_SCALE * jnp.where(x > 0, x, neg)


def _pool2x2(a):
    """2x2 / stride-2 max pool on a (H, W, C) value.

    W-direction pairs sit on adjacent sublanes, so one small reshape is unavoidable;
    the H-direction pool is a pure-VPU maximum of two leading-dim slices.
    """
    H, W, C = a.shape
    a = a.reshape(H, W // 2, 2, C)
    a = jnp.max(a, axis=2)                                  # (H, W//2, C)
    a = a.reshape(H // 2, 2, W // 2, C)
    a = jnp.maximum(a[:, 0, :, :], a[:, 1, :, :])           # (H//2, W//2, C)
    return a


def _conv3x3_taps(p_ref, w_ref, b_ref, H, W, Cin, Cout):
    """3x3 conv (zero-padded VMEM ref (H+2, W+2, Cin)) as 9 (Cin, Cout) MXU matmuls,
    bias add + SELU fused. Returns (H, W, Cout) f32."""
    acc = jnp.zeros((H * W, Cout), jnp.float32)
    for ky in range(3):
        for kx in range(3):
            win = p_ref[ky:ky + H, kx:kx + W, :].reshape(H * W, Cin)
            acc = acc + jnp.dot(win.astype(MXU_DTYPE), w_ref[ky * 3 + kx],
                                preferred_element_type=jnp.float32)
    acc = acc + b_ref[...]
    return _selu(acc).reshape(H, W, Cout)


def _make_fused_kernel(H, W):
    """Builds the whole-network kernel for a fixed (H, W) input resolution."""
    assert H % 16 == 0 and W % 16 == 0, "4 pool stages require spatial % 16 == 0"
    H1, W1 = H // 2, W // 2        # after block 1
    H2, W2 = H1 // 2, W1 // 2      # after block 2
    H3, W3 = H2 // 2, W2 // 2      # after block 3
    H4, W4 = H3 // 2, W3 // 2      # after block 4

    def kernel(pat_ref, w1_ref, b1_ref, w2_ref, b2_ref, w3_ref, b3_ref,
               w4_ref, b4_ref, fcw_ref, fcb_ref,
               clsf_ref, feats_ref,
               p2, p3, p4):
        # ---- block 1: im2col conv (single MXU dot, K=27) + SELU + pool ----
        acc = jnp.dot(pat_ref[0], w1_ref[...], preferred_element_type=jnp.float32)
        acc = acc + b1_ref[...]
        a = _pool2x2(_selu(acc).reshape(H, W, 64))            # (H1, W1, 64) f32

        # ---- block 2 (pad in VMEM scratch, 9 taps with K=64) ----
        p2[...] = jnp.zeros_like(p2)
        p2[1:H1 + 1, 1:W1 + 1, :] = a
        a = _pool2x2(_conv3x3_taps(p2, w2_ref, b2_ref, H1, W1, 64, 128))

        # ---- block 3 (K=128) ----
        p3[...] = jnp.zeros_like(p3)
        p3[1:H2 + 1, 1:W2 + 1, :] = a
        a = _pool2x2(_conv3x3_taps(p3, w3_ref, b3_ref, H2, W2, 128, 256))

        # ---- block 4 (K=256) ----
        p4[...] = jnp.zeros_like(p4)
        p4[1:H3 + 1, 1:W3 + 1, :] = a
        a = _pool2x2(_conv3x3_taps(p4, w4_ref, b4_ref, H3, W3, 256, 512))  # (H4, W4, 512)

        # ---- AdaptiveAvgPool2d(1) + Flatten (identity for 16x16 input) ----
        feats = a.reshape(H4 * W4, 512)
        if H4 * W4 > 1:
            feats = jnp.mean(feats, axis=0, keepdims=True)

        # ---- classifier: (1,512) @ (512,1) + b, kept in f32 ----
        clsf = jnp.dot(feats, fcw_ref[...], preferred_element_type=jnp.float32)
        clsf = clsf + fcb_ref[...]

        feats_ref[...] = feats.reshape(1, 1, 512)
        clsf_ref[...] = clsf.reshape(1, 1, 1)

    return kernel, (H1, W1, H2, W2, H3, W3)


def _lusnet_forward_impl(x_nchw, params):
    x = jnp.transpose(x_nchw, (0, 2, 3, 1)).astype(jnp.float32)   # NCHW -> NHWC
    N, H, W, Cin = x.shape
    assert Cin == 3

    # One-time layer-1 im2col on the tiny network input: (N, H*W, 27), tap-major
    # (ky, kx) then cin -- matches the (kh, kw, cin, cout) weight flattening below.
    xp = jnp.pad(x, ((0, 0), (1, 1), (1, 1), (0, 0)))
    taps = [xp[:, ky:ky + H, kx:kx + W, :] for ky in range(3) for kx in range(3)]
    patches = jnp.concatenate(taps, axis=-1).reshape(N, H * W, 27).astype(MXU_DTYPE)

    # Weight prep: torch OIHW -> (9, Cin, Cout), bf16 MXU operands; biases f32.
    (w1, b1), (w2, b2), (w3, b3), (w4, b4) = params["convs"]

    def prep(w):
        cout, cin = w.shape[0], w.shape[1]
        return jnp.transpose(w, (2, 3, 1, 0)).reshape(9, cin, cout).astype(MXU_DTYPE)

    w1p = prep(w1).reshape(27, 64)            # single im2col weight (27, 64)
    w2p, w3p, w4p = prep(w2), prep(w3), prep(w4)
    b1p = b1.reshape(1, 64).astype(jnp.float32)
    b2p = b2.reshape(1, 128).astype(jnp.float32)
    b3p = b3.reshape(1, 256).astype(jnp.float32)
    b4p = b4.reshape(1, 512).astype(jnp.float32)
    fcw = jnp.transpose(params["fc_w"], (1, 0)).astype(jnp.float32)   # (512, 1)
    fcb = params["fc_b"].reshape(1, 1).astype(jnp.float32)

    kernel, (H1, W1, H2, W2, H3, W3) = _make_fused_kernel(H, W)

    clsf3, feats3 = pl.pallas_call(
        kernel,
        out_shape=(jax.ShapeDtypeStruct((N, 1, 1), jnp.float32),
                   jax.ShapeDtypeStruct((N, 1, 512), jnp.float32)),
        grid=(N,),
        in_specs=[
            pl.BlockSpec((1, H * W, 27), lambda n: (n, 0, 0)),   # im2col patches
            pl.BlockSpec((27, 64), lambda n: (0, 0)),            # w1
            pl.BlockSpec((1, 64), lambda n: (0, 0)),             # b1
            pl.BlockSpec((9, 64, 128), lambda n: (0, 0, 0)),     # w2
            pl.BlockSpec((1, 128), lambda n: (0, 0)),            # b2
            pl.BlockSpec((9, 128, 256), lambda n: (0, 0, 0)),    # w3
            pl.BlockSpec((1, 256), lambda n: (0, 0)),            # b3
            pl.BlockSpec((9, 256, 512), lambda n: (0, 0, 0)),    # w4
            pl.BlockSpec((1, 512), lambda n: (0, 0)),            # b4
            pl.BlockSpec((512, 1), lambda n: (0, 0)),            # fc_w
            pl.BlockSpec((1, 1), lambda n: (0, 0)),              # fc_b
        ],
        out_specs=(
            pl.BlockSpec((1, 1, 1), lambda n: (n, 0, 0)),        # clsf
            pl.BlockSpec((1, 1, 512), lambda n: (n, 0, 0)),      # feats
        ),
        scratch_shapes=[
            pltpu.VMEM((H1 + 2, W1 + 2, 64), jnp.float32),       # padded act, block 2 in
            pltpu.VMEM((H2 + 2, W2 + 2, 128), jnp.float32),      # padded act, block 3 in
            pltpu.VMEM((H3 + 2, W3 + 2, 256), jnp.float32),      # padded act, block 4 in
        ],
        compiler_params=pltpu.CompilerParams(
            dimension_semantics=("parallel",)),                  # v7x: 1 image per TC
    )(patches, w1p, b1p, w2p, b2p, w3p, b3p, w4p, b4p, fcw, fcb)

    clsf = clsf3[:, 0, :]      # (N, 1)
    feats = feats3[:, 0, :]    # (N, 512)
    return clsf, feats


lusnet_forward = jax.jit(_lusnet_forward_impl)


def init_params(key):
    """Deterministic synthetic parameters matching LUSNet.__init__ shapes (torch layout)."""
    channels = [(3, 64), (64, 128), (128, 256), (256, 512)]
    convs = []
    for (cin, cout) in channels:
        key, k_w, k_b = jax.random.split(key, 3)
        bound = 1.0 / jnp.sqrt(cin * 9.0)
        w = jax.random.uniform(k_w, (cout, cin, 3, 3), jnp.float32, -bound, bound)
        b = jax.random.uniform(k_b, (cout,), jnp.float32, -bound, bound)
        convs.append((w, b))
    key, k_w, k_b = jax.random.split(key, 3)
    bound = 1.0 / jnp.sqrt(512.0)
    fc_w = jax.random.uniform(k_w, (1, 512), jnp.float32, -bound, bound)
    fc_b = jax.random.uniform(k_b, (1,), jnp.float32, -bound, bound)
    return {"convs": convs, "fc_w": fc_w, "fc_b": fc_b}


if __name__ == "__main__":
    key = jax.random.PRNGKey(0)
    key, k_x, k_p = jax.random.split(key, 3)
    # PyTorch-convention input: NCHW (batch=2, channels=3, 16x16 spatial).
    x = jax.random.normal(k_x, (2, 3, 16, 16), jnp.float32)
    params = init_params(k_p)

    clsf, feats = lusnet_forward(x, params)
    jax.block_until_ready((clsf, feats))

    assert clsf.shape == (2, 1), clsf.shape
    assert feats.shape == (2, 512), feats.shape
    assert jnp.all(jnp.isfinite(clsf)) and jnp.all(jnp.isfinite(feats))
    print("KERNEL_OK")
</pallas_src>

<mosaic_0001>
module attributes {stable_mosaic.version = 11 : i64} {
  func.func @kernel(%arg0: i32, %arg1: memref<1x256x27xbf16, #tpu.memory_space<vmem>>, %arg2: memref<27x64xbf16, #tpu.memory_space<vmem>>, %arg3: memref<1x64xf32, #tpu.memory_space<vmem>>, %arg4: memref<9x64x128xbf16, #tpu.memory_space<vmem>>, %arg5: memref<1x128xf32, #tpu.memory_space<vmem>>, %arg6: memref<9x128x256xbf16, #tpu.memory_space<vmem>>, %arg7: memref<1x256xf32, #tpu.memory_space<vmem>>, %arg8: memref<9x256x512xbf16, #tpu.memory_space<vmem>>, %arg9: memref<1x512xf32, #tpu.memory_space<vmem>>, %arg10: memref<512x1xf32, #tpu.memory_space<vmem>>, %arg11: memref<1x1xf32, #tpu.memory_space<vmem>>, %arg12: memref<1x1x1xf32, #tpu.memory_space<vmem>>, %arg13: memref<1x1x512xf32, #tpu.memory_space<vmem>>, %arg14: memref<10x10x64xf32, #tpu.memory_space<vmem>>, %arg15: memref<6x6x128xf32, #tpu.memory_space<vmem>>, %arg16: memref<4x4x256xf32, #tpu.memory_space<vmem>>) attributes {dimension_semantics = [#tpu.dimension_semantics<parallel>], iteration_bounds = array<i64: 2>, scalar_prefetch = 0 : i64, scratch_operands = 3 : i64, tpu.core_type = #tpu.core_type<tc>, window_params = [{transform_indices = @transform_0, window_bounds = array<i64: 1, 256, 27>}, {pipeline_mode = #tpu.pipeline_mode<synchronous>, transform_indices = @transform_1, window_bounds = array<i64: 27, 64>}, {pipeline_mode = #tpu.pipeline_mode<synchronous>, transform_indices = @transform_2, window_bounds = array<i64: 1, 64>}, {pipeline_mode = #tpu.pipeline_mode<synchronous>, transform_indices = @transform_3, window_bounds = array<i64: 9, 64, 128>}, {pipeline_mode = #tpu.pipeline_mode<synchronous>, transform_indices = @transform_4, window_bounds = array<i64: 1, 128>}, {pipeline_mode = #tpu.pipeline_mode<synchronous>, transform_indices = @transform_5, window_bounds = array<i64: 9, 128, 256>}, {pipeline_mode = #tpu.pipeline_mode<synchronous>, transform_indices = @transform_6, window_bounds = array<i64: 1, 256>}, {pipeline_mode = #tpu.pipeline_mode<synchronous>, transform_indices = @transform_7, window_bounds = array<i64: 9, 256, 512>}, {pipeline_mode = #tpu.pipeline_mode<synchronous>, transform_indices = @transform_8, window_bounds = array<i64: 1, 512>}, {pipeline_mode = #tpu.pipeline_mode<synchronous>, transform_indices = @transform_9, window_bounds = array<i64: 512, 1>}, {pipeline_mode = #tpu.pipeline_mode<synchronous>, transform_indices = @transform_10, window_bounds = array<i64: 1, 1>}, {transform_indices = @transform_11, window_bounds = array<i64: 1, 1, 1>}, {transform_indices = @transform_12, window_bounds = array<i64: 1, 1, 512>}]} {
    %c0 = arith.constant 0 : index
    %c0_0 = arith.constant 0 : index
    %c0_1 = arith.constant 0 : index
    %0 = vector.load %arg1[%c0, %c0_0, %c0_1] : memref<1x256x27xbf16, #tpu.memory_space<vmem>>, vector<1x256x27xbf16>
    %1 = vector.shape_cast %0 : vector<1x256x27xbf16> to vector<256x27xbf16>
    %c0_2 = arith.constant 0 : index
    %c0_3 = arith.constant 0 : index
    %2 = vector.load %arg2[%c0_2, %c0_3] : memref<27x64xbf16, #tpu.memory_space<vmem>>, vector<27x64xbf16>
    %cst = arith.constant dense<0.000000e+00> : vector<256x64xf32>
    %3 = tpu.matmul %1, %2, %cst {dimension_numbers = #tpu.dot_dimension_numbers<[1], [0], [0], [1], [0, 0, 1, 1], [], []>} : vector<256x27xbf16>, vector<27x64xbf16>, vector<256x64xf32> -> vector<256x64xf32>
    %c0_4 = arith.constant 0 : index
    %c0_5 = arith.constant 0 : index
    %4 = vector.load %arg3[%c0_4, %c0_5] : memref<1x64xf32, #tpu.memory_space<vmem>>, vector<1x64xf32>
    %5 = vector.broadcast %4 : vector<1x64xf32> to vector<256x64xf32>
    %6 = arith.addf %3, %5 : vector<256x64xf32>
    %cst_6 = arith.constant 0.000000e+00 : f32
    %7 = vector.broadcast %cst_6 : f32 to vector<256x64xf32>
    %8 = arith.minimumf %6, %7 : vector<256x64xf32>
    %9 = math.exp %8 : vector<256x64xf32>
    %cst_7 = arith.constant 1.000000e+00 : f32
    %10 = vector.broadcast %cst_7 : f32 to vector<256x64xf32>
    %11 = arith.subf %9, %10 : vector<256x64xf32>
    %cst_8 = arith.constant 1.67326319 : f32
    %12 = vector.broadcast %cst_8 : f32 to vector<256x64xf32>
    %13 = arith.mulf %12, %11 : vector<256x64xf32>
    %cst_9 = arith.constant 0.000000e+00 : f32
    %14 = vector.broadcast %cst_9 : f32 to vector<256x64xf32>
    %15 = arith.cmpf ogt, %6, %14 : vector<256x64xf32>
    %16 = arith.select %15, %6, %13 : vector<256x64xi1>, vector<256x64xf32>
    %cst_10 = arith.constant 1.05070102 : f32
    %17 = vector.broadcast %cst_10 : f32 to vector<256x64xf32>
    %18 = arith.mulf %17, %16 : vector<256x64xf32>
    %19 = vector.shape_cast %18 : vector<256x64xf32> to vector<16x16x64xf32>
    %20 = vector.shape_cast %19 : vector<16x16x64xf32> to vector<16x8x2x64xf32>
    %cst_11 = arith.constant dense<0xFF800000> : vector<16x8x64xf32>
    %21 = vector.multi_reduction <maximumf>, %20, %cst_11 [2] : vector<16x8x2x64xf32> to vector<16x8x64xf32>
    %22 = vector.shape_cast %21 : vector<16x8x64xf32> to vector<8x2x8x64xf32>
    %23 = vector.extract_strided_slice %22 {offsets = [0, 0, 0, 0], sizes = [8, 1, 8, 64], strides = [1, 1, 1, 1]} : vector<8x2x8x64xf32> to vector<8x1x8x64xf32>
    %24 = vector.shape_cast %23 : vector<8x1x8x64xf32> to vector<8x8x64xf32>
    %25 = vector.extract_strided_slice %22 {offsets = [0, 1, 0, 0], sizes = [8, 1, 8, 64], strides = [1, 1, 1, 1]} : vector<8x2x8x64xf32> to vector<8x1x8x64xf32>
    %26 = vector.shape_cast %25 : vector<8x1x8x64xf32> to vector<8x8x64xf32>
    %27 = arith.maximumf %24, %26 : vector<8x8x64xf32>
    %cst_12 = arith.constant 0.000000e+00 : f32
    %28 = vector.broadcast %cst_12 : f32 to vector<10x10x64xf32>
    %c0_13 = arith.constant 0 : index
    %c0_14 = arith.constant 0 : index
    %c0_15 = arith.constant 0 : index
    %29 = vector.load %arg14[%c0_13, %c0_14, %c0_15] : memref<10x10x64xf32, #tpu.memory_space<vmem>>, vector<10x10x64xf32>
    tpu.vector_store %arg14[%c0_13, %c0_14, %c0_15], %28 {strides = array<i32>} : memref<10x10x64xf32, #tpu.memory_space<vmem>>, vector<10x10x64xf32>,
    %c1 = arith.constant 1 : index
    %c1_16 = arith.constant 1 : index
    %c0_17 = arith.constant 0 : index
    %30 = vector.load %arg14[%c1, %c1_16, %c0_17] : memref<10x10x64xf32, #tpu.memory_space<vmem>>, vector<8x8x64xf32>
    tpu.vector_store %arg14[%c1, %c1_16, %c0_17], %27 {strides = array<i32>} : memref<10x10x64xf32, #tpu.memory_space<vmem>>, vector<8x8x64xf32>,
    %cst_18 = arith.constant 0.000000e+00 : f32
    %31 = vector.broadcast %cst_18 : f32 to vector<64x128xf32>
    %c0_19 = arith.constant 0 : index
    %c0_20 = arith.constant 0 : index
    %c0_21 = arith.constant 0 : index
    %32 = vector.load %arg14[%c0_19, %c0_20, %c0_21] : memref<10x10x64xf32, #tpu.memory_space<vmem>>, vector<8x8x64xf32>
    %33 = vector.shape_cast %32 : vector<8x8x64xf32> to vector<64x64xf32>
    %34 = arith.truncf %33 : vector<64x64xf32> to vector<64x64xbf16>
    %c0_22 = arith.constant 0 : index
    %c0_23 = arith.constant 0 : index
    %c0_24 = arith.constant 0 : index
    %35 = vector.load %arg4[%c0_22, %c0_23, %c0_24] : memref<9x64x128xbf16, #tpu.memory_space<vmem>>, vector<1x64x128xbf16>
    %36 = vector.shape_cast %35 : vector<1x64x128xbf16> to vector<64x128xbf16>
    %cst_25 = arith.constant dense<0.000000e+00> : vector<64x128xf32>
    %37 = tpu.matmul %34, %36, %cst_25 {dimension_numbers = #tpu.dot_dimension_numbers<[1], [0], [0], [1], [0, 0, 1, 1], [], []>} : vector<64x64xbf16>, vector<64x128xbf16>, vector<64x128xf32> -> vector<64x128xf32>
    %38 = arith.addf %31, %37 : vector<64x128xf32>
    %c0_26 = arith.constant 0 : index
    %c1_27 = arith.constant 1 : index
    %c0_28 = arith.constant 0 : index
    %39 = vector.load %arg14[%c0_26, %c1_27, %c0_28] : memref<10x10x64xf32, #tpu.memory_space<vmem>>, vector<8x8x64xf32>
    %40 = vector.shape_cast %39 : vector<8x8x64xf32> to vector<64x64xf32>
    %41 = arith.truncf %40 : vector<64x64xf32> to vector<64x64xbf16>
    %c1_29 = arith.constant 1 : index
    %c0_30 = arith.constant 0 : index
    %c0_31 = arith.constant 0 : index
    %42 = vector.load %arg4[%c1_29, %c0_30, %c0_31] : memref<9x64x128xbf16, #tpu.memory_space<vmem>>, vector<1x64x128xbf16>
    %43 = vector.shape_cast %42 : vector<1x64x128xbf16> to vector<64x128xbf16>
    %cst_32 = arith.constant dense<0.000000e+00> : vector<64x128xf32>
    %44 = tpu.matmul %41, %43, %cst_32 {dimension_numbers = #tpu.dot_dimension_numbers<[1], [0], [0], [1], [0, 0, 1, 1], [], []>} : vector<64x64xbf16>, vector<64x128xbf16>, vector<64x128xf32> -> vector<64x128xf32>
    %45 = arith.addf %38, %44 : vector<64x128xf32>
    %c0_33 = arith.constant 0 : index
    %c2 = arith.constant 2 : index
    %c0_34 = arith.constant 0 : index
    %46 = vector.load %arg14[%c0_33, %c2, %c0_34] : memref<10x10x64xf32, #tpu.memory_space<vmem>>, vector<8x8x64xf32>
    %47 = vector.shape_cast %46 : vector<8x8x64xf32> to vector<64x64xf32>
    %48 = arith.truncf %47 : vector<64x64xf32> to vector<64x64xbf16>
    %c2_35 = arith.constant 2 : index
    %c0_36 = arith.constant 0 : index
    %c0_37 = arith.constant 0 : index
    %49 = vector.load %arg4[%c2_35, %c0_36, %c0_37] : memref<9x64x128xbf16, #tpu.memory_space<vmem>>, vector<1x64x128xbf16>
    %50 = vector.shape_cast %49 : vector<1x64x128xbf16> to vector<64x128xbf16>
    %cst_38 = arith.constant dense<0.000000e+00> : vector<64x128xf32>
    %51 = tpu.matmul %48, %50, %cst_38 {dimension_numbers = #tpu.dot_dimension_numbers<[1], [0], [0], [1], [0, 0, 1, 1], [], []>} : vector<64x64xbf16>, vector<64x128xbf16>, vector<64x128xf32> -> vector<64x128xf32>
    %52 = arith.addf %45, %51 : vector<64x128xf32>
    %c1_39 = arith.constant 1 : index
    %c0_40 = arith.constant 0 : index
    %c0_41 = arith.constant 0 : index
    %53 = vector.load %arg14[%c1_39, %c0_40, %c0_41] : memref<10x10x64xf32, #tpu.memory_space<vmem>>, vector<8x8x64xf32>
    %54 = vector.shape_cast %53 : vector<8x8x64xf32> to vector<64x64xf32>
    %55 = arith.truncf %54 : vector<64x64xf32> to vector<64x64xbf16>
    %c3 = arith.constant 3 : index
    %c0_42 = arith.constant 0 : index
    %c0_43 = arith.constant 0 : index
    %56 = vector.load %arg4[%c3, %c0_42, %c0_43] : memref<9x64x128xbf16, #tpu.memory_space<vmem>>, vector<1x64x128xbf16>
    %57 = vector.shape_cast %56 : vector<1x64x128xbf16> to vector<64x128xbf16>
    %cst_44 = arith.constant dense<0.000000e+00> : vector<64x128xf32>
    %58 = tpu.matmul %55, %57, %cst_44 {dimension_numbers = #tpu.dot_dimension_numbers<[1], [0], [0], [1], [0, 0, 1, 1], [], []>} : vector<64x64xbf16>, vector<64x128xbf16>, vector<64x128xf32> -> vector<64x128xf32>
    %59 = arith.addf %52, %58 : vector<64x128xf32>
    %c1_45 = arith.constant 1 : index
    %c1_46 = arith.constant 1 : index
    %c0_47 = arith.constant 0 : index
    %60 = vector.load %arg14[%c1_45, %c1_46, %c0_47] : memref<10x10x64xf32, #tpu.memory_space<vmem>>, vector<8x8x64xf32>
    %61 = vector.shape_cast %60 : vector<8x8x64xf32> to vector<64x64xf32>
    %62 = arith.truncf %61 : vector<64x64xf32> to vector<64x64xbf16>
    %c4 = arith.constant 4 : index
    %c0_48 = arith.constant 0 : index
    %c0_49 = arith.constant 0 : index
    %63 = vector.load %arg4[%c4, %c0_48, %c0_49] : memref<9x64x128xbf16, #tpu.memory_space<vmem>>, vector<1x64x128xbf16>
    %64 = vector.shape_cast %63 : vector<1x64x128xbf16> to vector<64x128xbf16>
    %cst_50 = arith.constant dense<0.000000e+00> : vector<64x128xf32>
    %65 = tpu.matmul %62, %64, %cst_50 {dimension_numbers = #tpu.dot_dimension_numbers<[1], [0], [0], [1], [0, 0, 1, 1], [], []>} : vector<64x64xbf16>, vector<64x128xbf16>, vector<64x128xf32> -> vector<64x128xf32>
    %66 = arith.addf %59, %65 : vector<64x128xf32>
    %c1_51 = arith.constant 1 : index
    %c2_52 = arith.constant 2 : index
    %c0_53 = arith.constant 0 : index
    %67 = vector.load %arg14[%c1_51, %c2_52, %c0_53] : memref<10x10x64xf32, #tpu.memory_space<vmem>>, vector<8x8x64xf32>
    %68 = vector.shape_cast %67 : vector<8x8x64xf32> to vector<64x64xf32>
    %69 = arith.truncf %68 : vector<64x64xf32> to vector<64x64xbf16>
    %c5 = arith.constant 5 : index
    %c0_54 = arith.constant 0 : index
    %c0_55 = arith.constant 0 : index
    %70 = vector.load %arg4[%c5, %c0_54, %c0_55] : memref<9x64x128xbf16, #tpu.memory_space<vmem>>, vector<1x64x128xbf16>
    %71 = vector.shape_cast %70 : vector<1x64x128xbf16> to vector<64x128xbf16>
    %cst_56 = arith.constant dense<0.000000e+00> : vector<64x128xf32>
    %72 = tpu.matmul %69, %71, %cst_56 {dimension_numbers = #tpu.dot_dimension_numbers<[1], [0], [0], [1], [0, 0, 1, 1], [], []>} : vector<64x64xbf16>, vector<64x128xbf16>, vector<64x128xf32> -> vector<64x128xf32>
    %73 = arith.addf %66, %72 : vector<64x128xf32>
    %c2_57 = arith.constant 2 : index
    %c0_58 = arith.constant 0 : index
    %c0_59 = arith.constant 0 : index
    %74 = vector.load %arg14[%c2_57, %c0_58, %c0_59] : memref<10x10x64xf32, #tpu.memory_space<vmem>>, vector<8x8x64xf32>
    %75 = vector.shape_cast %74 : vector<8x8x64xf32> to vector<64x64xf32>
    %76 = arith.truncf %75 : vector<64x64xf32> to vector<64x64xbf16>
    %c6 = arith.constant 6 : index
    %c0_60 = arith.constant 0 : index
    %c0_61 = arith.constant 0 : index
    %77 = vector.load %arg4[%c6, %c0_60, %c0_61] : memref<9x64x128xbf16, #tpu.memory_space<vmem>>, vector<1x64x128xbf16>
    %78 = vector.shape_cast %77 : vector<1x64x128xbf16> to vector<64x128xbf16>
    %cst_62 = arith.constant dense<0.000000e+00> : vector<64x128xf32>
    %79 = tpu.matmul %76, %78, %cst_62 {dimension_numbers = #tpu.dot_dimension_numbers<[1], [0], [0], [1], [0, 0, 1, 1], [], []>} : vector<64x64xbf16>, vector<64x128xbf16>, vector<64x128xf32> -> vector<64x128xf32>
    %80 = arith.addf %73, %79 : vector<64x128xf32>
    %c2_63 = arith.constant 2 : index
    %c1_64 = arith.constant 1 : index
    %c0_65 = arith.constant 0 : index
    %81 = vector.load %arg14[%c2_63, %c1_64, %c0_65] : memref<10x10x64xf32, #tpu.memory_space<vmem>>, vector<8x8x64xf32>
    %82 = vector.shape_cast %81 : vector<8x8x64xf32> to vector<64x64xf32>
    %83 = arith.truncf %82 : vector<64x64xf32> to vector<64x64xbf16>
    %c7 = arith.constant 7 : index
    %c0_66 = arith.constant 0 : index
    %c0_67 = arith.constant 0 : index
    %84 = vector.load %arg4[%c7, %c0_66, %c0_67] : memref<9x64x128xbf16, #tpu.memory_space<vmem>>, vector<1x64x128xbf16>
    %85 = vector.shape_cast %84 : vector<1x64x128xbf16> to vector<64x128xbf16>
    %cst_68 = arith.constant dense<0.000000e+00> : vector<64x128xf32>
    %86 = tpu.matmul %83, %85, %cst_68 {dimension_numbers = #tpu.dot_dimension_numbers<[1], [0], [0], [1], [0, 0, 1, 1], [], []>} : vector<64x64xbf16>, vector<64x128xbf16>, vector<64x128xf32> -> vector<64x128xf32>
    %87 = arith.addf %80, %86 : vector<64x128xf32>
    %c2_69 = arith.constant 2 : index
    %c2_70 = arith.constant 2 : index
    %c0_71 = arith.constant 0 : index
    %88 = vector.load %arg14[%c2_69, %c2_70, %c0_71] : memref<10x10x64xf32, #tpu.memory_space<vmem>>, vector<8x8x64xf32>
    %89 = vector.shape_cast %88 : vector<8x8x64xf32> to vector<64x64xf32>
    %90 = arith.truncf %89 : vector<64x64xf32> to vector<64x64xbf16>
    %c8 = arith.constant 8 : index
    %c0_72 = arith.constant 0 : index
    %c0_73 = arith.constant 0 : index
    %91 = vector.load %arg4[%c8, %c0_72, %c0_73] : memref<9x64x128xbf16, #tpu.memory_space<vmem>>, vector<1x64x128xbf16>
    %92 = vector.shape_cast %91 : vector<1x64x128xbf16> to vector<64x128xbf16>
    %cst_74 = arith.constant dense<0.000000e+00> : vector<64x128xf32>
    %93 = tpu.matmul %90, %92, %cst_74 {dimension_numbers = #tpu.dot_dimension_numbers<[1], [0], [0], [1], [0, 0, 1, 1], [], []>} : vector<64x64xbf16>, vector<64x128xbf16>, vector<64x128xf32> -> vector<64x128xf32>
    %94 = arith.addf %87, %93 : vector<64x128xf32>
    %c0_75 = arith.constant 0 : index
    %c0_76 = arith.constant 0 : index
    %95 = vector.load %arg5[%c0_75, %c0_76] : memref<1x128xf32, #tpu.memory_space<vmem>>, vector<1x128xf32>
    %96 = vector.broadcast %95 : vector<1x128xf32> to vector<64x128xf32>
    %97 = arith.addf %94, %96 : vector<64x128xf32>
    %cst_77 = arith.constant 0.000000e+00 : f32
    %98 = vector.broadcast %cst_77 : f32 to vector<64x128xf32>
    %99 = arith.minimumf %97, %98 : vector<64x128xf32>
    %100 = math.exp %99 : vector<64x128xf32>
    %cst_78 = arith.constant 1.000000e+00 : f32
    %101 = vector.broadcast %cst_78 : f32 to vector<64x128xf32>
    %102 = arith.subf %100, %101 : vector<64x128xf32>
    %cst_79 = arith.constant 1.67326319 : f32
    %103 = vector.broadcast %cst_79 : f32 to vector<64x128xf32>
    %104 = arith.mulf %103, %102 : vector<64x128xf32>
    %cst_80 = arith.constant 0.000000e+00 : f32
    %105 = vector.broadcast %cst_80 : f32 to vector<64x128xf32>
    %106 = arith.cmpf ogt, %97, %105 : vector<64x128xf32>
    %107 = arith.select %106, %97, %104 : vector<64x128xi1>, vector<64x128xf32>
    %cst_81 = arith.constant 1.05070102 : f32
    %108 = vector.broadcast %cst_81 : f32 to vector<64x128xf32>
    %109 = arith.mulf %108, %107 : vector<64x128xf32>
    %110 = vector.shape_cast %109 : vector<64x128xf32> to vector<8x8x128xf32>
    %111 = vector.shape_cast %110 : vector<8x8x128xf32> to vector<8x4x2x128xf32>
    %cst_82 = arith.constant dense<0xFF800000> : vector<8x4x128xf32>
    %112 = vector.multi_reduction <maximumf>, %111, %cst_82 [2] : vector<8x4x2x128xf32> to vector<8x4x128xf32>
    %113 = vector.shape_cast %112 : vector<8x4x128xf32> to vector<4x2x4x128xf32>
    %114 = vector.extract_strided_slice %113 {offsets = [0, 0, 0, 0], sizes = [4, 1, 4, 128], strides = [1, 1, 1, 1]} : vector<4x2x4x128xf32> to vector<4x1x4x128xf32>
    %115 = vector.shape_cast %114 : vector<4x1x4x128xf32> to vector<4x4x128xf32>
    %116 = vector.extract_strided_slice %113 {offsets = [0, 1, 0, 0], sizes = [4, 1, 4, 128], strides = [1, 1, 1, 1]} : vector<4x2x4x128xf32> to vector<4x1x4x128xf32>
    %117 = vector.shape_cast %116 : vector<4x1x4x128xf32> to vector<4x4x128xf32>
    %118 = arith.maximumf %115, %117 : vector<4x4x128xf32>
    %cst_83 = arith.constant 0.000000e+00 : f32
    %119 = vector.broadcast %cst_83 : f32 to vector<6x6x128xf32>
    %c0_84 = arith.constant 0 : index
    %c0_85 = arith.constant 0 : index
    %c0_86 = arith.constant 0 : index
    %120 = vector.load %arg15[%c0_84, %c0_85, %c0_86] : memref<6x6x128xf32, #tpu.memory_space<vmem>>, vector<6x6x128xf32>
    tpu.vector_store %arg15[%c0_84, %c0_85, %c0_86], %119 {strides = array<i32>} : memref<6x6x128xf32, #tpu.memory_space<vmem>>, vector<6x6x128xf32>,
    %c1_87 = arith.constant 1 : index
    %c1_88 = arith.constant 1 : index
    %c0_89 = arith.constant 0 : index
    %121 = vector.load %arg15[%c1_87, %c1_88, %c0_89] : memref<6x6x128xf32, #tpu.memory_space<vmem>>, vector<4x4x128xf32>
    tpu.vector_store %arg15[%c1_87, %c1_88, %c0_89], %118 {strides = array<i32>} : memref<6x6x128xf32, #tpu.memory_space<vmem>>, vector<4x4x128xf32>,
    %cst_90 = arith.constant 0.000000e+00 : f32
    %122 = vector.broadcast %cst_90 : f32 to vector<16x256xf32>
    %c0_91 = arith.constant 0 : index
    %c0_92 = arith.constant 0 : index
    %c0_93 = arith.constant 0 : index
    %123 = vector.load %arg15[%c0_91, %c0_92, %c0_93] : memref<6x6x128xf32, #tpu.memory_space<vmem>>, vector<4x4x128xf32>
    %124 = vector.shape_cast %123 : vector<4x4x128xf32> to vector<16x128xf32>
    %125 = arith.truncf %124 : vector<16x128xf32> to vector<16x128xbf16>
    %c0_94 = arith.constant 0 : index
    %c0_95 = arith.constant 0 : index
    %c0_96 = arith.constant 0 : index
    %126 = vector.load %arg6[%c0_94, %c0_95, %c0_96] : memref<9x128x256xbf16, #tpu.memory_space<vmem>>, vector<1x128x256xbf16>
    %127 = vector.shape_cast %126 : vector<1x128x256xbf16> to vector<128x256xbf16>
    %cst_97 = arith.constant dense<0.000000e+00> : vector<16x256xf32>
    %128 = tpu.matmul %125, %127, %cst_97 {dimension_numbers = #tpu.dot_dimension_numbers<[1], [0], [0], [1], [0, 0, 1, 1], [], []>} : vector<16x128xbf16>, vector<128x256xbf16>, vector<16x256xf32> -> vector<16x256xf32>
    %129 = arith.addf %122, %128 : vector<16x256xf32>
    %c0_98 = arith.constant 0 : index
    %c1_99 = arith.constant 1 : index
    %c0_100 = arith.constant 0 : index
    %130 = vector.load %arg15[%c0_98, %c1_99, %c0_100] : memref<6x6x128xf32, #tpu.memory_space<vmem>>, vector<4x4x128xf32>
    %131 = vector.shape_cast %130 : vector<4x4x128xf32> to vector<16x128xf32>
    %132 = arith.truncf %131 : vector<16x128xf32> to vector<16x128xbf16>
    %c1_101 = arith.constant 1 : index
    %c0_102 = arith.constant 0 : index
    %c0_103 = arith.constant 0 : index
    %133 = vector.load %arg6[%c1_101, %c0_102, %c0_103] : memref<9x128x256xbf16, #tpu.memory_space<vmem>>, vector<1x128x256xbf16>
    %134 = vector.shape_cast %133 : vector<1x128x256xbf16> to vector<128x256xbf16>
    %cst_104 = arith.constant dense<0.000000e+00> : vector<16x256xf32>
    %135 = tpu.matmul %132, %134, %cst_104 {dimension_numbers = #tpu.dot_dimension_numbers<[1], [0], [0], [1], [0, 0, 1, 1], [], []>} : vector<16x128xbf16>, vector<128x256xbf16>, vector<16x256xf32> -> vector<16x256xf32>
    %136 = arith.addf %129, %135 : vector<16x256xf32>
    %c0_105 = arith.constant 0 : index
    %c2_106 = arith.constant 2 : index
    %c0_107 = arith.constant 0 : index
    %137 = vector.load %arg15[%c0_105, %c2_106, %c0_107] : memref<6x6x128xf32, #tpu.memory_space<vmem>>, vector<4x4x128xf32>
    %138 = vector.shape_cast %137 : vector<4x4x128xf32> to vector<16x128xf32>
    %139 = arith.truncf %138 : vector<16x128xf32> to vector<16x128xbf16>
    %c2_108 = arith.constant 2 : index
    %c0_109 = arith.constant 0 : index
    %c0_110 = arith.constant 0 : index
    %140 = vector.load %arg6[%c2_108, %c0_109, %c0_110] : memref<9x128x256xbf16, #tpu.memory_space<vmem>>, vector<1x128x256xbf16>
    %141 = vector.shape_cast %140 : vector<1x128x256xbf16> to vector<128x256xbf16>
    %cst_111 = arith.constant dense<0.000000e+00> : vector<16x256xf32>
    %142 = tpu.matmul %139, %141, %cst_111 {dimension_numbers = #tpu.dot_dimension_numbers<[1], [0], [0], [1], [0, 0, 1, 1], [], []>} : vector<16x128xbf16>, vector<128x256xbf16>, vector<16x256xf32> -> vector<16x256xf32>
    %143 = arith.addf %136, %142 : vector<16x256xf32>
    %c1_112 = arith.constant 1 : index
    %c0_113 = arith.constant 0 : index
    %c0_114 = arith.constant 0 : index
    %144 = vector.load %arg15[%c1_112, %c0_113, %c0_114] : memref<6x6x128xf32, #tpu.memory_space<vmem>>, vector<4x4x128xf32>
    %145 = vector.shape_cast %144 : vector<4x4x128xf32> to vector<16x128xf32>
    %146 = arith.truncf %145 : vector<16x128xf32> to vector<16x128xbf16>
    %c3_115 = arith.constant 3 : index
    %c0_116 = arith.constant 0 : index
    %c0_117 = arith.constant 0 : index
    %147 = vector.load %arg6[%c3_115, %c0_116, %c0_117] : memref<9x128x256xbf16, #tpu.memory_space<vmem>>, vector<1x128x256xbf16>
    %148 = vector.shape_cast %147 : vector<1x128x256xbf16> to vector<128x256xbf16>
    %cst_118 = arith.constant dense<0.000000e+00> : vector<16x256xf32>
    %149 = tpu.matmul %146, %148, %cst_118 {dimension_numbers = #tpu.dot_dimension_numbers<[1], [0], [0], [1], [0, 0, 1, 1], [], []>} : vector<16x128xbf16>, vector<128x256xbf16>, vector<16x256xf32> -> vector<16x256xf32>
    %150 = arith.addf %143, %149 : vector<16x256xf32>
    %c1_119 = arith.constant 1 : index
    %c1_120 = arith.constant 1 : index
    %c0_121 = arith.constant 0 : index
    %151 = vector.load %arg15[%c1_119, %c1_120, %c0_121] : memref<6x6x128xf32, #tpu.memory_space<vmem>>, vector<4x4x128xf32>
    %152 = vector.shape_cast %151 : vector<4x4x128xf32> to vector<16x128xf32>
    %153 = arith.truncf %152 : vector<16x128xf32> to vector<16x128xbf16>
    %c4_122 = arith.constant 4 : index
    %c0_123 = arith.constant 0 : index
    %c0_124 = arith.constant 0 : index
    %154 = vector.load %arg6[%c4_122, %c0_123, %c0_124] : memref<9x128x256xbf16, #tpu.memory_space<vmem>>, vector<1x128x256xbf16>
    %155 = vector.shape_cast %154 : vector<1x128x256xbf16> to vector<128x256xbf16>
    %cst_125 = arith.constant dense<0.000000e+00> : vector<16x256xf32>
    %156 = tpu.matmul %153, %155, %cst_125 {dimension_numbers = #tpu.dot_dimension_numbers<[1], [0], [0], [1], [0, 0, 1, 1], [], []>} : vector<16x128xbf16>, vector<128x256xbf16>, vector<16x256xf32> -> vector<16x256xf32>
    %157 = arith.addf %150, %156 : vector<16x256xf32>
    %c1_126 = arith.constant 1 : index
    %c2_127 = arith.constant 2 : index
    %c0_128 = arith.constant 0 : index
    %158 = vector.load %arg15[%c1_126, %c2_127, %c0_128] : memref<6x6x128xf32, #tpu.memory_space<vmem>>, vector<4x4x128xf32>
    %159 = vector.shape_cast %158 : vector<4x4x128xf32> to vector<16x128xf32>
    %160 = arith.truncf %159 : vector<16x128xf32> to vector<16x128xbf16>
    %c5_129 = arith.constant 5 : index
    %c0_130 = arith.constant 0 : index
    %c0_131 = arith.constant 0 : index
    %161 = vector.load %arg6[%c5_129, %c0_130, %c0_131] : memref<9x128x256xbf16, #tpu.memory_space<vmem>>, vector<1x128x256xbf16>
    %162 = vector.shape_cast %161 : vector<1x128x256xbf16> to vector<128x256xbf16>
    %cst_132 = arith.constant dense<0.000000e+00> : vector<16x256xf32>
    %163 = tpu.matmul %160, %162, %cst_132 {dimension_numbers = #tpu.dot_dimension_numbers<[1], [0], [0], [1], [0, 0, 1, 1], [], []>} : vector<16x128xbf16>, vector<128x256xbf16>, vector<16x256xf32> -> vector<16x256xf32>
    %164 = arith.addf %157, %163 : vector<16x256xf32>
    %c2_133 = arith.constant 2 : index
    %c0_134 = arith.constant 0 : index
    %c0_135 = arith.constant 0 : index
    %165 = vector.load %arg15[%c2_133, %c0_134, %c0_135] : memref<6x6x128xf32, #tpu.memory_space<vmem>>, vector<4x4x128xf32>
    %166 = vector.shape_cast %165 : vector<4x4x128xf32> to vector<16x128xf32>
    %167 = arith.truncf %166 : vector<16x128xf32> to vector<16x128xbf16>
    %c6_136 = arith.constant 6 : index
    %c0_137 = arith.constant 0 : index
    %c0_138 = arith.constant 0 : index
    %168 = vector.load %arg6[%c6_136, %c0_137, %c0_138] : memref<9x128x256xbf16, #tpu.memory_space<vmem>>, vector<1x128x256xbf16>
    %169 = vector.shape_cast %168 : vector<1x128x256xbf16> to vector<128x256xbf16>
    %cst_139 = arith.constant dense<0.000000e+00> : vector<16x256xf32>
    %170 = tpu.matmul %167, %169, %cst_139 {dimension_numbers = #tpu.dot_dimension_numbers<[1], [0], [0], [1], [0, 0, 1, 1], [], []>} : vector<16x128xbf16>, vector<128x256xbf16>, vector<16x256xf32> -> vector<16x256xf32>
    %171 = arith.addf %164, %170 : vector<16x256xf32>
    %c2_140 = arith.constant 2 : index
    %c1_141 = arith.constant 1 : index
    %c0_142 = arith.constant 0 : index
    %172 = vector.load %arg15[%c2_140, %c1_141, %c0_142] : memref<6x6x128xf32, #tpu.memory_space<vmem>>, vector<4x4x128xf32>
    %173 = vector.shape_cast %172 : vector<4x4x128xf32> to vector<16x128xf32>
    %174 = arith.truncf %173 : vector<16x128xf32> to vector<16x128xbf16>
    %c7_143 = arith.constant 7 : index
    %c0_144 = arith.constant 0 : index
    %c0_145 = arith.constant 0 : index
    %175 = vector.load %arg6[%c7_143, %c0_144, %c0_145] : memref<9x128x256xbf16, #tpu.memory_space<vmem>>, vector<1x128x256xbf16>
    %176 = vector.shape_cast %175 : vector<1x128x256xbf16> to vector<128x256xbf16>
    %cst_146 = arith.constant dense<0.000000e+00> : vector<16x256xf32>
    %177 = tpu.matmul %174, %176, %cst_146 {dimension_numbers = #tpu.dot_dimension_numbers<[1], [0], [0], [1], [0, 0, 1, 1], [], []>} : vector<16x128xbf16>, vector<128x256xbf16>, vector<16x256xf32> -> vector<16x256xf32>
    %178 = arith.addf %171, %177 : vector<16x256xf32>
    %c2_147 = arith.constant 2 : index
    %c2_148 = arith.constant 2 : index
    %c0_149 = arith.constant 0 : index
    %179 = vector.load %arg15[%c2_147, %c2_148, %c0_149] : memref<6x6x128xf32, #tpu.memory_space<vmem>>, vector<4x4x128xf32>
    %180 = vector.shape_cast %179 : vector<4x4x128xf32> to vector<16x128xf32>
    %181 = arith.truncf %180 : vector<16x128xf32> to vector<16x128xbf16>
    %c8_150 = arith.constant 8 : index
    %c0_151 = arith.constant 0 : index
    %c0_152 = arith.constant 0 : index
    %182 = vector.load %arg6[%c8_150, %c0_151, %c0_152] : memref<9x128x256xbf16, #tpu.memory_space<vmem>>, vector<1x128x256xbf16>
    %183 = vector.shape_cast %182 : vector<1x128x256xbf16> to vector<128x256xbf16>
    %cst_153 = arith.constant dense<0.000000e+00> : vector<16x256xf32>
    %184 = tpu.matmul %181, %183, %cst_153 {dimension_numbers = #tpu.dot_dimension_numbers<[1], [0], [0], [1], [0, 0, 1, 1], [], []>} : vector<16x128xbf16>, vector<128x256xbf16>, vector<16x256xf32> -> vector<16x256xf32>
    %185 = arith.addf %178, %184 : vector<16x256xf32>
    %c0_154 = arith.constant 0 : index
    %c0_155 = arith.constant 0 : index
    %186 = vector.load %arg7[%c0_154, %c0_155] : memref<1x256xf32, #tpu.memory_space<vmem>>, vector<1x256xf32>
    %187 = vector.broadcast %186 : vector<1x256xf32> to vector<16x256xf32>
    %188 = arith.addf %185, %187 : vector<16x256xf32>
    %cst_156 = arith.constant 0.000000e+00 : f32
    %189 = vector.broadcast %cst_156 : f32 to vector<16x256xf32>
    %190 = arith.minimumf %188, %189 : vector<16x256xf32>
    %191 = math.exp %190 : vector<16x256xf32>
    %cst_157 = arith.constant 1.000000e+00 : f32
    %192 = vector.broadcast %cst_157 : f32 to vector<16x256xf32>
    %193 = arith.subf %191, %192 : vector<16x256xf32>
    %cst_158 = arith.constant 1.67326319 : f32
    %194 = vector.broadcast %cst_158 : f32 to vector<16x256xf32>
    %195 = arith.mulf %194, %193 : vector<16x256xf32>
    %cst_159 = arith.constant 0.000000e+00 : f32
    %196 = vector.broadcast %cst_159 : f32 to vector<16x256xf32>
    %197 = arith.cmpf ogt, %188, %196 : vector<16x256xf32>
    %198 = arith.select %197, %188, %195 : vector<16x256xi1>, vector<16x256xf32>
    %cst_160 = arith.constant 1.05070102 : f32
    %199 = vector.broadcast %cst_160 : f32 to vector<16x256xf32>
    %200 = arith.mulf %199, %198 : vector<16x256xf32>
    %201 = vector.shape_cast %200 : vector<16x256xf32> to vector<4x4x256xf32>
    %202 = vector.shape_cast %201 : vector<4x4x256xf32> to vector<4x2x2x256xf32>
    %cst_161 = arith.constant dense<0xFF800000> : vector<4x2x256xf32>
    %203 = vector.multi_reduction <maximumf>, %202, %cst_161 [2] : vector<4x2x2x256xf32> to vector<4x2x256xf32>
    %204 = vector.shape_cast %203 : vector<4x2x256xf32> to vector<2x2x2x256xf32>
    %205 = vector.extract_strided_slice %204 {offsets = [0, 0, 0, 0], sizes = [2, 1, 2, 256], strides = [1, 1, 1, 1]} : vector<2x2x2x256xf32> to vector<2x1x2x256xf32>
    %206 = vector.shape_cast %205 : vector<2x1x2x256xf32> to vector<2x2x256xf32>
    %207 = vector.extract_strided_slice %204 {offsets = [0, 1, 0, 0], sizes = [2, 1, 2, 256], strides = [1, 1, 1, 1]} : vector<2x2x2x256xf32> to vector<2x1x2x256xf32>
    %208 = vector.shape_cast %207 : vector<2x1x2x256xf32> to vector<2x2x256xf32>
    %209 = arith.maximumf %206, %208 : vector<2x2x256xf32>
    %cst_162 = arith.constant 0.000000e+00 : f32
    %210 = vector.broadcast %cst_162 : f32 to vector<4x4x256xf32>
    %c0_163 = arith.constant 0 : index
    %c0_164 = arith.constant 0 : index
    %c0_165 = arith.constant 0 : index
    %211 = vector.load %arg16[%c0_163, %c0_164, %c0_165] : memref<4x4x256xf32, #tpu.memory_space<vmem>>, vector<4x4x256xf32>
    tpu.vector_store %arg16[%c0_163, %c0_164, %c0_165], %210 {strides = array<i32>} : memref<4x4x256xf32, #tpu.memory_space<vmem>>, vector<4x4x256xf32>,
    %c1_166 = arith.constant 1 : index
    %c1_167 = arith.constant 1 : index
    %c0_168 = arith.constant 0 : index
    %212 = vector.load %arg16[%c1_166, %c1_167, %c0_168] : memref<4x4x256xf32, #tpu.memory_space<vmem>>, vector<2x2x256xf32>
    tpu.vector_store %arg16[%c1_166, %c1_167, %c0_168], %209 {strides = array<i32>} : memref<4x4x256xf32, #tpu.memory_space<vmem>>, vector<2x2x256xf32>,
    %cst_169 = arith.constant 0.000000e+00 : f32
    %213 = vector.broadcast %cst_169 : f32 to vector<4x512xf32>
    %c0_170 = arith.constant 0 : index
    %c0_171 = arith.constant 0 : index
    %c0_172 = arith.constant 0 : index
    %214 = vector.load %arg16[%c0_170, %c0_171, %c0_172] : memref<4x4x256xf32, #tpu.memory_space<vmem>>, vector<2x2x256xf32>
    %215 = vector.shape_cast %214 : vector<2x2x256xf32> to vector<4x256xf32>
    %216 = arith.truncf %215 : vector<4x256xf32> to vector<4x256xbf16>
    %c0_173 = arith.constant 0 : index
    %c0_174 = arith.constant 0 : index
    %c0_175 = arith.constant 0 : index
    %217 = vector.load %arg8[%c0_173, %c0_174, %c0_175] : memref<9x256x512xbf16, #tpu.memory_space<vmem>>, vector<1x256x512xbf16>
    %218 = vector.shape_cast %217 : vector<1x256x512xbf16> to vector<256x512xbf16>
    %cst_176 = arith.constant dense<0.000000e+00> : vector<4x512xf32>
    %219 = tpu.matmul %216, %218, %cst_176 {dimension_numbers = #tpu.dot_dimension_numbers<[1], [0], [0], [1], [0, 0, 1, 1], [], []>} : vector<4x256xbf16>, vector<256x512xbf16>, vector<4x512xf32> -> vector<4x512xf32>
    %220 = arith.addf %213, %219 : vector<4x512xf32>
    %c0_177 = arith.constant 0 : index
    %c1_178 = arith.constant 1 : index
    %c0_179 = arith.constant 0 : index
    %221 = vector.load %arg16[%c0_177, %c1_178, %c0_179] : memref<4x4x256xf32, #tpu.memory_space<vmem>>, vector<2x2x256xf32>
    %222 = vector.shape_cast %221 : vector<2x2x256xf32> to vector<4x256xf32>
    %223 = arith.truncf %222 : vector<4x256xf32> to vector<4x256xbf16>
    %c1_180 = arith.constant 1 : index
    %c0_181 = arith.constant 0 : index
    %c0_182 = arith.constant 0 : index
    %224 = vector.load %arg8[%c1_180, %c0_181, %c0_182] : memref<9x256x512xbf16, #tpu.memory_space<vmem>>, vector<1x256x512xbf16>
    %225 = vector.shape_cast %224 : vector<1x256x512xbf16> to vector<256x512xbf16>
    %cst_183 = arith.constant dense<0.000000e+00> : vector<4x512xf32>
    %226 = tpu.matmul %223, %225, %cst_183 {dimension_numbers = #tpu.dot_dimension_numbers<[1], [0], [0], [1], [0, 0, 1, 1], [], []>} : vector<4x256xbf16>, vector<256x512xbf16>, vector<4x512xf32> -> vector<4x512xf32>
    %227 = arith.addf %220, %226 : vector<4x512xf32>
    %c0_184 = arith.constant 0 : index
    %c2_185 = arith.constant 2 : index
    %c0_186 = arith.constant 0 : index
    %228 = vector.load %arg16[%c0_184, %c2_185, %c0_186] : memref<4x4x256xf32, #tpu.memory_space<vmem>>, vector<2x2x256xf32>
    %229 = vector.shape_cast %228 : vector<2x2x256xf32> to vector<4x256xf32>
    %230 = arith.truncf %229 : vector<4x256xf32> to vector<4x256xbf16>
    %c2_187 = arith.constant 2 : index
    %c0_188 = arith.constant 0 : index
    %c0_189 = arith.constant 0 : index
    %231 = vector.load %arg8[%c2_187, %c0_188, %c0_189] : memref<9x256x512xbf16, #tpu.memory_space<vmem>>, vector<1x256x512xbf16>
    %232 = vector.shape_cast %231 : vector<1x256x512xbf16> to vector<256x512xbf16>
    %cst_190 = arith.constant dense<0.000000e+00> : vector<4x512xf32>
    %233 = tpu.matmul %230, %232, %cst_190 {dimension_numbers = #tpu.dot_dimension_numbers<[1], [0], [0], [1], [0, 0, 1, 1], [], []>} : vector<4x256xbf16>, vector<256x512xbf16>, vector<4x512xf32> -> vector<4x512xf32>
    %234 = arith.addf %227, %233 : vector<4x512xf32>
    %c1_191 = arith.constant 1 : index
    %c0_192 = arith.constant 0 : index
    %c0_193 = arith.constant 0 : index
    %235 = vector.load %arg16[%c1_191, %c0_192, %c0_193] : memref<4x4x256xf32, #tpu.memory_space<vmem>>, vector<2x2x256xf32>
    %236 = vector.shape_cast %235 : vector<2x2x256xf32> to vector<4x256xf32>
    %237 = arith.truncf %236 : vector<4x256xf32> to vector<4x256xbf16>
    %c3_194 = arith.constant 3 : index
    %c0_195 = arith.constant 0 : index
    %c0_196 = arith.constant 0 : index
    %238 = vector.load %arg8[%c3_194, %c0_195, %c0_196] : memref<9x256x512xbf16, #tpu.memory_space<vmem>>, vector<1x256x512xbf16>
    %239 = vector.shape_cast %238 : vector<1x256x512xbf16> to vector<256x512xbf16>
    %cst_197 = arith.constant dense<0.000000e+00> : vector<4x512xf32>
    %240 = tpu.matmul %237, %239, %cst_197 {dimension_numbers = #tpu.dot_dimension_numbers<[1], [0], [0], [1], [0, 0, 1, 1], [], []>} : vector<4x256xbf16>, vector<256x512xbf16>, vector<4x512xf32> -> vector<4x512xf32>
    %241 = arith.addf %234, %240 : vector<4x512xf32>
    %c1_198 = arith.constant 1 : index
    %c1_199 = arith.constant 1 : index
    %c0_200 = arith.constant 0 : index
    %242 = vector.load %arg16[%c1_198, %c1_199, %c0_200] : memref<4x4x256xf32, #tpu.memory_space<vmem>>, vector<2x2x256xf32>
    %243 = vector.shape_cast %242 : vector<2x2x256xf32> to vector<4x256xf32>
    %244 = arith.truncf %243 : vector<4x256xf32> to vector<4x256xbf16>
    %c4_201 = arith.constant 4 : index
    %c0_202 = arith.constant 0 : index
    %c0_203 = arith.constant 0 : index
    %245 = vector.load %arg8[%c4_201, %c0_202, %c0_203] : memref<9x256x512xbf16, #tpu.memory_space<vmem>>, vector<1x256x512xbf16>
    %246 = vector.shape_cast %245 : vector<1x256x512xbf16> to vector<256x512xbf16>
    %cst_204 = arith.constant dense<0.000000e+00> : vector<4x512xf32>
    %247 = tpu.matmul %244, %246, %cst_204 {dimension_numbers = #tpu.dot_dimension_numbers<[1], [0], [0], [1], [0, 0, 1, 1], [], []>} : vector<4x256xbf16>, vector<256x512xbf16>, vector<4x512xf32> -> vector<4x512xf32>
    %248 = arith.addf %241, %247 : vector<4x512xf32>
    %c1_205 = arith.constant 1 : index
    %c2_206 = arith.constant 2 : index
    %c0_207 = arith.constant 0 : index
    %249 = vector.load %arg16[%c1_205, %c2_206, %c0_207] : memref<4x4x256xf32, #tpu.memory_space<vmem>>, vector<2x2x256xf32>
    %250 = vector.shape_cast %249 : vector<2x2x256xf32> to vector<4x256xf32>
    %251 = arith.truncf %250 : vector<4x256xf32> to vector<4x256xbf16>
    %c5_208 = arith.constant 5 : index
    %c0_209 = arith.constant 0 : index
    %c0_210 = arith.constant 0 : index
    %252 = vector.load %arg8[%c5_208, %c0_209, %c0_210] : memref<9x256x512xbf16, #tpu.memory_space<vmem>>, vector<1x256x512xbf16>
    %253 = vector.shape_cast %252 : vector<1x256x512xbf16> to vector<256x512xbf16>
    %cst_211 = arith.constant dense<0.000000e+00> : vector<4x512xf32>
    %254 = tpu.matmul %251, %253, %cst_211 {dimension_numbers = #tpu.dot_dimension_numbers<[1], [0], [0], [1], [0, 0, 1, 1], [], []>} : vector<4x256xbf16>, vector<256x512xbf16>, vector<4x512xf32> -> vector<4x512xf32>
    %255 = arith.addf %248, %254 : vector<4x512xf32>
    %c2_212 = arith.constant 2 : index
    %c0_213 = arith.constant 0 : index
    %c0_214 = arith.constant 0 : index
    %256 = vector.load %arg16[%c2_212, %c0_213, %c0_214] : memref<4x4x256xf32, #tpu.memory_space<vmem>>, vector<2x2x256xf32>
    %257 = vector.shape_cast %256 : vector<2x2x256xf32> to vector<4x256xf32>
    %258 = arith.truncf %257 : vector<4x256xf32> to vector<4x256xbf16>
    %c6_215 = arith.constant 6 : index
    %c0_216 = arith.constant 0 : index
    %c0_217 = arith.constant 0 : index
    %259 = vector.load %arg8[%c6_215, %c0_216, %c0_217] : memref<9x256x512xbf16, #tpu.memory_space<vmem>>, vector<1x256x512xbf16>
    %260 = vector.shape_cast %259 : vector<1x256x512xbf16> to vector<256x512xbf16>
    %cst_218 = arith.constant dense<0.000000e+00> : vector<4x512xf32>
    %261 = tpu.matmul %258, %260, %cst_218 {dimension_numbers = #tpu.dot_dimension_numbers<[1], [0], [0], [1], [0, 0, 1, 1], [], []>} : vector<4x256xbf16>, vector<256x512xbf16>, vector<4x512xf32> -> vector<4x512xf32>
    %262 = arith.addf %255, %261 : vector<4x512xf32>
    %c2_219 = arith.constant 2 : index
    %c1_220 = arith.constant 1 : index
    %c0_221 = arith.constant 0 : index
    %263 = vector.load %arg16[%c2_219, %c1_220, %c0_221] : memref<4x4x256xf32, #tpu.memory_space<vmem>>, vector<2x2x256xf32>
    %264 = vector.shape_cast %263 : vector<2x2x256xf32> to vector<4x256xf32>
    %265 = arith.truncf %264 : vector<4x256xf32> to vector<4x256xbf16>
    %c7_222 = arith.constant 7 : index
    %c0_223 = arith.constant 0 : index
    %c0_224 = arith.constant 0 : index
    %266 = vector.load %arg8[%c7_222, %c0_223, %c0_224] : memref<9x256x512xbf16, #tpu.memory_space<vmem>>, vector<1x256x512xbf16>
    %267 = vector.shape_cast %266 : vector<1x256x512xbf16> to vector<256x512xbf16>
    %cst_225 = arith.constant dense<0.000000e+00> : vector<4x512xf32>
    %268 = tpu.matmul %265, %267, %cst_225 {dimension_numbers = #tpu.dot_dimension_numbers<[1], [0], [0], [1], [0, 0, 1, 1], [], []>} : vector<4x256xbf16>, vector<256x512xbf16>, vector<4x512xf32> -> vector<4x512xf32>
    %269 = arith.addf %262, %268 : vector<4x512xf32>
    %c2_226 = arith.constant 2 : index
    %c2_227 = arith.constant 2 : index
    %c0_228 = arith.constant 0 : index
    %270 = vector.load %arg16[%c2_226, %c2_227, %c0_228] : memref<4x4x256xf32, #tpu.memory_space<vmem>>, vector<2x2x256xf32>
    %271 = vector.shape_cast %270 : vector<2x2x256xf32> to vector<4x256xf32>
    %272 = arith.truncf %271 : vector<4x256xf32> to vector<4x256xbf16>
    %c8_229 = arith.constant 8 : index
    %c0_230 = arith.constant 0 : index
    %c0_231 = arith.constant 0 : index
    %273 = vector.load %arg8[%c8_229, %c0_230, %c0_231] : memref<9x256x512xbf16, #tpu.memory_space<vmem>>, vector<1x256x512xbf16>
    %274 = vector.shape_cast %273 : vector<1x256x512xbf16> to vector<256x512xbf16>
    %cst_232 = arith.constant dense<0.000000e+00> : vector<4x512xf32>
    %275 = tpu.matmul %272, %274, %cst_232 {dimension_numbers = #tpu.dot_dimension_numbers<[1], [0], [0], [1], [0, 0, 1, 1], [], []>} : vector<4x256xbf16>, vector<256x512xbf16>, vector<4x512xf32> -> vector<4x512xf32>
    %276 = arith.addf %269, %275 : vector<4x512xf32>
    %c0_233 = arith.constant 0 : index
    %c0_234 = arith.constant 0 : index
    %277 = vector.load %arg9[%c0_233, %c0_234] : memref<1x512xf32, #tpu.memory_space<vmem>>, vector<1x512xf32>
    %278 = vector.broadcast %277 : vector<1x512xf32> to vector<4x512xf32>
    %279 = arith.addf %276, %278 : vector<4x512xf32>
    %cst_235 = arith.constant 0.000000e+00 : f32
    %280 = vector.broadcast %cst_235 : f32 to vector<4x512xf32>
    %281 = arith.minimumf %279, %280 : vector<4x512xf32>
    %282 = math.exp %281 : vector<4x512xf32>
    %cst_236 = arith.constant 1.000000e+00 : f32
    %283 = vector.broadcast %cst_236 : f32 to vector<4x512xf32>
    %284 = arith.subf %282, %283 : vector<4x512xf32>
    %cst_237 = arith.constant 1.67326319 : f32
    %285 = vector.broadcast %cst_237 : f32 to vector<4x512xf32>
    %286 = arith.mulf %285, %284 : vector<4x512xf32>
    %cst_238 = arith.constant 0.000000e+00 : f32
    %287 = vector.broadcast %cst_238 : f32 to vector<4x512xf32>
    %288 = arith.cmpf ogt, %279, %287 : vector<4x512xf32>
    %289 = arith.select %288, %279, %286 : vector<4x512xi1>, vector<4x512xf32>
    %cst_239 = arith.constant 1.05070102 : f32
    %290 = vector.broadcast %cst_239 : f32 to vector<4x512xf32>
    %291 = arith.mulf %290, %289 : vector<4x512xf32>
    %292 = vector.shape_cast %291 : vector<4x512xf32> to vector<2x2x512xf32>
    %293 = vector.shape_cast %292 : vector<2x2x512xf32> to vector<2x1x2x512xf32>
    %cst_240 = arith.constant dense<0xFF800000> : vector<2x1x512xf32>
    %294 = vector.multi_reduction <maximumf>, %293, %cst_240 [2] : vector<2x1x2x512xf32> to vector<2x1x512xf32>
    %295 = vector.shape_cast %294 : vector<2x1x512xf32> to vector<1x2x1x512xf32>
    %296 = vector.extract_strided_slice %295 {offsets = [0, 0, 0, 0], sizes = [1, 1, 1, 512], strides = [1, 1, 1, 1]} : vector<1x2x1x512xf32> to vector<1x1x1x512xf32>
    %297 = vector.shape_cast %296 : vector<1x1x1x512xf32> to vector<1x1x512xf32>
    %298 = vector.extract_strided_slice %295 {offsets = [0, 1, 0, 0], sizes = [1, 1, 1, 512], strides = [1, 1, 1, 1]} : vector<1x2x1x512xf32> to vector<1x1x1x512xf32>
    %299 = vector.shape_cast %298 : vector<1x1x1x512xf32> to vector<1x1x512xf32>
    %300 = arith.maximumf %297, %299 : vector<1x1x512xf32>
    %301 = vector.shape_cast %300 : vector<1x1x512xf32> to vector<1x512xf32>
    %c0_241 = arith.constant 0 : index
    %c0_242 = arith.constant 0 : index
    %302 = vector.load %arg10[%c0_241, %c0_242] : memref<512x1xf32, #tpu.memory_space<vmem>>, vector<512x1xf32>
    %cst_243 = arith.constant dense<0.000000e+00> : vector<1x1xf32>
    %303 = tpu.matmul %301, %302, %cst_243 {dimension_numbers = #tpu.dot_dimension_numbers<[1], [0], [0], [1], [0, 0, 1, 1], [], []>} : vector<1x512xf32>, vector<512x1xf32>, vector<1x1xf32> -> vector<1x1xf32>
    %c0_244 = arith.constant 0 : index
    %c0_245 = arith.constant 0 : index
    %304 = vector.load %arg11[%c0_244, %c0_245] : memref<1x1xf32, #tpu.memory_space<vmem>>, vector<1x1xf32>
    %305 = arith.addf %303, %304 : vector<1x1xf32>
    %306 = vector.shape_cast %301 : vector<1x512xf32> to vector<1x1x512xf32>
    %c0_246 = arith.constant 0 : index
    %c0_247 = arith.constant 0 : index
    %c0_248 = arith.constant 0 : index
    %307 = vector.load %arg13[%c0_246, %c0_247, %c0_248] : memref<1x1x512xf32, #tpu.memory_space<vmem>>, vector<1x1x512xf32>
    tpu.vector_store %arg13[%c0_246, %c0_247, %c0_248], %306 {strides = array<i32>} : memref<1x1x512xf32, #tpu.memory_space<vmem>>, vector<1x1x512xf32>,
    %308 = vector.shape_cast %305 : vector<1x1xf32> to vector<1x1x1xf32>
    %c0_249 = arith.constant 0 : index
    %c0_250 = arith.constant 0 : index
    %c0_251 = arith.constant 0 : index
    %309 = vector.load %arg12[%c0_249, %c0_250, %c0_251] : memref<1x1x1xf32, #tpu.memory_space<vmem>>, vector<1x1x1xf32>
    tpu.vector_store %arg12[%c0_249, %c0_250, %c0_251], %308 {strides = array<i32>} : memref<1x1x1xf32, #tpu.memory_space<vmem>>, vector<1x1x1xf32>,
    return
  }
  func.func @transform_0(%arg0: i32) -> (i32, i32, i32) {
    %c0_i32 = arith.constant 0 : i32
    %c0_i32_0 = arith.constant 0 : i32
    %c0_i32_1 = arith.constant 0 : i32
    return %arg0, %c0_i32, %c0_i32_0 : i32, i32, i32
  }
  func.func @transform_1(%arg0: i32) -> (i32, i32) {
    %c0_i32 = arith.constant 0 : i32
    %c0_i32_0 = arith.constant 0 : i32
    %c0_i32_1 = arith.constant 0 : i32
    return %c0_i32, %c0_i32_0 : i32, i32
  }
  func.func @transform_2(%arg0: i32) -> (i32, i32) {
    %c0_i32 = arith.constant 0 : i32
    %c0_i32_0 = arith.constant 0 : i32
    %c0_i32_1 = arith.constant 0 : i32
    return %c0_i32, %c0_i32_0 : i32, i32
  }
  func.func @transform_3(%arg0: i32) -> (i32, i32, i32) {
    %c0_i32 = arith.constant 0 : i32
    %c0_i32_0 = arith.constant 0 : i32
    %c0_i32_1 = arith.constant 0 : i32
    %c0_i32_2 = arith.constant 0 : i32
    return %c0_i32, %c0_i32_0, %c0_i32_1 : i32, i32, i32
  }
  func.func @transform_4(%arg0: i32) -> (i32, i32) {
    %c0_i32 = arith.constant 0 : i32
    %c0_i32_0 = arith.constant 0 : i32
    %c0_i32_1 = arith.constant 0 : i32
    return %c0_i32, %c0_i32_0 : i32, i32
  }
  func.func @transform_5(%arg0: i32) -> (i32, i32, i32) {
    %c0_i32 = arith.constant 0 : i32
    %c0_i32_0 = arith.constant 0 : i32
    %c0_i32_1 = arith.constant 0 : i32
    %c0_i32_2 = arith.constant 0 : i32
    return %c0_i32, %c0_i32_0, %c0_i32_1 : i32, i32, i32
  }
  func.func @transform_6(%arg0: i32) -> (i32, i32) {
    %c0_i32 = arith.constant 0 : i32
    %c0_i32_0 = arith.constant 0 : i32
    %c0_i32_1 = arith.constant 0 : i32
    return %c0_i32, %c0_i32_0 : i32, i32
  }
  func.func @transform_7(%arg0: i32) -> (i32, i32, i32) {
    %c0_i32 = arith.constant 0 : i32
    %c0_i32_0 = arith.constant 0 : i32
    %c0_i32_1 = arith.constant 0 : i32
    %c0_i32_2 = arith.constant 0 : i32
    return %c0_i32, %c0_i32_0, %c0_i32_1 : i32, i32, i32
  }
  func.func @transform_8(%arg0: i32) -> (i32, i32) {
    %c0_i32 = arith.constant 0 : i32
    %c0_i32_0 = arith.constant 0 : i32
    %c0_i32_1 = arith.constant 0 : i32
    return %c0_i32, %c0_i32_0 : i32, i32
  }
  func.func @transform_9(%arg0: i32) -> (i32, i32) {
    %c0_i32 = arith.constant 0 : i32
    %c0_i32_0 = arith.constant 0 : i32
    %c0_i32_1 = arith.constant 0 : i32
    return %c0_i32, %c0_i32_0 : i32, i32
  }
  func.func @transform_10(%arg0: i32) -> (i32, i32) {
    %c0_i32 = arith.constant 0 : i32
    %c0_i32_0 = arith.constant 0 : i32
    %c0_i32_1 = arith.constant 0 : i32
    return %c0_i32, %c0_i32_0 : i32, i32
  }
  func.func @transform_11(%arg0: i32) -> (i32, i32, i32) {
    %c0_i32 = arith.constant 0 : i32
    %c0_i32_0 = arith.constant 0 : i32
    %c0_i32_1 = arith.constant 0 : i32
    return %arg0, %c0_i32, %c0_i32_0 : i32, i32, i32
  }
  func.func @transform_12(%arg0: i32) -> (i32, i32, i32) {
    %c0_i32 = arith.constant 0 : i32
    %c0_i32_0 = arith.constant 0 : i32
    %c0_i32_1 = arith.constant 0 : i32
    return %arg0, %c0_i32, %c0_i32_0 : i32, i32, i32
  }
}

</mosaic_0001>

<bundles_post_ra>
// kernel: _lusnet_forward_impl.1
= control target key start
LH: loop header
LB: loop body
LE: loop exit
PB: predicated region body
PF: predicated region fallthrough
CT: control target
= control target key end

     0   :  { %s15042_s23 = smov 0   ;;  %s21226_s0 = inlined_call_operand.vmem [shape: bf16[2,256,27], index: 0, kind: input, shape index: {}]   ;;  %s21227_s1 = inlined_call_operand.vmem [shape: bf16[27,64], index: 1, kind: input, shape index: {}]   ;;  %s21228_s2 = inlined_call_operand.vmem [shape: f32[1,64], index: 2, kind: input, shape index: {}]   ;;  %s21229_s3 = inlined_call_operand.vmem [shape: bf16[9,64,128], index: 3, kind: input, shape index: {}]   ;;  %s21230_s4 = inlined_call_operand.vmem [shape: f32[1,128], index: 4, kind: input, shape index: {}]   ;;  %s21231_s5 = inlined_call_operand.vmem [shape: bf16[9,128,256], index: 5, kind: input, shape index: {}]   ;;  %s21232_s6 = inlined_call_operand.vmem [shape: f32[1,256], index: 6, kind: input, shape index: {}]   ;;  %s21233_s7 = inlined_call_operand.vmem [shape: bf16[9,256,512], index: 7, kind: input, shape index: {}]   ;;  %s21234_s8 = inlined_call_operand.vmem [shape: f32[1,512], index: 8, kind: input, shape index: {}]   ;;  %s21235_s9 = inlined_call_operand.vmem [shape: f32[512,1], index: 9, kind: input, shape index: {}]   ;;  %s21236_s10 = inlined_call_operand.<no memory space> [shape: f32[1,1], index: 10, kind: input, shape index: {}]   ;;  %s21237_s11 = inlined_call_operand.vmem [shape: f32[2,1,1], index: 11, kind: output, shape index: {0}]   ;;  %s21238_s12 = inlined_call_operand.vmem [shape: f32[2,1,512], index: 12, kind: output, shape index: {1}]  }
   0x1   :  { %v18_v0 = vstv %s21236_s10 }
   0x2   :  { %19 = vst [vmem:[#allocation5] sm:$0x1] %v18_v0 }
   0x3 LB: > { %s10153_s24 = sadd.s32 4294967295, %s14970_s23   ;;  %p10157_p0 = scmp.ge.s32.totalorder %s14970_s23, 1  ;;  %s14970_s23 = sphi %s15042_s23, %s25_s23  }
   0x4   : > { %p367_p1 = scmp.lt.s32.totalorder %s14970_s23, 3 }
   0x6   : > { %p368_p2 = pnand %p10157_p0, %p367_p1 }
   0x7   : > { %p411_p3 = scmp.lt.s32.totalorder (!%p368_p2), %s10153_s24, 1 }
   0x8   : > { %371 = sbr.rel (%p368_p2) target bundleno = 2096 (0x830), region = 64 }
   0xd   : > { %v10231_v1 = vld [vmem:[%s21227_s1 + $0x8] sm:$0xf]  ;;  %v14093_v2 = vld [vmem:[%s21227_s1 + $0x8] sm:$0x30]  ;;  %vm604_vm0 = vcmask 1044480   ;;  %vm605_vm1 = vcmask 1045504  }
   0xe   : > { %v10232_v3 = vor.u32 %v14093_v2, %v10231_v1  ;;  %v14972_v4 = vmov 65535   ;;  %s21246_s24 = smov (!%p411_p3, %s10153_s24), 1  ;;  %v14092_v8 = vld [vmem:[%s21227_s1] sm:$0xff]  ;;  %vm555_vm2 = vcmask 220160   ;;  %vm1180_vm4 = vcmask 517120  }
   0xf   : > { %v606_v5 = vsel %vm604_vm0, 4294967295, %v14972_v4  ;;  %s14075_s28 = sshll.u32 %s21246_s24, 7  ;;  %v15087_v17 = vld [vmem:[%s21228_s2] ss:$0 sm:$0xff]  ;;  %vm2141_vm7 = vcmask 523264   ;;  %vm2226_vm9 = vcmask 1041409   ;;  %s418_s21 = scalar_lea.vmem %s21237_s11, %s21246_s24 }
  0x10   : > { %v607_v6 = vsel %vm605_vm1, %v606_v5, 0  ;;  %s15066_s15 = scalar_lea.vmem %s21226_s0, %s14075_s28  ;;  %vm2228_vm10 = vcmask 1042434   ;;  %vm2230_vm11 = vcmask 1043459   ;;  %vm2232_vm12 = vcmask 1044484   ;;  %s10160_s14 = sshll.u32 %s21246_s24, 2 }
  0x11   : > { %v609_v7 = vand.u32 %v10232_v3, %v607_v6  ;;  %v14076_v9 = vld [vmem:[%s15066_s15] sm:$0xff]  ;;  %v14077_v10 = vld [vmem:[%s15066_s15 + $0x8] sm:$0xff]  ;;  %v14078_v11 = vld [vmem:[%s15066_s15 + $0x10] sm:$0xff]  ;;  %vm2234_vm13 = vcmask 1045509   ;;  %vm2236_vm14 = vcmask 1046534   ;;  %vm2238_vm0 = vcmask 1047559   ;;  %s422_s18 = scalar_lea.vmem %s21238_s12, %s10160_s14 }
  0x12   : > { %v14079_v12 = vld [vmem:[%s15066_s15 + $0x18] sm:$0xff]  ;;  %v14080_v13 = vld [vmem:[%s15066_s15 + $0x20] sm:$0xff]  ;;  %v14081_v14 = vld [vmem:[%s15066_s15 + $0x28] sm:$0xff] }
  0x13   : > { %617 = vmatpush.bf16.msra.mxu0 %v609_v7  ;;  %v14082_v15 = vld [vmem:[%s15066_s15 + $0x30] sm:$0xff]  ;;  %v14083_v16 = vld [vmem:[%s15066_s15 + $0x38] sm:$0xff]  ;;  %v14084_v18 = vld [vmem:[%s15066_s15 + $0x40] sm:$0xff] }
  0x14   : > { %v14085_v29 = vld [vmem:[%s15066_s15 + $0x48] sm:$0xff]  ;;  %v14086_v6 = vld [vmem:[%s15066_s15 + $0x50] sm:$0xff] }
  0x17   : > { %618 = vmatpush.bf16.msra.mxu0 %v14092_v8 }
  0x1a   : > { %10233 = vmatmul.msk.bf16.vlgmr.msra.gmra.mxu0 %vm555_vm2, %v14076_v9 }
  0x2a   : > { %10234 = vmatmul.msk.bf16.gmra.mxu0 %vm555_vm2, %v14077_v10 }
  0x3a   : > { %10235 = vmatmul.msk.bf16.gmra.mxu0 %vm555_vm2, %v14078_v11 }
  0x4a   : > { %10236 = vmatmul.msk.bf16.gmra.mxu0 %vm555_vm2, %v14079_v12 }
  0x5a   : > { %10237 = vmatmul.msk.bf16.gmra.mxu0 %vm555_vm2, %v14080_v13 }
  0x6a   : > { %10238 = vmatmul.msk.bf16.gmra.mxu0 %vm555_vm2, %v14081_v14 }
  0x7a   : > { %10239 = vmatmul.msk.bf16.gmra.mxu0 %vm555_vm2, %v14082_v15 }
  0x8a   : > { %10240 = vmatmul.msk.bf16.gmra.mxu0 %vm555_vm2, %v14083_v16 }
  0x97   : > { %v620_v19 = vpop.f32.mrf.mxu0 }
  0x98   : > { %v621_v20 = vadd.f32 %v15087_v17, %v620_v19 }
  0x9a   : > { %v700_v21 = vmin.f32 %v621_v20, 0.0  ;;  %10241 = vmatmul.msk.bf16.gmra.mxu0 %vm555_vm2, %v14084_v18  ;;  %vm860_vm3 = vcmp.gt.f32.partialorder %v621_v20, 0.0 }
  0x9c   : > { %v732_v22 = vmul.f32 1.442695, %v700_v21 }
  0x9e   : > { %14862 = vpow2.f32 %v732_v22 }
  0x9f   : > { %v622_v23 = vpop.f32.mrf.mxu0 }
  0xa0   : > { %v623_v24 = vadd.f32 %v15087_v17, %v622_v23 }
  0xa2   : > { %v701_v25 = vmin.f32 %v623_v24, 0.0  ;;  %vm861_vm5 = vcmp.gt.f32.partialorder %v623_v24, 0.0 }
  0xa4   : > { %v14863_v26 = vpop.eup %14862  ;;  %v734_v27 = vmul.f32 1.442695, %v701_v25 }
  0xa5   : > { %v10249_v28 = vadd.f32 -1.0, %v14863_v26 }
  0xa6   : > { %14864 = vpow2.f32 %v734_v27 }
  0xa7   : > { %v828_v30 = vmul.f32 1.6732632, %v10249_v28  ;;  %v625_v31 = vpop.f32.mrf.mxu0 }
  0xa8   : > { %v15095_v32 = vadd.f32 %v15087_v17, %v625_v31 }
  0xa9   : > { %v892_v33 = vsel %vm860_vm3, %v621_v20, %v828_v30 }
  0xaa   : > { %v924_v34 = vmul.f32 1.050701, %v892_v33  ;;  %v702_v35 = vmin.f32 %v15095_v32, 0.0  ;;  %10242 = vmatmul.msk.bf16.gmra.mxu0 %vm555_vm2, %v14085_v29  ;;  %vm862_vm6 = vcmp.gt.f32.partialorder %v15095_v32, 0.0 }
  0xac   : > { %v14865_v36 = vpop.eup %14864  ;;  %v988_v37 = vrot.slane %v924_v34, 2  ;;  %v989_v38 = vrot.slane %v924_v34, 4  ;;  %v990_v39 = vrot.slane %v924_v34, 6  ;;  %v1181_v40 = vsel %vm1180_vm4, %v924_v34, -inf }
  0xad   : > { %v1182_v41 = vrot.slane %v1181_v40, 4  ;;  %v10250_v42 = vadd.f32 -1.0, %v14865_v36  ;;  %v736_v43 = vmul.f32 1.442695, %v702_v35 }
  0xae   : > { %v1188_v44 = vsel %vm1180_vm4, %v988_v37, -inf  ;;  %v1195_v45 = vsel %vm1180_vm4, %v989_v38, -inf  ;;  %v1202_v46 = vsel %vm1180_vm4, %v990_v39, -inf  ;;  %v14973_v37 = vmov 0.0  }
  0xaf   : > { %v1183_v47 = vmax.f32 %v1181_v40, %v1182_v41  ;;  %v1189_v48 = vrot.slane %v1188_v44, 4  ;;  %v1196_v49 = vrot.slane %v1195_v45, 4  ;;  %v1203_v50 = vrot.slane %v1202_v46, 4  ;;  %v627_v51 = vpop.f32.mrf.mxu0  ;;  %2144 = vst.msk [vmem:[#allocation2 + $0x10] sm:$0xff] %vm2141_vm7, %v14973_v37 }
  0xb0   : > { %v829_v52 = vmul.f32 1.6732632, %v10250_v42  ;;  %14866 = vpow2.f32 %v736_v43  ;;  %v15104_v53 = vadd.f32 %v15087_v17, %v627_v51  ;;  %2145 = vst.msk [vmem:[#allocation2 + $0x18] sm:$0x3] %vm1180_vm4, %v14973_v37 }
  0xb1   : > { %v1184_v54 = vrot.slane %v1183_v47, 2  ;;  %v1190_v55 = vmax.f32 %v1188_v44, %v1189_v48  ;;  %v1197_v56 = vmax.f32 %v1195_v45, %v1196_v49  ;;  %v1204_v57 = vmax.f32 %v1202_v46, %v1203_v50  ;;  %2142 = vst.msk [vmem:[#allocation2] sm:$0xff] %vm2141_vm7, %v14973_v37 }
  0xb2   : > { %v893_v58 = vsel %vm861_vm5, %v623_v24, %v829_v52  ;;  %v703_v61 = vmin.f32 %v15104_v53, 0.0  ;;  %vm863_vm8 = vcmp.gt.f32.partialorder %v15104_v53, 0.0  ;;  %2143 = vst.msk [vmem:[#allocation2 + $0x8] sm:$0x3] %vm1180_vm4, %v14973_v37 }
  0xb3   : > { %v1191_v59 = vrot.slane %v1190_v55, 2  ;;  %v1198_v60 = vrot.slane %v1197_v56, 2  ;;  %v925_v62 = vmul.f32 1.050701, %v893_v58  ;;  %v1185_v63 = vmax.f32 %v1183_v47, %v1184_v54  ;;  %2146 = vst.msk [vmem:[#allocation2 + $0x20] sm:$0xff] %vm2141_vm7, %v14973_v37 }
  0xb4   : > { %v1205_v0 = vrot.slane %v1204_v57, 2  ;;  %v738_v9 = vmul.f32 1.442695, %v703_v61  ;;  %2147 = vst.msk [vmem:[#allocation2 + $0x28] sm:$0x3] %vm1180_vm4, %v14973_v37 }
  0xb5   : > { %v991_v2 = vrot.slane %v925_v62, 2  ;;  %v992_v3 = vrot.slane %v925_v62, 4  ;;  %v993_v4 = vrot.slane %v925_v62, 6  ;;  %v1209_v5 = vsel %vm1180_vm4, %v925_v62, -inf  ;;  %2148 = vst.msk [vmem:[#allocation2 + $0x30] sm:$0xff] %vm2141_vm7, %v14973_v37 }
  0xb6   : > { %v14867_v1 = vpop.eup %14866  ;;  %v1192_v7 = vmax.f32 %v1190_v55, %v1191_v59  ;;  %v1199_v8 = vmax.f32 %v1197_v56, %v1198_v60  ;;  %v1210_v11 = vrot.slane %v1209_v5, 4  ;;  %v1186_v15 = vrot.slane %v1185_v63, 1  ;;  %2149 = vst.msk [vmem:[#allocation2 + $0x38] sm:$0x3] %vm1180_vm4, %v14973_v37 }
  0xb7   : > { %v630_v10 = vpop.f32.mrf.mxu0  ;;  %v1216_v12 = vsel %vm1180_vm4, %v991_v2, -inf  ;;  %v1223_v13 = vsel %vm1180_vm4, %v992_v3, -inf  ;;  %v1230_v14 = vsel %vm1180_vm4, %v993_v4, -inf  ;;  %v1206_v16 = vmax.f32 %v1204_v57, %v1205_v0  ;;  %2150 = vst.msk [vmem:[#allocation2 + $0x40] sm:$0xff] %vm2141_vm7, %v14973_v37 }
  0xb8   : > { %v1217_v18 = vrot.slane %v1216_v12, 4  ;;  %v1211_v19 = vmax.f32 %v1209_v5, %v1210_v11  ;;  %v1224_v20 = vrot.slane %v1223_v13, 4  ;;  %v1231_v21 = vrot.slane %v1230_v14, 4  ;;  %2151 = vst.msk [vmem:[#allocation2 + $0x48] sm:$0x3] %vm1180_vm4, %v14973_v37 }
  0xb9   : > { %v10251_v22 = vadd.f32 -1.0, %v14867_v1  ;;  %v1193_v23 = vrot.slane %v1192_v7, 1  ;;  %v1200_v24 = vrot.slane %v1199_v8, 1  ;;  %14868 = vpow2.f32 %v738_v9  ;;  %2152 = vst.msk [vmem:[#allocation2 + $0x50] sm:$0xff] %vm2141_vm7, %v14973_v37 }
  0xba   : > { %10243 = vmatmul.msk.bf16.gmra.mxu0 %vm555_vm2, %v14086_v6  ;;  %v1218_v25 = vmax.f32 %v1216_v12, %v1217_v18  ;;  %v1212_v26 = vrot.slane %v1211_v19, 2  ;;  %v1225_v27 = vmax.f32 %v1223_v13, %v1224_v20  ;;  %v1232_v28 = vmax.f32 %v1230_v14, %v1231_v21  ;;  %v14087_v6 = vld [vmem:[%s15066_s15 + $0x58] sm:$0xff]  ;;  %2153 = vst.msk [vmem:[#allocation2 + $0x58] sm:$0x3] %vm1180_vm4, %v14973_v37 }
  0xbb   : > { %v830_v29 = vmul.f32 1.6732632, %v10251_v22  ;;  %v1207_v30 = vrot.slane %v1206_v16, 1  ;;  %v15121_v41 = vmax.f32 %v1185_v63, %v1186_v15  ;;  %v15123_v42 = vmax.f32 %v1192_v7, %v1193_v23  ;;  %v14097_v22 = vld [vmem:[%s21229_s3 + $0x18] sm:$0xff]  ;;  %2154 = vst.msk [vmem:[#allocation2 + $0x60] sm:$0xff] %vm2141_vm7, %v14973_v37 }
  0xbc   : > { %v1219_v31 = vrot.slane %v1218_v25, 2  ;;  %v1213_v33 = vmax.f32 %v1211_v19, %v1212_v26  ;;  %v1226_v34 = vrot.slane %v1225_v27, 2  ;;  %v1233_v35 = vrot.slane %v1232_v28, 2  ;;  %v14105_v23 = vld [vmem:[%s21229_s3 + $0x58] sm:$0xff]  ;;  %2155 = vst.msk [vmem:[#allocation2 + $0x68] sm:$0x3] %vm1180_vm4, %v14973_v37  ;;  %2452 = vmatpush.bf16.msra.mxu2 %v14097_v22 }
  0xbd   : > { %v894_v36 = vsel %vm862_vm6, %v15095_v32, %v830_v29  ;;  %v15132_v49 = vmax.f32 %v1199_v8, %v1200_v24  ;;  %v15134_v50 = vmax.f32 %v1206_v16, %v1207_v30  ;;  %v15140_v52 = vadd.f32 %v15087_v17, %v630_v10  ;;  %v14101_v16 = vld [vmem:[%s21229_s3 + $0x38] sm:$0xff]  ;;  %2538 = vmatpush.bf16.msra.mxu3 %v14105_v23 }
  0xbe   : > { %v1220_v38 = vmax.f32 %v1218_v25, %v1219_v31  ;;  %v926_v39 = vmul.f32 1.050701, %v894_v36  ;;  %v1214_v43 = vrot.slane %v1213_v33, 1  ;;  %v1227_v44 = vmax.f32 %v1225_v27, %v1226_v34  ;;  %2387 = vmatpush.bf16.msra.mxu1 %v14101_v16  ;;  %2156 = vst.msk [vmem:[#allocation2 + $0x70] sm:$0xff] %vm2141_vm7, %v14973_v37  ;;  %v14100_v16 = vld [vmem:[%s21229_s3 + $0x30] sm:$0xff] }
  0xbf   : > { %v632_v40 = vpop.f32.mrf.mxu0  ;;  %v14869_v32 = vpop.eup %14868  ;;  %v15128_v45 = vmax.f32 %v1232_v28, %v1233_v35  ;;  %v704_v5 = vmin.f32 %v15140_v52, 0.0  ;;  %2157 = vst.msk [vmem:[#allocation2 + $0x78] sm:$0x3] %vm1180_vm4, %v14973_v37  ;;  %vm864_vm15 = vcmp.gt.f32.partialorder %v15140_v52, 0.0 }
  0xc0   : > { %v994_v46 = vrot.slane %v926_v39, 2  ;;  %v995_v47 = vrot.slane %v926_v39, 4  ;;  %v996_v48 = vrot.slane %v926_v39, 6  ;;  %v1237_v51 = vsel %vm1180_vm4, %v926_v39, -inf  ;;  %2158 = vst.msk [vmem:[#allocation2 + $0x80] sm:$0xff] %vm2141_vm7, %v14973_v37 }
  0xc1   : > { %v1221_v54 = vrot.slane %v1220_v38, 1  ;;  %v1238_v55 = vrot.slane %v1237_v51, 4  ;;  %v15146_v58 = vmax.f32 %v1213_v33, %v1214_v43  ;;  %v1228_v59 = vrot.slane %v1227_v44, 1  ;;  %2159 = vst.msk [vmem:[#allocation2 + $0x88] sm:$0x3] %vm1180_vm4, %v14973_v37 }
  0xc2   : > { %v1244_v56 = vsel %vm1180_vm4, %v994_v46, -inf  ;;  %v1251_v57 = vsel %vm1180_vm4, %v995_v47, -inf  ;;  %v1235_v62 = vrot.slane %v15128_v45, 1  ;;  %v1258_v0 = vsel %vm1180_vm4, %v996_v48, -inf  ;;  %2160 = vst.msk [vmem:[#allocation2 + $0x90] sm:$0xff] %vm2141_vm7, %v14973_v37  ;;  %2388 = vmatpush.bf16.msra.mxu1 %v14100_v16 }
  0xc3   : > { %v1245_v60 = vrot.slane %v1244_v56, 4  ;;  %v1252_v61 = vrot.slane %v1251_v57, 4  ;;  %v1239_v63 = vmax.f32 %v1237_v51, %v1238_v55  ;;  %v10252_v1 = vadd.f32 -1.0, %v14869_v32  ;;  %2161 = vst.msk [vmem:[#allocation2 + $0x98] sm:$0x3] %vm1180_vm4, %v14973_v37 }
  0xc4   : > { %v1259_v4 = vrot.slane %v1258_v0, 4  ;;  %v15158_v7 = vmax.f32 %v1220_v38, %v1221_v54  ;;  %v15163_v10 = vadd.f32 %v15087_v17, %v632_v40  ;;  %v740_v15 = vmul.f32 1.442695, %v704_v5  ;;  %3509 = vst [vmem:[#allocation3] sm:$0x3f] %v14973_v37 }
  0xc5   : > { %v1246_v2 = vmax.f32 %v1244_v56, %v1245_v60  ;;  %v1253_v3 = vmax.f32 %v1251_v57, %v1252_v61  ;;  %v1240_v8 = vrot.slane %v1239_v63, 2  ;;  %v831_v9 = vmul.f32 1.6732632, %v10252_v1  ;;  %3510 = vst [vmem:[#allocation3 + $0x8] sm:$0x3f] %v14973_v37 }
  0xc6   : > { %v1260_v14 = vmax.f32 %v1258_v0, %v1259_v4  ;;  %v15170_v18 = vmax.f32 %v1227_v44, %v1228_v59  ;;  %v705_v21 = vmin.f32 %v15163_v10, 0.0  ;;  %14870 = vpow2.f32 %v740_v15  ;;  %3511 = vst [vmem:[#allocation3 + $0x10] sm:$0x3f] %v14973_v37 }
  0xc7   : > { %v635_v11 = vpop.f32.mrf.mxu0  ;;  %v1247_v12 = vrot.slane %v1246_v2, 2  ;;  %v1254_v13 = vrot.slane %v1253_v3, 2  ;;  %v1241_v19 = vmax.f32 %v1239_v63, %v1240_v8  ;;  %v895_v20 = vsel %vm863_vm8, %v15104_v53, %v831_v9  ;;  %3512 = vst [vmem:[#allocation3 + $0x18] sm:$0x3f] %v14973_v37 }
  0xc8   : > { %v1261_v26 = vrot.slane %v1260_v14, 2  ;;  %v927_v27 = vmul.f32 1.050701, %v895_v20  ;;  %v742_v28 = vmul.f32 1.442695, %v705_v21  ;;  %v15190_v29 = vadd.f32 %v15087_v17, %v635_v11  ;;  %5110 = vst [vmem:[#allocation4 + $0x10] sm:$0xff] %v14973_v37 }
  0xc9   : > { %v1248_v24 = vmax.f32 %v1246_v2, %v1247_v12  ;;  %v1255_v25 = vmax.f32 %v1253_v3, %v1254_v13  ;;  %v1242_v53 = vrot.slane %v1241_v19, 1  ;;  %v15214_v0 = vmax.f32 %v15128_v45, %v1235_v62  ;;  %3513 = vst [vmem:[#allocation3 + $0x20] sm:$0x3f] %v14973_v37 }
  0xca   : > { %10244 = vmatmul.msk.bf16.gmra.mxu0 %vm555_vm2, %v14087_v6  ;;  %v1262_v33 = vmax.f32 %v1260_v14, %v1261_v26  ;;  %v997_v34 = vrot.slane %v927_v27, 2  ;;  %v998_v36 = vrot.slane %v927_v27, 4  ;;  %v999_v38 = vrot.slane %v927_v27, 6  ;;  %3514 = vst [vmem:[#allocation3 + $0x28] sm:$0x3f] %v14973_v37 }
  0xcb   : > { %v1249_v30 = vrot.slane %v1248_v24, 1  ;;  %v1256_v31 = vrot.slane %v1255_v25, 1  ;;  %v1243_v35 = vmax.f32 %v1241_v19, %v1242_v53  ;;  %v1265_v39 = vsel %vm1180_vm4, %v927_v27, -inf  ;;  %5111 = vst [vmem:[#allocation4] sm:$0xff] %v14973_v37 }
  0xcc   : > { %v1263_v44 = vrot.slane %v1262_v33, 1  ;;  %v1266_v32 = vrot.slane %v1265_v39, 4  ;;  %v1272_v47 = vsel %vm1180_vm4, %v997_v34, -inf  ;;  %v1279_v48 = vsel %vm1180_vm4, %v998_v36, -inf  ;;  %5112 = vst [vmem:[#allocation4 + $0x18] sm:$0xff] %v14973_v37 }
  0xcd   : > { %v1250_v40 = vmax.f32 %v1248_v24, %v1249_v30  ;;  %v1257_v43 = vmax.f32 %v1255_v25, %v1256_v31  ;;  %v2077_v46 = vmax.f32 %v15121_v41, %v1243_v35  ;;  %v1286_v51 = vsel %vm1180_vm4, %v999_v38, -inf  ;;  %v14871_v41 = vpop.eup %14870  ;;  %v14096_v25 = vld [vmem:[%s21229_s3 + $0x10] sm:$0xff]  ;;  %v14099_v35 = vld [vmem:[%s21229_s3 + $0x28] sm:$0xff]  ;;  %5113 = vst [vmem:[#allocation4 + $0x8] sm:$0xff] %v14973_v37  ;;  %v14098_v37 = vld [vmem:[%s21229_s3 + $0x20] sm:$0xff] }
  0xce   : > { %v1264_v55 = vmax.f32 %v1262_v33, %v1263_v44  ;;  %v1267_v59 = vmax.f32 %v1265_v39, %v1266_v32  ;;  %v1273_v60 = vrot.slane %v1272_v47, 4  ;;  %v1280_v61 = vrot.slane %v1279_v48, 4  ;;  %2453 = vmatpush.bf16.msra.mxu2 %v14096_v25  ;;  %v14103_v44 = vld [vmem:[%s21229_s3 + $0x48] sm:$0xff]  ;;  %2389 = vmatpush.bf16.msra.mxu1 %v14099_v35 }
  0xcf   : > { %v637_v54 = vpop.f32.mrf.mxu0  ;;  %v2078_v56 = vmax.f32 %v15123_v42, %v1250_v40  ;;  %v2079_v57 = vmax.f32 %v15132_v49, %v1257_v43  ;;  %v1287_v63 = vrot.slane %v1286_v51, 4  ;;  %14872 = vpow2.f32 %v742_v28  ;;  %v14088_v28 = vld [vmem:[%s15066_s15 + $0x60] sm:$0xff]  ;;  %v14095_v43 = vld [vmem:[%s21229_s3 + $0x8] sm:$0xff] }
  0xd0   : > { %v1268_v49 = vrot.slane %v1267_v59, 2  ;;  %v10253_v1 = vadd.f32 -1.0, %v14871_v41  ;;  %v1274_v3 = vmax.f32 %v1272_v47, %v1273_v60  ;;  %v1281_v4 = vmax.f32 %v1279_v48, %v1280_v61  ;;  %v14094_v60 = vld [vmem:[%s21229_s3] sm:$0xff] }
  0xd1   : > { %v2227_v42 = vsel %vm2226_vm9, %v2078_v56, %v2077_v46  ;;  %v1288_v5 = vmax.f32 %v1286_v51, %v1287_v63  ;;  %v2080_v6 = vmax.f32 %v15134_v50, %v1264_v55  ;;  %v706_v62 = vmin.f32 %v15190_v29, 0.0 }
  0xd2   : > { %v2229_v2 = vsel %vm2228_vm10, %v2079_v57, %v2227_v42  ;;  %v1269_v8 = vmax.f32 %v1267_v59, %v1268_v49  ;;  %v832_v45 = vmul.f32 1.6732632, %v10253_v1  ;;  %v1275_v9 = vrot.slane %v1274_v3, 2  ;;  %2454 = vmatpush.bf16.msra.mxu2 %v14095_v43  ;;  %2390 = vmatpush.bf16.msra.mxu1 %v14098_v37 }
  0xd3   : > { %v1282_v11 = vrot.slane %v1281_v4, 2  ;;  %v1289_v12 = vrot.slane %v1288_v5, 2  ;;  %v2231_v13 = vsel %vm2230_vm11, %v2080_v6, %v2229_v2  ;;  %v744_v15 = vmul.f32 1.442695, %v706_v62 }
  0xd4   : > { %v1270_v14 = vrot.slane %v1269_v8, 1  ;;  %v896_v50 = vsel %vm864_vm15, %v15140_v52, %v832_v45  ;;  %v1276_v20 = vmax.f32 %v1274_v3, %v1275_v9  ;;  %v14104_v52 = vld [vmem:[%s21229_s3 + $0x50] sm:$0xff]  ;;  %vm865_vm3 = vcmp.gt.f32.partialorder %v15163_v10, 0.0 }
  0xd5   : > { %v14873_v19 = vpop.eup %14872  ;;  %v1283_v21 = vmax.f32 %v1281_v4, %v1282_v11  ;;  %v1290_v22 = vmax.f32 %v1288_v5, %v1289_v12  ;;  %v928_v23 = vmul.f32 1.050701, %v896_v50  ;;  %14874 = vpow2.f32 %v744_v15  ;;  %2539 = vmatpush.bf16.msra.mxu3 %v14104_v52 }
  0xd6   : > { %v1271_v26 = vmax.f32 %v1269_v8, %v1270_v14  ;;  %v10254_v27 = vadd.f32 -1.0, %v14873_v19  ;;  %v15243_v53 = vadd.f32 %v15087_v17, %v637_v54  ;;  %v1277_v30 = vrot.slane %v1276_v20, 1  ;;  %2455 = vmatpush.bf16.msra.mxu2 %v14094_v60 }
  0xd7   : > { %v15232_v24 = vpop.f32.mrf.mxu0  ;;  %v1284_v31 = vrot.slane %v1283_v21, 1  ;;  %v1291_v33 = vrot.slane %v1290_v22, 1  ;;  %v1000_v34 = vrot.slane %v928_v23, 2  ;;  %v1001_v38 = vrot.slane %v928_v23, 4 }
  0xd8   : > { %v2081_v36 = vmax.f32 %v15146_v58, %v1271_v26  ;;  %v1002_v39 = vrot.slane %v928_v23, 6  ;;  %v1293_v40 = vsel %vm1180_vm4, %v928_v23, -inf  ;;  %v1278_v32 = vmax.f32 %v1276_v20, %v1277_v30 }
  0xd9   : > { %v1285_v46 = vmax.f32 %v1283_v21, %v1284_v31  ;;  %v1292_v47 = vmax.f32 %v1290_v22, %v1291_v33  ;;  %v1294_v58 = vrot.slane %v1293_v40, 4  ;;  %v1300_v51 = vsel %vm1180_vm4, %v1000_v34, -inf  ;;  %2540 = vmatpush.bf16.msra.mxu3 %v14103_v44 }
  0xda   : > { %10245 = vmatmul.msk.bf16.gmra.mxu0 %vm555_vm2, %v14088_v28  ;;  %v2233_v48 = vsel %vm2232_vm12, %v2081_v36, %v2231_v13  ;;  %v1307_v54 = vsel %vm1180_vm4, %v1001_v38, -inf  ;;  %v1314_v55 = vsel %vm1180_vm4, %v1002_v39, -inf  ;;  %v2082_v56 = vmax.f32 %v15158_v7, %v1278_v32  ;;  %v14102_v7 = vld [vmem:[%s21229_s3 + $0x40] sm:$0xff] }
  0xdb   : > { %v2083_v57 = vmax.f32 %v15170_v18, %v1285_v46  ;;  %v1295_v59 = vmax.f32 %v1293_v40, %v1294_v58  ;;  %v707_v41 = vmin.f32 %v15243_v53, 0.0  ;;  %v14875_v61 = vpop.eup %14874  ;;  %v1301_v63 = vrot.slane %v1300_v51, 4  ;;  %v14089_v58 = vld [vmem:[%s15066_s15 + $0x68] sm:$0xff] }
  0xdc   : > { %v1308_v42 = vrot.slane %v1307_v54, 4  ;;  %v1315_v49 = vrot.slane %v1314_v55, 4  ;;  %v833_v1 = vmul.f32 1.6732632, %v10254_v27  ;;  %v2084_v18 = vmax.f32 %v15214_v0, %v1292_v47 }
  0xdd   : > { %v2235_v2 = vsel %vm2234_vm13, %v2082_v56, %v2233_v48  ;;  %v1296_v3 = vrot.slane %v1295_v59, 2  ;;  %v10255_v4 = vadd.f32 -1.0, %v14875_v61  ;;  %v1302_v8 = vmax.f32 %v1300_v51, %v1301_v63  ;;  %2541 = vmatpush.bf16.msra.mxu3 %v14102_v7 }
  0xde   : > { %v2237_v6 = vsel %vm2236_vm14, %v2083_v57, %v2235_v2  ;;  %v1309_v45 = vmax.f32 %v1307_v54, %v1308_v42  ;;  %v1316_v62 = vmax.f32 %v1314_v55, %v1315_v49  ;;  %v897_v11 = vsel %vm865_vm3, %v15163_v10, %v833_v1 }
  0xdf   : > { %v15279_v5 = vpop.f32.mrf.mxu0  ;;  %v2239_v9 = vsel %vm2238_vm0, %v2084_v18, %v2237_v6  ;;  %v834_v12 = vmul.f32 1.6732632, %v10255_v4  ;;  %v746_v0 = vmul.f32 1.442695, %v707_v41  ;;  %v1297_v13 = vmax.f32 %v1295_v59, %v1296_v3 }
  0xe0   : > { %2298 = vst.msk [vmem:[#allocation2 + $0x11] sm:$0xff] %vm2141_vm7, %v2239_v9  ;;  %v1303_v14 = vrot.slane %v1302_v8, 2  ;;  %v1310_v50 = vrot.slane %v1309_v45, 2  ;;  %v929_v15 = vmul.f32 1.050701, %v897_v11  ;;  %v1317_v16 = vrot.slane %v1316_v62, 2 }
  0xe1   : > { %vm866_vm5 = vcmp.gt.f32.partialorder %v15190_v29, 0.0  ;;  %v1298_v52 = vrot.slane %v1297_v13, 1  ;;  %14876 = vpow2.f32 %v746_v0  ;;  %vm867_vm6 = vcmp.gt.f32.partialorder %v15243_v53, 0.0 }
  0xe2   : > { %v1304_v19 = vmax.f32 %v1302_v8, %v1303_v14  ;;  %v1311_v20 = vmax.f32 %v1309_v45, %v1310_v50  ;;  %v1003_v21 = vrot.slane %v929_v15, 2  ;;  %v898_v22 = vsel %vm866_vm5, %v15190_v29, %v834_v12 }
  0xe3   : > { %v1004_v23 = vrot.slane %v929_v15, 4  ;;  %v1005_v10 = vrot.slane %v929_v15, 6  ;;  %v1321_v25 = vsel %vm1180_vm4, %v929_v15, -inf  ;;  %v930_v31 = vmul.f32 1.050701, %v898_v22 }
  0xe4   : > { %v1322_v26 = vrot.slane %v1321_v25, 4  ;;  %v1328_v27 = vsel %vm1180_vm4, %v1003_v21, -inf  ;;  %v1305_v33 = vrot.slane %v1304_v19, 1  ;;  %v1312_v34 = vrot.slane %v1311_v20, 1  ;;  %v2326_v21 = vld [vmem:[#allocation2 + $0x1] sm:$0xff] }
  0xe5   : > { %v1335_v28 = vsel %vm1180_vm4, %v1004_v23, -inf  ;;  %v1342_v30 = vsel %vm1180_vm4, %v1005_v10, -inf  ;;  %v1318_v35 = vmax.f32 %v1316_v62, %v1317_v16  ;;  %v1329_v29 = vrot.slane %v1328_v27, 4 }
  0xe6   : > { %v1323_v36 = vmax.f32 %v1321_v25, %v1322_v26  ;;  %v1336_v38 = vrot.slane %v1335_v28, 4  ;;  %v1343_v39 = vrot.slane %v1342_v30, 4  ;;  %v1006_v40 = vrot.slane %v930_v31, 2 }
  0xe7   : > { %v15293_v43 = vpop.f32.mrf.mxu0  ;;  %v1007_v32 = vrot.slane %v930_v31, 4  ;;  %v1008_v46 = vrot.slane %v930_v31, 6  ;;  %v1349_v47 = vsel %vm1180_vm4, %v930_v31, -inf  ;;  %v1330_v48 = vmax.f32 %v1328_v27, %v1329_v29  ;;  %v14877_v56 = vpop.eup %14876  ;;  %v2327_v22 = vld [vmem:[#allocation2 + $0x11] sm:$0xff] }
  0xe8   : > { %v1324_v44 = vrot.slane %v1323_v36, 2  ;;  %v1337_v51 = vmax.f32 %v1335_v28, %v1336_v38  ;;  %v1344_v54 = vmax.f32 %v1342_v30, %v1343_v39  ;;  %v1350_v55 = vrot.slane %v1349_v47, 4 }
  0xe9   : > { %v1356_v59 = vsel %vm1180_vm4, %v1006_v40, -inf  ;;  %v1363_v41 = vsel %vm1180_vm4, %v1007_v32, -inf  ;;  %v1370_v37 = vsel %vm1180_vm4, %v1008_v46, -inf  ;;  %v1331_v60 = vrot.slane %v1330_v48, 2 }
  0xea   : > { %v1325_v57 = vmax.f32 %v1323_v36, %v1324_v44  ;;  %10246 = vmatmul.msk.bf16.gmra.mxu0 %vm555_vm2, %v14089_v58  ;;  %v1338_v61 = vrot.slane %v1337_v51, 2  ;;  %v1345_v63 = vrot.slane %v1344_v54, 2  ;;  %v1351_v42 = vmax.f32 %v1349_v47, %v1350_v55 }
  0xeb   : > { %v15302_v49 = vmax.f32 %v1297_v13, %v1298_v52  ;;  %v1357_v1 = vrot.slane %v1356_v59, 4  ;;  %v1364_v7 = vrot.slane %v1363_v41, 4  ;;  %v1371_v18 = vrot.slane %v1370_v37, 4 }
  0xec   : > { %v1319_v2 = vrot.slane %v1318_v35, 1  ;;  %v1332_v3 = vmax.f32 %v1330_v48, %v1331_v60  ;;  %v1339_v4 = vmax.f32 %v1337_v51, %v1338_v61  ;;  %v1352_v6 = vrot.slane %v1351_v42, 2 }
  0xed   : > { %v15304_v8 = vmax.f32 %v1304_v19, %v1305_v33  ;;  %v1358_v45 = vmax.f32 %v1356_v59, %v1357_v1  ;;  %v1365_v62 = vmax.f32 %v1363_v41, %v1364_v7  ;;  %v1372_v9 = vmax.f32 %v1370_v37, %v1371_v18  ;;  %v2306_v7 = vld [vmem:[#allocation2] sm:$0xff]  ;;  %v2307_v18 = vld [vmem:[#allocation2 + $0x10] sm:$0xff] }
  0xee   : > { %v15306_v11 = vmax.f32 %v1311_v20, %v1312_v34  ;;  %v1326_v12 = vrot.slane %v1325_v57, 1  ;;  %v1346_v0 = vmax.f32 %v1344_v54, %v1345_v63  ;;  %v1353_v14 = vmax.f32 %v1351_v42, %v1352_v6  ;;  %v2477_v6 = vld [vmem:[#allocation2 + $0x2] sm:$0xff] }
  0xef   : > { %v1359_v50 = vrot.slane %v1358_v45, 2  ;;  %v1366_v13 = vrot.slane %v1365_v62, 2  ;;  %v1373_v15 = vrot.slane %v1372_v9, 2  ;;  %v10256_v16 = vadd.f32 -1.0, %v14877_v56  ;;  %v15310_v52 = vpop.f32.mrf.mxu0 }
  0xf0   : > { %v15308_v23 = vmax.f32 %v1318_v35, %v1319_v2  ;;  %v1333_v10 = vrot.slane %v1332_v3, 1  ;;  %v1340_v25 = vrot.slane %v1339_v4, 1  ;;  %v1354_v19 = vrot.slane %v1353_v14, 1 }
  0xf1   : > { %v1360_v26 = vmax.f32 %v1358_v45, %v1359_v50  ;;  %v1367_v27 = vmax.f32 %v1365_v62, %v1366_v13  ;;  %v1374_v20 = vmax.f32 %v1372_v9, %v1373_v15  ;;  %v835_v28 = vmul.f32 1.6732632, %v10256_v16 }
  0xf2   : > { %v15312_v30 = vmax.f32 %v1325_v57, %v1326_v12  ;;  %v15316_v31 = vadd.f32 %v15087_v17, %v15232_v24  ;;  %v15320_v33 = vadd.f32 %v15087_v17, %v15279_v5  ;;  %v2334_v34 = vpack.c.bf16 %v2327_v22, %v2326_v21 }
  0xf3   : > { %v1347_v35 = vrot.slane %v1346_v0, 1  ;;  %v1361_v36 = vrot.slane %v1360_v26, 1  ;;  %v1368_v29 = vrot.slane %v1367_v27, 1  ;;  %v899_v38 = vsel %vm867_vm6, %v15243_v53, %v835_v28 }
  0xf4   : > { %v15325_v39 = vmax.f32 %v1332_v3, %v1333_v10  ;;  %v15327_v40 = vmax.f32 %v1339_v4, %v1340_v25  ;;  %v931_v44 = vmul.f32 1.050701, %v899_v38  ;;  %v708_v24 = vmin.f32 %v15316_v31, 0.0  ;;  %10305 = vmatmul.msk.bf16.vlgmr.msra.gmra.mxu1 %vm2141_vm7, %v2334_v34 }
  0xf5   : > { %v1355_v32 = vmax.f32 %v1353_v14, %v1354_v19  ;;  %v1362_v5 = vmax.f32 %v1360_v26, %v1361_v36  ;;  %v1375_v46 = vrot.slane %v1374_v20, 1  ;;  %v709_v47 = vmin.f32 %v15320_v33, 0.0  ;;  %v14090_v14 = vld [vmem:[%s15066_s15 + $0x70] sm:$0xff] }
  0xf6   : > { %v1009_v58 = vrot.slane %v931_v44, 2  ;;  %v1010_v48 = vrot.slane %v931_v44, 4  ;;  %v1011_v51 = vrot.slane %v931_v44, 6  ;;  %v1377_v54 = vsel %vm1180_vm4, %v931_v44, -inf }
  0xf7   : > { %v15333_v53 = vmax.f32 %v1346_v0, %v1347_v35  ;;  %v1369_v55 = vmax.f32 %v1367_v27, %v1368_v29  ;;  %v2086_v56 = vmax.f32 %v15304_v8, %v1362_v5  ;;  %v1378_v57 = vrot.slane %v1377_v54, 4  ;;  %v2478_v8 = vld [vmem:[#allocation2 + $0x12] sm:$0xff]  ;;  %v650_v45 = vpop.f32.mrf.mxu0 }
  0xf8   : > { %v1384_v59 = vsel %vm1180_vm4, %v1009_v58, -inf  ;;  %v1391_v41 = vsel %vm1180_vm4, %v1010_v48, -inf  ;;  %v1398_v37 = vsel %vm1180_vm4, %v1011_v51, -inf  ;;  %v748_v60 = vmul.f32 1.442695, %v708_v24 }
  0xf9   : > { %v2085_v61 = vmax.f32 %v15302_v49, %v1355_v32  ;;  %v1379_v63 = vmax.f32 %v1377_v54, %v1378_v57  ;;  %v1385_v42 = vrot.slane %v1384_v59, 4  ;;  %v1392_v1 = vrot.slane %v1391_v41, 4 }
  0xfa   : > { %v1376_v2 = vmax.f32 %v1374_v20, %v1375_v46  ;;  %v1399_v3 = vrot.slane %v1398_v37, 4  ;;  %14878 = vpow2.f32 %v748_v60  ;;  %v750_v4 = vmul.f32 1.442695, %v709_v47  ;;  %10247 = vmatmul.msk.bf16.gmra.mxu0 %vm555_vm2, %v14090_v14 }
  0xfb   : > { %v2087_v62 = vmax.f32 %v15306_v11, %v1369_v55  ;;  %v1380_v9 = vrot.slane %v1379_v63, 2  ;;  %v1386_v12 = vmax.f32 %v1384_v59, %v1385_v42  ;;  %v1393_v0 = vmax.f32 %v1391_v41, %v1392_v1 }
  0xfc   : > { %v2240_v49 = vsel %vm2226_vm9, %v2086_v56, %v2085_v61  ;;  %v1400_v50 = vmax.f32 %v1398_v37, %v1399_v3  ;;  %vm868_vm8 = vcmp.gt.f32.partialorder %v15316_v31, 0.0  ;;  %14880 = vpow2.f32 %v750_v4 }
  0xfd   : > { %v2314_v13 = vpack.c.bf16 %v2307_v18, %v2306_v7  ;;  %v1381_v15 = vmax.f32 %v1379_v63, %v1380_v9  ;;  %v1387_v16 = vrot.slane %v1386_v12, 2  ;;  %v1394_v21 = vrot.slane %v1393_v0, 2 }
  0xfe   : > { %v2485_v22 = vpack.c.bf16 %v2478_v8, %v2477_v6  ;;  %v2088_v10 = vmax.f32 %v15308_v23, %v1376_v2  ;;  %v1401_v11 = vrot.slane %v1400_v50, 2  ;;  %v15349_v25 = vadd.f32 %v15087_v17, %v15293_v43 }
  0xff   : > { %10325 = vmatmul.msk.bf16.vlgmr.msra.gmra.mxu2 %vm2141_vm7, %v2314_v13  ;;  %v15353_v19 = vadd.f32 %v15087_v17, %v15310_v52  ;;  %v2241_v26 = vsel %vm2228_vm10, %v2087_v62, %v2240_v49  ;;  %v1382_v27 = vrot.slane %v1381_v15, 1  ;;  %v1388_v20 = vmax.f32 %v1386_v12, %v1387_v16  ;;  %v652_v59 = vpop.f32.mrf.mxu0 }
 0x100   : > { %v1395_v28 = vmax.f32 %v1393_v0, %v1394_v21  ;;  %10353 = vmatmul.msk.bf16.vlgmr.msra.gmra.mxu3 %vm2141_vm7, %v2485_v22  ;;  %v14879_v34 = vpop.eup %14878  ;;  %v1402_v23 = vmax.f32 %v1400_v50, %v1401_v11  ;;  %v710_v35 = vmin.f32 %v15349_v25, 0.0  ;;  %v15360_v43 = vadd.f32 %v15087_v17, %v650_v45 }
 0x101   : > { %v711_v36 = vmin.f32 %v15353_v19, 0.0  ;;  %v1383_v29 = vmax.f32 %v1381_v15, %v1382_v27  ;;  %v1389_v38 = vrot.slane %v1388_v20, 1  ;;  %v10257_v44 = vadd.f32 -1.0, %v14879_v34 }
 0x102   : > { %v1396_v52 = vrot.slane %v1395_v28, 1  ;;  %v14881_v24 = vpop.eup %14880  ;;  %v2242_v32 = vsel %vm2230_vm11, %v2088_v10, %v2241_v26  ;;  %v1403_v5 = vrot.slane %v1402_v23, 1  ;;  %v752_v46 = vmul.f32 1.442695, %v710_v35 }
 0x103   : > { %v754_v47 = vmul.f32 1.442695, %v711_v36  ;;  %v1390_v58 = vmax.f32 %v1388_v20, %v1389_v38  ;;  %v2089_v51 = vmax.f32 %v15312_v30, %v1383_v29  ;;  %v836_v54 = vmul.f32 1.6732632, %v10257_v44 }
 0x104   : > { %v1397_v48 = vmax.f32 %v1395_v28, %v1396_v52  ;;  %v1404_v55 = vmax.f32 %v1402_v23, %v1403_v5  ;;  %v10258_v56 = vadd.f32 -1.0, %v14881_v24  ;;  %14882 = vpow2.f32 %v752_v46 }
 0x105   : > { %v712_v57 = vmin.f32 %v15360_v43, 0.0  ;;  %v2090_v41 = vmax.f32 %v15325_v39, %v1390_v58  ;;  %v2243_v60 = vsel %vm2232_vm12, %v2089_v51, %v2242_v32  ;;  %v900_v61 = vsel %vm868_vm8, %v15316_v31, %v836_v54 }
 0x106   : > { %v2091_v37 = vmax.f32 %v15327_v40, %v1397_v48  ;;  %v932_v63 = vmul.f32 1.050701, %v900_v61  ;;  %v837_v42 = vmul.f32 1.6732632, %v10258_v56  ;;  %vm869_vm15 = vcmp.gt.f32.partialorder %v15320_v33, 0.0  ;;  %v14091_v61 = vld [vmem:[%s15066_s15 + $0x78] sm:$0xff] }
 0x107   : > { %v2092_v30 = vmax.f32 %v15333_v53, %v1404_v55  ;;  %v2244_v1 = vsel %vm2234_vm13, %v2090_v41, %v2243_v60  ;;  %v756_v7 = vmul.f32 1.442695, %v712_v57  ;;  %v15375_v18 = vadd.f32 %v15087_v17, %v652_v59  ;;  %v655_v51 = vpop.f32.mrf.mxu0 }
 0x108   : > { %v2245_v39 = vsel %vm2236_vm14, %v2091_v37, %v2244_v1  ;;  %v1012_v40 = vrot.slane %v932_v63, 2  ;;  %v1013_v2 = vrot.slane %v932_v63, 4  ;;  %v1014_v3 = vrot.slane %v932_v63, 6 }
 0x109   : > { %v2246_v4 = vsel %vm2238_vm0, %v2092_v30, %v2245_v39  ;;  %v1405_v31 = vsel %vm1180_vm4, %v932_v63, -inf  ;;  %v901_v6 = vsel %vm869_vm15, %v15320_v33, %v837_v42  ;;  %14884 = vpow2.f32 %v754_v47 }
 0x10a   : > { %v14883_v8 = vpop.eup %14882  ;;  %2299 = vst.msk [vmem:[#allocation2 + $0x21] sm:$0xff] %vm2141_vm7, %v2246_v4  ;;  %v1406_v53 = vrot.slane %v1405_v31, 4  ;;  %v1412_v45 = vsel %vm1180_vm4, %v1012_v40, -inf  ;;  %v1419_v17 = vsel %vm1180_vm4, %v1013_v2, -inf  ;;  %v1426_v62 = vsel %vm1180_vm4, %v1014_v3, -inf  ;;  %10248 = vmatmul.msk.bf16.gmra.mxu0 %vm555_vm2, %v14091_v61 }
 0x10b   : > { %v1413_v9 = vrot.slane %v1412_v45, 4  ;;  %v1420_v12 = vrot.slane %v1419_v17, 4  ;;  %v1427_v0 = vrot.slane %v1426_v62, 4  ;;  %v933_v14 = vmul.f32 1.050701, %v901_v6 }
 0x10c   : > { %v1407_v49 = vmax.f32 %v1405_v31, %v1406_v53  ;;  %v10259_v50 = vadd.f32 -1.0, %v14883_v8  ;;  %14886 = vpow2.f32 %v756_v7  ;;  %v713_v33 = vmin.f32 %v15375_v18, 0.0 }
 0x10d   : > { %v1414_v13 = vmax.f32 %v1412_v45, %v1413_v9  ;;  %v1421_v15 = vmax.f32 %v1419_v17, %v1420_v12  ;;  %v1428_v16 = vmax.f32 %v1426_v62, %v1427_v0  ;;  %v1015_v21 = vrot.slane %v933_v14, 2 }
 0x10e   : > { %v1408_v22 = vrot.slane %v1407_v49, 2  ;;  %v1016_v10 = vrot.slane %v933_v14, 4  ;;  %v1017_v11 = vrot.slane %v933_v14, 6  ;;  %v1433_v26 = vsel %vm1180_vm4, %v933_v14, -inf }
 0x10f   : > { %v14885_v27 = vpop.eup %14884  ;;  %v1415_v20 = vrot.slane %v1414_v13, 2  ;;  %v1422_v28 = vrot.slane %v1421_v15, 2  ;;  %v1429_v34 = vrot.slane %v1428_v16, 2  ;;  %v1434_v23 = vrot.slane %v1433_v26, 4 }
 0x110   : > { %vm870_vm3 = vcmp.gt.f32.partialorder %v15349_v25, 0.0  ;;  %v1409_v35 = vmax.f32 %v1407_v49, %v1408_v22  ;;  %v1440_v36 = vsel %vm1180_vm4, %v1015_v21, -inf  ;;  %v1447_v29 = vsel %vm1180_vm4, %v1016_v10, -inf }
 0x111   : > { %v1454_v38 = vsel %vm1180_vm4, %v1017_v11, -inf  ;;  %v1416_v52 = vmax.f32 %v1414_v13, %v1415_v20  ;;  %v1423_v44 = vmax.f32 %v1421_v15, %v1422_v28  ;;  %v1430_v24 = vmax.f32 %v1428_v16, %v1429_v34  ;;  %v657_v11 = vpop.f32.mrf.mxu0 }
 0x112   : > { %v1435_v32 = vmax.f32 %v1433_v26, %v1434_v23  ;;  %v14887_v5 = vpop.eup %14886  ;;  %v1410_v46 = vrot.slane %v1409_v35, 1  ;;  %v1441_v47 = vrot.slane %v1440_v36, 4  ;;  %v1448_v58 = vrot.slane %v1447_v29, 4 }
 0x113   : > { %v1455_v48 = vrot.slane %v1454_v38, 4  ;;  %v1417_v54 = vrot.slane %v1416_v52, 1  ;;  %v1424_v55 = vrot.slane %v1423_v44, 1  ;;  %v1431_v56 = vrot.slane %v1430_v24, 1 }
 0x114   : > { %v1436_v57 = vrot.slane %v1435_v32, 2  ;;  %v15391_v59 = vmax.f32 %v1409_v35, %v1410_v46  ;;  %v1442_v41 = vmax.f32 %v1440_v36, %v1441_v47  ;;  %v1449_v37 = vmax.f32 %v1447_v29, %v1448_v58 }
 0x115   : > { %v1456_v60 = vmax.f32 %v1454_v38, %v1455_v48  ;;  %vm871_vm5 = vcmp.gt.f32.partialorder %v15353_v19, 0.0  ;;  %v15395_v63 = vmax.f32 %v1416_v52, %v1417_v54  ;;  %v15397_v42 = vmax.f32 %v1423_v44, %v1424_v55  ;;  %v15427_v52 = vld [vmem:[%s21228_s2] ss:$0 sm:$0xff] }
 0x116   : > { %v15399_v30 = vmax.f32 %v1430_v24, %v1431_v56  ;;  %v1437_v1 = vmax.f32 %v1435_v32, %v1436_v57  ;;  %v1443_v7 = vrot.slane %v1442_v41, 2  ;;  %v1450_v39 = vrot.slane %v1449_v37, 2 }
 0x117   : > { %v1457_v40 = vrot.slane %v1456_v60, 2  ;;  %v838_v2 = vmul.f32 1.6732632, %v10259_v50  ;;  %vm872_vm6 = vcmp.gt.f32.partialorder %v15360_v43, 0.0  ;;  %v10260_v4 = vadd.f32 -1.0, %v14885_v27 }
 0x118   : > { %v1438_v3 = vrot.slane %v1437_v1, 1  ;;  %v10261_v31 = vadd.f32 -1.0, %v14887_v5  ;;  %v758_v6 = vmul.f32 1.442695, %v713_v33  ;;  %v1444_v8 = vmax.f32 %v1442_v41, %v1443_v7 }
 0x119   : > { %v1451_v53 = vmax.f32 %v1449_v37, %v1450_v39  ;;  %v1458_v45 = vmax.f32 %v1456_v60, %v1457_v40  ;;  %v902_v17 = vsel %vm870_vm3, %v15349_v25, %v838_v2  ;;  %v839_v12 = vmul.f32 1.6732632, %v10260_v4 }
 0x11a   : > { %v15406_v62 = vmax.f32 %v1437_v1, %v1438_v3  ;;  %v934_v9 = vmul.f32 1.050701, %v902_v17  ;;  %v840_v0 = vmul.f32 1.6732632, %v10261_v31  ;;  %v1445_v14 = vrot.slane %v1444_v8, 1 }
 0x11b   : > { %v1452_v49 = vrot.slane %v1451_v53, 1  ;;  %v1459_v50 = vrot.slane %v1458_v45, 1  ;;  %14888 = vpow2.f32 %v758_v6  ;;  %v903_v28 = vsel %vm871_vm5, %v15353_v19, %v839_v12 }
 0x11c   : > { %v1018_v13 = vrot.slane %v934_v9, 2  ;;  %v1019_v15 = vrot.slane %v934_v9, 4  ;;  %v1020_v16 = vrot.slane %v934_v9, 6  ;;  %v1461_v33 = vsel %vm1180_vm4, %v934_v9, -inf }
 0x11d   : > { %v15409_v21 = vmax.f32 %v1444_v8, %v1445_v14  ;;  %v15411_v22 = vmax.f32 %v1451_v53, %v1452_v49  ;;  %v15413_v10 = vmax.f32 %v1458_v45, %v1459_v50  ;;  %v1462_v25 = vrot.slane %v1461_v33, 4 }
 0x11e   : > { %v1468_v26 = vsel %vm1180_vm4, %v1018_v13, -inf  ;;  %v1475_v27 = vsel %vm1180_vm4, %v1019_v15, -inf  ;;  %v1482_v20 = vsel %vm1180_vm4, %v1020_v16, -inf  ;;  %v935_v29 = vmul.f32 1.050701, %v903_v28 }
 0x11f   : > { %v1463_v34 = vmax.f32 %v1461_v33, %v1462_v25  ;;  %v1469_v23 = vrot.slane %v1468_v26, 4  ;;  %v1476_v35 = vrot.slane %v1475_v27, 4  ;;  %v1483_v36 = vrot.slane %v1482_v20, 4 }
 0x120   : > { %v904_v38 = vsel %vm872_vm6, %v15360_v43, %v840_v0  ;;  %v15430_v44 = vadd.f32 %v15427_v52, %v655_v51  ;;  %v15433_v24 = vadd.f32 %v15427_v52, %v657_v11  ;;  %v1021_v58 = vrot.slane %v935_v29, 2 }
 0x121   : > { %v15435_v19 = vpop.eup %14888  ;;  %v1464_v32 = vrot.slane %v1463_v34, 2  ;;  %v1470_v5 = vmax.f32 %v1468_v26, %v1469_v23  ;;  %v1477_v46 = vmax.f32 %v1475_v27, %v1476_v35  ;;  %v1484_v47 = vmax.f32 %v1482_v20, %v1483_v36 }
 0x122   : > { %v1022_v48 = vrot.slane %v935_v29, 4  ;;  %v1023_v43 = vrot.slane %v935_v29, 6  ;;  %v1489_v54 = vsel %vm1180_vm4, %v935_v29, -inf  ;;  %v1496_v37 = vsel %vm1180_vm4, %v1021_v58, -inf }
 0x123   : > { %v1465_v55 = vmax.f32 %v1463_v34, %v1464_v32  ;;  %v1471_v56 = vrot.slane %v1470_v5, 2  ;;  %v1478_v57 = vrot.slane %v1477_v46, 2  ;;  %v1485_v41 = vrot.slane %v1484_v47, 2 }
 0x124   : > { %v1490_v51 = vrot.slane %v1489_v54, 4  ;;  %v1503_v60 = vsel %vm1180_vm4, %v1022_v48, -inf  ;;  %v1510_v61 = vsel %vm1180_vm4, %v1023_v43, -inf  ;;  %v1497_v3 = vrot.slane %v1496_v37, 4 }
 0x125   : > { %v1466_v1 = vrot.slane %v1465_v55, 1  ;;  %v1472_v7 = vmax.f32 %v1470_v5, %v1471_v56  ;;  %v1479_v39 = vmax.f32 %v1477_v46, %v1478_v57  ;;  %v1486_v40 = vmax.f32 %v1484_v47, %v1485_v41 }
 0x126   : > { %v1491_v2 = vmax.f32 %v1489_v54, %v1490_v51  ;;  %v1504_v4 = vrot.slane %v1503_v60, 4  ;;  %v1511_v31 = vrot.slane %v1510_v61, 4  ;;  %v1498_v9 = vmax.f32 %v1496_v37, %v1497_v3  ;;  %v660_v37 = vpop.f32.mrf.mxu0 }
 0x127   : > { %v1467_v6 = vmax.f32 %v1465_v55, %v1466_v1  ;;  %v1473_v8 = vrot.slane %v1472_v7, 1  ;;  %v1480_v53 = vrot.slane %v1479_v39, 1  ;;  %v1487_v45 = vrot.slane %v1486_v40, 1 }
 0x128   : > { %v1492_v17 = vrot.slane %v1491_v2, 2  ;;  %v1505_v12 = vmax.f32 %v1503_v60, %v1504_v4  ;;  %v1512_v0 = vmax.f32 %v1510_v61, %v1511_v31  ;;  %v1499_v16 = vrot.slane %v1498_v9, 2 }
 0x129   : > { %v1474_v14 = vmax.f32 %v1472_v7, %v1473_v8  ;;  %v1481_v49 = vmax.f32 %v1479_v39, %v1480_v53  ;;  %v1488_v50 = vmax.f32 %v1486_v40, %v1487_v45  ;;  %v2093_v13 = vmax.f32 %v15391_v59, %v1467_v6 }
 0x12a   : > { %v1493_v15 = vmax.f32 %v1491_v2, %v1492_v17  ;;  %v1506_v33 = vrot.slane %v1505_v12, 2  ;;  %v1513_v25 = vrot.slane %v1512_v0, 2  ;;  %v936_v20 = vmul.f32 1.050701, %v904_v38 }
 0x12b   : > { %v2094_v11 = vmax.f32 %v15395_v63, %v1474_v14  ;;  %v2095_v26 = vmax.f32 %v15397_v42, %v1481_v49  ;;  %v2096_v27 = vmax.f32 %v15399_v30, %v1488_v50  ;;  %v1500_v34 = vmax.f32 %v1498_v9, %v1499_v16 }
 0x12c   : > { %v1494_v28 = vrot.slane %v1493_v15, 1  ;;  %v1507_v23 = vmax.f32 %v1505_v12, %v1506_v33  ;;  %v1514_v35 = vmax.f32 %v1512_v0, %v1513_v25  ;;  %v1024_v29 = vrot.slane %v936_v20, 2 }
 0x12d   : > { %v2247_v36 = vsel %vm2226_vm9, %v2094_v11, %v2093_v13  ;;  %v1025_v32 = vrot.slane %v936_v20, 4  ;;  %v1026_v59 = vrot.slane %v936_v20, 6  ;;  %v1501_v47 = vrot.slane %v1500_v34, 1 }
 0x12e   : > { %v2248_v5 = vsel %vm2228_vm10, %v2095_v26, %v2247_v36  ;;  %v1495_v46 = vmax.f32 %v1493_v15, %v1494_v28  ;;  %v1508_v58 = vrot.slane %v1507_v23, 1  ;;  %v1515_v42 = vrot.slane %v1514_v35, 1 }
 0x12f   : > { %v2249_v63 = vsel %vm2230_vm11, %v2096_v27, %v2248_v5  ;;  %v1517_v30 = vsel %vm1180_vm4, %v936_v20, -inf  ;;  %v1524_v38 = vsel %vm1180_vm4, %v1024_v29, -inf  ;;  %v1502_v48 = vmax.f32 %v1500_v34, %v1501_v47  ;;  %v662_v20 = vpop.f32.mrf.mxu0 }
 0x130   : > { %v1509_v43 = vmax.f32 %v1507_v23, %v1508_v58  ;;  %v2097_v54 = vmax.f32 %v15406_v62, %v1495_v46  ;;  %v1518_v55 = vrot.slane %v1517_v30, 4  ;;  %v1516_v56 = vmax.f32 %v1514_v35, %v1515_v42 }
 0x131   : > { %v1525_v57 = vrot.slane %v1524_v38, 4  ;;  %v1531_v41 = vsel %vm1180_vm4, %v1025_v32, -inf  ;;  %v1538_v51 = vsel %vm1180_vm4, %v1026_v59, -inf  ;;  %v2098_v60 = vmax.f32 %v15409_v21, %v1502_v48 }
 0x132   : > { %v2099_v61 = vmax.f32 %v15411_v22, %v1509_v43  ;;  %v2250_v1 = vsel %vm2232_vm12, %v2097_v54, %v2249_v63  ;;  %v1519_v7 = vmax.f32 %v1517_v30, %v1518_v55  ;;  %v2100_v39 = vmax.f32 %v15413_v10, %v1516_v56 }
 0x133   : > { %v1526_v40 = vmax.f32 %v1524_v38, %v1525_v57  ;;  %v1532_v2 = vrot.slane %v1531_v41, 4  ;;  %v1539_v62 = vrot.slane %v1538_v51, 4  ;;  %v2251_v3 = vsel %vm2234_vm13, %v2098_v60, %v2250_v1 }
 0x134   : > { %v1520_v4 = vrot.slane %v1519_v7, 2  ;;  %v10262_v31 = vadd.f32 -1.0, %v15435_v19  ;;  %v714_v6 = vmin.f32 %v15430_v44, 0.0  ;;  %v2252_v8 = vsel %vm2236_vm14, %v2099_v61, %v2251_v3 }
 0x135   : > { %v1527_v21 = vrot.slane %v1526_v40, 2  ;;  %v1533_v53 = vmax.f32 %v1531_v41, %v1532_v2  ;;  %v1540_v22 = vmax.f32 %v1538_v51, %v1539_v62  ;;  %v2253_v45 = vsel %vm2238_vm0, %v2100_v39, %v2252_v8 }
 0x136   : > { %v1521_v17 = vmax.f32 %v1519_v7, %v1520_v4  ;;  %v841_v9 = vmul.f32 1.6732632, %v10262_v31  ;;  %v760_v10 = vmul.f32 1.442695, %v714_v6  ;;  %2300 = vst.msk [vmem:[#allocation2 + $0x31] sm:$0xff] %vm2141_vm7, %v2253_v45  ;;  %vm873_vm2 = vcmp.gt.f32.partialorder %v15375_v18, 0.0 }
 0x137   : > { %v1528_v12 = vmax.f32 %v1526_v40, %v1527_v21  ;;  %v1534_v0 = vrot.slane %v1533_v53, 2  ;;  %v1541_v14 = vrot.slane %v1540_v22, 2  ;;  %v715_v50 = vmin.f32 %v15433_v24, 0.0  ;;  %v2328_v6 = vld [vmem:[#allocation2 + $0x21] sm:$0xff]  ;;  %v665_v45 = vpop.f32.mrf.mxu0 }
 0x138   : > { %v1522_v19 = vrot.slane %v1521_v17, 1  ;;  %v905_v49 = vsel %vm873_vm2, %v15375_v18, %v841_v9  ;;  %14890 = vpow2.f32 %v760_v10  ;;  %v15467_v25 = vadd.f32 %v15427_v52, %v660_v37 }
 0x139   : > { %v1529_v13 = vrot.slane %v1528_v12, 1  ;;  %v1535_v15 = vmax.f32 %v1533_v53, %v1534_v0  ;;  %v937_v16 = vmul.f32 1.050701, %v905_v49  ;;  %v762_v33 = vmul.f32 1.442695, %v715_v50 }
 0x13a   : > { %v15469_v11 = vmax.f32 %v1521_v17, %v1522_v19  ;;  %v1542_v26 = vmax.f32 %v1540_v22, %v1541_v14  ;;  %vm874_vm8 = vcmp.gt.f32.partialorder %v15430_v44, 0.0  ;;  %v716_v47 = vmin.f32 %v15467_v25, 0.0 }
 0x13b   : > { %v1027_v27 = vrot.slane %v937_v16, 2  ;;  %v1028_v28 = vrot.slane %v937_v16, 4  ;;  %v1029_v34 = vrot.slane %v937_v16, 6  ;;  %v1545_v18 = vsel %vm1180_vm4, %v937_v16, -inf }
 0x13c   : > { %14892 = vpow2.f32 %v762_v33  ;;  %v15473_v23 = vmax.f32 %v1528_v12, %v1529_v13  ;;  %v1536_v35 = vrot.slane %v1535_v15, 1  ;;  %v1546_v36 = vrot.slane %v1545_v18, 4 }
 0x13d   : > { %v1552_v29 = vsel %vm1180_vm4, %v1027_v27, -inf  ;;  %v1559_v5 = vsel %vm1180_vm4, %v1028_v28, -inf  ;;  %v1566_v46 = vsel %vm1180_vm4, %v1029_v34, -inf  ;;  %v1543_v38 = vrot.slane %v1542_v26, 1  ;;  %v2329_v1 = vld [vmem:[#allocation2 + $0x31] sm:$0xff] }
 0x13e   : > { %v14891_v32 = vpop.eup %14890  ;;  %v1553_v59 = vrot.slane %v1552_v29, 4  ;;  %v1547_v58 = vmax.f32 %v1545_v18, %v1546_v36  ;;  %v1560_v63 = vrot.slane %v1559_v5, 4  ;;  %v1567_v42 = vrot.slane %v1566_v46, 4  ;;  %v2309_v28 = vld [vmem:[#allocation2 + $0x30] sm:$0xff] }
 0x13f   : > { %v10263_v30 = vadd.f32 -1.0, %v14891_v32  ;;  %v764_v43 = vmul.f32 1.442695, %v716_v47  ;;  %v15480_v54 = vadd.f32 %v15427_v52, %v662_v20  ;;  %v15482_v37 = vmax.f32 %v1535_v15, %v1536_v35 }
 0x140   : > { %v1554_v48 = vmax.f32 %v1552_v29, %v1553_v59  ;;  %v1548_v55 = vrot.slane %v1547_v58, 2  ;;  %v1561_v56 = vmax.f32 %v1559_v5, %v1560_v63  ;;  %v1568_v57 = vmax.f32 %v1566_v46, %v1567_v42  ;;  %v2308_v5 = vld [vmem:[#allocation2 + $0x20] sm:$0xff]  ;;  %v2480_v46 = vld [vmem:[#allocation2 + $0x32] sm:$0xff] }
 0x141   : > { %v842_v41 = vmul.f32 1.6732632, %v10263_v30  ;;  %14894 = vpow2.f32 %v764_v43  ;;  %v717_v61 = vmin.f32 %v15480_v54, 0.0  ;;  %vm875_vm15 = vcmp.gt.f32.partialorder %v15433_v24, 0.0 }
 0x142   : > { %v14893_v51 = vpop.eup %14892  ;;  %v1555_v60 = vrot.slane %v1554_v48, 2  ;;  %v1549_v7 = vmax.f32 %v1547_v58, %v1548_v55  ;;  %v1562_v39 = vrot.slane %v1561_v56, 2  ;;  %v1569_v40 = vrot.slane %v1568_v57, 2  ;;  %v2479_v55 = vld [vmem:[#allocation2 + $0x22] sm:$0xff] }
 0x143   : > { %v906_v2 = vsel %vm874_vm8, %v15430_v44, %v842_v41  ;;  %v15489_v62 = vmax.f32 %v1542_v26, %v1543_v38  ;;  %v10264_v31 = vadd.f32 -1.0, %v14893_v51  ;;  %vm876_vm3 = vcmp.gt.f32.partialorder %v15467_v25, 0.0 }
 0x144   : > { %v1556_v3 = vmax.f32 %v1554_v48, %v1555_v60  ;;  %v938_v4 = vmul.f32 1.050701, %v906_v2  ;;  %v1550_v8 = vrot.slane %v1549_v7, 1  ;;  %v1563_v21 = vmax.f32 %v1561_v56, %v1562_v39 }
 0x145   : > { %v15491_v53 = vmax.f32 %v1568_v57, %v1569_v40  ;;  %v2335_v22 = vpack.c.bf16 %v2329_v1, %v2328_v6  ;;  %v766_v19 = vmul.f32 1.442695, %v717_v61  ;;  %v843_v35 = vmul.f32 1.6732632, %v10264_v31 }
 0x146   : > { %v1557_v17 = vrot.slane %v1556_v3, 1  ;;  %v1030_v9 = vrot.slane %v938_v4, 2  ;;  %v1031_v10 = vrot.slane %v938_v4, 4  ;;  %v1032_v44 = vrot.slane %v938_v4, 6 }
 0x147   : > { %v15494_v12 = vmax.f32 %v1549_v7, %v1550_v8  ;;  %v1564_v0 = vrot.slane %v1563_v21, 1  ;;  %v1573_v14 = vsel %vm1180_vm4, %v938_v4, -inf  ;;  %10306 = vmatmul.msk.bf16.gmra.mxu1 %vm2141_vm7, %v2335_v22  ;;  %v14895_v49 = vpop.eup %14894  ;;  %v1571_v50 = vrot.slane %v15491_v53, 1  ;;  %v15516_v7 = vpop.f32.mrf.mxu0 }
 0x148   : > { %v1574_v13 = vrot.slane %v1573_v14, 4  ;;  %v1580_v15 = vsel %vm1180_vm4, %v1030_v9, -inf  ;;  %v1587_v16 = vsel %vm1180_vm4, %v1031_v10, -inf  ;;  %v15501_v33 = vmax.f32 %v1556_v3, %v1557_v17 }
 0x149   : > { %v15503_v26 = vmax.f32 %v1563_v21, %v1564_v0  ;;  %v1581_v27 = vrot.slane %v1580_v15, 4  ;;  %v1588_v20 = vrot.slane %v1587_v16, 4  ;;  %v1594_v18 = vsel %vm1180_vm4, %v1032_v44, -inf }
 0x14a   : > { %v1575_v34 = vmax.f32 %v1573_v14, %v1574_v13  ;;  %v10265_v36 = vadd.f32 -1.0, %v14895_v49  ;;  %v1595_v59 = vrot.slane %v1594_v18, 4  ;;  %14896 = vpow2.f32 %v766_v19 }
 0x14b   : > { %v1582_v29 = vmax.f32 %v1580_v15, %v1581_v27  ;;  %v1589_v32 = vmax.f32 %v1587_v16, %v1588_v20  ;;  %v907_v58 = vsel %vm875_vm15, %v15433_v24, %v843_v35  ;;  %v2315_v42 = vpack.c.bf16 %v2309_v28, %v2308_v5 }
 0x14c   : > { %v1576_v47 = vrot.slane %v1575_v34, 2  ;;  %v844_v63 = vmul.f32 1.6732632, %v10265_v36  ;;  %v1596_v48 = vmax.f32 %v1594_v18, %v1595_v59  ;;  %v939_v43 = vmul.f32 1.050701, %v907_v58 }
 0x14d   : > { %v1583_v30 = vrot.slane %v1582_v29, 2  ;;  %v1590_v38 = vrot.slane %v1589_v32, 2  ;;  %10326 = vmatmul.msk.bf16.gmra.mxu2 %vm2141_vm7, %v2315_v42  ;;  %v2486_v41 = vpack.c.bf16 %v2480_v46, %v2479_v55  ;;  %v15514_v51 = vadd.f32 %v15427_v52, %v665_v45 }
 0x14e   : > { %v1577_v56 = vmax.f32 %v1575_v34, %v1576_v47  ;;  %v908_v57 = vsel %vm876_vm3, %v15467_v25, %v844_v63  ;;  %v1597_v61 = vrot.slane %v1596_v48, 2  ;;  %v1033_v1 = vrot.slane %v939_v43, 2 }
 0x14f   : > { %v1584_v60 = vmax.f32 %v1582_v29, %v1583_v30  ;;  %v1591_v24 = vmax.f32 %v1589_v32, %v1590_v38  ;;  %v1034_v40 = vrot.slane %v939_v43, 4  ;;  %v1035_v2 = vrot.slane %v939_v43, 6  ;;  %10354 = vmatmul.msk.bf16.gmra.mxu3 %vm2141_vm7, %v2486_v41  ;;  %v670_v42 = vpop.f32.mrf.mxu0 }
 0x150   : > { %v1578_v39 = vrot.slane %v1577_v56, 1  ;;  %v1601_v3 = vsel %vm1180_vm4, %v939_v43, -inf  ;;  %v14897_v25 = vpop.eup %14896  ;;  %v1598_v6 = vmax.f32 %v1596_v48, %v1597_v61  ;;  %v1608_v22 = vsel %vm1180_vm4, %v1033_v1, -inf }
 0x151   : > { %v1585_v4 = vrot.slane %v1584_v60, 1  ;;  %v1592_v31 = vrot.slane %v1591_v24, 1  ;;  %v1602_v8 = vrot.slane %v1601_v3, 4  ;;  %v1615_v45 = vsel %vm1180_vm4, %v1034_v40, -inf }
 0x152   : > { %v1579_v21 = vmax.f32 %v1577_v56, %v1578_v39  ;;  %v1622_v17 = vsel %vm1180_vm4, %v1035_v2, -inf  ;;  %v1599_v44 = vrot.slane %v1598_v6, 1  ;;  %v1609_v19 = vrot.slane %v1608_v22, 4 }
 0x153   : > { %v1586_v9 = vmax.f32 %v1584_v60, %v1585_v4  ;;  %v1593_v10 = vmax.f32 %v1591_v24, %v1592_v31  ;;  %v1603_v0 = vmax.f32 %v1601_v3, %v1602_v8  ;;  %v1616_v49 = vrot.slane %v1615_v45, 4 }
 0x154   : > { %v2101_v14 = vmax.f32 %v15469_v11, %v1579_v21  ;;  %v1623_v13 = vrot.slane %v1622_v17, 4  ;;  %v1600_v15 = vmax.f32 %v1598_v6, %v1599_v44  ;;  %v1610_v28 = vmax.f32 %v1608_v22, %v1609_v19 }
 0x155   : > { %v2102_v16 = vmax.f32 %v15473_v23, %v1586_v9  ;;  %v2103_v27 = vmax.f32 %v15482_v37, %v1593_v10  ;;  %v1604_v20 = vrot.slane %v1603_v0, 2  ;;  %v1617_v34 = vmax.f32 %v1615_v45, %v1616_v49 }
 0x156   : > { %v1624_v18 = vmax.f32 %v1622_v17, %v1623_v13  ;;  %v940_v35 = vmul.f32 1.050701, %v908_v57  ;;  %v2104_v36 = vmax.f32 %v15489_v62, %v1600_v15  ;;  %v10266_v59 = vadd.f32 -1.0, %v14897_v25 }
 0x157   : > { %v2254_v29 = vsel %vm2226_vm9, %v2102_v16, %v2101_v14  ;;  %v1605_v32 = vmax.f32 %v1603_v0, %v1604_v20  ;;  %v1611_v5 = vrot.slane %v1610_v28, 2  ;;  %v1618_v46 = vrot.slane %v1617_v34, 2 }
 0x158   : > { %v2255_v11 = vsel %vm2228_vm10, %v2103_v27, %v2254_v29  ;;  %v1625_v47 = vrot.slane %v1624_v18, 2  ;;  %v1036_v37 = vrot.slane %v940_v35, 2  ;;  %v1037_v63 = vrot.slane %v940_v35, 4 }
 0x159   : > { %v2256_v23 = vsel %vm2230_vm11, %v2104_v36, %v2255_v11  ;;  %v1606_v58 = vrot.slane %v1605_v32, 1  ;;  %v1612_v30 = vmax.f32 %v1610_v28, %v1611_v5  ;;  %v1619_v38 = vmax.f32 %v1617_v34, %v1618_v46 }
 0x15a   : > { %v1626_v48 = vmax.f32 %v1624_v18, %v1625_v47  ;;  %v1038_v43 = vrot.slane %v940_v35, 6  ;;  %v1629_v55 = vsel %vm1180_vm4, %v940_v35, -inf  ;;  %v1636_v56 = vsel %vm1180_vm4, %v1036_v37, -inf }
 0x15b   : > { %v1607_v62 = vmax.f32 %v1605_v32, %v1606_v58  ;;  %v1643_v57 = vsel %vm1180_vm4, %v1037_v63, -inf  ;;  %vm877_vm5 = vcmp.gt.f32.partialorder %v15480_v54, 0.0  ;;  %v1613_v41 = vrot.slane %v1612_v30, 1 }
 0x15c   : > { %v1620_v60 = vrot.slane %v1619_v38, 1  ;;  %v1627_v24 = vrot.slane %v1626_v48, 1  ;;  %v1630_v61 = vrot.slane %v1629_v55, 4  ;;  %v1637_v39 = vrot.slane %v1636_v56, 4 }
 0x15d   : > { %v2105_v1 = vmax.f32 %v15494_v12, %v1607_v62  ;;  %v1644_v40 = vrot.slane %v1643_v57, 4  ;;  %v1650_v2 = vsel %vm1180_vm4, %v1038_v43, -inf  ;;  %v1614_v3 = vmax.f32 %v1612_v30, %v1613_v41 }
 0x15e   : > { %v1621_v25 = vmax.f32 %v1619_v38, %v1620_v60  ;;  %v1628_v4 = vmax.f32 %v1626_v48, %v1627_v24  ;;  %v1631_v31 = vmax.f32 %v1629_v55, %v1630_v61  ;;  %v1638_v8 = vmax.f32 %v1636_v56, %v1637_v39 }
 0x15f   : > { %v2257_v6 = vsel %vm2232_vm12, %v2105_v1, %v2256_v23  ;;  %v1645_v21 = vmax.f32 %v1643_v57, %v1644_v40  ;;  %v1651_v22 = vrot.slane %v1650_v2, 4  ;;  %v1572_v45 = vmax.f32 %v15491_v53, %v1571_v50  ;;  %v672_v50 = vpop.f32.mrf.mxu0 }
 0x160   : > { %v2106_v17 = vmax.f32 %v15501_v33, %v1614_v3  ;;  %v2107_v12 = vmax.f32 %v15503_v26, %v1621_v25  ;;  %v1632_v9 = vrot.slane %v1631_v31, 2  ;;  %v1639_v10 = vrot.slane %v1638_v8, 2 }
 0x161   : > { %v1646_v44 = vrot.slane %v1645_v21, 2  ;;  %v1652_v0 = vmax.f32 %v1650_v2, %v1651_v22  ;;  %v845_v14 = vmul.f32 1.6732632, %v10266_v59  ;;  %v2108_v19 = vmax.f32 %v1572_v45, %v1628_v4 }
 0x162   : > { %v2258_v49 = vsel %vm2234_vm13, %v2106_v17, %v2257_v6  ;;  %v1633_v13 = vmax.f32 %v1631_v31, %v1632_v9  ;;  %v718_v15 = vmin.f32 %v15514_v51, 0.0  ;;  %v1640_v27 = vmax.f32 %v1638_v8, %v1639_v10 }
 0x163   : > { %v2259_v16 = vsel %vm2236_vm14, %v2107_v12, %v2258_v49  ;;  %v1647_v20 = vmax.f32 %v1645_v21, %v1646_v44  ;;  %v1653_v53 = vrot.slane %v1652_v0, 2  ;;  %v909_v26 = vsel %vm877_vm5, %v15480_v54, %v845_v14 }
 0x164   : > { %v2260_v33 = vsel %vm2238_vm0, %v2108_v19, %v2259_v16  ;;  %v768_v28 = vmul.f32 1.442695, %v718_v15  ;;  %v1634_v34 = vrot.slane %v1633_v13, 1  ;;  %v1641_v18 = vrot.slane %v1640_v27, 1 }
 0x165   : > { %2301 = vst.msk [vmem:[#allocation2 + $0x41] sm:$0xff] %vm2141_vm7, %v2260_v33  ;;  %v941_v35 = vmul.f32 1.050701, %v909_v26  ;;  %v15552_v36 = vadd.f32 %v15427_v52, %v15516_v7  ;;  %v1648_v29 = vrot.slane %v1647_v20, 1  ;;  %v1654_v32 = vmax.f32 %v1652_v0, %v1653_v53 }
 0x166   : > { %14898 = vpow2.f32 %v768_v28  ;;  %v15555_v11 = vadd.f32 %v15427_v52, %v670_v42  ;;  %vm878_vm6 = vcmp.gt.f32.partialorder %v15514_v51, 0.0  ;;  %v15560_v23 = vmax.f32 %v1633_v13, %v1634_v34 }
 0x167   : > { %v1039_v59 = vrot.slane %v941_v35, 2  ;;  %v1040_v5 = vrot.slane %v941_v35, 4  ;;  %v1041_v46 = vrot.slane %v941_v35, 6  ;;  %v1657_v54 = vsel %vm1180_vm4, %v941_v35, -inf  ;;  %v675_v40 = vpop.f32.mrf.mxu0 }
 0x168   : > { %v719_v47 = vmin.f32 %v15552_v36, 0.0  ;;  %v15562_v58 = vmax.f32 %v1640_v27, %v1641_v18  ;;  %v1658_v7 = vrot.slane %v1657_v54, 4  ;;  %v720_v55 = vmin.f32 %v15555_v11, 0.0 }
 0x169   : > { %v1664_v37 = vsel %vm1180_vm4, %v1039_v59, -inf  ;;  %v1671_v30 = vsel %vm1180_vm4, %v1040_v5, -inf  ;;  %v1678_v42 = vsel %vm1180_vm4, %v1041_v46, -inf  ;;  %v15568_v57 = vmax.f32 %v1647_v20, %v1648_v29 }
 0x16a   : > { %v1665_v63 = vrot.slane %v1664_v37, 4  ;;  %v770_v38 = vmul.f32 1.442695, %v719_v47  ;;  %v1659_v48 = vmax.f32 %v1657_v54, %v1658_v7  ;;  %v1672_v43 = vrot.slane %v1671_v30, 4 }
 0x16b   : > { %v1679_v62 = vrot.slane %v1678_v42, 4  ;;  %v15571_v60 = vadd.f32 %v15427_v52, %v672_v50  ;;  %v1655_v2 = vrot.slane %v1654_v32, 1  ;;  %v772_v25 = vmul.f32 1.442695, %v720_v55 }
 0x16c   : > { %v14899_v56 = vpop.eup %14898  ;;  %v1666_v41 = vmax.f32 %v1664_v37, %v1665_v63  ;;  %14900 = vpow2.f32 %v770_v38  ;;  %v1660_v24 = vrot.slane %v1659_v48, 2  ;;  %v1673_v61 = vmax.f32 %v1671_v30, %v1672_v43 }
 0x16d   : > { %v1680_v1 = vmax.f32 %v1678_v42, %v1679_v62  ;;  %v10267_v39 = vadd.f32 -1.0, %v14899_v56  ;;  %v721_v4 = vmin.f32 %v15571_v60, 0.0  ;;  %14902 = vpow2.f32 %v772_v25 }
 0x16e   : > { %v1667_v3 = vrot.slane %v1666_v41, 2  ;;  %v1661_v31 = vmax.f32 %v1659_v48, %v1660_v24  ;;  %v1674_v6 = vrot.slane %v1673_v61, 2  ;;  %v15575_v17 = vadd.f32 %v15427_v52, %v675_v40 }
 0x16f   : > { %v1681_v8 = vrot.slane %v1680_v1, 2  ;;  %v846_v21 = vmul.f32 1.6732632, %v10267_v39  ;;  %v774_v45 = vmul.f32 1.442695, %v721_v4  ;;  %v15580_v14 = vmax.f32 %v1654_v32, %v1655_v2 }
 0x170   : > { %v1668_v22 = vmax.f32 %v1666_v41, %v1667_v3  ;;  %v1662_v12 = vrot.slane %v1661_v31, 1  ;;  %v1675_v9 = vmax.f32 %v1673_v61, %v1674_v6  ;;  %vm879_vm2 = vcmp.gt.f32.partialorder %v15552_v36, 0.0 }
 0x171   : > { %v1682_v10 = vmax.f32 %v1680_v1, %v1681_v8  ;;  %v910_v44 = vsel %vm878_vm6, %v15514_v51, %v846_v21  ;;  %14904 = vpow2.f32 %v774_v45  ;;  %v722_v16 = vmin.f32 %v15575_v17, 0.0 }
 0x172   : > { %v14901_v0 = vpop.eup %14900  ;;  %v1669_v19 = vrot.slane %v1668_v22, 1  ;;  %v942_v49 = vmul.f32 1.050701, %v910_v44  ;;  %v1676_v13 = vrot.slane %v1675_v9, 1  ;;  %v15584_v33 = vmax.f32 %v1661_v31, %v1662_v12 }
 0x173   : > { %v10268_v15 = vadd.f32 -1.0, %v14901_v0  ;;  %v1683_v27 = vrot.slane %v1682_v10, 1  ;;  %v14903_v34 = vpop.eup %14902  ;;  %vm880_vm8 = vcmp.gt.f32.partialorder %v15555_v11, 0.0  ;;  %vm881_vm15 = vcmp.gt.f32.partialorder %v15571_v60, 0.0 }
 0x174   : > { %v1042_v20 = vrot.slane %v942_v49, 2  ;;  %v1043_v53 = vrot.slane %v942_v49, 4  ;;  %v1044_v50 = vrot.slane %v942_v49, 6  ;;  %v15586_v26 = vmax.f32 %v1668_v22, %v1669_v19 }
 0x175   : > { %v1685_v51 = vsel %vm1180_vm4, %v942_v49, -inf  ;;  %v847_v28 = vmul.f32 1.6732632, %v10268_v15  ;;  %v15595_v47 = vmax.f32 %v1675_v9, %v1676_v13  ;;  %v15597_v7 = vmax.f32 %v1682_v10, %v1683_v27 }
 0x176   : > { %v1686_v18 = vrot.slane %v1685_v51, 4  ;;  %v1692_v35 = vsel %vm1180_vm4, %v1042_v20, -inf  ;;  %v1699_v29 = vsel %vm1180_vm4, %v1043_v53, -inf  ;;  %v1706_v32 = vsel %vm1180_vm4, %v1044_v50, -inf }
 0x177   : > { %v1693_v59 = vrot.slane %v1692_v35, 4  ;;  %v1700_v5 = vrot.slane %v1699_v29, 4  ;;  %v1707_v46 = vrot.slane %v1706_v32, 4  ;;  %v911_v54 = vsel %vm879_vm2, %v15552_v36, %v847_v28  ;;  %v14905_v30 = vpop.eup %14904 }
 0x178   : > { %v1687_v37 = vmax.f32 %v1685_v51, %v1686_v18  ;;  %v943_v63 = vmul.f32 1.050701, %v911_v54  ;;  %v10269_v43 = vadd.f32 -1.0, %v14903_v34  ;;  %v10270_v53 = vadd.f32 -1.0, %v14905_v30  ;;  %v15605_v18 = vpop.f32.mrf.mxu0 }
 0x179   : > { %v1694_v42 = vmax.f32 %v1692_v35, %v1693_v59  ;;  %v1701_v38 = vmax.f32 %v1699_v29, %v1700_v5  ;;  %v1708_v48 = vmax.f32 %v1706_v32, %v1707_v46  ;;  %vm882_vm3 = vcmp.gt.f32.partialorder %v15575_v17, 0.0 }
 0x17a   : > { %v1688_v62 = vrot.slane %v1687_v37, 2  ;;  %v1045_v55 = vrot.slane %v943_v63, 2  ;;  %v1046_v56 = vrot.slane %v943_v63, 4  ;;  %v1047_v41 = vrot.slane %v943_v63, 6 }
 0x17b   : > { %v1695_v24 = vrot.slane %v1694_v42, 2  ;;  %v1702_v61 = vrot.slane %v1701_v38, 2  ;;  %v1709_v1 = vrot.slane %v1708_v48, 2  ;;  %v1713_v36 = vsel %vm1180_vm4, %v943_v63, -inf }
 0x17c   : > { %v1689_v39 = vmax.f32 %v1687_v37, %v1688_v62  ;;  %v1714_v40 = vrot.slane %v1713_v36, 4  ;;  %v1720_v2 = vsel %vm1180_vm4, %v1045_v55, -inf  ;;  %v1727_v3 = vsel %vm1180_vm4, %v1046_v56, -inf }
 0x17d   : > { %v1696_v25 = vmax.f32 %v1694_v42, %v1695_v24  ;;  %v1703_v4 = vmax.f32 %v1701_v38, %v1702_v61  ;;  %v1710_v31 = vmax.f32 %v1708_v48, %v1709_v1  ;;  %v1721_v6 = vrot.slane %v1720_v2, 4 }
 0x17e   : > { %v1690_v8 = vrot.slane %v1689_v39, 1  ;;  %v1715_v21 = vmax.f32 %v1713_v36, %v1714_v40  ;;  %v1728_v22 = vrot.slane %v1727_v3, 4  ;;  %v1734_v45 = vsel %vm1180_vm4, %v1047_v41, -inf }
 0x17f   : > { %v1697_v12 = vrot.slane %v1696_v25, 1  ;;  %v1704_v9 = vrot.slane %v1703_v4, 1  ;;  %v1711_v10 = vrot.slane %v1710_v31, 1  ;;  %v1722_v44 = vmax.f32 %v1720_v2, %v1721_v6 }
 0x180   : > { %v1691_v0 = vmax.f32 %v1689_v39, %v1690_v8  ;;  %v1716_v19 = vrot.slane %v1715_v21, 2  ;;  %v1729_v49 = vmax.f32 %v1727_v3, %v1728_v22  ;;  %v1735_v13 = vrot.slane %v1734_v45, 4  ;;  %v680_v8 = vpop.f32.mrf.mxu0 }
 0x181   : > { %v1698_v15 = vmax.f32 %v1696_v25, %v1697_v12  ;;  %v1705_v27 = vmax.f32 %v1703_v4, %v1704_v9  ;;  %v1723_v20 = vrot.slane %v1722_v44, 2  ;;  %v1712_v50 = vmax.f32 %v1710_v31, %v1711_v10 }
 0x182   : > { %v1717_v51 = vmax.f32 %v1715_v21, %v1716_v19  ;;  %v1730_v28 = vrot.slane %v1729_v49, 2  ;;  %v1736_v34 = vmax.f32 %v1734_v45, %v1735_v13  ;;  %v2109_v35 = vmax.f32 %v15560_v23, %v1691_v0 }
 0x183   : > { %v2110_v29 = vmax.f32 %v15562_v58, %v1698_v15  ;;  %v2111_v32 = vmax.f32 %v15568_v57, %v1705_v27  ;;  %v1724_v59 = vmax.f32 %v1722_v44, %v1723_v20  ;;  %v848_v37 = vmul.f32 1.6732632, %v10269_v43 }
 0x184   : > { %v1718_v5 = vrot.slane %v1717_v51, 1  ;;  %v1731_v46 = vmax.f32 %v1729_v49, %v1730_v28  ;;  %v1737_v54 = vrot.slane %v1736_v34, 2  ;;  %v849_v42 = vmul.f32 1.6732632, %v10270_v53 }
 0x185   : > { %v2261_v63 = vsel %vm2226_vm9, %v2110_v29, %v2109_v35  ;;  %v1725_v30 = vrot.slane %v1724_v59, 1  ;;  %v776_v38 = vmul.f32 1.442695, %v722_v16  ;;  %v2112_v58 = vmax.f32 %v15580_v14, %v1712_v50 }
 0x186   : > { %v2262_v48 = vsel %vm2228_vm10, %v2111_v32, %v2261_v63  ;;  %v1719_v62 = vmax.f32 %v1717_v51, %v1718_v5  ;;  %v1732_v23 = vrot.slane %v1731_v46, 1  ;;  %v1738_v55 = vmax.f32 %v1736_v34, %v1737_v54 }
 0x187   : > { %v1726_v57 = vmax.f32 %v1724_v59, %v1725_v30  ;;  %v912_v56 = vsel %vm880_vm8, %v15555_v11, %v848_v37  ;;  %v913_v43 = vsel %vm881_vm15, %v15571_v60, %v849_v42  ;;  %v2263_v1 = vsel %vm2230_vm11, %v2112_v58, %v2262_v48 }
 0x188   : > { %v1733_v41 = vmax.f32 %v1731_v46, %v1732_v23  ;;  %v1739_v24 = vrot.slane %v1738_v55, 1  ;;  %v2113_v16 = vmax.f32 %v15584_v33, %v1719_v62  ;;  %v944_v61 = vmul.f32 1.050701, %v912_v56  ;;  %v682_v56 = vpop.f32.mrf.mxu0 }
 0x189   : > { %v2114_v36 = vmax.f32 %v15586_v26, %v1726_v57  ;;  %v945_v39 = vmul.f32 1.050701, %v913_v43  ;;  %14906 = vpow2.f32 %v776_v38  ;;  %v15641_v23 = vadd.f32 %v15427_v52, %v15605_v18  ;;  %v15654_v18 = vld [vmem:[%s21228_s2] ss:$0 sm:$0xff] }
 0x18a   : > { %v1740_v14 = vmax.f32 %v1738_v55, %v1739_v24  ;;  %v2115_v40 = vmax.f32 %v15595_v47, %v1733_v41  ;;  %v2264_v11 = vsel %vm2232_vm12, %v2113_v16, %v2263_v1  ;;  %v1048_v2 = vrot.slane %v944_v61, 2 }
 0x18b   : > { %v2265_v3 = vsel %vm2234_vm13, %v2114_v36, %v2264_v11  ;;  %v1049_v60 = vrot.slane %v944_v61, 4  ;;  %v1050_v25 = vrot.slane %v944_v61, 6  ;;  %v1741_v4 = vsel %vm1180_vm4, %v944_v61, -inf }
 0x18c   : > { %v2116_v33 = vmax.f32 %v15597_v7, %v1740_v14  ;;  %v2266_v31 = vsel %vm2236_vm14, %v2115_v40, %v2265_v3  ;;  %v1742_v6 = vrot.slane %v1741_v4, 4  ;;  %v1748_v26 = vsel %vm1180_vm4, %v1048_v2, -inf }
 0x18d   : > { %v1749_v21 = vrot.slane %v1748_v26, 4  ;;  %v1755_v47 = vsel %vm1180_vm4, %v1049_v60, -inf  ;;  %v1762_v22 = vsel %vm1180_vm4, %v1050_v25, -inf  ;;  %v1051_v45 = vrot.slane %v945_v39, 2 }
 0x18e   : > { %v2267_v12 = vsel %vm2238_vm0, %v2116_v33, %v2266_v31  ;;  %v1743_v9 = vmax.f32 %v1741_v4, %v1742_v6  ;;  %v1756_v10 = vrot.slane %v1755_v47, 4  ;;  %v1763_v44 = vrot.slane %v1762_v22, 4 }
 0x18f   : > { %v14907_v0 = vpop.eup %14906  ;;  %2302 = vst.msk [vmem:[#allocation2 + $0x51] sm:$0xff] %vm2141_vm7, %v2267_v12  ;;  %v1750_v7 = vmax.f32 %v1748_v26, %v1749_v21  ;;  %v1052_v19 = vrot.slane %v945_v39, 4  ;;  %v1053_v49 = vrot.slane %v945_v39, 6  ;;  %v1769_v13 = vsel %vm1180_vm4, %v945_v39, -inf }
 0x190   : > { %v1744_v15 = vrot.slane %v1743_v9, 2  ;;  %v1757_v27 = vmax.f32 %v1755_v47, %v1756_v10  ;;  %v1764_v20 = vmax.f32 %v1762_v22, %v1763_v44  ;;  %v1770_v53 = vrot.slane %v1769_v13, 4 }
 0x191   : > { %v1751_v50 = vrot.slane %v1750_v7, 2  ;;  %v1776_v51 = vsel %vm1180_vm4, %v1051_v45, -inf  ;;  %v1783_v28 = vsel %vm1180_vm4, %v1052_v19, -inf  ;;  %v1790_v34 = vsel %vm1180_vm4, %v1053_v49, -inf  ;;  %v2330_v49 = vld [vmem:[#allocation2 + $0x41] sm:$0xff] }
 0x192   : > { %v1745_v35 = vmax.f32 %v1743_v9, %v1744_v15  ;;  %v1758_v29 = vrot.slane %v1757_v27, 2  ;;  %v1765_v32 = vrot.slane %v1764_v20, 2  ;;  %v1771_v59 = vmax.f32 %v1769_v13, %v1770_v53 }
 0x193   : > { %v1752_v5 = vmax.f32 %v1750_v7, %v1751_v50  ;;  %v1777_v46 = vrot.slane %v1776_v51, 4  ;;  %v1784_v54 = vrot.slane %v1783_v28, 4  ;;  %v1791_v37 = vrot.slane %v1790_v34, 4  ;;  %v2457_v50 = vpop.f32.mrf.mxu2 }
 0x194   : > { %v1759_v63 = vmax.f32 %v1757_v27, %v1758_v29  ;;  %v1766_v30 = vmax.f32 %v1764_v20, %v1765_v32  ;;  %v1772_v42 = vrot.slane %v1771_v59, 2  ;;  %v1746_v55 = vrot.slane %v1745_v35, 1  ;;  %v15682_v20 = vld [vmem:[#allocation2 + $0x40] sm:$0xff] }
 0x195   : > { %v1778_v38 = vmax.f32 %v1776_v51, %v1777_v46  ;;  %v1785_v48 = vmax.f32 %v1783_v28, %v1784_v54  ;;  %v1792_v62 = vmax.f32 %v1790_v34, %v1791_v37  ;;  %v1753_v58 = vrot.slane %v1752_v5, 1  ;;  %v685_v51 = vpop.f32.mrf.mxu0  ;;  %v2392_v54 = vpop.f32.mrf.mxu1  ;;  %v15692_v37 = vld [vmem:[#allocation2 + $0x42] sm:$0xff] }
 0x196   : > { %v1773_v57 = vmax.f32 %v1771_v59, %v1772_v42  ;;  %v1760_v43 = vrot.slane %v1759_v63, 1  ;;  %v1767_v61 = vrot.slane %v1766_v30, 1  ;;  %v10271_v1 = vadd.f32 -1.0, %v14907_v0  ;;  %v2331_v45 = vld [vmem:[#allocation2 + $0x51] sm:$0xff] }
 0x197   : > { %v1779_v41 = vrot.slane %v1778_v38, 2  ;;  %v1786_v24 = vrot.slane %v1785_v48, 2  ;;  %v1793_v16 = vrot.slane %v1792_v62, 2  ;;  %v723_v40 = vmin.f32 %v15641_v23, 0.0  ;;  %v2482_v53 = vld [vmem:[#allocation2 + $0x52] sm:$0xff] }
 0x198   : > { %v1774_v36 = vrot.slane %v1773_v57, 1  ;;  %v850_v52 = vmul.f32 1.6732632, %v10271_v1  ;;  %v15657_v2 = vadd.f32 %v15654_v18, %v680_v8  ;;  %v15659_v3 = vmax.f32 %v1745_v35, %v1746_v55 }
 0x199   : > { %v15643_v39 = vmax.f32 %v1778_v38, %v1779_v41  ;;  %v15645_v14 = vmax.f32 %v1785_v48, %v1786_v24  ;;  %v15648_v11 = vmax.f32 %v1792_v62, %v1793_v16  ;;  %v15661_v60 = vmax.f32 %v1752_v5, %v1753_v58 }
 0x19a   : > { %v15663_v25 = vmax.f32 %v1759_v63, %v1760_v43  ;;  %v778_v4 = vmul.f32 1.442695, %v723_v40  ;;  %v15665_v33 = vmax.f32 %v1766_v30, %v1767_v61  ;;  %v914_v31 = vsel %vm882_vm3, %v15575_v17, %v850_v52  ;;  %v2311_v17 = vld [vmem:[#allocation2 + $0x50] sm:$0xff] }
 0x19b   : > { %v724_v6 = vmin.f32 %v15657_v2, 0.0  ;;  %v15670_v26 = vadd.f32 %v15654_v18, %v682_v56  ;;  %v15672_v21 = vmax.f32 %v1773_v57, %v1774_v36  ;;  %v1781_v8 = vrot.slane %v15643_v39, 1  ;;  %v2543_v57 = vpop.f32.mrf.mxu3 }
 0x19c   : > { %v1788_v47 = vrot.slane %v15645_v14, 1  ;;  %v946_v22 = vmul.f32 1.050701, %v914_v31  ;;  %v1795_v12 = vrot.slane %v15648_v11, 1  ;;  %14908 = vpow2.f32 %v778_v4 }
 0x19d   : > { %v780_v9 = vmul.f32 1.442695, %v724_v6  ;;  %v725_v10 = vmin.f32 %v15670_v26, 0.0  ;;  %vm883_vm5 = vcmp.gt.f32.partialorder %v15641_v23, 0.0  ;;  %v15680_v27 = vpack.c.bf16 %v2331_v45, %v2330_v49 }
 0x19e   : > { %v1054_v44 = vrot.slane %v946_v22, 2  ;;  %v1055_v0 = vrot.slane %v946_v22, 4  ;;  %v1056_v7 = vrot.slane %v946_v22, 6  ;;  %v1797_v19 = vsel %vm1180_vm4, %v946_v22, -inf }
 0x19f   : > { %v1798_v13 = vrot.slane %v1797_v19, 4  ;;  %14910 = vpow2.f32 %v780_v9  ;;  %v782_v15 = vmul.f32 1.442695, %v725_v10  ;;  %v15688_v29 = vpack.c.bf16 %v2311_v17, %v15682_v20  ;;  %10307 = vmatmul.msk.bf16.gmra.mxu1 %vm2141_vm7, %v15680_v27 }
 0x1a0   : > { %v1804_v28 = vsel %vm1180_vm4, %v1054_v44, -inf  ;;  %v1811_v34 = vsel %vm1180_vm4, %v1055_v0, -inf  ;;  %v1818_v35 = vsel %vm1180_vm4, %v1056_v7, -inf  ;;  %v15697_v63 = vpack.c.bf16 %v2482_v53, %v15692_v37 }
 0x1a1   : > { %v1799_v32 = vmax.f32 %v1797_v19, %v1798_v13  ;;  %v1805_v59 = vrot.slane %v1804_v28, 4  ;;  %v1812_v5 = vrot.slane %v1811_v34, 4  ;;  %v1819_v46 = vrot.slane %v1818_v35, 4  ;;  %10327 = vmatmul.msk.bf16.gmra.mxu2 %vm2141_vm7, %v15688_v29 }
 0x1a2   : > { %14912 = vpow2.f32 %v782_v15  ;;  %v2458_v30 = vadd.f32 %v2457_v50, %v2392_v54  ;;  %v15700_v42 = vadd.f32 %v15654_v18, %v685_v51  ;;  %v14909_v38 = vpop.eup %14908  ;;  %vm884_vm6 = vcmp.gt.f32.partialorder %v15657_v2, 0.0  ;;  %10355 = vmatmul.msk.bf16.gmra.mxu3 %vm2141_vm7, %v15697_v63 }
 0x1a3   : > { %v1800_v48 = vrot.slane %v1799_v32, 2  ;;  %v1806_v62 = vmax.f32 %v1804_v28, %v1805_v59  ;;  %v1813_v55 = vmax.f32 %v1811_v34, %v1812_v5  ;;  %v1820_v58 = vmax.f32 %v1818_v35, %v1819_v46 }
 0x1a4   : > { %v10272_v56 = vadd.f32 -1.0, %v14909_v38  ;;  %v15705_v43 = vadd.f32 %v2543_v57, %v2458_v30  ;;  %v726_v41 = vmin.f32 %v15700_v42, 0.0  ;;  %v15709_v40 = vmax.f32 %v15643_v39, %v1781_v8 }
 0x1a5   : > { %v14911_v24 = vpop.eup %14910  ;;  %v1801_v16 = vmax.f32 %v1799_v32, %v1800_v48  ;;  %v1807_v61 = vrot.slane %v1806_v62, 2  ;;  %v1814_v1 = vrot.slane %v1813_v55, 2  ;;  %v1821_v36 = vrot.slane %v1820_v58, 2 }
 0x1a6   : > { %v851_v52 = vmul.f32 1.6732632, %v10272_v56  ;;  %v10273_v4 = vadd.f32 -1.0, %v14911_v24  ;;  %v784_v31 = vmul.f32 1.442695, %v726_v41  ;;  %v15714_v17 = vmax.f32 %v15645_v14, %v1788_v47 }
 0x1a7   : > { %v1802_v6 = vrot.slane %v1801_v16, 1  ;;  %v1808_v22 = vmax.f32 %v1806_v62, %v1807_v61  ;;  %v1815_v45 = vmax.f32 %v1813_v55, %v1814_v1  ;;  %v1822_v9 = vmax.f32 %v1820_v58, %v1821_v36 }
 0x1a8   : > { %v14913_v10 = vpop.eup %14912  ;;  %v15717_v44 = vmax.f32 %v15648_v11, %v1795_v12  ;;  %v915_v39 = vsel %vm883_vm5, %v15641_v23, %v851_v52  ;;  %v852_v8 = vmul.f32 1.6732632, %v10273_v4  ;;  %14914 = vpow2.f32 %v784_v31 }
 0x1a9   : > { %v1803_v0 = vmax.f32 %v1801_v16, %v1802_v6  ;;  %v1809_v7 = vrot.slane %v1808_v22, 1  ;;  %v1816_v19 = vrot.slane %v1815_v45, 1  ;;  %v1823_v49 = vrot.slane %v1822_v9, 1 }
 0x1aa   : > { %v947_v13 = vmul.f32 1.050701, %v915_v39  ;;  %v916_v15 = vsel %vm884_vm6, %v15657_v2, %v852_v8  ;;  %v15725_v53 = vadd.f32 -1.0, %v14913_v10  ;;  %vm885_vm2 = vcmp.gt.f32.partialorder %v15670_v26, 0.0 }
 0x1ab   : > { %v1810_v14 = vmax.f32 %v1808_v22, %v1809_v7  ;;  %v1817_v11 = vmax.f32 %v1815_v45, %v1816_v19  ;;  %v1824_v47 = vmax.f32 %v1822_v9, %v1823_v49  ;;  %v2117_v12 = vmax.f32 %v15659_v3, %v1803_v0  ;;  %v687_v3 = vpop.f32.mrf.mxu0 }
 0x1ac   : > { %v1057_v50 = vrot.slane %v947_v13, 2  ;;  %v1058_v23 = vrot.slane %v947_v13, 4  ;;  %v1059_v51 = vrot.slane %v947_v13, 6  ;;  %v1825_v28 = vsel %vm1180_vm4, %v947_v13, -inf }
 0x1ad   : > { %v2118_v34 = vmax.f32 %v15661_v60, %v1810_v14  ;;  %v2119_v35 = vmax.f32 %v15663_v25, %v1817_v11  ;;  %v2120_v32 = vmax.f32 %v15665_v33, %v1824_v47  ;;  %v1826_v2 = vrot.slane %v1825_v28, 4 }
 0x1ae   : > { %v1832_v59 = vsel %vm1180_vm4, %v1057_v50, -inf  ;;  %v1839_v5 = vsel %vm1180_vm4, %v1058_v23, -inf  ;;  %v1846_v46 = vsel %vm1180_vm4, %v1059_v51, -inf  ;;  %v948_v54 = vmul.f32 1.050701, %v916_v15  ;;  %v14915_v55 = vpop.eup %14914 }
 0x1af   : > { %v2268_v30 = vsel %vm2226_vm9, %v2118_v34, %v2117_v12  ;;  %v1827_v38 = vmax.f32 %v1825_v28, %v1826_v2  ;;  %v1833_v48 = vrot.slane %v1832_v59, 4  ;;  %v1840_v62 = vrot.slane %v1839_v5, 4 }
 0x1b0   : > { %v2269_v60 = vsel %vm2228_vm10, %v2119_v35, %v2268_v30  ;;  %v1847_v25 = vrot.slane %v1846_v46, 4  ;;  %v1060_v58 = vrot.slane %v948_v54, 2  ;;  %v1061_v33 = vrot.slane %v948_v54, 4 }
 0x1b1   : > { %v2270_v57 = vsel %vm2230_vm11, %v2120_v32, %v2269_v60  ;;  %v1828_v56 = vrot.slane %v1827_v38, 2  ;;  %v1834_v41 = vmax.f32 %v1832_v59, %v1833_v48  ;;  %v1841_v24 = vmax.f32 %v1839_v5, %v1840_v62 }
 0x1b2   : > { %v1848_v16 = vmax.f32 %v1846_v46, %v1847_v25  ;;  %v1062_v61 = vrot.slane %v948_v54, 6  ;;  %v1853_v1 = vsel %vm1180_vm4, %v948_v54, -inf  ;;  %v1860_v36 = vsel %vm1180_vm4, %v1060_v58, -inf }
 0x1b3   : > { %v1829_v52 = vmax.f32 %v1827_v38, %v1828_v56  ;;  %v1835_v4 = vrot.slane %v1834_v41, 2  ;;  %v1842_v31 = vrot.slane %v1841_v24, 2  ;;  %v1854_v6 = vrot.slane %v1853_v1, 4  ;;  %v15742_v34 = vpop.f32.mrf.mxu0 }
 0x1b4   : > { %v1849_v22 = vrot.slane %v1848_v16, 2  ;;  %v1861_v45 = vrot.slane %v1860_v36, 4  ;;  %v1867_v9 = vsel %vm1180_vm4, %v1061_v33, -inf  ;;  %v1874_v10 = vsel %vm1180_vm4, %v1062_v61, -inf }
 0x1b5   : > { %v1830_v39 = vrot.slane %v1829_v52, 1  ;;  %v1836_v8 = vmax.f32 %v1834_v41, %v1835_v4  ;;  %v1843_v0 = vmax.f32 %v1841_v24, %v1842_v31  ;;  %v1855_v7 = vmax.f32 %v1853_v1, %v1854_v6 }
 0x1b6   : > { %v1850_v19 = vmax.f32 %v1848_v16, %v1849_v22  ;;  %v1862_v49 = vmax.f32 %v1860_v36, %v1861_v45  ;;  %v1868_v13 = vrot.slane %v1867_v9, 4  ;;  %v1875_v15 = vrot.slane %v1874_v10, 4 }
 0x1b7   : > { %v1831_v14 = vmax.f32 %v1829_v52, %v1830_v39  ;;  %v1837_v11 = vrot.slane %v1836_v8, 1  ;;  %v1844_v47 = vrot.slane %v1843_v0, 1  ;;  %v1856_v12 = vrot.slane %v1855_v7, 2 }
 0x1b8   : > { %v1851_v50 = vrot.slane %v1850_v19, 1  ;;  %v1863_v23 = vrot.slane %v1862_v49, 2  ;;  %v1869_v51 = vmax.f32 %v1867_v9, %v1868_v13  ;;  %v1876_v28 = vmax.f32 %v1874_v10, %v1875_v15 }
 0x1b9   : > { %v1838_v35 = vmax.f32 %v1836_v8, %v1837_v11  ;;  %v1845_v32 = vmax.f32 %v1843_v0, %v1844_v47  ;;  %v2121_v2 = vmax.f32 %v15672_v21, %v1831_v14  ;;  %v1857_v59 = vmax.f32 %v1855_v7, %v1856_v12 }
 0x1ba   : > { %v1852_v5 = vmax.f32 %v1850_v19, %v1851_v50  ;;  %v1864_v46 = vmax.f32 %v1862_v49, %v1863_v23  ;;  %v1870_v54 = vrot.slane %v1869_v51, 2  ;;  %v1877_v30 = vrot.slane %v1876_v28, 2 }
 0x1bb   : > { %v2122_v38 = vmax.f32 %v15709_v40, %v1838_v35  ;;  %v2123_v48 = vmax.f32 %v15714_v17, %v1845_v32  ;;  %v2271_v62 = vsel %vm2232_vm12, %v2121_v2, %v2270_v57  ;;  %v15749_v60 = vadd.f32 %v15654_v18, %v687_v3  ;;  %v692_v6 = vpop.f32.mrf.mxu0 }
 0x1bc   : > { %v2124_v25 = vmax.f32 %v15717_v44, %v1852_v5  ;;  %v1858_v58 = vrot.slane %v1857_v59, 1  ;;  %v1865_v21 = vrot.slane %v1864_v46, 1  ;;  %v853_v56 = vmul.f32 1.6732632, %v15725_v53 }
 0x1bd   : > { %v2272_v33 = vsel %vm2234_vm13, %v2122_v38, %v2271_v62  ;;  %v10275_v41 = vadd.f32 -1.0, %v14915_v55  ;;  %v1871_v16 = vmax.f32 %v1869_v51, %v1870_v54  ;;  %v1878_v40 = vmax.f32 %v1876_v28, %v1877_v30 }
 0x1be   : > { %v2273_v24 = vsel %vm2236_vm14, %v2123_v48, %v2272_v33  ;;  %v917_v3 = vsel %vm885_vm2, %v15670_v26, %v853_v56  ;;  %v727_v44 = vmin.f32 %v15749_v60, 0.0  ;;  %vm886_vm8 = vcmp.gt.f32.partialorder %v15700_v42, 0.0 }
 0x1bf   : > { %v2274_v17 = vsel %vm2238_vm0, %v2124_v25, %v2273_v24  ;;  %v854_v57 = vmul.f32 1.6732632, %v10275_v41  ;;  %v949_v61 = vmul.f32 1.050701, %v917_v3  ;;  %v15761_v53 = vmax.f32 %v1857_v59, %v1858_v58 }
 0x1c0   : > { %2303 = vst.msk [vmem:[#allocation2 + $0x61] sm:$0xff] %vm2141_vm7, %v2274_v17  ;;  %v15763_v55 = vmax.f32 %v1864_v46, %v1865_v21  ;;  %v786_v36 = vmul.f32 1.442695, %v727_v44  ;;  %v1872_v22 = vrot.slane %v1871_v16, 1  ;;  %v1879_v45 = vrot.slane %v1878_v40, 1 }
 0x1c1   : > { %v918_v1 = vsel %vm886_vm8, %v15700_v42, %v854_v57  ;;  %v1063_v52 = vrot.slane %v949_v61, 2  ;;  %v1064_v4 = vrot.slane %v949_v61, 4  ;;  %v1065_v31 = vrot.slane %v949_v61, 6 }
 0x1c2   : > { %v1881_v26 = vsel %vm1180_vm4, %v949_v61, -inf  ;;  %v950_v10 = vmul.f32 1.050701, %v918_v1  ;;  %14916 = vpow2.f32 %v786_v36  ;;  %v15774_v2 = vmax.f32 %v1871_v16, %v1872_v22 }
 0x1c3   : > { %v1882_v9 = vrot.slane %v1881_v26, 4  ;;  %v1888_v39 = vsel %vm1180_vm4, %v1063_v52, -inf  ;;  %v1895_v8 = vsel %vm1180_vm4, %v1064_v4, -inf  ;;  %v1902_v0 = vsel %vm1180_vm4, %v1065_v31, -inf  ;;  %v695_v17 = vpop.f32.mrf.mxu0 }
 0x1c4   : > { %v1889_v42 = vrot.slane %v1888_v39, 4  ;;  %v1896_v19 = vrot.slane %v1895_v8, 4  ;;  %v1903_v49 = vrot.slane %v1902_v0, 4  ;;  %v1066_v13 = vrot.slane %v950_v10, 2 }
 0x1c5   : > { %v1883_v7 = vmax.f32 %v1881_v26, %v1882_v9  ;;  %v1067_v15 = vrot.slane %v950_v10, 4  ;;  %v1068_v14 = vrot.slane %v950_v10, 6  ;;  %v1909_v11 = vsel %vm1180_vm4, %v950_v10, -inf }
 0x1c6   : > { %v1890_v12 = vmax.f32 %v1888_v39, %v1889_v42  ;;  %v1897_v50 = vmax.f32 %v1895_v8, %v1896_v19  ;;  %v1904_v23 = vmax.f32 %v1902_v0, %v1903_v49  ;;  %v1910_v51 = vrot.slane %v1909_v11, 4 }
 0x1c7   : > { %v1884_v47 = vrot.slane %v1883_v7, 2  ;;  %v1916_v28 = vsel %vm1180_vm4, %v1066_v13, -inf  ;;  %v1923_v35 = vsel %vm1180_vm4, %v1067_v15, -inf  ;;  %v1930_v32 = vsel %vm1180_vm4, %v1068_v14, -inf }
 0x1c8   : > { %v1891_v59 = vrot.slane %v1890_v12, 2  ;;  %v1898_v5 = vrot.slane %v1897_v50, 2  ;;  %v15778_v46 = vadd.f32 %v15654_v18, %v15742_v34  ;;  %v14917_v54 = vpop.eup %14916  ;;  %v1911_v30 = vmax.f32 %v1909_v11, %v1910_v51 }
 0x1c9   : > { %v1917_v38 = vrot.slane %v1916_v28, 4  ;;  %v1924_v48 = vrot.slane %v1923_v35, 4  ;;  %v1931_v62 = vrot.slane %v1930_v32, 4  ;;  %v15780_v25 = vmax.f32 %v1878_v40, %v1879_v45 }
 0x1ca   : > { %v1885_v58 = vmax.f32 %v1883_v7, %v1884_v47  ;;  %v1905_v33 = vrot.slane %v1904_v23, 2  ;;  %v15783_v21 = vadd.f32 %v15654_v18, %v692_v6  ;;  %v1912_v56 = vrot.slane %v1911_v30, 2 }
 0x1cb   : > { %v1918_v41 = vmax.f32 %v1916_v28, %v1917_v38  ;;  %v1925_v24 = vmax.f32 %v1923_v35, %v1924_v48  ;;  %v1932_v16 = vmax.f32 %v1930_v32, %v1931_v62  ;;  %v1892_v3 = vmax.f32 %v1890_v12, %v1891_v59  ;;  %v697_v59 = vpop.f32.mrf.mxu0 }
 0x1cc   : > { %v1899_v34 = vmax.f32 %v1897_v50, %v1898_v5  ;;  %vm887_vm15 = vcmp.gt.f32.partialorder %v15749_v60, 0.0  ;;  %v728_v57 = vmin.f32 %v15778_v46, 0.0  ;;  %v1913_v44 = vmax.f32 %v1911_v30, %v1912_v56 }
 0x1cd   : > { %v1919_v61 = vrot.slane %v1918_v41, 2  ;;  %v1926_v40 = vrot.slane %v1925_v24, 2  ;;  %v1933_v1 = vrot.slane %v1932_v16, 2  ;;  %v1886_v36 = vrot.slane %v1885_v58, 1 }
 0x1ce   : > { %v15787_v52 = vmax.f32 %v1904_v23, %v1905_v33  ;;  %v10276_v4 = vadd.f32 -1.0, %v14917_v54  ;;  %v729_v31 = vmin.f32 %v15783_v21, 0.0  ;;  %v1914_v26 = vrot.slane %v1913_v44, 1 }
 0x1cf   : > { %v1920_v6 = vmax.f32 %v1918_v41, %v1919_v61  ;;  %v1927_v22 = vmax.f32 %v1925_v24, %v1926_v40  ;;  %v1934_v45 = vmax.f32 %v1932_v16, %v1933_v1  ;;  %v1893_v9 = vrot.slane %v1892_v3, 1 }
 0x1d0   : > { %v1900_v10 = vrot.slane %v1899_v34, 1  ;;  %v855_v39 = vmul.f32 1.6732632, %v10276_v4  ;;  %v788_v8 = vmul.f32 1.442695, %v728_v57  ;;  %v1915_v0 = vmax.f32 %v1913_v44, %v1914_v26 }
 0x1d1   : > { %v1921_v7 = vrot.slane %v1920_v6, 1  ;;  %v1928_v42 = vrot.slane %v1927_v22, 1  ;;  %v1935_v19 = vrot.slane %v1934_v45, 1  ;;  %v15790_v49 = vmax.f32 %v1885_v58, %v1886_v36 }
 0x1d2   : > { %v919_v13 = vsel %vm887_vm15, %v15749_v60, %v855_v39  ;;  %14918 = vpow2.f32 %v788_v8  ;;  %v790_v15 = vmul.f32 1.442695, %v729_v31  ;;  %v1907_v14 = vrot.slane %v15787_v52, 1 }
 0x1d3   : > { %v1922_v11 = vmax.f32 %v1920_v6, %v1921_v7  ;;  %v1929_v47 = vmax.f32 %v1927_v22, %v1928_v42  ;;  %v15797_v12 = vadd.f32 %v15654_v18, %v695_v17  ;;  %v15799_v50 = vmax.f32 %v1892_v3, %v1893_v9  ;;  %v14113_v7 = vld [vmem:[%s21229_s3 + $0x98] sm:$0xff] }
 0x1d4   : > { %v15801_v23 = vmax.f32 %v1899_v34, %v1900_v10  ;;  %v951_v51 = vmul.f32 1.050701, %v919_v13  ;;  %14920 = vpow2.f32 %v790_v15  ;;  %v1936_v28 = vmax.f32 %v1934_v45, %v1935_v19  ;;  %v14117_v42 = vld [vmem:[%s21229_s3 + $0xb8] sm:$0xff]  ;;  %2726 = vmatpush.bf16.msrb.mxu2 %v14113_v7  ;;  %v14110_v7 = vld [vmem:[%s21229_s3 + $0x80] sm:$0xff] }
 0x1d5   : > { %v2125_v35 = vmax.f32 %v15761_v53, %v1915_v0  ;;  %v2126_v60 = vmax.f32 %v15763_v55, %v1922_v11  ;;  %v2127_v32 = vmax.f32 %v15774_v2, %v1929_v47  ;;  %vm888_vm3 = vcmp.gt.f32.partialorder %v15778_v46, 0.0  ;;  %v14109_v0 = vld [vmem:[%s21229_s3 + $0x78] sm:$0xff]  ;;  %2820 = vmatpush.bf16.msrb.mxu3 %v14117_v42  ;;  %v14114_v42 = vld [vmem:[%s21229_s3 + $0xa0] sm:$0xff] }
 0x1d6   : > { %v1069_v5 = vrot.slane %v951_v51, 2  ;;  %v1070_v54 = vrot.slane %v951_v51, 4  ;;  %v1071_v30 = vrot.slane %v951_v51, 6  ;;  %v1937_v38 = vsel %vm1180_vm4, %v951_v51, -inf  ;;  %2632 = vmatpush.bf16.msrb.mxu1 %v14109_v0 }
 0x1d7   : > { %v2275_v48 = vsel %vm2226_vm9, %v2126_v60, %v2125_v35  ;;  %v1938_v62 = vrot.slane %v1937_v38, 4  ;;  %v730_v58 = vmin.f32 %v15797_v12, 0.0  ;;  %v15814_v56 = vadd.f32 %v15654_v18, %v697_v59 }
 0x1d8   : > { %v14919_v33 = vpop.eup %14918  ;;  %v1944_v53 = vsel %vm1180_vm4, %v1069_v5, -inf  ;;  %v1951_v55 = vsel %vm1180_vm4, %v1070_v54, -inf  ;;  %v1958_v2 = vsel %vm1180_vm4, %v1071_v30, -inf  ;;  %vm889_vm5 = vcmp.gt.f32.partialorder %v15783_v21, 0.0  ;;  %v14108_v54 = vld [vmem:[%s21229_s3 + $0x70] sm:$0xff] }
 0x1d9   : > { %v1939_v41 = vmax.f32 %v1937_v38, %v1938_v62  ;;  %v1945_v24 = vrot.slane %v1944_v53, 4  ;;  %v1952_v16 = vrot.slane %v1951_v55, 4  ;;  %v2128_v3 = vmax.f32 %v15780_v25, %v1936_v28 }
 0x1da   : > { %v14921_v17 = vpop.eup %14920  ;;  %v2276_v34 = vsel %vm2228_vm10, %v2127_v32, %v2275_v48  ;;  %v1959_v57 = vrot.slane %v1958_v2, 4  ;;  %v10277_v44 = vadd.f32 -1.0, %v14919_v33  ;;  %v792_v18 = vmul.f32 1.442695, %v730_v58  ;;  %v14116_v58 = vld [vmem:[%s21229_s3 + $0xb0] sm:$0xff]  ;;  %2633 = vmatpush.bf16.msrb.mxu1 %v14108_v54  ;;  %v15888_v54 = vld [vmem:[#allocation2 + $0x11] sm:$0xff] }
 0x1db   : > { %v1940_v61 = vrot.slane %v1939_v41, 2  ;;  %v1946_v40 = vmax.f32 %v1944_v53, %v1945_v24  ;;  %v1953_v1 = vmax.f32 %v1951_v55, %v1952_v16  ;;  %v10278_v36 = vadd.f32 -1.0, %v14921_v17  ;;  %2821 = vmatpush.bf16.msrb.mxu3 %v14116_v58 }
 0x1dc   : > { %v1960_v4 = vmax.f32 %v1958_v2, %v1959_v57  ;;  %v856_v31 = vmul.f32 1.6732632, %v10277_v44  ;;  %v731_v26 = vmin.f32 %v15814_v56, 0.0  ;;  %v1908_v10 = vmax.f32 %v15787_v52, %v1907_v14  ;;  %v14107_v44 = vld [vmem:[%s21229_s3 + $0x68] sm:$0xff] }
 0x1dd   : > { %v1941_v6 = vmax.f32 %v1939_v41, %v1940_v61  ;;  %v1947_v22 = vrot.slane %v1946_v40, 2  ;;  %v1954_v45 = vrot.slane %v1953_v1, 2  ;;  %v857_v9 = vmul.f32 1.6732632, %v10278_v36  ;;  %v14111_v61 = vld [vmem:[%s21229_s3 + $0x88] sm:$0xff] }
 0x1de   : > { %v2277_v25 = vsel %vm2230_vm11, %v2128_v3, %v2276_v34  ;;  %v1961_v39 = vrot.slane %v1960_v4, 2  ;;  %v920_v8 = vsel %vm888_vm3, %v15778_v46, %v856_v31  ;;  %14922 = vpow2.f32 %v792_v18  ;;  %2634 = vmatpush.bf16.msrb.mxu1 %v14107_v44 }
 0x1df   : > { %v1942_v52 = vrot.slane %v1941_v6, 1  ;;  %v1948_v19 = vmax.f32 %v1946_v40, %v1947_v22  ;;  %v1955_v13 = vmax.f32 %v1953_v1, %v1954_v45  ;;  %v952_v15 = vmul.f32 1.050701, %v920_v8 }
 0x1e0   : > { %v1962_v14 = vmax.f32 %v1960_v4, %v1961_v39  ;;  %v921_v46 = vsel %vm889_vm5, %v15783_v21, %v857_v9  ;;  %v794_v11 = vmul.f32 1.442695, %v731_v26  ;;  %v14112_v21 = vld [vmem:[%s21229_s3 + $0x90] sm:$0xff]  ;;  %v14106_v39 = vld [vmem:[%s21229_s3 + $0x60] sm:$0xff]  ;;  %vm890_vm6 = vcmp.gt.f32.partialorder %v15797_v12, 0.0 }
 0x1e1   : > { %v1943_v47 = vmax.f32 %v1941_v6, %v1942_v52  ;;  %v1949_v51 = vrot.slane %v1948_v19, 1  ;;  %v1956_v28 = vrot.slane %v1955_v13, 1  ;;  %v1072_v35 = vrot.slane %v952_v15, 2  ;;  %2727 = vmatpush.bf16.msrb.mxu2 %v14112_v21 }
 0x1e2   : > { %v1963_v60 = vrot.slane %v1962_v14, 1  ;;  %v1073_v32 = vrot.slane %v952_v15, 4  ;;  %v1074_v59 = vrot.slane %v952_v15, 6  ;;  %v1965_v5 = vsel %vm1180_vm4, %v952_v15, -inf  ;;  %2635 = vmatpush.bf16.msrb.mxu1 %v14106_v39 }
 0x1e3   : > { %v1950_v30 = vmax.f32 %v1948_v19, %v1949_v51  ;;  %v1957_v38 = vmax.f32 %v1955_v13, %v1956_v28  ;;  %v2129_v48 = vmax.f32 %v15790_v49, %v1943_v47  ;;  %v1966_v62 = vrot.slane %v1965_v5, 4  ;;  %v15881_v47 = vld [vmem:[#allocation2 + $0x21] sm:$0xff] }
 0x1e4   : > { %v1964_v33 = vmax.f32 %v1962_v14, %v1963_v60  ;;  %v1972_v53 = vsel %vm1180_vm4, %v1072_v35, -inf  ;;  %v1979_v55 = vsel %vm1180_vm4, %v1073_v32, -inf  ;;  %v1986_v2 = vsel %vm1180_vm4, %v1074_v59, -inf  ;;  %v14923_v17 = vpop.eup %14922  ;;  %v15884_v35 = vpop.f32.mrf.mxu2 }
 0x1e5   : > { %v2130_v41 = vmax.f32 %v15799_v50, %v1950_v30  ;;  %v2131_v24 = vmax.f32 %v15801_v23, %v1957_v38  ;;  %v2278_v49 = vsel %vm2232_vm12, %v2129_v48, %v2277_v25  ;;  %v1967_v16 = vmax.f32 %v1965_v5, %v1966_v62  ;;  %v14115_v50 = vld [vmem:[%s21229_s3 + $0xa8] sm:$0xff]  ;;  %2728 = vmatpush.bf16.msrb.mxu2 %v14111_v61  ;;  %v15886_v5 = vld [vmem:[#allocation2 + $0x10] sm:$0xff]  ;;  %v15896_v62 = vpop.f32.mrf.mxu1 }
 0x1e6   : > { %v1973_v3 = vrot.slane %v1972_v53, 4  ;;  %v1980_v34 = vrot.slane %v1979_v55, 4  ;;  %v1987_v57 = vrot.slane %v1986_v2, 4  ;;  %v2132_v23 = vmax.f32 %v1908_v10, %v1964_v33  ;;  %2822 = vmatpush.bf16.msrb.mxu3 %v14115_v50 }
 0x1e7   : > { %v2279_v40 = vsel %vm2234_vm13, %v2130_v41, %v2278_v49  ;;  %v1968_v1 = vrot.slane %v1967_v16, 2  ;;  %v953_v36 = vmul.f32 1.050701, %v921_v46  ;;  %v10279_v0 = vadd.f32 -1.0, %v14923_v17 }
 0x1e8   : > { %v2280_v4 = vsel %vm2236_vm14, %v2131_v24, %v2279_v40  ;;  %v1974_v31 = vmax.f32 %v1972_v53, %v1973_v3  ;;  %v1981_v18 = vmax.f32 %v1979_v55, %v1980_v34  ;;  %v1988_v6 = vmax.f32 %v1986_v2, %v1987_v57  ;;  %v15903_v2 = vld [vmem:[#allocation2 + $0x61] sm:$0xff]  ;;  %v15917_v57 = vpop.f32.mrf.mxu3 }
 0x1e9   : > { %v2281_v26 = vsel %vm2238_vm0, %v2132_v23, %v2280_v4  ;;  %v1075_v22 = vrot.slane %v953_v36, 2  ;;  %v1076_v45 = vrot.slane %v953_v36, 4  ;;  %v1969_v9 = vmax.f32 %v1967_v16, %v1968_v1  ;;  %2729 = vmatpush.bf16.msrb.mxu2 %v14110_v7  ;;  %v15915_v34 = vld [vmem:[#allocation2 + $0x60] sm:$0xff] }
 0x1ea   : > { %2304 = vst.msk [vmem:[#allocation2 + $0x71] sm:$0xff] %vm2141_vm7, %v2281_v26  ;;  %v1975_v10 = vrot.slane %v1974_v31, 2  ;;  %v1982_v25 = vrot.slane %v1981_v18, 2  ;;  %v1993_v8 = vsel %vm1180_vm4, %v953_v36, -inf  ;;  %14924 = vpow2.f32 %v794_v11  ;;  %2823 = vmatpush.bf16.msrb.mxu3 %v14114_v42  ;;  %v15879_v11 = vld [vmem:[#allocation2 + $0x20] sm:$0xff] }
 0x1eb   : > { %v1077_v52 = vrot.slane %v953_v36, 6  ;;  %v2000_v19 = vsel %vm1180_vm4, %v1075_v22, -inf  ;;  %v2007_v13 = vsel %vm1180_vm4, %v1076_v45, -inf  ;;  %v1989_v14 = vrot.slane %v1988_v6, 2 }
 0x1ec   : > { %v1976_v15 = vmax.f32 %v1974_v31, %v1975_v10  ;;  %v1994_v46 = vrot.slane %v1993_v8, 4  ;;  %v1970_v51 = vrot.slane %v1969_v9, 1  ;;  %v1983_v28 = vmax.f32 %v1981_v18, %v1982_v25  ;;  %v2462_v7 = vpop.f32.mrf.mxu2 }
 0x1ed   : > { %v2001_v60 = vrot.slane %v2000_v19, 4  ;;  %v2008_v32 = vrot.slane %v2007_v13, 4  ;;  %v858_v59 = vmul.f32 1.6732632, %v10279_v0  ;;  %v2014_v21 = vsel %vm1180_vm4, %v1077_v52, -inf }
 0x1ee   : > { %vm891_vm2 = vcmp.gt.f32.partialorder %v15814_v56, 0.0  ;;  %v2579_v30 = vpack.c.bf16 %v15879_v11, %v15886_v5  ;;  %v2673_v38 = vpack.c.bf16 %v15881_v47, %v15888_v54  ;;  %v1977_v58 = vrot.slane %v1976_v15, 1  ;;  %v2759_v5 = vld [vmem:[#allocation2 + $0x12] sm:$0xff] }
 0x1ef   : > { %v15898_v33 = vmax.f32 %v1988_v6, %v1989_v14  ;;  %v1995_v53 = vmax.f32 %v1993_v8, %v1994_v46  ;;  %v922_v55 = vsel %vm890_vm6, %v15797_v12, %v858_v59  ;;  %v15909_v49 = vmax.f32 %v1969_v9, %v1970_v51 }
 0x1f0   : > { %v14925_v48 = vpop.eup %14924  ;;  %v1984_v16 = vrot.slane %v1983_v28, 1  ;;  %v954_v17 = vmul.f32 1.050701, %v922_v55  ;;  %v2002_v44 = vmax.f32 %v2000_v19, %v2001_v60  ;;  %v2009_v12 = vmax.f32 %v2007_v13, %v2008_v32 }
 0x1f1   : > { %v15905_v41 = vld [vmem:[#allocation2 + $0x71] sm:$0xff]  ;;  %v2015_v61 = vrot.slane %v2014_v21, 4  ;;  %v10280_v36 = vadd.f32 -1.0, %v14925_v48  ;;  %v15925_v4 = vmax.f32 %v1976_v15, %v1977_v58  ;;  %v1991_v31 = vrot.slane %v15898_v33, 1  ;;  %v15938_v15 = vld [vmem:[#allocation2 + $0x62] sm:$0xff] }
 0x1f2   : > { %v15907_v24 = vld [vmem:[#allocation2 + $0x70] sm:$0xff]  ;;  %v15913_v3 = vpack.c.bf16 %v15905_v41, %v15903_v2  ;;  %v1078_v23 = vrot.slane %v954_v17, 2  ;;  %v1079_v40 = vrot.slane %v954_v17, 4  ;;  %v1080_v1 = vrot.slane %v954_v17, 6 }
 0x1f3   : > { %v15921_v50 = vpack.c.bf16 %v15907_v24, %v15915_v34  ;;  %v1996_v18 = vrot.slane %v1995_v53, 2  ;;  %v2021_v26 = vsel %vm1180_vm4, %v954_v17, -inf  ;;  %v15931_v6 = vmax.f32 %v1983_v28, %v1984_v16  ;;  %v15935_v10 = vld [vmem:[#allocation2 + $0x72] sm:$0xff]  ;;  %v2397_v28 = vpop.f32.mrf.mxu1 }
 0x1f4   : > { %10308 = vmatmul.msk.bf16.gmra.mxu1 %vm2141_vm7, %v15913_v3  ;;  %v2022_v22 = vrot.slane %v2021_v26, 4  ;;  %v2028_v45 = vsel %vm1180_vm4, %v1078_v23, -inf  ;;  %v2035_v9 = vsel %vm1180_vm4, %v1079_v40, -inf  ;;  %v2003_v25 = vrot.slane %v2002_v44, 2 }
 0x1f5   : > { %10328 = vmatmul.msk.bf16.gmra.mxu2 %vm2141_vm7, %v15921_v50  ;;  %v2010_v39 = vrot.slane %v2009_v12, 2  ;;  %v2016_v8 = vmax.f32 %v2014_v21, %v2015_v61  ;;  %v2029_v0 = vrot.slane %v2028_v45, 4  ;;  %v2036_v52 = vrot.slane %v2035_v9, 4 }
 0x1f6   : > { %v2023_v42 = vmax.f32 %v2021_v26, %v2022_v22  ;;  %v2042_v19 = vsel %vm1180_vm4, %v1080_v1, -inf  ;;  %v859_v13 = vmul.f32 1.6732632, %v10280_v36  ;;  %v15940_v14 = vmax.f32 %v1995_v53, %v1996_v18  ;;  %v2548_v53 = vpop.f32.mrf.mxu3 }
 0x1f7   : > { %v2030_v46 = vmax.f32 %v2028_v45, %v2029_v0  ;;  %v2043_v51 = vrot.slane %v2042_v19, 4  ;;  %v15944_v60 = vpack.c.bf16 %v15935_v10, %v15938_v15  ;;  %v2037_v59 = vmax.f32 %v2035_v9, %v2036_v52 }
 0x1f8   : > { %v2024_v32 = vrot.slane %v2023_v42, 2  ;;  %v923_v21 = vsel %vm891_vm2, %v15814_v56, %v859_v13  ;;  %v2463_v48 = vadd.f32 %v2462_v7, %v2397_v28  ;;  %v2004_v58 = vmax.f32 %v2002_v44, %v2003_v25 }
 0x1f9   : > { %v2031_v55 = vrot.slane %v2030_v46, 2  ;;  %v2044_v16 = vmax.f32 %v2042_v19, %v2043_v51  ;;  %v955_v17 = vmul.f32 1.050701, %v923_v21  ;;  %10356 = vmatmul.msk.bf16.gmra.mxu3 %vm2141_vm7, %v15944_v60  ;;  %v15951_v61 = vmax.f32 %v2009_v12, %v2010_v39 }
 0x1fa   : > { %v2025_v23 = vmax.f32 %v2023_v42, %v2024_v32  ;;  %v2038_v40 = vrot.slane %v2037_v59, 2  ;;  %v15953_v1 = vadd.f32 %v2548_v53, %v2463_v48  ;;  %v2017_v13 = vrot.slane %v2016_v8, 2 }
 0x1fb   : > { %v2032_v36 = vmax.f32 %v2030_v46, %v2031_v55  ;;  %v2045_v18 = vrot.slane %v2044_v16, 2  ;;  %v1081_v26 = vrot.slane %v955_v17, 2  ;;  %v1082_v22 = vrot.slane %v955_v17, 4 }
 0x1fc   : > { %v2026_v56 = vrot.slane %v2025_v23, 1  ;;  %v2039_v45 = vmax.f32 %v2037_v59, %v2038_v40  ;;  %v1083_v44 = vrot.slane %v955_v17, 6  ;;  %v2049_v9 = vsel %vm1180_vm4, %v955_v17, -inf }
 0x1fd   : > { %v2033_v25 = vrot.slane %v2032_v36, 1  ;;  %v2046_v0 = vmax.f32 %v2044_v16, %v2045_v18  ;;  %v2050_v7 = vrot.slane %v2049_v9, 4  ;;  %v2056_v52 = vsel %vm1180_vm4, %v1081_v26, -inf }
 0x1fe   : > { %v2027_v12 = vmax.f32 %v2025_v23, %v2026_v56  ;;  %v2040_v39 = vrot.slane %v2039_v45, 1  ;;  %v2057_v42 = vrot.slane %v2056_v52, 4  ;;  %v2063_v19 = vsel %vm1180_vm4, %v1082_v22, -inf }
 0x1ff   : > { %v2034_v46 = vmax.f32 %v2032_v36, %v2033_v25  ;;  %v2051_v51 = vmax.f32 %v2049_v9, %v2050_v7  ;;  %v2064_v28 = vrot.slane %v2063_v19, 4  ;;  %v2047_v21 = vrot.slane %v2046_v0, 1  ;;  %v15966_v36 = vld [vmem:[#allocation2 + $0x22] sm:$0xff] }
 0x200   : > { %v2041_v32 = vmax.f32 %v2039_v45, %v2040_v39  ;;  %v2058_v59 = vmax.f32 %v2056_v52, %v2057_v42  ;;  %v2070_v48 = vsel %vm1180_vm4, %v1083_v44, -inf  ;;  %v1998_v55 = vrot.slane %v15940_v14, 1 }
 0x201   : > { %v2134_v16 = vmax.f32 %v15925_v4, %v2034_v46  ;;  %v2052_v17 = vrot.slane %v2051_v51, 2  ;;  %v2065_v53 = vmax.f32 %v2063_v19, %v2064_v28  ;;  %v2005_v23 = vrot.slane %v2004_v58, 1 }
 0x202   : > { %v2133_v40 = vmax.f32 %v15909_v49, %v2027_v12  ;;  %v2059_v18 = vrot.slane %v2058_v59, 2  ;;  %v2071_v26 = vrot.slane %v2070_v48, 4  ;;  %v2018_v22 = vmax.f32 %v2016_v8, %v2017_v13 }
 0x203   : > { %v2135_v56 = vmax.f32 %v15931_v6, %v2041_v32  ;;  %v2053_v45 = vmax.f32 %v2051_v51, %v2052_v17  ;;  %v2066_v44 = vrot.slane %v2065_v53, 2  ;;  %v2048_v49 = vmax.f32 %v2046_v0, %v2047_v21 }
 0x204   : > { %10381 = vmatmul.msk.bf16.vlgmr.msrb.gmra.mxu1 %vm2141_vm7, %v2579_v30  ;;  %v2282_v4 = vsel %vm2226_vm9, %v2134_v16, %v2133_v40  ;;  %v2060_v9 = vmax.f32 %v2058_v59, %v2059_v18  ;;  %v2072_v25 = vmax.f32 %v2070_v48, %v2071_v26  ;;  %v2012_v30 = vrot.slane %v15951_v61, 1  ;;  %v15987_v40 = vld [vmem:[#allocation2 + $0x30] sm:$0xff] }
 0x205   : > { %10409 = vmatmul.msk.bf16.vlgmr.msrb.gmra.mxu2 %vm2141_vm7, %v2673_v38  ;;  %v2054_v7 = vrot.slane %v2053_v45, 1  ;;  %v2067_v52 = vmax.f32 %v2065_v53, %v2066_v44  ;;  %v2767_v8 = vpack.c.bf16 %v15966_v36, %v2759_v5  ;;  %v1992_v6 = vmax.f32 %v15898_v33, %v1991_v31  ;;  %v15992_v26 = vld [vmem:[#allocation2 + $0x31] sm:$0xff]  ;;  %v14124_v5 = vld [vmem:[%s21229_s3 + $0xf0] sm:$0xff] }
 0x206   : > { %v1999_v54 = vmax.f32 %v15940_v14, %v1998_v55  ;;  %v2061_v12 = vrot.slane %v2060_v9, 1  ;;  %v2073_v38 = vrot.slane %v2072_v25, 2  ;;  %v2006_v0 = vmax.f32 %v2004_v58, %v2005_v23 }
 0x207   : > { %v2283_v39 = vsel %vm2228_vm10, %v2135_v56, %v2282_v4  ;;  %v2055_v42 = vmax.f32 %v2053_v45, %v2054_v7  ;;  %v2068_v19 = vrot.slane %v2067_v52, 1  ;;  %v2019_v13 = vrot.slane %v2018_v22, 1  ;;  %v14960_v56 = vld [vmem:[#allocation2 + $0x41] sm:$0xff]  ;;  %v2761_v45 = vld [vmem:[#allocation2 + $0x32] sm:$0xff] }
 0x208   : > { %v2136_v46 = vmax.f32 %v1992_v6, %v2048_v49  ;;  %v2062_v51 = vmax.f32 %v2060_v9, %v2061_v12  ;;  %v2074_v28 = vmax.f32 %v2072_v25, %v2073_v38  ;;  %v2013_v32 = vmax.f32 %v15951_v61, %v2012_v30  ;;  %v14125_v49 = vld [vmem:[%s21229_s3 + $0xf8] sm:$0xff]  ;;  %v16009_v9 = vpop.f32.mrf.mxu1  ;;  %v16011_v25 = vpop.f32.mrf.mxu2  ;;  %v14128_v7 = vld [vmem:[%s21229_s3 + $0x110] sm:$0xff]  ;;  %v14127_v12 = vld [vmem:[%s21229_s3 + $0x108] sm:$0xff] }
 0x209   : > { %v2069_v21 = vmax.f32 %v2067_v52, %v2068_v19  ;;  %v2137_v59 = vmax.f32 %v1999_v54, %v2055_v42  ;;  %10437 = vmatmul.msk.bf16.vlgmr.msrb.gmra.mxu3 %vm2141_vm7, %v2767_v8  ;;  %v2020_v55 = vmax.f32 %v2018_v22, %v2019_v13  ;;  %v2580_v18 = vpack.c.bf16 %v15682_v20, %v15987_v40  ;;  %v14121_v20 = vld [vmem:[%s21229_s3 + $0xd8] sm:$0xff]  ;;  %v16019_v30 = vpop.f32.mrf.mxu3  ;;  %v14119_v52 = vld [vmem:[%s21229_s3 + $0xc8] sm:$0xff] }
 0x20a   : > { %v2284_v33 = vsel %vm2230_vm11, %v2136_v46, %v2283_v39  ;;  %v2075_v31 = vrot.slane %v2074_v28, 1  ;;  %v2138_v14 = vmax.f32 %v2006_v0, %v2062_v51  ;;  %v2674_v22 = vpack.c.bf16 %v14960_v56, %v15992_v26  ;;  %v14129_v4 = vld [vmem:[%s21229_s3 + $0x118] sm:$0xff]  ;;  %2915 = vmatpush.bf16.msra.mxu1 %v14121_v20  ;;  %3009 = vmatpush.bf16.msra.mxu2 %v14125_v49  ;;  %v14123_v54 = vld [vmem:[%s21229_s3 + $0xe8] sm:$0xff]  ;;  %v14122_v46 = vld [vmem:[%s21229_s3 + $0xe0] sm:$0xff] }
 0x20b   : > { %v2139_v48 = vmax.f32 %v2013_v32, %v2069_v21  ;;  %v2285_v58 = vsel %vm2232_vm12, %v2137_v59, %v2284_v33  ;;  %v2768_v44 = vpack.c.bf16 %v15692_v37, %v2761_v45  ;;  %v14120_v37 = vld [vmem:[%s21229_s3 + $0xd0] sm:$0xff]  ;;  %3103 = vmatpush.bf16.msra.mxu3 %v14129_v4  ;;  %v14961_v8 = vld [vmem:[#allocation2 + $0x50] sm:$0xff]  ;;  %vm4934_vm2 = vcmask 1043458  }
 0x20c   : > { %v2076_v16 = vmax.f32 %v2074_v28, %v2075_v31  ;;  %v2286_v17 = vsel %vm2234_vm13, %v2138_v14, %v2285_v58  ;;  %v2581_v6 = vpack.c.bf16 %v15915_v34, %v14961_v8  ;;  %v14962_v38 = vld [vmem:[#allocation2 + $0x51] sm:$0xff]  ;;  %v2956_v58 = vpack.c.bf16 %v15992_v26, %v15881_v47 }
 0x20d   : > { %v2287_v53 = vsel %vm2236_vm14, %v2139_v48, %v2286_v17  ;;  %v2675_v0 = vpack.c.bf16 %v15903_v2, %v14962_v38  ;;  %v14118_v34 = vld [vmem:[%s21229_s3 + $0xc0] sm:$0xff]  ;;  %v2861_v47 = vld [vmem:[#allocation2 + $0x90] sm:$0xff] }
 0x20e   : > { %v2140_v23 = vmax.f32 %v2020_v55, %v2076_v16  ;;  %2916 = vmatpush.bf16.msra.mxu1 %v14120_v37  ;;  %3010 = vmatpush.bf16.msra.mxu2 %v14124_v5  ;;  %v14126_v2 = vld [vmem:[%s21229_s3 + $0x100] sm:$0xff] }
 0x20f   : > { %3104 = vmatpush.bf16.msra.mxu3 %v14128_v7  ;;  %v14963_v28 = vld [vmem:[#allocation2 + $0x52] sm:$0xff] }
 0x210   : > { %v2288_v61 = vsel %vm2238_vm0, %v2140_v23, %v2287_v53  ;;  %v2769_v32 = vpack.c.bf16 %v15938_v15, %v14963_v28  ;;  %v2862_v15 = vpack.c.bf16 %v15987_v40, %v15879_v11 }
 0x211   : > { %2305 = vst.msk [vmem:[#allocation2 + $0x81] sm:$0xff] %vm2141_vm7, %v2288_v61 }
 0x212   : > { %2917 = vmatpush.bf16.msra.mxu1 %v14119_v52  ;;  %3011 = vmatpush.bf16.msra.mxu2 %v14123_v54 }
 0x213   : > { %3105 = vmatpush.bf16.msra.mxu3 %v14127_v12 }
 0x214   : > { %10382 = vmatmul.msk.bf16.gmra.mxu1 %vm2141_vm7, %v2580_v18 }
 0x215   : > { %10410 = vmatmul.msk.bf16.gmra.mxu2 %vm2141_vm7, %v2674_v22 }
 0x216   : > { %2918 = vmatpush.bf16.msra.mxu1 %v14118_v34  ;;  %3012 = vmatpush.bf16.msra.mxu2 %v14122_v46 }
 0x217   : > { %3106 = vmatpush.bf16.msra.mxu3 %v14126_v2 }
 0x218   : > { %v2578_v21 = vld [vmem:[#allocation2 + $0x80] sm:$0xff] }
 0x219   : > { %10438 = vmatmul.msk.bf16.gmra.mxu3 %vm2141_vm7, %v2768_v44  ;;  %v2672_v59 = vld [vmem:[#allocation2 + $0x81] sm:$0xff]  ;;  %v2582_v33 = vpack.c.bf16 %v2578_v21, %v15907_v24 }
 0x21a   : > { %v2676_v31 = vpack.c.bf16 %v2672_v59, %v15905_v41  ;;  %v2766_v14 = vld [vmem:[#allocation2 + $0x82] sm:$0xff]  ;;  %v3050_v41 = vpack.c.bf16 %v2761_v45, %v15966_v36 }
 0x21b   : > { %v2770_v48 = vpack.c.bf16 %v2766_v14, %v15935_v10 }
 0x21c   : > { %v2402_v39 = vpop.f32.mrf.mxu1 }
 0x224   : > { %10383 = vmatmul.msk.bf16.gmra.mxu1 %vm2141_vm7, %v2581_v6  ;;  %v2467_v42 = vpop.f32.mrf.mxu2  ;;  %v16074_v11 = vpop.f32.mrf.mxu1 }
 0x225   : > { %10411 = vmatmul.msk.bf16.gmra.mxu2 %vm2141_vm7, %v2675_v0  ;;  %v2468_v19 = vadd.f32 %v2467_v42, %v2402_v39  ;;  %v2553_v13 = vpop.f32.mrf.mxu3 }
 0x227   : > { %v16046_v51 = vadd.f32 %v2553_v13, %v2468_v19 }
 0x229   : > { %10439 = vmatmul.msk.bf16.gmra.mxu3 %vm2141_vm7, %v2769_v32 }
 0x22c   : > { %v16078_v24 = vpop.f32.mrf.mxu2 }
 0x234   : > { %10384 = vmatmul.msk.bf16.gmra.mxu1 %vm2141_vm7, %v2582_v33 }
 0x235   : > { %10412 = vmatmul.msk.bf16.gmra.mxu2 %vm2141_vm7, %v2676_v31  ;;  %v2460_v31 = vadd.f32 %v15884_v35, %v15896_v62 }
 0x239   : > { %10440 = vmatmul.msk.bf16.gmra.mxu3 %vm2141_vm7, %v2770_v48 }
 0x244   : > { %10465 = vmatmul.msk.bf16.vlgmr.msra.gmra.mxu1 %vm2141_vm7, %v2862_v15 }
 0x245   : > { %10493 = vmatmul.msk.bf16.vlgmr.msra.gmra.mxu2 %vm2141_vm7, %v2956_v58  ;;  %v2564_v58 = vadd.f32 %v15917_v57, %v2460_v31 }
 0x249   : > { %10521 = vmatmul.msk.bf16.vlgmr.msra.gmra.mxu3 %vm2141_vm7, %v3050_v41 }
 0x254   : > { %10466 = vmatmul.msk.bf16.gmra.mxu1 %vm2141_vm7, %v15688_v29  ;;  %v2955_v29 = vld [vmem:[#allocation2 + $0x91] sm:$0xff] }
 0x255   : > { %10494 = vmatmul.msk.bf16.gmra.mxu2 %vm2141_vm7, %v15680_v27  ;;  %v2865_v27 = vpack.c.bf16 %v2861_v47, %v2578_v21  ;;  %v2959_v36 = vpack.c.bf16 %v2955_v29, %v2672_v59 }
 0x259   : > { %10522 = vmatmul.msk.bf16.gmra.mxu3 %vm2141_vm7, %v15697_v63  ;;  %v16082_v63 = vpop.f32.mrf.mxu3 }
 0x264   : > { %10467 = vmatmul.msk.bf16.gmra.mxu1 %vm2141_vm7, %v15921_v50  ;;  %v3049_v50 = vld [vmem:[#allocation2 + $0x92] sm:$0xff] }
 0x265   : > { %10495 = vmatmul.msk.bf16.gmra.mxu2 %vm2141_vm7, %v15913_v3  ;;  %v3053_v55 = vpack.c.bf16 %v3049_v50, %v2766_v14 }
 0x269   : > { %10523 = vmatmul.msk.bf16.gmra.mxu3 %vm2141_vm7, %v15944_v60 }
 0x271   : > { %v2407_v10 = vpop.f32.mrf.mxu1 }
 0x274   : > { %10468 = vmatmul.msk.bf16.gmra.mxu1 %vm2141_vm7, %v2865_v27  ;;  %v16124_v27 = vld [vmem:[%s21230_s4] ss:$0 sm:$0xff] }
 0x275   : > { %10496 = vmatmul.msk.bf16.gmra.mxu2 %vm2141_vm7, %v2959_v36 }
 0x278   : > { %v2472_v3 = vpop.f32.mrf.mxu2 }
 0x279   : > { %v2473_v16 = vadd.f32 %v2472_v3, %v2407_v10  ;;  %v16084_v17 = vpop.f32.mrf.mxu1  ;;  %10524 = vmatmul.msk.bf16.gmra.mxu3 %vm2141_vm7, %v3053_v55  ;;  %vm3268_vm7 = vcmask 1041408  }
 0x27c   : > { %v2558_v60 = vpop.f32.mrf.mxu3 }
 0x27d   : > { %v2569_v53 = vadd.f32 %v2558_v60, %v2473_v16 }
 0x280   : > { %v16087_v23 = vpop.f32.mrf.mxu2 }
 0x281   : > { %v2637_v40 = vpop.f32.mrf.mxu1 }
 0x282   : > { %v2657_v61 = vadd.f32 %v2637_v40, %v15705_v43 }
 0x284   : > { %v16090_v18 = vpop.f32.mrf.mxu3 }
 0x288   : > { %v2731_v26 = vpop.f32.mrf.mxu2 }
 0x289   : > { %v2751_v56 = vadd.f32 %v2731_v26, %v2657_v61  ;;  %v2639_v22 = vpop.f32.mrf.mxu1 }
 0x28a   : > { %v2658_v47 = vadd.f32 %v2639_v22, %v2564_v58 }
 0x28c   : > { %v2825_v45 = vpop.f32.mrf.mxu3 }
 0x28d   : > { %v2845_v44 = vadd.f32 %v2825_v45, %v2751_v56 }
 0x290   : > { %v2733_v20 = vpop.f32.mrf.mxu2 }
 0x291   : > { %v2642_v49 = vpop.f32.mrf.mxu1  ;;  %v2752_v10 = vadd.f32 %v2733_v20, %v2658_v47 }
 0x292   : > { %v2659_v4 = vadd.f32 %v2642_v49, %v15953_v1 }
 0x294   : > { %v2827_v37 = vpop.f32.mrf.mxu3 }
 0x295   : > { %v2846_v3 = vadd.f32 %v2827_v37, %v2752_v10  ;;  %v3552_v37 = vld [vmem:[#allocation3] sm:$0xf] }
 0x296   : > { %3560 = vst [vmem:[#allocation1] ss:$2 sm:$0xff] %v3552_v37 }
 0x298   : > { %v2736_v5 = vpop.f32.mrf.mxu2 }
 0x299   : > { %v2753_v7 = vadd.f32 %v2736_v5, %v2659_v4  ;;  %v16093_v52 = vpop.f32.mrf.mxu1 }
 0x29c   : > { %v2830_v8 = vpop.f32.mrf.mxu3 }
 0x29d   : > { %v16095_v6 = vadd.f32 %v2830_v8, %v2753_v7 }
 0x2a0   : > { %v16097_v43 = vpop.f32.mrf.mxu2 }
 0x2a1   : > { %v2647_v54 = vpop.f32.mrf.mxu1 }
 0x2a2   : > { %v2661_v12 = vadd.f32 %v2647_v54, %v16046_v51 }
 0x2a4   : > { %v16100_v38 = vpop.f32.mrf.mxu3 }
 0x2a8   : > { %v2741_v0 = vpop.f32.mrf.mxu2 }
 0x2a9   : > { %v2755_v39 = vadd.f32 %v2741_v0, %v2661_v12  ;;  %v16102_v42 = vpop.f32.mrf.mxu1 }
 0x2ac   : > { %v2835_v1 = vpop.f32.mrf.mxu3 }
 0x2ad   : > { %v16104_v19 = vadd.f32 %v2835_v1, %v2755_v39 }
 0x2b0   : > { %v16106_v34 = vpop.f32.mrf.mxu2 }
 0x2b1   : > { %v2652_v13 = vpop.f32.mrf.mxu1 }
 0x2b2   : > { %v2663_v46 = vadd.f32 %v2652_v13, %v2569_v53 }
 0x2b4   : > { %v16108_v2 = vpop.f32.mrf.mxu3 }
 0x2b8   : > { %v2746_v28 = vpop.f32.mrf.mxu2 }
 0x2b9   : > { %v2757_v32 = vadd.f32 %v2746_v28, %v2663_v46  ;;  %v16110_v21 = vpop.f32.mrf.mxu1 }
 0x2bc   : > { %v2840_v51 = vpop.f32.mrf.mxu3 }
 0x2bd   : > { %v16112_v59 = vadd.f32 %v2840_v51, %v2757_v32 }
 0x2c0   : > { %v16114_v33 = vpop.f32.mrf.mxu2 }
 0x2c1   : > { %v2920_v48 = vpop.f32.mrf.mxu1 }
 0x2c2   : > { %v2940_v41 = vadd.f32 %v2920_v48, %v2845_v44 }
 0x2c4   : > { %v16118_v14 = vpop.f32.mrf.mxu3 }
 0x2c8   : > { %v3014_v15 = vpop.f32.mrf.mxu2 }
 0x2c9   : > { %v3034_v29 = vadd.f32 %v3014_v15, %v2940_v41  ;;  %v2922_v62 = vpop.f32.mrf.mxu1 }
 0x2ca   : > { %v2941_v60 = vadd.f32 %v2922_v62, %v2846_v3 }
 0x2cc   : > { %v3108_v36 = vpop.f32.mrf.mxu3 }
 0x2cd   : > { %v3128_v50 = vadd.f32 %v3108_v36, %v3034_v29 }
 0x2cf   : > { %v3140_v35 = vadd.f32 %v16124_v27, %v3128_v50 }
 0x2d0   : > { %v3016_v55 = vpop.f32.mrf.mxu2 }
 0x2d1   : > { %v3148_v16 = vmin.f32 %v3140_v35, 0.0  ;;  %v3035_v57 = vadd.f32 %v3016_v55, %v2941_v60  ;;  %vm3188_vm4 = vcmp.gt.f32.partialorder %v3140_v35, 0.0 }
 0x2d3   : > { %v3156_v53 = vmul.f32 1.442695, %v3148_v16 }
 0x2d4   : > { %v3110_v40 = vpop.f32.mrf.mxu3 }
 0x2d5   : > { %14926 = vpow2.f32 %v3156_v53  ;;  %v3129_v61 = vadd.f32 %v3110_v40, %v3035_v57 }
 0x2d7   : > { %v3141_v26 = vadd.f32 %v16124_v27, %v3129_v61 }
 0x2d9   : > { %v3149_v56 = vmin.f32 %v3141_v26, 0.0  ;;  %vm3189_vm13 = vcmp.gt.f32.partialorder %v3141_v26, 0.0 }
 0x2db   : > { %v14927_v22 = vpop.eup %14926  ;;  %v3158_v45 = vmul.f32 1.442695, %v3149_v56 }
 0x2dc   : > { %v10525_v44 = vadd.f32 -1.0, %v14927_v22 }
 0x2dd   : > { %14928 = vpow2.f32 %v3158_v45 }
 0x2de   : > { %v3180_v20 = vmul.f32 1.6732632, %v10525_v44 }
 0x2e0   : > { %v3196_v49 = vsel %vm3188_vm4, %v3140_v35, %v3180_v20  ;;  %vm4937_vm4 = vcmask 1045508  }
 0x2e1   : > { %v3204_v4 = vmul.f32 1.050701, %v3196_v49 }
 0x2e3   : > { %v14929_v5 = vpop.eup %14928  ;;  %v3220_v7 = vrot.slane %v3204_v4, 2  ;;  %v3221_v8 = vrot.slane %v3204_v4, 4  ;;  %v3222_v54 = vrot.slane %v3204_v4, 6  ;;  %v3269_v12 = vsel %vm3268_vm7, %v3204_v4, -inf }
 0x2e4   : > { %v10526_v0 = vadd.f32 -1.0, %v14929_v5  ;;  %v3270_v46 = vrot.slane %v3269_v12, 4 }
 0x2e5   : > { %v3276_v39 = vsel %vm3268_vm7, %v3220_v7, -inf  ;;  %v3283_v1 = vsel %vm3268_vm7, %v3221_v8, -inf  ;;  %v3290_v13 = vsel %vm3268_vm7, %v3222_v54, -inf }
 0x2e6   : > { %v3277_v28 = vrot.slane %v3276_v39, 4  ;;  %v3284_v32 = vrot.slane %v3283_v1, 4  ;;  %v3181_v51 = vmul.f32 1.6732632, %v10526_v0  ;;  %v3291_v31 = vrot.slane %v3290_v13, 4 }
 0x2e7   : > { %v3271_v15 = vmax.f32 %v3269_v12, %v3270_v46 }
 0x2e8   : > { %v3197_v48 = vsel %vm3189_vm13, %v3141_v26, %v3181_v51  ;;  %v3278_v58 = vmax.f32 %v3276_v39, %v3277_v28  ;;  %v3285_v41 = vmax.f32 %v3283_v1, %v3284_v32  ;;  %v3292_v29 = vmax.f32 %v3290_v13, %v3291_v31 }
 0x2e9   : > { %v3205_v47 = vmul.f32 1.050701, %v3197_v48  ;;  %v3272_v35 = vrot.slane %v3271_v15, 2 }
 0x2ea   : > { %v3279_v62 = vrot.slane %v3278_v58, 2  ;;  %v3286_v55 = vrot.slane %v3285_v41, 2  ;;  %v3293_v40 = vrot.slane %v3292_v29, 2 }
 0x2eb   : > { %v3223_v10 = vrot.slane %v3205_v47, 2  ;;  %v3224_v36 = vrot.slane %v3205_v47, 4  ;;  %v3225_v50 = vrot.slane %v3205_v47, 6  ;;  %v3297_v3 = vsel %vm3268_vm7, %v3205_v47, -inf }
 0x2ec   : > { %v3298_v16 = vrot.slane %v3297_v3, 4  ;;  %v3273_v45 = vmax.f32 %v3271_v15, %v3272_v35  ;;  %v3280_v44 = vmax.f32 %v3278_v58, %v3279_v62  ;;  %v3287_v49 = vmax.f32 %v3285_v41, %v3286_v55 }
 0x2ed   : > { %v3304_v60 = vsel %vm3268_vm7, %v3223_v10, -inf  ;;  %v3311_v53 = vsel %vm3268_vm7, %v3224_v36, -inf  ;;  %v3318_v57 = vsel %vm3268_vm7, %v3225_v50, -inf  ;;  %v3294_v7 = vmax.f32 %v3292_v29, %v3293_v40 }
 0x2ee   : > { %v3305_v61 = vrot.slane %v3304_v60, 4  ;;  %v3299_v26 = vmax.f32 %v3297_v3, %v3298_v16  ;;  %v3312_v56 = vrot.slane %v3311_v53, 4  ;;  %v3319_v22 = vrot.slane %v3318_v57, 4 }
 0x2ef   : > { %v3274_v39 = vrot.slane %v3273_v45, 1  ;;  %v3281_v1 = vrot.slane %v3280_v44, 1  ;;  %v3288_v46 = vrot.slane %v3287_v49, 1  ;;  %v3295_v31 = vrot.slane %v3294_v7, 1 }
 0x2f0   : > { %v3306_v20 = vmax.f32 %v3304_v60, %v3305_v61  ;;  %v3300_v4 = vrot.slane %v3299_v26, 2  ;;  %v3313_v37 = vmax.f32 %v3311_v53, %v3312_v56  ;;  %v3320_v5 = vmax.f32 %v3318_v57, %v3319_v22  ;;  %v2925_v56 = vpop.f32.mrf.mxu1  ;;  %v3019_v22 = vpop.f32.mrf.mxu2 }
 0x2f1   : > { %v3275_v47 = vmax.f32 %v3273_v45, %v3274_v39  ;;  %v3282_v10 = vmax.f32 %v3280_v44, %v3281_v1  ;;  %v3289_v29 = vmax.f32 %v3287_v49, %v3288_v46  ;;  %v3296_v35 = vmax.f32 %v3294_v7, %v3295_v31 }
 0x2f2   : > { %v3307_v8 = vrot.slane %v3306_v20, 2  ;;  %v3301_v54 = vmax.f32 %v3299_v26, %v3300_v4  ;;  %v3314_v12 = vrot.slane %v3313_v37, 2  ;;  %v3321_v0 = vrot.slane %v3320_v5, 2 }
 0x2f3   : > { %v2465_v60 = vadd.f32 %v16011_v25, %v16009_v9  ;;  %v2942_v44 = vadd.f32 %v2925_v56, %v16095_v6 }
 0x2f4   : > { %v3308_v13 = vmax.f32 %v3306_v20, %v3307_v8  ;;  %v3302_v28 = vrot.slane %v3301_v54, 1  ;;  %v3315_v32 = vmax.f32 %v3313_v37, %v3314_v12  ;;  %v3322_v51 = vmax.f32 %v3320_v5, %v3321_v0  ;;  %v3113_v20 = vpop.f32.mrf.mxu3  ;;  %v3588_v12 = vld [vmem:[#allocation3 + $0x1] sm:$0xf] }
 0x2f5   : > { %v2566_v26 = vadd.f32 %v16019_v30, %v2465_v60  ;;  %v3036_v9 = vadd.f32 %v3019_v22, %v2942_v44 }
 0x2f6   : > { %v3309_v48 = vrot.slane %v3308_v13, 1  ;;  %v3303_v15 = vmax.f32 %v3301_v54, %v3302_v28  ;;  %v3316_v58 = vrot.slane %v3315_v32, 1  ;;  %v3323_v41 = vrot.slane %v3322_v51, 1 }
 0x2f7   : > { %v2660_v45 = vadd.f32 %v16093_v52, %v2566_v26  ;;  %v3130_v4 = vadd.f32 %v3113_v20, %v3036_v9 }
 0x2f8   : > { %v3310_v36 = vmax.f32 %v3308_v13, %v3309_v48  ;;  %v3317_v50 = vmax.f32 %v3315_v32, %v3316_v58  ;;  %v3324_v3 = vmax.f32 %v3322_v51, %v3323_v41  ;;  %v3493_v62 = vmax.f32 %v3275_v47, %v3303_v15  ;;  %v2927_v7 = vpop.f32.mrf.mxu1  ;;  %v3021_v8 = vpop.f32.mrf.mxu2  ;;  %v3841_v32 = vld [vmem:[#allocation3 + $0x2] sm:$0xf] }
 0x2f9   : > { %v2754_v49 = vadd.f32 %v16097_v43, %v2660_v45  ;;  %v3142_v5 = vadd.f32 %v16124_v27, %v3130_v4 }
 0x2fa   : > { %v3494_v55 = vmax.f32 %v3282_v10, %v3310_v36  ;;  %v3495_v16 = vmax.f32 %v3289_v29, %v3317_v50  ;;  %v3496_v53 = vmax.f32 %v3296_v35, %v3324_v3 }
 0x2fb   : > { %v2848_v37 = vadd.f32 %v16100_v38, %v2754_v49  ;;  %v3150_v30 = vmin.f32 %v3142_v5, 0.0  ;;  %vm3190_vm0 = vcmp.gt.f32.partialorder %v3142_v5, 0.0 }
 0x2fc   : > { %v3531_v57 = vsel %vm2226_vm9, %v3494_v55, %v3493_v62  ;;  %v3115_v39 = vpop.f32.mrf.mxu3 }
 0x2fd   : > { %v3532_v40 = vsel %vm2228_vm10, %v3495_v16, %v3531_v57  ;;  %v2943_v54 = vadd.f32 %v2927_v7, %v2848_v37  ;;  %v3160_v0 = vmul.f32 1.442695, %v3150_v30 }
 0x2fe   : > { %v3533_v61 = vsel %vm2230_vm11, %v3496_v53, %v3532_v40 }
 0x2ff   : > { %3548 = vst [vmem:[#allocation3 + $0x9] sm:$0xf] %v3533_v61  ;;  %v3037_v52 = vadd.f32 %v3021_v8, %v2943_v54  ;;  %14930 = vpow2.f32 %v3160_v0 }
 0x301   : > { %v3131_v43 = vadd.f32 %v3115_v39, %v3037_v52 }
 0x303   : > { %v3143_v13 = vadd.f32 %v16124_v27, %v3131_v43 }
 0x305   : > { %v3151_v38 = vmin.f32 %v3143_v13, 0.0  ;;  %v14931_v46 = vpop.eup %14930  ;;  %vm3191_vm8 = vcmp.gt.f32.partialorder %v3143_v13, 0.0 }
 0x306   : > { %v3553_v25 = vld [vmem:[#allocation3 + $0x8] sm:$0xf]  ;;  %v10527_v51 = vadd.f32 -1.0, %v14931_v46 }
 0x307   : > { %3562 = vst [vmem:[#allocation1 + $0x1] ss:$2 sm:$0xff] %v3553_v25  ;;  %v3589_v1 = vld [vmem:[#allocation3 + $0x9] sm:$0xf]  ;;  %v3162_v28 = vmul.f32 1.442695, %v3151_v38 }
 0x308   : > { %v3182_v48 = vmul.f32 1.6732632, %v10527_v51  ;;  %v3842_v15 = vld [vmem:[#allocation3 + $0xa] sm:$0xf] }
 0x309   : > { %14932 = vpow2.f32 %v3162_v28  ;;  %v3990_v16 = vld [vmem:[#allocation3 + $0x8] sm:$0xf] }
 0x30a   : > { %v3198_v58 = vsel %vm3190_vm0, %v3142_v5, %v3182_v48 }
 0x30b   : > { %v3206_v41 = vmul.f32 1.050701, %v3198_v58 }
 0x30d   : > { %v3226_v10 = vrot.slane %v3206_v41, 2  ;;  %v3227_v36 = vrot.slane %v3206_v41, 4  ;;  %v3228_v29 = vrot.slane %v3206_v41, 6  ;;  %v3325_v50 = vsel %vm3268_vm7, %v3206_v41, -inf }
 0x30e   : > { %v16147_v6 = vld.sshfl [vmem:[#allocation1] sm:$0xff pattern:$0x75316420]  ;;  %v3326_v60 = vrot.slane %v3325_v50, 4 }
 0x30f   : > { %3596 = vst [vmem:[#allocation1] ss:$2 sm:$0xff] %v3588_v12  ;;  %v14933_v47 = vpop.eup %14932  ;;  %v3332_v35 = vsel %vm3268_vm7, %v3226_v10, -inf  ;;  %v3339_v62 = vsel %vm3268_vm7, %v3227_v36, -inf  ;;  %v3346_v55 = vsel %vm3268_vm7, %v3228_v29, -inf  ;;  %v2470_v29 = vadd.f32 %v16078_v24, %v16074_v11 }
 0x310   : > { %3598 = vst [vmem:[#allocation1 + $0x1] ss:$2 sm:$0xff] %v3589_v1  ;;  %v10528_v3 = vadd.f32 -1.0, %v14933_v47  ;;  %v3333_v53 = vrot.slane %v3332_v35, 4  ;;  %v3340_v57 = vrot.slane %v3339_v62, 4  ;;  %v3347_v26 = vrot.slane %v3346_v55, 4 }
 0x311   : > { %v3327_v22 = vmax.f32 %v3325_v50, %v3326_v60 }
 0x312   : > { %v3183_v61 = vmul.f32 1.6732632, %v10528_v3  ;;  %v3334_v45 = vmax.f32 %v3332_v35, %v3333_v53  ;;  %v3341_v44 = vmax.f32 %v3339_v62, %v3340_v57  ;;  %v3348_v49 = vmax.f32 %v3346_v55, %v3347_v26 }
 0x313   : > { %v3328_v5 = vrot.slane %v3327_v22, 2 }
 0x314   : > { %v3199_v56 = vsel %vm3191_vm8, %v3143_v13, %v3183_v61  ;;  %v3335_v7 = vrot.slane %v3334_v45, 2  ;;  %v3342_v8 = vrot.slane %v3341_v44, 2  ;;  %v3349_v52 = vrot.slane %v3348_v49, 2 }
 0x315   : > { %v3207_v20 = vmul.f32 1.050701, %v3199_v56  ;;  %v3329_v38 = vmax.f32 %v3327_v22, %v3328_v5  ;;  %v3024_v5 = vpop.f32.mrf.mxu2  ;;  %vm5126_vm8 = vcmask 1043456  }
 0x316   : > { %v3336_v46 = vmax.f32 %v3334_v45, %v3335_v7  ;;  %v3350_v58 = vmax.f32 %v3348_v49, %v3349_v52 }
 0x317   : > { %v16150_v31 = vld.sshfl [vmem:[#allocation1] sm:$0xff pattern:$0x75316420]  ;;  %v3229_v9 = vrot.slane %v3207_v20, 2  ;;  %v3230_v25 = vrot.slane %v3207_v20, 4  ;;  %v3231_v4 = vrot.slane %v3207_v20, 6 }
 0x318   : > { %3849 = vst [vmem:[#allocation1] ss:$2 sm:$0xff] %v3841_v32  ;;  %v3353_v37 = vsel %vm3268_vm7, %v3207_v20, -inf  ;;  %v3343_v32 = vmax.f32 %v3341_v44, %v3342_v8  ;;  %v3330_v50 = vrot.slane %v3329_v38, 1  ;;  %v3337_v3 = vrot.slane %v3336_v46, 1 }
 0x319   : > { %3851 = vst [vmem:[#allocation1 + $0x1] ss:$2 sm:$0xff] %v3842_v15  ;;  %v3354_v30 = vrot.slane %v3353_v37, 4  ;;  %v3360_v54 = vsel %vm3268_vm7, %v3229_v9, -inf  ;;  %v3367_v12 = vsel %vm3268_vm7, %v3230_v25, -inf  ;;  %v3374_v0 = vsel %vm3268_vm7, %v3231_v4, -inf }
 0x31a   : > { %v3361_v39 = vrot.slane %v3360_v54, 4  ;;  %v3368_v1 = vrot.slane %v3367_v12, 4  ;;  %v3375_v13 = vrot.slane %v3374_v0, 4  ;;  %v3344_v62 = vrot.slane %v3343_v32, 1 }
 0x31b   : > { %v3355_v43 = vmax.f32 %v3353_v37, %v3354_v30  ;;  %v3351_v53 = vrot.slane %v3350_v58, 1  ;;  %v3331_v22 = vmax.f32 %v3329_v38, %v3330_v50  ;;  %v3338_v45 = vmax.f32 %v3336_v46, %v3337_v3  ;;  %v2930_v37 = vpop.f32.mrf.mxu1 }
 0x31c   : > { %v3362_v28 = vmax.f32 %v3360_v54, %v3361_v39  ;;  %v3369_v48 = vmax.f32 %v3367_v12, %v3368_v1  ;;  %v3376_v15 = vmax.f32 %v3374_v0, %v3375_v13  ;;  %v2568_v20 = vadd.f32 %v16082_v63, %v2470_v29  ;;  %v3118_v0 = vpop.f32.mrf.mxu3  ;;  %v4139_v29 = vld [vmem:[#allocation3 + $0x9] sm:$0xf] }
 0x31d   : > { %v3356_v51 = vrot.slane %v3355_v43, 2  ;;  %v3345_v49 = vmax.f32 %v3343_v32, %v3344_v62  ;;  %v3352_v24 = vmax.f32 %v3350_v58, %v3351_v53  ;;  %v2944_v30 = vadd.f32 %v2930_v37, %v16104_v19  ;;  %v3026_v46 = vpop.f32.mrf.mxu2 }
 0x31e   : > { %v3363_v41 = vrot.slane %v3362_v28, 2  ;;  %v3370_v10 = vrot.slane %v3369_v48, 2  ;;  %v3377_v36 = vrot.slane %v3376_v15, 2  ;;  %v2662_v7 = vadd.f32 %v16102_v42, %v2568_v20 }
 0x31f   : > { %v3357_v47 = vmax.f32 %v3355_v43, %v3356_v51  ;;  %v3038_v39 = vadd.f32 %v3024_v5, %v2944_v30 }
 0x320   : > { %v16156_v40 = vld.sshfl [vmem:[#allocation1] sm:$0xff pattern:$0x75316420]  ;;  %v3364_v35 = vmax.f32 %v3362_v28, %v3363_v41  ;;  %v3378_v60 = vmax.f32 %v3376_v15, %v3377_v36  ;;  %v2756_v52 = vadd.f32 %v16106_v34, %v2662_v7 }
 0x321   : > { %3998 = vst [vmem:[#allocation1] ss:$2 sm:$0xff] %v3990_v16  ;;  %v3358_v55 = vrot.slane %v3357_v47, 1  ;;  %v3371_v16 = vmax.f32 %v3369_v48, %v3370_v10  ;;  %v3132_v1 = vadd.f32 %v3118_v0, %v3038_v39 }
 0x322   : > { %v3365_v57 = vrot.slane %v3364_v35, 1  ;;  %v3379_v56 = vrot.slane %v3378_v60, 1  ;;  %v2850_v13 = vadd.f32 %v16108_v2, %v2756_v52 }
 0x323   : > { %v3359_v61 = vmax.f32 %v3357_v47, %v3358_v55  ;;  %v3372_v26 = vrot.slane %v3371_v16, 1  ;;  %v3144_v42 = vadd.f32 %v16124_v27, %v3132_v1  ;;  %v2932_v38 = vpop.f32.mrf.mxu1 }
 0x324   : > { %v3366_v44 = vmax.f32 %v3364_v35, %v3365_v57  ;;  %v3380_v11 = vmax.f32 %v3378_v60, %v3379_v56  ;;  %v2945_v28 = vadd.f32 %v2932_v38, %v2850_v13  ;;  %v3120_v15 = vpop.f32.mrf.mxu3 }
 0x325   : > { %v3373_v9 = vmax.f32 %v3371_v16, %v3372_v26  ;;  %v3497_v25 = vmax.f32 %v3331_v22, %v3359_v61  ;;  %v3152_v19 = vmin.f32 %v3144_v42, 0.0  ;;  %vm3192_vm15 = vcmp.gt.f32.partialorder %v3144_v42, 0.0 }
 0x326   : > { %v3498_v4 = vmax.f32 %v3338_v45, %v3366_v44  ;;  %v3500_v54 = vmax.f32 %v3352_v24, %v3380_v11  ;;  %v3039_v51 = vadd.f32 %v3026_v46, %v2945_v28  ;;  %v4288_v24 = vld [vmem:[#allocation3 + $0xa] sm:$0xf] }
 0x327   : > { %v3499_v8 = vmax.f32 %v3345_v49, %v3373_v9  ;;  %v3164_v32 = vmul.f32 1.442695, %v3152_v19 }
 0x328   : > { %v3534_v12 = vsel %vm2226_vm9, %v3498_v4, %v3497_v25  ;;  %v3133_v58 = vadd.f32 %v3120_v15, %v3039_v51 }
 0x329   : > { %v3535_v63 = vsel %vm2228_vm10, %v3499_v8, %v3534_v12  ;;  %14934 = vpow2.f32 %v3164_v32 }
 0x32a   : > { %v3536_v43 = vsel %vm2230_vm11, %v3500_v54, %v3535_v63  ;;  %v3145_v41 = vadd.f32 %v16124_v27, %v3133_v58 }
 0x32b   : > { %3549 = vst [vmem:[#allocation3 + $0x11] sm:$0xf] %v3536_v43 }
 0x32c   : > { %v3153_v47 = vmin.f32 %v3145_v41, 0.0  ;;  %vm3193_vm3 = vcmp.gt.f32.partialorder %v3145_v41, 0.0 }
 0x32e   : > { %v3166_v2 = vmul.f32 1.442695, %v3153_v47 }
 0x32f   : > { %v14935_v10 = vpop.eup %14934 }
 0x330   : > { %v10529_v36 = vadd.f32 -1.0, %v14935_v10  ;;  %14936 = vpow2.f32 %v3166_v2 }
 0x332   : > { %v3554_v48 = vld [vmem:[#allocation3 + $0x10] sm:$0xf]  ;;  %v3184_v35 = vmul.f32 1.6732632, %v10529_v36 }
 0x333   : > { %3564 = vst [vmem:[#allocation1 + $0x10] ss:$2 sm:$0xff] %v3554_v48  ;;  %v3991_v34 = vld [vmem:[#allocation3 + $0x10] sm:$0xf] }
 0x334   : > { %4000 = vst [vmem:[#allocation1 + $0x1] ss:$2 sm:$0xff] %v3991_v34  ;;  %v4140_v3 = vld [vmem:[#allocation3 + $0x11] sm:$0xf]  ;;  %v3200_v62 = vsel %vm3192_vm15, %v3144_v42, %v3184_v35  ;;  %vm5237_vm15 = vcmask 1040384  }
 0x335   : > { %v3208_v55 = vmul.f32 1.050701, %v3200_v62  ;;  %v4289_v56 = vld [vmem:[#allocation3 + $0x12] sm:$0xf] }
 0x336   : > { %v14937_v16 = vpop.eup %14936 }
 0x337   : > { %v3232_v60 = vrot.slane %v3208_v55, 2  ;;  %v3233_v53 = vrot.slane %v3208_v55, 4  ;;  %v3234_v57 = vrot.slane %v3208_v55, 6  ;;  %v3381_v61 = vsel %vm3268_vm7, %v3208_v55, -inf }
 0x338   : > { %v10530_v26 = vadd.f32 -1.0, %v14937_v16  ;;  %v3382_v49 = vrot.slane %v3381_v61, 4  ;;  %v2475_v55 = vadd.f32 %v16087_v23, %v16084_v17 }
 0x339   : > { %v3388_v22 = vsel %vm3268_vm7, %v3232_v60, -inf  ;;  %v3395_v45 = vsel %vm3268_vm7, %v3233_v53, -inf  ;;  %v3402_v44 = vsel %vm3268_vm7, %v3234_v57, -inf }
 0x33a   : > { %v3389_v9 = vrot.slane %v3388_v22, 4  ;;  %v3396_v11 = vrot.slane %v3395_v45, 4  ;;  %v3185_v25 = vmul.f32 1.6732632, %v10530_v26  ;;  %v3403_v4 = vrot.slane %v3402_v44, 4 }
 0x33b   : > { %v16174_v50 = vld.sshfl [vmem:[#allocation1] sm:$0xff pattern:$0x75316420]  ;;  %v3383_v5 = vmax.f32 %v3381_v61, %v3382_v49  ;;  %v10671_v49 = vld [vmem:[%s21231_s5 + $0x70] sm:$0xf] }
 0x33c   : > { %4147 = vst [vmem:[#allocation1] ss:$2 sm:$0xff] %v4139_v29  ;;  %v3201_v37 = vsel %vm3193_vm3, %v3145_v41, %v3185_v25  ;;  %v3390_v7 = vmax.f32 %v3388_v22, %v3389_v9  ;;  %v3397_v8 = vmax.f32 %v3395_v45, %v3396_v11  ;;  %v3404_v54 = vmax.f32 %v3402_v44, %v3403_v4  ;;  %v2935_v44 = vpop.f32.mrf.mxu1  ;;  %v14145_v9 = vld [vmem:[%s21231_s5 + $0x74] sm:$0xf0]  ;;  %vm17433_vm3 = vmor %vm5237_vm15, %vm2228_vm10 }
 0x33d   : > { %4149 = vst [vmem:[#allocation1 + $0x1] ss:$2 sm:$0xff] %v4140_v3  ;;  %v3209_v30 = vmul.f32 1.050701, %v3201_v37  ;;  %v3384_v39 = vrot.slane %v3383_v5, 2  ;;  %v10672_v37 = vor.u32 %v14145_v9, %v10671_v49 }
 0x33e   : > { %v3391_v43 = vrot.slane %v3390_v7, 2  ;;  %v3398_v1 = vrot.slane %v3397_v8, 2  ;;  %v3405_v19 = vrot.slane %v3404_v54, 2 }
 0x33f   : > { %v3235_v12 = vrot.slane %v3209_v30, 2  ;;  %v3236_v0 = vrot.slane %v3209_v30, 4  ;;  %v3237_v52 = vrot.slane %v3209_v30, 6  ;;  %v3409_v63 = vsel %vm3268_vm7, %v3209_v30, -inf  ;;  %3813 = vmatpush.bf16.msrb.mxu3 %v10672_v37 }
 0x340   : > { %v3410_v13 = vrot.slane %v3409_v63, 4  ;;  %v3385_v15 = vmax.f32 %v3383_v5, %v3384_v39  ;;  %v3392_v34 = vmax.f32 %v3390_v7, %v3391_v43  ;;  %v3399_v41 = vmax.f32 %v3397_v8, %v3398_v1 }
 0x341   : > { %v3416_v42 = vsel %vm3268_vm7, %v3235_v12, -inf  ;;  %v3423_v38 = vsel %vm3268_vm7, %v3236_v0, -inf  ;;  %v3430_v46 = vsel %vm3268_vm7, %v3237_v52, -inf  ;;  %v3406_v36 = vmax.f32 %v3404_v54, %v3405_v19  ;;  %v10663_v52 = vld [vmem:[%s21231_s5 + $0x60] sm:$0xf] }
 0x342   : > { %v3417_v28 = vrot.slane %v3416_v42, 4  ;;  %v3411_v32 = vmax.f32 %v3409_v63, %v3410_v13  ;;  %v3424_v51 = vrot.slane %v3423_v38, 4  ;;  %v3431_v48 = vrot.slane %v3430_v46, 4  ;;  %v14143_v63 = vld [vmem:[%s21231_s5 + $0x64] sm:$0xf0] }
 0x343   : > { %v3386_v16 = vrot.slane %v3385_v15, 1  ;;  %v3393_v60 = vrot.slane %v3392_v34, 1  ;;  %v3400_v57 = vrot.slane %v3399_v41, 1  ;;  %v3407_v22 = vrot.slane %v3406_v36, 1 }
 0x344   : > { %v16180_v20 = vld.sshfl [vmem:[#allocation1] sm:$0xff pattern:$0x75316420]  ;;  %v3418_v58 = vmax.f32 %v3416_v42, %v3417_v28  ;;  %v3412_v47 = vrot.slane %v3411_v32, 2  ;;  %v3425_v10 = vmax.f32 %v3423_v38, %v3424_v51  ;;  %v3432_v2 = vmax.f32 %v3430_v46, %v3431_v48  ;;  %v3029_v38 = vpop.f32.mrf.mxu2  ;;  %v3123_v46 = vpop.f32.mrf.mxu3  ;;  %v14160_v48 = vld [vmem:[%s21231_s5 + $0xf4] sm:$0xf] }
 0x345   : > { %4298 = vst [vmem:[#allocation1 + $0x1] ss:$2 sm:$0xff] %v4289_v56  ;;  %v3394_v25 = vmax.f32 %v3392_v34, %v3393_v60  ;;  %v2570_v5 = vadd.f32 %v16090_v18, %v2475_v55  ;;  %v3401_v7 = vmax.f32 %v3399_v41, %v3400_v57  ;;  %v3408_v54 = vmax.f32 %v3406_v36, %v3407_v22  ;;  %v10609_v34 = vld [vmem:[%s21231_s5 + $0xf8] sm:$0xf0]  ;;  %v2937_v41 = vpop.f32.mrf.mxu1  ;;  %v10601_v60 = vld [vmem:[%s21231_s5 + $0xe8] sm:$0xf0] }
 0x346   : > { %4296 = vst [vmem:[#allocation1] ss:$2 sm:$0xff] %v4288_v24  ;;  %v3419_v29 = vrot.slane %v3418_v58, 2  ;;  %v3413_v3 = vmax.f32 %v3411_v32, %v3412_v47  ;;  %v3426_v35 = vrot.slane %v3425_v10, 2  ;;  %v3433_v62 = vrot.slane %v3432_v2, 2 }
 0x347   : > { %v3387_v24 = vmax.f32 %v3385_v15, %v3386_v16  ;;  %v2664_v39 = vadd.f32 %v16110_v21, %v2570_v5  ;;  %v2946_v18 = vadd.f32 %v2935_v44, %v16112_v59  ;;  %v10664_v1 = vor.u32 %v14143_v63, %v10663_v52  ;;  %v10607_v21 = vld [vmem:[%s21231_s5 + $0xf0] sm:$0xf]  ;;  %v14161_v59 = vld [vmem:[%s21231_s5 + $0xf4] sm:$0xf0]  ;;  %v10585_v52 = vld [vmem:[%s21231_s5 + $0xc8] sm:$0xf0] }
 0x348   : > { %v3420_v53 = vmax.f32 %v3418_v58, %v3419_v29  ;;  %v3414_v61 = vrot.slane %v3413_v3, 1  ;;  %v3427_v26 = vmax.f32 %v3425_v10, %v3426_v35  ;;  %v3434_v56 = vmax.f32 %v3432_v2, %v3433_v62  ;;  %v10655_v58 = vld [vmem:[%s21231_s5 + $0x50] sm:$0xf]  ;;  %v14141_v10 = vld [vmem:[%s21231_s5 + $0x54] sm:$0xf0] }
 0x349   : > { %v2758_v19 = vadd.f32 %v16114_v33, %v2664_v39  ;;  %v3040_v32 = vadd.f32 %v3029_v38, %v2946_v18  ;;  %3814 = vmatpush.bf16.msrb.mxu3 %v10664_v1  ;;  %v10608_v15 = vor.u32 %v14161_v59, %v10607_v21  ;;  %v10612_v47 = vor.u32 %v14160_v48, %v10609_v34  ;;  %v14159_v35 = vld [vmem:[%s21231_s5 + $0xe4] sm:$0xf0]  ;;  %v14158_v62 = vld [vmem:[%s21231_s5 + $0xe4] sm:$0xf]  ;;  %v10577_v48 = vld [vmem:[%s21231_s5 + $0xb8] sm:$0xf0] }
 0x34a   : > { %v3421_v45 = vrot.slane %v3420_v53, 1  ;;  %v3415_v11 = vmax.f32 %v3413_v3, %v3414_v61  ;;  %v3428_v17 = vrot.slane %v3427_v26, 1  ;;  %v3435_v23 = vrot.slane %v3434_v56, 1  ;;  %v10599_v3 = vld [vmem:[%s21231_s5 + $0xe0] sm:$0xf] }
 0x34b   : > { %v3134_v33 = vadd.f32 %v3123_v46, %v3040_v32  ;;  %v2852_v2 = vadd.f32 %v16118_v14, %v2758_v19  ;;  %3705 = vmatpush.bf16.msrb.mxu1 %v10608_v15  ;;  %v10656_v29 = vor.u32 %v14141_v10, %v10655_v58  ;;  %3719 = vmatpush.bf16.msrb.mxu2 %v10612_v47  ;;  %v14153_v32 = vld [vmem:[%s21231_s5 + $0xb4] sm:$0xf0]  ;;  %v10623_v15 = vld [vmem:[%s21231_s5 + $0x10] sm:$0xf] }
 0x34c   : > { %v3422_v4 = vmax.f32 %v3420_v53, %v3421_v45  ;;  %v3429_v8 = vmax.f32 %v3427_v26, %v3428_v17  ;;  %v3436_v30 = vmax.f32 %v3434_v56, %v3435_v23  ;;  %v3501_v12 = vmax.f32 %v3387_v24, %v3415_v11  ;;  %v10647_v53 = vld [vmem:[%s21231_s5 + $0x40] sm:$0xf]  ;;  %v3031_v57 = vpop.f32.mrf.mxu2  ;;  %v14139_v26 = vld [vmem:[%s21231_s5 + $0x44] sm:$0xf0]  ;;  %v3125_v49 = vpop.f32.mrf.mxu3  ;;  %v10591_v17 = vld [vmem:[%s21231_s5 + $0xd0] sm:$0xf] }
 0x34d   : > { %v16227_v36 = vadd.f32 %v16124_v27, %v3134_v33  ;;  %v2947_v55 = vadd.f32 %v2937_v41, %v2852_v2  ;;  %3815 = vmatpush.bf16.msrb.mxu3 %v10656_v29  ;;  %v10600_v16 = vor.u32 %v14159_v35, %v10599_v3  ;;  %v10604_v61 = vor.u32 %v14158_v62, %v10601_v60  ;;  %v14157_v23 = vld [vmem:[%s21231_s5 + $0xd4] sm:$0xf0]  ;;  %v10831_v58 = vld [vmem:[%s21231_s5 + $0x1f0] sm:$0xf]  ;;  %v10567_v2 = vld [vmem:[%s21231_s5 + $0xa0] sm:$0xf] }
 0x34e   : > { %v3502_v0 = vmax.f32 %v3394_v25, %v3422_v4  ;;  %v3503_v43 = vmax.f32 %v3401_v7, %v3429_v8  ;;  %v3504_v13 = vmax.f32 %v3408_v54, %v3436_v30  ;;  %v10648_v45 = vor.u32 %v14139_v26, %v10647_v53  ;;  %v14156_v25 = vld [vmem:[%s21231_s5 + $0xd4] sm:$0xf]  ;;  %v10593_v4 = vld [vmem:[%s21231_s5 + $0xd8] sm:$0xf0]  ;;  %v14137_v7 = vld [vmem:[%s21231_s5 + $0x34] sm:$0xf0] }
 0x34f   : > { %v3154_v14 = vmin.f32 %v16227_v36, 0.0  ;;  %v3041_v22 = vadd.f32 %v3031_v57, %v2947_v55  ;;  %3706 = vmatpush.bf16.msrb.mxu1 %v10600_v16  ;;  %3720 = vmatpush.bf16.msrb.mxu2 %v10604_v61  ;;  %v10592_v24 = vor.u32 %v14157_v23, %v10591_v17  ;;  %vm3194_vm5 = vcmp.gt.f32.partialorder %v16227_v36, 0.0  ;;  %v10583_v8 = vld [vmem:[%s21231_s5 + $0xc0] sm:$0xf]  ;;  %v3590_v30 = vld [vmem:[#allocation3 + $0x11] sm:$0xf] }
 0x350   : > { %v3537_v42 = vsel %vm2226_vm9, %v3502_v0, %v3501_v12  ;;  %v10596_v5 = vor.u32 %v14156_v25, %v10593_v4  ;;  %v14155_v12 = vld [vmem:[%s21231_s5 + $0xc4] sm:$0xf0]  ;;  %v14154_v0 = vld [vmem:[%s21231_s5 + $0xc4] sm:$0xf]  ;;  %v14133_v34 = vld [vmem:[%s21231_s5 + $0x14] sm:$0xf0] }
 0x351   : > { %v3538_v28 = vsel %vm2228_vm10, %v3503_v43, %v3537_v42  ;;  %v3168_v56 = vmul.f32 1.442695, %v3154_v14  ;;  %v3135_v9 = vadd.f32 %v3125_v49, %v3041_v22  ;;  %3816 = vmatpush.bf16.msrb.mxu3 %v10648_v45  ;;  %v10584_v18 = vor.u32 %v14155_v12, %v10583_v8  ;;  %v14135_v42 = vld [vmem:[%s21231_s5 + $0x24] sm:$0xf0]  ;;  %v14193_v10 = vld [vmem:[%s21231_s5 + $0x1f4] sm:$0xf0] }
 0x352   : > { %v3539_v51 = vsel %vm2230_vm11, %v3504_v13, %v3538_v28  ;;  %v10588_v1 = vor.u32 %v14154_v0, %v10585_v52  ;;  %v10631_v13 = vld [vmem:[%s21231_s5 + $0x20] sm:$0xf]  ;;  %v10575_v28 = vld [vmem:[%s21231_s5 + $0xb0] sm:$0xf]  ;;  %v10624_v47 = vor.u32 %v14133_v34, %v10623_v15  ;;  %v14151_v29 = vld [vmem:[%s21231_s5 + $0xa4] sm:$0xf0]  ;;  %v10832_v35 = vor.u32 %v14193_v10, %v10831_v58 }
 0x353   : > { %3550 = vst [vmem:[#allocation3 + $0x19] sm:$0xf] %v3539_v51  ;;  %14938 = vpow2.f32 %v3168_v56  ;;  %v16249_v11 = vadd.f32 %v16124_v27, %v3135_v9  ;;  %v10639_v27 = vld [vmem:[%s21231_s5 + $0x30] sm:$0xf]  ;;  %3707 = vmatpush.bf16.msrb.mxu1 %v10592_v24  ;;  %3721 = vmatpush.bf16.msrb.mxu2 %v10596_v5  ;;  %v10632_v19 = vor.u32 %v14135_v42, %v10631_v13  ;;  %v14152_v51 = vld [vmem:[%s21231_s5 + $0xb4] sm:$0xf] }
 0x354   : > { %v10640_v54 = vor.u32 %v14137_v7, %v10639_v27  ;;  %v10576_v59 = vor.u32 %v14153_v32, %v10575_v28  ;;  %v10580_v33 = vor.u32 %v14152_v51, %v10577_v48  ;;  %v10569_v62 = vld [vmem:[%s21231_s5 + $0xa8] sm:$0xf0]  ;;  %v10568_v14 = vor.u32 %v14151_v29, %v10567_v2  ;;  %v10615_v16 = vld [vmem:[%s21231_s5] sm:$0xf]  ;;  %v14131_v60 = vld [vmem:[%s21231_s5 + $0x4] sm:$0xf0]  ;;  %4107 = vmatpush.bf16.msrb.mxu0 %v10832_v35 }
 0x355   : > { %v3155_v37 = vmin.f32 %v16249_v11, 0.0  ;;  %vm3195_vm6 = vcmp.gt.f32.partialorder %v16249_v11, 0.0  ;;  %v14176_v53 = vld [vmem:[%s21231_s5 + $0x174] sm:$0xf]  ;;  %v3843_v61 = vld [vmem:[#allocation3 + $0x12] sm:$0xf]  ;;  %v10616_v23 = vor.u32 %v14131_v60, %v10615_v16 }
 0x356   : > { %3817 = vmatpush.bf16.msrb.mxu3 %v10640_v54  ;;  %v10823_v25 = vld [vmem:[%s21231_s5 + $0x1e0] sm:$0xf]  ;;  %v14191_v4 = vld [vmem:[%s21231_s5 + $0x1e4] sm:$0xf0]  ;;  %v14149_v13 = vld [vmem:[%s21231_s5 + $0x94] sm:$0xf0] }
 0x357   : > { %v3170_v43 = vmul.f32 1.442695, %v3155_v37  ;;  %3708 = vmatpush.bf16.msrb.mxu1 %v10584_v18  ;;  %3722 = vmatpush.bf16.msrb.mxu2 %v10588_v1  ;;  %v10824_v8 = vor.u32 %v14191_v4, %v10823_v25  ;;  %v14148_v42 = vld [vmem:[%s21231_s5 + $0x94] sm:$0xf]  ;;  %v10561_v28 = vld [vmem:[%s21231_s5 + $0x98] sm:$0xf0] }
 0x358   : > { %v14174_v32 = vld [vmem:[%s21231_s5 + $0x164] sm:$0xf]  ;;  %v10745_v51 = vld [vmem:[%s21231_s5 + $0x168] sm:$0xf0]  ;;  %v14189_v10 = vld [vmem:[%s21231_s5 + $0x1d4] sm:$0xf0] }
 0x359   : > { %v14939_v63 = vpop.eup %14938  ;;  %14940 = vpow2.f32 %v3170_v43  ;;  %4108 = vmatpush.bf16.msrb.mxu0 %v10824_v8  ;;  %v10553_v60 = vld [vmem:[%s21231_s5 + $0x88] sm:$0xf0]  ;;  %v10751_v4 = vld [vmem:[%s21231_s5 + $0x170] sm:$0xf] }
 0x35a   : > { %v3555_v44 = vld [vmem:[#allocation3 + $0x18] sm:$0xf]  ;;  %v10531_v46 = vadd.f32 -1.0, %v14939_v63  ;;  %3818 = vmatpush.bf16.msrb.mxu3 %v10632_v19  ;;  %v10559_v63 = vld [vmem:[%s21231_s5 + $0x90] sm:$0xf] }
 0x35b   : > { %3566 = vst [vmem:[#allocation1 + $0x11] ss:$2 sm:$0xff] %v3555_v44  ;;  %v3591_v39 = vld [vmem:[#allocation3 + $0x19] sm:$0xf]  ;;  %3709 = vmatpush.bf16.msrb.mxu1 %v10576_v59  ;;  %3723 = vmatpush.bf16.msrb.mxu2 %v10580_v33  ;;  %v10753_v44 = vld [vmem:[%s21231_s5 + $0x178] sm:$0xf0]  ;;  %v10560_v19 = vor.u32 %v14149_v13, %v10559_v63  ;;  %v10748_v33 = vor.u32 %v14174_v32, %v10745_v51 }
 0x35c   : > { %v3186_v21 = vmul.f32 1.6732632, %v10531_v46  ;;  %v3844_v49 = vld [vmem:[#allocation3 + $0x1a] sm:$0xf]  ;;  %v10756_v24 = vor.u32 %v14176_v53, %v10753_v44 }
 0x35d   : > { %v3992_v15 = vld [vmem:[#allocation3 + $0x18] sm:$0xf] }
 0x35e   : > { %v3202_v41 = vsel %vm3194_vm5, %v16227_v36, %v3186_v21  ;;  %v14150_v36 = vld [vmem:[%s21231_s5 + $0xa4] sm:$0xf]  ;;  %3819 = vmatpush.bf16.msrb.mxu3 %v10624_v47  ;;  %v10815_v47 = vld [vmem:[%s21231_s5 + $0x1d0] sm:$0xf]  ;;  %v10743_v32 = vld [vmem:[%s21231_s5 + $0x160] sm:$0xf] }
 0x35f   : > { %v3210_v3 = vmul.f32 1.050701, %v3202_v41  ;;  %v10572_v55 = vor.u32 %v14150_v36, %v10569_v62  ;;  %v14941_v57 = vpop.eup %14940  ;;  %3710 = vmatpush.bf16.msrb.mxu1 %v10568_v14  ;;  %v10551_v36 = vld [vmem:[%s21231_s5 + $0x80] sm:$0xf]  ;;  %v14147_v62 = vld [vmem:[%s21231_s5 + $0x84] sm:$0xf0]  ;;  %v10816_v25 = vor.u32 %v14189_v10, %v10815_v47  ;;  %vm17472_vm5 = vmor %vm17433_vm3, %vm2232_vm12 }
 0x360   : > { %v10532_v17 = vadd.f32 -1.0, %v14941_v57  ;;  %v14146_v14 = vld [vmem:[%s21231_s5 + $0x84] sm:$0xf]  ;;  %v10729_v47 = vld [vmem:[%s21231_s5 + $0x148] sm:$0xf0]  ;;  %vm17505_vm12 = vmor %vm17472_vm5, %vm2236_vm14 }
 0x361   : > { %v3238_v26 = vrot.slane %v3210_v3, 2  ;;  %v3239_v56 = vrot.slane %v3210_v3, 4  ;;  %v3240_v22 = vrot.slane %v3210_v3, 6  ;;  %v3437_v45 = vsel %vm3268_vm7, %v3210_v3, -inf  ;;  %3724 = vmatpush.bf16.msrb.mxu2 %v10572_v55  ;;  %4109 = vmatpush.bf16.msrb.mxu0 %v10816_v25  ;;  %v10799_v10 = vld [vmem:[%s21231_s5 + $0x1b0] sm:$0xf] }
 0x362   : > { %v16289_v38 = vld.sshfl [vmem:[#allocation1 + $0x10] sm:$0xff pattern:$0x75316420]  ;;  %v3438_v9 = vrot.slane %v3437_v45, 4  ;;  %v3187_v52 = vmul.f32 1.6732632, %v10532_v17  ;;  %3820 = vmatpush.bf16.msrb.mxu3 %v10616_v23  ;;  %v10556_v8 = vor.u32 %v14146_v14, %v10553_v60 }
 0x363   : > { %3600 = vst [vmem:[#allocation1 + $0x10] ss:$2 sm:$0xff] %v3590_v30  ;;  %v3444_v37 = vsel %vm3268_vm7, %v3238_v26, -inf  ;;  %v3451_v5 = vsel %vm3268_vm7, %v3239_v56, -inf  ;;  %v3458_v7 = vsel %vm3268_vm7, %v3240_v22, -inf  ;;  %3711 = vmatpush.bf16.msrb.mxu1 %v10560_v19 }
 0x364   : > { %3602 = vst [vmem:[#allocation1 + $0x11] ss:$2 sm:$0xff] %v3591_v39  ;;  %v3439_v30 = vmax.f32 %v3437_v45, %v3438_v9  ;;  %v3445_v54 = vrot.slane %v3444_v37, 4  ;;  %v3452_v12 = vrot.slane %v3451_v5, 4  ;;  %v3459_v0 = vrot.slane %v3458_v7, 4 }
 0x365   : > { %v3203_v46 = vsel %vm3195_vm6, %v16249_v11, %v3187_v52  ;;  %v10564_v11 = vor.u32 %v14148_v42, %v10561_v28  ;;  %v10673_v9 = vld [vmem:[%s21231_s5 + $0x78] sm:$0xf0]  ;;  %v10665_v28 = vld [vmem:[%s21231_s5 + $0x68] sm:$0xf0] }
 0x366   : > { %v3440_v39 = vrot.slane %v3439_v30, 2  ;;  %v3446_v43 = vmax.f32 %v3444_v37, %v3445_v54  ;;  %v3453_v18 = vmax.f32 %v3451_v5, %v3452_v12  ;;  %v3460_v1 = vmax.f32 %v3458_v7, %v3459_v0  ;;  %3972 = vmatpush.bf16.msra.mxu3 %v10756_v24  ;;  %v14177_v37 = vld [vmem:[%s21231_s5 + $0x174] sm:$0xf0]  ;;  %v14172_v54 = vld [vmem:[%s21231_s5 + $0x154] sm:$0xf] }
 0x367   : > { %v3211_v48 = vmul.f32 1.050701, %v3203_v46  ;;  %3725 = vmatpush.bf16.msrb.mxu2 %v10564_v11  ;;  %v10552_v7 = vor.u32 %v14147_v62, %v10551_v36  ;;  %v10737_v12 = vld [vmem:[%s21231_s5 + $0x158] sm:$0xf0]  ;;  %v10807_v0 = vld [vmem:[%s21231_s5 + $0x1c0] sm:$0xf] }
 0x368   : > { %v16376_v21 = vmax.f32 %v3439_v30, %v3440_v39  ;;  %v3447_v59 = vrot.slane %v3446_v43, 2  ;;  %v3454_v58 = vrot.slane %v3453_v18, 2  ;;  %v3461_v41 = vrot.slane %v3460_v1, 2  ;;  %v14140_v62 = vld [vmem:[%s21231_s5 + $0x54] sm:$0xf] }
 0x369   : > { %v3241_v2 = vrot.slane %v3211_v48, 2  ;;  %v3242_v29 = vrot.slane %v3211_v48, 4  ;;  %v3243_v3 = vrot.slane %v3211_v48, 6  ;;  %v3465_v35 = vsel %vm3268_vm7, %v3211_v48, -inf  ;;  %3712 = vmatpush.bf16.msrb.mxu1 %v10552_v7  ;;  %v10657_v14 = vld [vmem:[%s21231_s5 + $0x58] sm:$0xf0] }
 0x36a   : > { %v16378_v34 = vmax.f32 %v3446_v43, %v3447_v59  ;;  %3973 = vmatpush.bf16.msra.mxu3 %v10748_v33  ;;  %v3442_v16 = vrot.slane %v16376_v21, 1  ;;  %v3466_v53 = vrot.slane %v3465_v35, 4  ;;  %v16406_v22 = vmax.f32 %v3453_v18, %v3454_v58  ;;  %v14187_v18 = vld [vmem:[%s21231_s5 + $0x1c4] sm:$0xf0]  ;;  %v10721_v25 = vld [vmem:[%s21231_s5 + $0x138] sm:$0xf0] }
 0x36b   : > { %v16350_v27 = vld.sshfl [vmem:[#allocation1 + $0x10] sm:$0xff pattern:$0x75316420]  ;;  %v3472_v57 = vsel %vm3268_vm7, %v3241_v2, -inf  ;;  %v3486_v26 = vsel %vm3268_vm7, %v3243_v3, -inf  ;;  %v16408_v45 = vmax.f32 %v3460_v1, %v3461_v41  ;;  %v10752_v43 = vor.u32 %v14177_v37, %v10751_v4  ;;  %3726 = vmatpush.bf16.msrb.mxu2 %v10556_v8 }
 0x36c   : > { %3853 = vst [vmem:[#allocation1 + $0x10] ss:$2 sm:$0xff] %v3843_v61  ;;  %v3479_v61 = vsel %vm3268_vm7, %v3242_v29, -inf  ;;  %v3449_v56 = vrot.slane %v16378_v34, 1  ;;  %v3473_v44 = vrot.slane %v3472_v57, 4  ;;  %v3467_v17 = vmax.f32 %v3465_v35, %v3466_v53 }
 0x36d   : > { %3855 = vst [vmem:[#allocation1 + $0x11] ss:$2 sm:$0xff] %v3844_v49  ;;  %v14144_v49 = vld [vmem:[%s21231_s5 + $0x74] sm:$0xf]  ;;  %v3480_v23 = vrot.slane %v3479_v61, 4  ;;  %v3487_v24 = vrot.slane %v3486_v26, 4  ;;  %v10740_v46 = vor.u32 %v14172_v54, %v10737_v12  ;;  %v10808_v19 = vor.u32 %v14187_v18, %v10807_v0 }
 0x36e   : > { %v3474_v5 = vmax.f32 %v3472_v57, %v3473_v44  ;;  %v10676_v30 = vor.u32 %v14144_v49, %v10673_v9  ;;  %v3468_v52 = vrot.slane %v3467_v17, 2  ;;  %v14142_v1 = vld [vmem:[%s21231_s5 + $0x64] sm:$0xf]  ;;  %v3456_v13 = vrot.slane %v16406_v22, 1  ;;  %v14175_v33 = vld [vmem:[%s21231_s5 + $0x164] sm:$0xf0] }
 0x36f   : > { %v3481_v63 = vmax.f32 %v3479_v61, %v3480_v23  ;;  %v3488_v39 = vmax.f32 %v3486_v26, %v3487_v24  ;;  %3958 = vmatpush.bf16.msra.mxu2 %v10752_v43  ;;  %v10668_v11 = vor.u32 %v14142_v1, %v10665_v28  ;;  %3974 = vmatpush.bf16.msra.mxu3 %v10740_v46  ;;  %v14185_v2 = vld [vmem:[%s21231_s5 + $0x1b4] sm:$0xf0]  ;;  %v3463_v60 = vrot.slane %v16408_v45, 1  ;;  %v10735_v26 = vld [vmem:[%s21231_s5 + $0x150] sm:$0xf] }
 0x370   : > { %v3475_v42 = vrot.slane %v3474_v5, 2  ;;  %v3469_v51 = vmax.f32 %v3467_v17, %v3468_v52  ;;  %3827 = vmatpush.bf16.msra.mxu1 %v10676_v30  ;;  %v10744_v41 = vor.u32 %v14175_v33, %v10743_v32  ;;  %4110 = vmatpush.bf16.msrb.mxu0 %v10808_v19  ;;  %v10800_v57 = vor.u32 %v14185_v2, %v10799_v10  ;;  %v14173_v44 = vld [vmem:[%s21231_s5 + $0x154] sm:$0xf0]  ;;  %v14168_v24 = vld [vmem:[%s21231_s5 + $0x134] sm:$0xf] }
 0x371   : > { %v3482_v59 = vrot.slane %v3481_v63, 2  ;;  %v3489_v48 = vrot.slane %v3488_v39, 2  ;;  %v10660_v61 = vor.u32 %v14140_v62, %v10657_v14  ;;  %v10736_v23 = vor.u32 %v14173_v44, %v10735_v26  ;;  %v10791_v8 = vld [vmem:[%s21231_s5 + $0x1a0] sm:$0xf]  ;;  %v14183_v30 = vld [vmem:[%s21231_s5 + $0x1a4] sm:$0xf0] }
 0x372   : > { %v3476_v58 = vmax.f32 %v3474_v5, %v3475_v42  ;;  %v3470_v29 = vrot.slane %v3469_v51, 1  ;;  %v3443_v4 = vmax.f32 %v16376_v21, %v3442_v16  ;;  %v3450_v37 = vmax.f32 %v16378_v34, %v3449_v56  ;;  %v14138_v54 = vld [vmem:[%s21231_s5 + $0x44] sm:$0xf]  ;;  %v10649_v56 = vld [vmem:[%s21231_s5 + $0x48] sm:$0xf0] }
 0x373   : > { %v3483_v3 = vmax.f32 %v3481_v63, %v3482_v59  ;;  %v3490_v35 = vmax.f32 %v3488_v39, %v3489_v48  ;;  %3959 = vmatpush.bf16.msra.mxu2 %v10744_v41  ;;  %v10724_v7 = vor.u32 %v14168_v24, %v10721_v25  ;;  %v3457_v21 = vmax.f32 %v16406_v22, %v3456_v13  ;;  %v10727_v0 = vld [vmem:[%s21231_s5 + $0x140] sm:$0xf]  ;;  %v14171_v52 = vld [vmem:[%s21231_s5 + $0x144] sm:$0xf0]  ;;  %v14166_v43 = vld [vmem:[%s21231_s5 + $0x124] sm:$0xf] }
 0x374   : > { %v16396_v55 = vld.sshfl [vmem:[#allocation1 + $0x10] sm:$0xff pattern:$0x75316420]  ;;  %v3477_v53 = vrot.slane %v3476_v58, 1  ;;  %v3471_v49 = vmax.f32 %v3469_v51, %v3470_v29  ;;  %3828 = vmatpush.bf16.msra.mxu1 %v10668_v11  ;;  %4111 = vmatpush.bf16.msrb.mxu0 %v10800_v57  ;;  %v10792_v34 = vor.u32 %v14183_v30, %v10791_v8  ;;  %v3464_v63 = vmax.f32 %v16408_v45, %v3463_v60  ;;  %v10713_v18 = vld [vmem:[%s21231_s5 + $0x128] sm:$0xf0] }
 0x375   : > { %4002 = vst [vmem:[#allocation1 + $0x10] ss:$2 sm:$0xff] %v3992_v15  ;;  %v14170_v15 = vld [vmem:[%s21231_s5 + $0x144] sm:$0xf]  ;;  %v3484_v9 = vrot.slane %v3483_v3, 1  ;;  %v3491_v17 = vrot.slane %v3490_v35, 1  ;;  %v16515_v13 = vpack.c.bf16 %v16289_v38, %v16147_v6  ;;  %v10652_v45 = vor.u32 %v14138_v54, %v10649_v56 }
 0x376   : > { %v10732_v36 = vor.u32 %v14170_v15, %v10729_v47  ;;  %v3478_v5 = vmax.f32 %v3476_v58, %v3477_v53  ;;  %v3505_v39 = vmax.f32 %v3443_v4, %v3471_v49  ;;  %v10783_v1 = vld [vmem:[%s21231_s5 + $0x190] sm:$0xf]  ;;  %v10728_v46 = vor.u32 %v14171_v52, %v10727_v0  ;;  %v14181_v19 = vld [vmem:[%s21231_s5 + $0x194] sm:$0xf0]  ;;  %v14136_v28 = vld [vmem:[%s21231_s5 + $0x34] sm:$0xf] }
 0x377   : > { %v3485_v16 = vmax.f32 %v3483_v3, %v3484_v9  ;;  %v3492_v12 = vmax.f32 %v3490_v35, %v3491_v17  ;;  %3960 = vmatpush.bf16.msra.mxu2 %v10736_v23  ;;  %v10716_v59 = vor.u32 %v14166_v43, %v10713_v18  ;;  %v10641_v6 = vld [vmem:[%s21231_s5 + $0x38] sm:$0xf0]  ;;  %v10719_v38 = vld [vmem:[%s21231_s5 + $0x130] sm:$0xf]  ;;  %v14169_v48 = vld [vmem:[%s21231_s5 + $0x134] sm:$0xf0]  ;;  %v3607_v11 = vpack.c.bf16 %v16350_v27, %v16150_v31 }
 0x378   : > { %3975 = vmatpush.bf16.msra.mxu3 %v10732_v36  ;;  %v3506_v22 = vmax.f32 %v3450_v37, %v3478_v5  ;;  %3829 = vmatpush.bf16.msra.mxu1 %v10660_v61  ;;  %v10784_v15 = vor.u32 %v14181_v19, %v10783_v1  ;;  %v14164_v58 = vld [vmem:[%s21231_s5 + $0x114] sm:$0xf]  ;;  %v10705_v41 = vld [vmem:[%s21231_s5 + $0x118] sm:$0xf0]  ;;  %v10775_v31 = vld [vmem:[%s21231_s5 + $0x180] sm:$0xf]  ;;  %v10644_v2 = vor.u32 %v14136_v28, %v10641_v6 }
 0x379   : > { %v3507_v42 = vmax.f32 %v3457_v21, %v3485_v16  ;;  %v3508_v32 = vmax.f32 %v3464_v63, %v3492_v12  ;;  %4112 = vmatpush.bf16.msrb.mxu0 %v10792_v34  ;;  %3821 = vmatmul.bf16.vlgmr.msrb.gmra.mxu3 %v16515_v13  ;;  %v14179_v27 = vld [vmem:[%s21231_s5 + $0x184] sm:$0xf0]  ;;  %v10991_v10 = vld [vmem:[%s21231_s5 + $0x2f0] sm:$0xf]  ;;  %v10720_v29 = vor.u32 %v14169_v48, %v10719_v38  ;;  %v14225_v3 = vld [vmem:[%s21231_s5 + $0x2f4] sm:$0xf0] }
 0x37a   : > { %v3540_v51 = vsel %vm2226_vm9, %v3506_v22, %v3505_v39  ;;  %3713 = vmatmul.bf16.vlgmr.msrb.gmra.mxu1 %v3607_v11  ;;  %3727 = vmatmul.bf16.vlgmr.msrb.gmra.mxu2 %v3607_v11  ;;  %v14134_v35 = vld [vmem:[%s21231_s5 + $0x24] sm:$0xf]  ;;  %v10708_v36 = vor.u32 %v14164_v58, %v10705_v41  ;;  %v10633_v62 = vld [vmem:[%s21231_s5 + $0x28] sm:$0xf0]  ;;  %v10711_v14 = vld [vmem:[%s21231_s5 + $0x120] sm:$0xf]  ;;  %v10776_v53 = vor.u32 %v14179_v27, %v10775_v31 }
 0x37b   : > { %v3541_v33 = vsel %vm2228_vm10, %v3507_v42, %v3540_v51  ;;  %3961 = vmatpush.bf16.msra.mxu2 %v10728_v46  ;;  %v14167_v60 = vld [vmem:[%s21231_s5 + $0x124] sm:$0xf0]  ;;  %v14162_v57 = vld [vmem:[%s21231_s5 + $0x104] sm:$0xf]  ;;  %v10697_v61 = vld [vmem:[%s21231_s5 + $0x108] sm:$0xf0]  ;;  %v10992_v26 = vor.u32 %v14225_v3, %v10991_v10  ;;  %v10636_v9 = vor.u32 %v14134_v35, %v10633_v62 }
 0x37c   : > { %3976 = vmatpush.bf16.msra.mxu3 %v10724_v7  ;;  %v3542_v47 = vsel %vm2230_vm11, %v3508_v32, %v3541_v33  ;;  %3830 = vmatpush.bf16.msra.mxu1 %v10652_v45  ;;  %v14208_v44 = vld [vmem:[%s21231_s5 + $0x274] sm:$0xf]  ;;  %v10913_v49 = vld [vmem:[%s21231_s5 + $0x278] sm:$0xf0]  ;;  %v10712_v17 = vor.u32 %v14167_v60, %v10711_v14  ;;  %v10983_v23 = vld [vmem:[%s21231_s5 + $0x2e0] sm:$0xf]  ;;  %v10700_v4 = vor.u32 %v14162_v57, %v10697_v61 }
 0x37d   : > { %3551 = vst [vmem:[#allocation3 + $0x21] sm:$0xf] %v3542_v47  ;;  %4113 = vmatpush.bf16.msrb.mxu0 %v10784_v15  ;;  %v14223_v24 = vld [vmem:[%s21231_s5 + $0x2e4] sm:$0xf0]  ;;  %v14132_v25 = vld [vmem:[%s21231_s5 + $0x14] sm:$0xf]  ;;  %v10916_v8 = vor.u32 %v14208_v44, %v10913_v49  ;;  %v3860_v32 = vpack.c.bf16 %v16396_v55, %v16156_v40 }
 0x37e   : > { %v10625_v37 = vld [vmem:[%s21231_s5 + $0x18] sm:$0xf0]  ;;  %v10703_v5 = vld [vmem:[%s21231_s5 + $0x110] sm:$0xf]  ;;  %v14165_v7 = vld [vmem:[%s21231_s5 + $0x114] sm:$0xf0]  ;;  %v10984_v16 = vor.u32 %v14223_v24, %v10983_v23 }
 0x37f   : > { %3962 = vmatpush.bf16.msra.mxu2 %v10720_v29  ;;  %v14206_v30 = vld [vmem:[%s21231_s5 + $0x264] sm:$0xf]  ;;  %v10905_v54 = vld [vmem:[%s21231_s5 + $0x268] sm:$0xf0]  ;;  %v10975_v12 = vld [vmem:[%s21231_s5 + $0x2d0] sm:$0xf]  ;;  %v10628_v56 = vor.u32 %v14132_v25, %v10625_v37  ;;  %v10704_v0 = vor.u32 %v14165_v7, %v10703_v5 }
 0x380   : > { %3977 = vmatpush.bf16.msra.mxu3 %v10716_v59  ;;  %3831 = vmatpush.bf16.msra.mxu1 %v10644_v2  ;;  %v14221_v34 = vld [vmem:[%s21231_s5 + $0x2d4] sm:$0xf0]  ;;  %v14130_v52 = vld [vmem:[%s21231_s5 + $0x4] sm:$0xf]  ;;  %v10617_v63 = vld [vmem:[%s21231_s5 + $0x8] sm:$0xf0]  ;;  %v10908_v18 = vor.u32 %v14206_v30, %v10905_v54 }
 0x381   : > { %4114 = vmatpush.bf16.msrb.mxu0 %v10776_v53  ;;  %v10695_v39 = vld [vmem:[%s21231_s5 + $0x100] sm:$0xf]  ;;  %v14163_v22 = vld [vmem:[%s21231_s5 + $0x104] sm:$0xf0]  ;;  %v14192_v43 = vld [vmem:[%s21231_s5 + $0x1f4] sm:$0xf]  ;;  %v10976_v46 = vor.u32 %v14221_v34, %v10975_v12  ;;  %v10620_v51 = vor.u32 %v14130_v52, %v10617_v63 }
 0x382   : > { %v10833_v1 = vld [vmem:[%s21231_s5 + $0x1f8] sm:$0xf0]  ;;  %v10911_v42 = vld [vmem:[%s21231_s5 + $0x270] sm:$0xf]  ;;  %v14209_v45 = vld [vmem:[%s21231_s5 + $0x274] sm:$0xf0]  ;;  %v10696_v59 = vor.u32 %v14163_v22, %v10695_v39 }
 0x383   : > { %3963 = vmatpush.bf16.msra.mxu2 %v10712_v17  ;;  %v14204_v19 = vld [vmem:[%s21231_s5 + $0x254] sm:$0xf]  ;;  %v10897_v28 = vld [vmem:[%s21231_s5 + $0x258] sm:$0xf0]  ;;  %v10967_v6 = vld [vmem:[%s21231_s5 + $0x2c0] sm:$0xf]  ;;  %v10836_v11 = vor.u32 %v14192_v43, %v10833_v1  ;;  %v10912_v33 = vor.u32 %v14209_v45, %v10911_v42 }
 0x384   : > { %3978 = vmatpush.bf16.msra.mxu3 %v10708_v36  ;;  %v3993_v21 = vld [vmem:[#allocation3 + $0x20] sm:$0xf]  ;;  %3832 = vmatpush.bf16.msra.mxu1 %v10636_v9  ;;  %v4141_v48 = vld [vmem:[#allocation3 + $0x19] sm:$0xf]  ;;  %v10825_v40 = vld [vmem:[%s21231_s5 + $0x1e8] sm:$0xf0]  ;;  %v10900_v58 = vor.u32 %v14204_v19, %v10897_v28 }
 0x385   : > { %4405 = vmatpush.bf16.msra.mxu0 %v10992_v26  ;;  %4004 = vst [vmem:[#allocation1 + $0x11] ss:$2 sm:$0xff] %v3993_v21  ;;  %v14219_v38 = vld [vmem:[%s21231_s5 + $0x2c4] sm:$0xf0]  ;;  %v14190_v15 = vld [vmem:[%s21231_s5 + $0x1e4] sm:$0xf] }
 0x386   : > { %v4142_v55 = vld [vmem:[#allocation3 + $0x21] sm:$0xf]  ;;  %v10903_v41 = vld [vmem:[%s21231_s5 + $0x260] sm:$0xf]  ;;  %v14202_v31 = vld [vmem:[%s21231_s5 + $0x244] sm:$0xf]  ;;  %v10968_v10 = vor.u32 %v14219_v38, %v10967_v6  ;;  %v10828_v36 = vor.u32 %v14190_v15, %v10825_v40 }
 0x387   : > { %3964 = vmatpush.bf16.msra.mxu2 %v10704_v0  ;;  %v14207_v47 = vld [vmem:[%s21231_s5 + $0x264] sm:$0xf0]  ;;  %v10889_v2 = vld [vmem:[%s21231_s5 + $0x248] sm:$0xf0]  ;;  %v10959_v29 = vld [vmem:[%s21231_s5 + $0x2b0] sm:$0xf] }
 0x388   : > { %3979 = vmatpush.bf16.msra.mxu3 %v10700_v4  ;;  %3833 = vmatpush.bf16.msra.mxu1 %v10628_v56  ;;  %v14217_v3 = vld [vmem:[%s21231_s5 + $0x2b4] sm:$0xf0]  ;;  %v10904_v62 = vor.u32 %v14207_v47, %v10903_v41  ;;  %v14188_v14 = vld [vmem:[%s21231_s5 + $0x1d4] sm:$0xf]  ;;  %v10892_v60 = vor.u32 %v14202_v31, %v10889_v2  ;;  %v10817_v53 = vld [vmem:[%s21231_s5 + $0x1d8] sm:$0xf0] }
 0x389   : > { %4406 = vmatpush.bf16.msra.mxu0 %v10984_v16  ;;  %v14205_v57 = vld [vmem:[%s21231_s5 + $0x254] sm:$0xf0]  ;;  %v10960_v61 = vor.u32 %v14217_v3, %v10959_v29  ;;  %v14200_v26 = vld [vmem:[%s21231_s5 + $0x234] sm:$0xf]  ;;  %v10881_v44 = vld [vmem:[%s21231_s5 + $0x238] sm:$0xf0]  ;;  %v10820_v17 = vor.u32 %v14188_v14, %v10817_v53 }
 0x38a   : > { %v10951_v49 = vld [vmem:[%s21231_s5 + $0x2a0] sm:$0xf]  ;;  %v14215_v9 = vld [vmem:[%s21231_s5 + $0x2a4] sm:$0xf0]  ;;  %v14186_v24 = vld [vmem:[%s21231_s5 + $0x1c4] sm:$0xf] }
 0x38b   : > { %3980 = vmatmul.bf16.vlgmr.msra.gmra.mxu3 %v3860_v32  ;;  %3965 = vmatpush.bf16.msra.mxu2 %v10696_v59  ;;  %v4291_v25 = vld [vmem:[#allocation3 + $0x22] sm:$0xf]  ;;  %v10887_v37 = vld [vmem:[%s21231_s5 + $0x240] sm:$0xf]  ;;  %v14198_v30 = vld [vmem:[%s21231_s5 + $0x224] sm:$0xf] }
 0x38c   : > { %4270 = vmatpush.bf16.msrb.mxu3 %v10916_v8  ;;  %v4006_v27 = vld.sshfl [vmem:[#allocation1 + $0x10] sm:$0xff pattern:$0x75316420]  ;;  %3834 = vmatpush.bf16.msra.mxu1 %v10620_v51  ;;  %v10809_v4 = vld [vmem:[%s21231_s5 + $0x1c8] sm:$0xf0]  ;;  %v10952_v8 = vor.u32 %v14215_v9, %v10951_v49 }
 0x38d   : > { %4407 = vmatpush.bf16.msra.mxu0 %v10976_v46  ;;  %4151 = vst [vmem:[#allocation1 + $0x10] ss:$2 sm:$0xff] %v4141_v48  ;;  %v16673_v35 = vpack.c.bf16 %v4006_v27, %v16174_v50  ;;  %v10895_v50 = vld [vmem:[%s21231_s5 + $0x250] sm:$0xf]  ;;  %v14203_v5 = vld [vmem:[%s21231_s5 + $0x244] sm:$0xf0]  ;;  %v10812_v34 = vor.u32 %v14186_v24, %v10809_v4 }
 0x38e   : > { %4153 = vst [vmem:[#allocation1 + $0x11] ss:$2 sm:$0xff] %v4142_v55  ;;  %3966 = vmatmul.bf16.vlgmr.msra.gmra.mxu2 %v3860_v32  ;;  %v10896_v23 = vor.u32 %v14205_v57, %v10895_v50  ;;  %v4290_v7 = vld [vmem:[#allocation3 + $0x1a] sm:$0xf]  ;;  %v10873_v54 = vld [vmem:[%s21231_s5 + $0x228] sm:$0xf0]  ;;  %v10888_v56 = vor.u32 %v14203_v5, %v10887_v37 }
 0x38f   : > { %4256 = vmatpush.bf16.msrb.mxu2 %v10912_v33  ;;  %4115 = vmatmul.bf16.vlgmr.msrb.gmra.mxu0 %v16673_v35  ;;  %v10943_v21 = vld [vmem:[%s21231_s5 + $0x290] sm:$0xf]  ;;  %v14213_v12 = vld [vmem:[%s21231_s5 + $0x294] sm:$0xf0]  ;;  %v14184_v0 = vld [vmem:[%s21231_s5 + $0x1b4] sm:$0xf]  ;;  %v10876_v63 = vor.u32 %v14198_v30, %v10873_v54 }
 0x390   : > { %4271 = vmatpush.bf16.msrb.mxu3 %v10908_v18  ;;  %4121 = vmatpush.bf16.msrb.mxu1 %v10836_v11  ;;  %v10801_v52 = vld [vmem:[%s21231_s5 + $0x1b8] sm:$0xf0]  ;;  %v10879_v39 = vld [vmem:[%s21231_s5 + $0x230] sm:$0xf]  ;;  %v14201_v22 = vld [vmem:[%s21231_s5 + $0x234] sm:$0xf0]  ;;  %v10944_v43 = vor.u32 %v14213_v12, %v10943_v21 }
 0x391   : > { %4408 = vmatpush.bf16.msra.mxu0 %v10968_v10  ;;  %3835 = vmatmul.bf16.vlgmr.msra.gmra.mxu1 %v16515_v13  ;;  %v10884_v13 = vor.u32 %v14200_v26, %v10881_v44  ;;  %v14196_v18 = vld [vmem:[%s21231_s5 + $0x214] sm:$0xf]  ;;  %v10865_v1 = vld [vmem:[%s21231_s5 + $0x218] sm:$0xf0]  ;;  %v10935_v42 = vld [vmem:[%s21231_s5 + $0x280] sm:$0xf]  ;;  %v10804_v46 = vor.u32 %v14184_v0, %v10801_v52  ;;  %v10880_v19 = vor.u32 %v14201_v22, %v10879_v39 }
 0x392   : > { %v14211_v45 = vld [vmem:[%s21231_s5 + $0x284] sm:$0xf0]  ;;  %v11151_v28 = vld [vmem:[%s21231_s5 + $0x3f0] sm:$0xf]  ;;  %v14257_v32 = vld [vmem:[%s21231_s5 + $0x3f4] sm:$0xf0]  ;;  %v10868_v59 = vor.u32 %v14196_v18, %v10865_v1 }
 0x393   : > { %4257 = vmatpush.bf16.msrb.mxu2 %v10904_v62  ;;  %v14182_v51 = vld [vmem:[%s21231_s5 + $0x1a4] sm:$0xf]  ;;  %v10793_v6 = vld [vmem:[%s21231_s5 + $0x1a8] sm:$0xf0]  ;;  %v10871_v38 = vld [vmem:[%s21231_s5 + $0x220] sm:$0xf]  ;;  %v10936_v11 = vor.u32 %v14211_v45, %v10935_v42  ;;  %v11152_v40 = vor.u32 %v14257_v32, %v11151_v28 }
 0x394   : > { %4272 = vmatpush.bf16.msrb.mxu3 %v10900_v58  ;;  %4122 = vmatpush.bf16.msrb.mxu1 %v10828_v36  ;;  %v14199_v48 = vld [vmem:[%s21231_s5 + $0x224] sm:$0xf0]  ;;  %v14194_v33 = vld [vmem:[%s21231_s5 + $0x204] sm:$0xf]  ;;  %v10857_v15 = vld [vmem:[%s21231_s5 + $0x208] sm:$0xf0]  ;;  %v10796_v47 = vor.u32 %v14182_v51, %v10793_v6 }
 0x395   : > { %4409 = vmatpush.bf16.msra.mxu0 %v10960_v61  ;;  %v16722_v16 = vld.sshfl [vmem:[#allocation1 + $0x10] sm:$0xff pattern:$0x75316420]  ;;  %v11073_v58 = vld [vmem:[%s21231_s5 + $0x378] sm:$0xf0]  ;;  %v10872_v31 = vor.u32 %v14199_v48, %v10871_v38  ;;  %v10860_v3 = vor.u32 %v14194_v33, %v10857_v15 }
 0x396   : > { %4302 = vst [vmem:[#allocation1 + $0x11] ss:$2 sm:$0xff] %v4291_v25  ;;  %v14240_v55 = vld [vmem:[%s21231_s5 + $0x374] sm:$0xf]  ;;  %v11143_v41 = vld [vmem:[%s21231_s5 + $0x3e0] sm:$0xf]  ;;  %v4158_v37 = vpack.c.bf16 %v16722_v16, %v16180_v20 }
 0x397   : > { %4258 = vmatpush.bf16.msrb.mxu2 %v10896_v23  ;;  %4300 = vst [vmem:[#allocation1 + $0x10] ss:$2 sm:$0xff] %v4290_v7  ;;  %v14255_v27 = vld [vmem:[%s21231_s5 + $0x3e4] sm:$0xf0]  ;;  %v14180_v10 = vld [vmem:[%s21231_s5 + $0x194] sm:$0xf]  ;;  %v11076_v53 = vor.u32 %v14240_v55, %v11073_v58 }
 0x398   : > { %4273 = vmatpush.bf16.msrb.mxu3 %v10892_v60  ;;  %4123 = vmatpush.bf16.msrb.mxu1 %v10820_v17  ;;  %v10785_v2 = vld [vmem:[%s21231_s5 + $0x198] sm:$0xf0]  ;;  %v4438_v29 = vld [vmem:[#allocation3 + $0x10] sm:$0xf]  ;;  %v10863_v36 = vld [vmem:[%s21231_s5 + $0x210] sm:$0xf]  ;;  %v11144_v44 = vor.u32 %v14255_v27, %v11143_v41 }
 0x399   : > { %4410 = vmatpush.bf16.msra.mxu0 %v10952_v8  ;;  %v14197_v62 = vld [vmem:[%s21231_s5 + $0x214] sm:$0xf0]  ;;  %v14238_v14 = vld [vmem:[%s21231_s5 + $0x364] sm:$0xf]  ;;  %v4439_v60 = vld [vmem:[#allocation3 + $0x18] sm:$0xf]  ;;  %v10788_v25 = vor.u32 %v14180_v10, %v10785_v2 }
 0x39a   : > { %v11065_v50 = vld [vmem:[%s21231_s5 + $0x368] sm:$0xf0]  ;;  %v11135_v57 = vld [vmem:[%s21231_s5 + $0x3d0] sm:$0xf]  ;;  %v14253_v61 = vld [vmem:[%s21231_s5 + $0x3d4] sm:$0xf0] }
 0x39b   : > { %4259 = vmatpush.bf16.msrb.mxu2 %v10888_v56  ;;  %v4440_v26 = vld [vmem:[#allocation3 + $0x20] sm:$0xf]  ;;  %v14178_v49 = vld [vmem:[%s21231_s5 + $0x184] sm:$0xf]  ;;  %v10777_v9 = vld [vmem:[%s21231_s5 + $0x188] sm:$0xf0]  ;;  %v11068_v30 = vor.u32 %v14238_v14, %v11065_v50  ;;  %v11136_v21 = vor.u32 %v14253_v61, %v11135_v57 }
 0x39c   : > { %4274 = vmatpush.bf16.msrb.mxu3 %v10884_v13  ;;  %4124 = vmatpush.bf16.msrb.mxu1 %v10812_v34  ;;  %v10855_v17 = vld [vmem:[%s21231_s5 + $0x200] sm:$0xf]  ;;  %v14195_v23 = vld [vmem:[%s21231_s5 + $0x204] sm:$0xf0]  ;;  %v10864_v13 = vor.u32 %v14197_v62, %v10863_v36  ;;  %v14224_v5 = vld [vmem:[%s21231_s5 + $0x2f4] sm:$0xf]  ;;  %v10780_v34 = vor.u32 %v14178_v49, %v10777_v9 }
 0x39d   : > { %4411 = vmatpush.bf16.msra.mxu0 %v10944_v43  ;;  %v4303_v24 = vld.sshfl [vmem:[#allocation1] sm:$0xff pattern:$0x75316420]  ;;  %v10993_v7 = vld [vmem:[%s21231_s5 + $0x2f8] sm:$0xf0]  ;;  %v10856_v56 = vor.u32 %v14195_v23, %v10855_v17 }
 0x39e   : > { %v4304_v4 = vld.sshfl [vmem:[#allocation1 + $0x10] sm:$0xff pattern:$0x75316420]  ;;  %4446 = vst [vmem:[#allocation1] ss:$2 sm:$0xff] %v4438_v29 }
 0x39f   : > { %4260 = vmatpush.bf16.msrb.mxu2 %v10880_v19  ;;  %v16831_v8 = vpack.c.bf16 %v4304_v4, %v4303_v24  ;;  %4448 = vst [vmem:[#allocation1 + $0x1] ss:$2 sm:$0xff] %v4439_v60  ;;  %v11071_v54 = vld [vmem:[%s21231_s5 + $0x370] sm:$0xf]  ;;  %v14241_v20 = vld [vmem:[%s21231_s5 + $0x374] sm:$0xf0] }
 0x3a0   : > { %4275 = vmatpush.bf16.msrb.mxu3 %v10876_v63  ;;  %4125 = vmatpush.bf16.msrb.mxu1 %v10804_v46  ;;  %4450 = vst [vmem:[#allocation1 + $0x10] ss:$2 sm:$0xff] %v4440_v26  ;;  %v14236_v16 = vld [vmem:[%s21231_s5 + $0x354] sm:$0xf]  ;;  %v11057_v12 = vld [vmem:[%s21231_s5 + $0x358] sm:$0xf0]  ;;  %v10996_v63 = vor.u32 %v14224_v5, %v10993_v7  ;;  %v11072_v39 = vor.u32 %v14241_v20, %v11071_v54 }
 0x3a1   : > { %4412 = vmatpush.bf16.msra.mxu0 %v10936_v11  ;;  %v11127_v0 = vld [vmem:[%s21231_s5 + $0x3c0] sm:$0xf]  ;;  %v14251_v52 = vld [vmem:[%s21231_s5 + $0x3c4] sm:$0xf0]  ;;  %v14222_v22 = vld [vmem:[%s21231_s5 + $0x2e4] sm:$0xf]  ;;  %v11060_v43 = vor.u32 %v14236_v16, %v11057_v12 }
 0x3a2   : > { %v10985_v18 = vld [vmem:[%s21231_s5 + $0x2e8] sm:$0xf0]  ;;  %v11063_v1 = vld [vmem:[%s21231_s5 + $0x360] sm:$0xf]  ;;  %v14239_v42 = vld [vmem:[%s21231_s5 + $0x364] sm:$0xf0]  ;;  %v11128_v45 = vor.u32 %v14251_v52, %v11127_v0 }
 0x3a3   : > { %4261 = vmatpush.bf16.msrb.mxu2 %v10872_v31  ;;  %v14234_v46 = vld [vmem:[%s21231_s5 + $0x344] sm:$0xf]  ;;  %v11049_v19 = vld [vmem:[%s21231_s5 + $0x348] sm:$0xf0]  ;;  %v11119_v28 = vld [vmem:[%s21231_s5 + $0x3b0] sm:$0xf]  ;;  %v10988_v51 = vor.u32 %v14222_v22, %v10985_v18 }
 0x3a4   : > { %4276 = vmatpush.bf16.msrb.mxu3 %v10868_v59  ;;  %4126 = vmatpush.bf16.msrb.mxu1 %v10796_v47  ;;  %v14249_v32 = vld [vmem:[%s21231_s5 + $0x3b4] sm:$0xf0]  ;;  %v11064_v59 = vor.u32 %v14239_v42, %v11063_v1  ;;  %v14220_v6 = vld [vmem:[%s21231_s5 + $0x2d4] sm:$0xf]  ;;  %v10977_v38 = vld [vmem:[%s21231_s5 + $0x2d8] sm:$0xf0]  ;;  %v11052_v48 = vor.u32 %v14234_v46, %v11049_v19 }
 0x3a5   : > { %4704 = vmatpush.bf16.msrb.mxu0 %v11152_v40  ;;  %v11055_v11 = vld [vmem:[%s21231_s5 + $0x350] sm:$0xf]  ;;  %v14237_v33 = vld [vmem:[%s21231_s5 + $0x354] sm:$0xf0]  ;;  %v14232_v15 = vld [vmem:[%s21231_s5 + $0x334] sm:$0xf]  ;;  %v11120_v55 = vor.u32 %v14249_v32, %v11119_v28  ;;  %v10980_v2 = vor.u32 %v14220_v6, %v10977_v38 }
 0x3a6   : > { %4413 = vmatmul.bf16.vlgmr.msra.gmra.mxu0 %v16831_v8  ;;  %v4587_v40 = vld [vmem:[#allocation3 + $0x11] sm:$0xf]  ;;  %v11111_v41 = vld [vmem:[%s21231_s5 + $0x3a0] sm:$0xf]  ;;  %v14247_v47 = vld [vmem:[%s21231_s5 + $0x3a4] sm:$0xf0]  ;;  %v11056_v29 = vor.u32 %v14237_v33, %v11055_v11 }
 0x3a7   : > { %4262 = vmatpush.bf16.msrb.mxu2 %v10864_v13  ;;  %v11041_v58 = vld [vmem:[%s21231_s5 + $0x338] sm:$0xf0]  ;;  %v4588_v31 = vld [vmem:[#allocation3 + $0x19] sm:$0xf]  ;;  %v4441_v10 = vld [vmem:[#allocation3 + $0x28] sm:$0xf]  ;;  %v11112_v60 = vor.u32 %v14247_v47, %v11111_v41 }
 0x3a8   : > { %4277 = vmatpush.bf16.msrb.mxu3 %v10860_v3  ;;  %4127 = vmatpush.bf16.msrb.mxu1 %v10788_v25  ;;  %v14218_v27 = vld [vmem:[%s21231_s5 + $0x2c4] sm:$0xf]  ;;  %4452 = vst [vmem:[#allocation1 + $0x11] ss:$2 sm:$0xff] %v4441_v10  ;;  %v11044_v36 = vor.u32 %v14232_v15, %v11041_v58  ;;  %v11047_v62 = vld [vmem:[%s21231_s5 + $0x340] sm:$0xf] }
 0x3a9   : > { %4705 = vmatpush.bf16.msrb.mxu0 %v11144_v44  ;;  %v16907_v3 = vld.sshfl [vmem:[#allocation1] sm:$0xff pattern:$0x75316420]  ;;  %v14235_v14 = vld [vmem:[%s21231_s5 + $0x344] sm:$0xf0] }
 0x3aa   : > { %4595 = vst [vmem:[#allocation1] ss:$2 sm:$0xff] %v4587_v40  ;;  %v11033_v50 = vld [vmem:[%s21231_s5 + $0x328] sm:$0xf0]  ;;  %v11103_v57 = vld [vmem:[%s21231_s5 + $0x390] sm:$0xf]  ;;  %v11048_v44 = vor.u32 %v14235_v14, %v11047_v62 }
 0x3ab   : > { %4278 = vmatmul.bf16.vlgmr.msrb.gmra.mxu3 %v4158_v37  ;;  %4263 = vmatpush.bf16.msrb.mxu2 %v10856_v56  ;;  %4597 = vst [vmem:[#allocation1 + $0x1] ss:$2 sm:$0xff] %v4588_v31  ;;  %v14245_v61 = vld [vmem:[%s21231_s5 + $0x394] sm:$0xf0]  ;;  %v14216_v49 = vld [vmem:[%s21231_s5 + $0x2b4] sm:$0xf] }
 0x3ac   : > { %4569 = vmatpush.bf16.msra.mxu3 %v11076_v53  ;;  %4128 = vmatpush.bf16.msrb.mxu1 %v10780_v34  ;;  %v14230_v53 = vld [vmem:[%s21231_s5 + $0x324] sm:$0xf]  ;;  %v10961_v9 = vld [vmem:[%s21231_s5 + $0x2b8] sm:$0xf0]  ;;  %v11039_v17 = vld [vmem:[%s21231_s5 + $0x330] sm:$0xf] }
 0x3ad   : > { %4706 = vmatpush.bf16.msrb.mxu0 %v11136_v21  ;;  %v4589_v23 = vld [vmem:[#allocation3 + $0x21] sm:$0xf]  ;;  %v11036_v24 = vor.u32 %v14230_v53, %v11033_v50  ;;  %v14233_v25 = vld [vmem:[%s21231_s5 + $0x334] sm:$0xf0]  ;;  %v14228_v13 = vld [vmem:[%s21231_s5 + $0x314] sm:$0xf]  ;;  %v10964_v34 = vor.u32 %v14216_v49, %v10961_v9 }
 0x3ae   : > { %4264 = vmatmul.bf16.vlgmr.msrb.gmra.mxu2 %v4158_v37  ;;  %v11025_v4 = vld [vmem:[%s21231_s5 + $0x318] sm:$0xf0]  ;;  %v11104_v37 = vor.u32 %v14245_v61, %v11103_v57  ;;  %v11095_v5 = vld [vmem:[%s21231_s5 + $0x380] sm:$0xf]  ;;  %v14243_v7 = vld [vmem:[%s21231_s5 + $0x384] sm:$0xf0]  ;;  %v11040_v56 = vor.u32 %v14233_v25, %v11039_v17 }
 0x3af   : > { %4555 = vmatpush.bf16.msra.mxu2 %v11072_v39  ;;  %4129 = vmatmul.bf16.vlgmr.msrb.gmra.mxu1 %v16673_v35  ;;  %v10969_v35 = vld [vmem:[%s21231_s5 + $0x2c8] sm:$0xf0]  ;;  %v4736_v54 = vld [vmem:[#allocation3 + $0x12] sm:$0xf]  ;;  %v14214_v21 = vld [vmem:[%s21231_s5 + $0x2a4] sm:$0xf]  ;;  %v11096_v22 = vor.u32 %v14243_v7, %v11095_v5 }
 0x3b0   : > { %4570 = vmatpush.bf16.msra.mxu3 %v11068_v30  ;;  %4419 = vmatpush.bf16.msra.mxu1 %v10996_v63  ;;  %v10972_v26 = vor.u32 %v14218_v27, %v10969_v35  ;;  %v4590_v30 = vld [vmem:[#allocation3 + $0x29] sm:$0xf]  ;;  %v10953_v16 = vld [vmem:[%s21231_s5 + $0x2a8] sm:$0xf0]  ;;  %v4737_v12 = vld [vmem:[#allocation3 + $0x1a] sm:$0xf]  ;;  %v11028_v63 = vor.u32 %v14228_v13, %v11025_v4 }
 0x3b1   : > { %4707 = vmatpush.bf16.msrb.mxu0 %v11128_v45  ;;  %v4454_v20 = vld.sshfl [vmem:[#allocation1 + $0x10] sm:$0xff pattern:$0x75316420]  ;;  %v11031_v0 = vld [vmem:[%s21231_s5 + $0x320] sm:$0xf]  ;;  %v10956_v45 = vor.u32 %v14214_v21, %v10953_v16 }
 0x3b2   : > { %4599 = vst [vmem:[#allocation1 + $0x10] ss:$2 sm:$0xff] %v4589_v23  ;;  %v14231_v52 = vld [vmem:[%s21231_s5 + $0x324] sm:$0xf0]  ;;  %v11017_v18 = vld [vmem:[%s21231_s5 + $0x308] sm:$0xf0]  ;;  %v4457_v27 = vpack.c.bf16 %v4454_v20, %v16907_v3 }
 0x3b3   : > { %4556 = vmatpush.bf16.msra.mxu2 %v11064_v59  ;;  %4601 = vst [vmem:[#allocation1 + $0x11] ss:$2 sm:$0xff] %v4590_v30  ;;  %v4602_v39 = vld.sshfl [vmem:[#allocation1] sm:$0xff pattern:$0x75316420]  ;;  %v11032_v46 = vor.u32 %v14231_v52, %v11031_v0 }
 0x3b4   : > { %4571 = vmatpush.bf16.msra.mxu3 %v11060_v43  ;;  %4420 = vmatpush.bf16.msra.mxu1 %v10988_v51  ;;  %4744 = vst [vmem:[#allocation1] ss:$2 sm:$0xff] %v4736_v54  ;;  %v14226_v43 = vld [vmem:[%s21231_s5 + $0x304] sm:$0xf]  ;;  %v14272_v1 = vld [vmem:[%s21231_s5 + $0x474] sm:$0xf] }
 0x3b5   : > { %4708 = vmatpush.bf16.msrb.mxu0 %v11120_v55  ;;  %4746 = vst [vmem:[#allocation1 + $0x1] ss:$2 sm:$0xff] %v4737_v12  ;;  %v11233_v42 = vld [vmem:[%s21231_s5 + $0x478] sm:$0xf0]  ;;  %v11020_v19 = vor.u32 %v14226_v43, %v11017_v18  ;;  %v14212_v28 = vld [vmem:[%s21231_s5 + $0x294] sm:$0xf] }
 0x3b6   : > { %v10945_v32 = vld [vmem:[%s21231_s5 + $0x298] sm:$0xf0]  ;;  %v4738_v51 = vld [vmem:[#allocation3 + $0x22] sm:$0xf]  ;;  %v11236_v59 = vor.u32 %v14272_v1, %v11233_v42  ;;  %v11023_v6 = vld [vmem:[%s21231_s5 + $0x310] sm:$0xf] }
 0x3b7   : > { %4557 = vmatpush.bf16.msra.mxu2 %v11056_v29  ;;  %v14229_v38 = vld [vmem:[%s21231_s5 + $0x314] sm:$0xf0]  ;;  %v11225_v11 = vld [vmem:[%s21231_s5 + $0x468] sm:$0xf0]  ;;  %v14210_v33 = vld [vmem:[%s21231_s5 + $0x284] sm:$0xf]  ;;  %v10948_v40 = vor.u32 %v14212_v28, %v10945_v32 }
 0x3b8   : > { %4572 = vmatpush.bf16.msra.mxu3 %v11052_v48  ;;  %4421 = vmatpush.bf16.msra.mxu1 %v10980_v2  ;;  %v14270_v48 = vld [vmem:[%s21231_s5 + $0x464] sm:$0xf]  ;;  %v10937_v55 = vld [vmem:[%s21231_s5 + $0x288] sm:$0xf0]  ;;  %v11024_v41 = vor.u32 %v14229_v38, %v11023_v6  ;;  %v11015_v47 = vld [vmem:[%s21231_s5 + $0x300] sm:$0xf] }
 0x3b9   : > { %4709 = vmatpush.bf16.msrb.mxu0 %v11112_v60  ;;  %v14227_v31 = vld [vmem:[%s21231_s5 + $0x304] sm:$0xf0]  ;;  %v11228_v35 = vor.u32 %v14270_v48, %v11225_v11  ;;  %v14256_v10 = vld [vmem:[%s21231_s5 + $0x3f4] sm:$0xf]  ;;  %v11153_v2 = vld [vmem:[%s21231_s5 + $0x3f8] sm:$0xf0]  ;;  %v10940_v14 = vor.u32 %v14210_v33, %v10937_v55 }
 0x3ba   : > { %v4603_v15 = vld.sshfl [vmem:[#allocation1 + $0x10] sm:$0xff pattern:$0x75316420]  ;;  %v11217_v62 = vld [vmem:[%s21231_s5 + $0x458] sm:$0xf0]  ;;  %v11016_v60 = vor.u32 %v14227_v31, %v11015_v47  ;;  %v11156_v53 = vor.u32 %v14256_v10, %v11153_v2 }
 0x3bb   : > { %4558 = vmatpush.bf16.msra.mxu2 %v11048_v44  ;;  %v16999_v58 = vpack.c.bf16 %v4603_v15, %v4602_v39  ;;  %4748 = vst [vmem:[#allocation1 + $0x10] ss:$2 sm:$0xff] %v4738_v51  ;;  %v11231_v29 = vld [vmem:[%s21231_s5 + $0x470] sm:$0xf]  ;;  %v14268_v3 = vld [vmem:[%s21231_s5 + $0x454] sm:$0xf] }
 0x3bc   : > { %4573 = vmatpush.bf16.msra.mxu3 %v11044_v36  ;;  %4422 = vmatpush.bf16.msra.mxu1 %v10972_v26  ;;  %v14273_v36 = vld [vmem:[%s21231_s5 + $0x474] sm:$0xf0]  ;;  %v14254_v50 = vld [vmem:[%s21231_s5 + $0x3e4] sm:$0xf]  ;;  %v11220_v61 = vor.u32 %v14268_v3, %v11217_v62  ;;  %v11145_v26 = vld [vmem:[%s21231_s5 + $0x3e8] sm:$0xf0] }
 0x3bd   : > { %4710 = vmatpush.bf16.msrb.mxu0 %v11104_v37  ;;  %v11232_v57 = vor.u32 %v14273_v36, %v11231_v29  ;;  %v11223_v44 = vld [vmem:[%s21231_s5 + $0x460] sm:$0xf]  ;;  %v14271_v49 = vld [vmem:[%s21231_s5 + $0x464] sm:$0xf0]  ;;  %v14266_v9 = vld [vmem:[%s21231_s5 + $0x444] sm:$0xf] }
 0x3be   : > { %v11209_v17 = vld [vmem:[%s21231_s5 + $0x448] sm:$0xf0]  ;;  %v4739_v23 = vld [vmem:[#allocation3 + $0x2a] sm:$0xf]  ;;  %v11224_v25 = vor.u32 %v14271_v49, %v11223_v44  ;;  %v11137_v37 = vld [vmem:[%s21231_s5 + $0x3d8] sm:$0xf0] }
 0x3bf   : > { %4559 = vmatpush.bf16.msra.mxu2 %v11040_v56  ;;  %4750 = vst [vmem:[#allocation1 + $0x11] ss:$2 sm:$0xff] %v4739_v23  ;;  %v11212_v13 = vor.u32 %v14266_v9, %v11209_v17  ;;  %v14252_v4 = vld [vmem:[%s21231_s5 + $0x3d4] sm:$0xf]  ;;  %v11215_v5 = vld [vmem:[%s21231_s5 + $0x450] sm:$0xf] }
 0x3c0   : > { %4574 = vmatpush.bf16.msra.mxu3 %v11036_v24  ;;  %4423 = vmatpush.bf16.msra.mxu1 %v10964_v34  ;;  %v11148_v24 = vor.u32 %v14254_v50, %v11145_v26  ;;  %v14269_v7 = vld [vmem:[%s21231_s5 + $0x454] sm:$0xf0]  ;;  %v14264_v30 = vld [vmem:[%s21231_s5 + $0x434] sm:$0xf]  ;;  %v11201_v54 = vld [vmem:[%s21231_s5 + $0x438] sm:$0xf0]  ;;  %v11140_v20 = vor.u32 %v14252_v4, %v11137_v37 }
 0x3c1   : > { %4711 = vmatpush.bf16.msrb.mxu0 %v11096_v22  ;;  %v11216_v21 = vor.u32 %v14269_v7, %v11215_v5  ;;  %v11204_v16 = vor.u32 %v14264_v30, %v11201_v54  ;;  %v11129_v12 = vld [vmem:[%s21231_s5 + $0x3c8] sm:$0xf0]  ;;  %v11207_v34 = vld [vmem:[%s21231_s5 + $0x440] sm:$0xf]  ;;  %v14267_v56 = vld [vmem:[%s21231_s5 + $0x444] sm:$0xf0] }
 0x3c2   : > { %v14262_v0 = vld [vmem:[%s21231_s5 + $0x424] sm:$0xf]  ;;  %v11193_v52 = vld [vmem:[%s21231_s5 + $0x428] sm:$0xf0]  ;;  %v11208_v39 = vor.u32 %v14267_v56, %v11207_v34  ;;  %v14248_v43 = vld [vmem:[%s21231_s5 + $0x3b4] sm:$0xf] }
 0x3c3   : > { %4560 = vmatpush.bf16.msra.mxu2 %v11032_v46  ;;  %v11196_v22 = vor.u32 %v14262_v0, %v11193_v52  ;;  %v11121_v18 = vld [vmem:[%s21231_s5 + $0x3b8] sm:$0xf0]  ;;  %v11199_v1 = vld [vmem:[%s21231_s5 + $0x430] sm:$0xf]  ;;  %v14265_v42 = vld [vmem:[%s21231_s5 + $0x434] sm:$0xf0] }
 0x3c4   : > { %4575 = vmatpush.bf16.msra.mxu3 %v11028_v63  ;;  %4424 = vmatpush.bf16.msra.mxu1 %v10956_v45  ;;  %v14260_v45 = vld [vmem:[%s21231_s5 + $0x414] sm:$0xf]  ;;  %v11185_v46 = vld [vmem:[%s21231_s5 + $0x418] sm:$0xf0]  ;;  %v11200_v28 = vor.u32 %v14265_v42, %v11199_v1  ;;  %v14246_v51 = vld [vmem:[%s21231_s5 + $0x3a4] sm:$0xf] }
 0x3c5   : > { %4712 = vmatmul.bf16.vlgmr.msrb.gmra.mxu0 %v16999_v58  ;;  %v11188_v32 = vor.u32 %v14260_v45, %v11185_v46  ;;  %v11191_v6 = vld [vmem:[%s21231_s5 + $0x420] sm:$0xf]  ;;  %v14263_v38 = vld [vmem:[%s21231_s5 + $0x424] sm:$0xf0]  ;;  %v14258_v48 = vld [vmem:[%s21231_s5 + $0x404] sm:$0xf] }
 0x3c6   : > { %v11177_v11 = vld [vmem:[%s21231_s5 + $0x408] sm:$0xf0]  ;;  %v11192_v15 = vor.u32 %v14263_v38, %v11191_v6  ;;  %v14244_v55 = vld [vmem:[%s21231_s5 + $0x394] sm:$0xf]  ;;  %v11183_v47 = vld [vmem:[%s21231_s5 + $0x410] sm:$0xf] }
 0x3c7   : > { %4561 = vmatpush.bf16.msra.mxu2 %v11024_v41  ;;  %v11105_v41 = vld [vmem:[%s21231_s5 + $0x398] sm:$0xf0]  ;;  %v14261_v31 = vld [vmem:[%s21231_s5 + $0x414] sm:$0xf0]  ;;  %v14242_v29 = vld [vmem:[%s21231_s5 + $0x384] sm:$0xf] }
 0x3c8   : > { %4576 = vmatpush.bf16.msra.mxu3 %v11020_v19  ;;  %4425 = vmatpush.bf16.msra.mxu1 %v10948_v40  ;;  %v11124_v19 = vor.u32 %v14248_v43, %v11121_v18  ;;  %v11180_v40 = vor.u32 %v14258_v48, %v11177_v11  ;;  %v11108_v10 = vor.u32 %v14244_v55, %v11105_v41  ;;  %v11097_v36 = vld [vmem:[%s21231_s5 + $0x388] sm:$0xf0]  ;;  %v11175_v62 = vld [vmem:[%s21231_s5 + $0x400] sm:$0xf] }
 0x3c9   : > { %v11184_v2 = vor.u32 %v14261_v31, %v11183_v47 }
 0x3cb   : > { %4577 = vmatmul.bf16.vlgmr.msra.gmra.mxu3 %v4457_v27  ;;  %4562 = vmatpush.bf16.msra.mxu2 %v11016_v60  ;;  %v11100_v60 = vor.u32 %v14242_v29, %v11097_v36 }
 0x3cc   : > { %4867 = vmatpush.bf16.msrb.mxu3 %v11236_v59  ;;  %4426 = vmatpush.bf16.msra.mxu1 %v10940_v14  ;;  %v11113_v59 = vld [vmem:[%s21231_s5 + $0x3a8] sm:$0xf0]  ;;  %v14259_v14 = vld [vmem:[%s21231_s5 + $0x404] sm:$0xf0] }
 0x3cd   : > { %v11116_v33 = vor.u32 %v14246_v51, %v11113_v59 }
 0x3ce   : > { %4563 = vmatmul.bf16.vlgmr.msra.gmra.mxu2 %v4457_v27  ;;  %v4752_v27 = vld.sshfl [vmem:[#allocation1 + $0x10] sm:$0xff pattern:$0x75316420] }
 0x3cf   : > { %4853 = vmatpush.bf16.msrb.mxu2 %v11232_v57  ;;  %4427 = vmatmul.bf16.vlgmr.msra.gmra.mxu1 %v16831_v8  ;;  %v14250_v8 = vld [vmem:[%s21231_s5 + $0x3c4] sm:$0xf] }
 0x3d0   : > { %4868 = vmatpush.bf16.msrb.mxu3 %v11228_v35  ;;  %4718 = vmatpush.bf16.msrb.mxu1 %v11156_v53  ;;  %v11132_v63 = vor.u32 %v14250_v8, %v11129_v12  ;;  %v4751_v35 = vld.sshfl [vmem:[#allocation1] sm:$0xff pattern:$0x75316420]  ;;  %v11176_v53 = vor.u32 %v14259_v14, %v11175_v62 }
 0x3d1   : > { %v4755_v3 = vpack.c.bf16 %v4752_v27, %v4751_v35 }
 0x3d3   : > { %4854 = vmatpush.bf16.msrb.mxu2 %v11224_v25 }
 0x3d4   : > { %4869 = vmatpush.bf16.msrb.mxu3 %v11220_v61  ;;  %4719 = vmatpush.bf16.msrb.mxu1 %v11148_v24 }
 0x3d7   : > { %4855 = vmatpush.bf16.msrb.mxu2 %v11216_v21 }
 0x3d8   : > { %4870 = vmatpush.bf16.msrb.mxu3 %v11212_v13  ;;  %4720 = vmatpush.bf16.msrb.mxu1 %v11140_v20 }
 0x3db   : > { %4856 = vmatpush.bf16.msrb.mxu2 %v11208_v39 }
 0x3dc   : > { %4871 = vmatpush.bf16.msrb.mxu3 %v11204_v16  ;;  %4721 = vmatpush.bf16.msrb.mxu1 %v11132_v63 }
 0x3df   : > { %4857 = vmatpush.bf16.msrb.mxu2 %v11200_v28 }
 0x3e0   : > { %4872 = vmatpush.bf16.msrb.mxu3 %v11196_v22  ;;  %4722 = vmatpush.bf16.msrb.mxu1 %v11124_v19  ;;  %v4885_v19 = vld [vmem:[%s21232_s6] sm:$0x3] }
 0x3e3   : > { %4858 = vmatpush.bf16.msrb.mxu2 %v11192_v15  ;;  %v4888_v15 = vperm.slane %v4885_v19, 1 }
 0x3e4   : > { %4873 = vmatpush.bf16.msrb.mxu3 %v11188_v32  ;;  %4723 = vmatpush.bf16.msrb.mxu1 %v11116_v33 }
 0x3e7   : > { %4859 = vmatpush.bf16.msrb.mxu2 %v11184_v2  ;;  %v4887_v2 = vperm.slane %v4885_v19, 0 }
 0x3e8   : > { %4874 = vmatpush.bf16.msrb.mxu3 %v11180_v40  ;;  %4724 = vmatpush.bf16.msrb.mxu1 %v11108_v10 }
 0x3eb   : > { %4875 = vmatmul.bf16.vlgmr.msrb.gmra.mxu3 %v4755_v3  ;;  %4860 = vmatpush.bf16.msrb.mxu2 %v11176_v53 }
 0x3ec   : > { %4725 = vmatpush.bf16.msrb.mxu1 %v11100_v60 }
 0x3ee   : > { %4861 = vmatmul.bf16.vlgmr.msrb.gmra.mxu2 %v4755_v3 }
 0x3ef   : > { %4726 = vmatmul.bf16.vlgmr.msrb.gmra.mxu1 %v16999_v58 }
 0x3f7   : > { %v3714_v50 = vpop.f32.mrf.mxu1 }
 0x3fc   : > { %v3822_v57 = vpop.f32.mrf.mxu3 }
 0x3fd   : > { %v3728_v61 = vpop.f32.mrf.mxu2  ;;  %v3823_v56 = vadd.f32 %v3822_v57, %v3714_v50 }
 0x3ff   : > { %v3716_v26 = vpop.f32.mrf.mxu1 }
 0x404   : > { %v3824_v44 = vpop.f32.mrf.mxu3 }
 0x405   : > { %v3730_v49 = vpop.f32.mrf.mxu2  ;;  %v3825_v28 = vadd.f32 %v3824_v44, %v3716_v26 }
 0x40c   : > { %v4116_v37 = vpop.f32.mrf.mxu0 }
 0x40e   : > { %v3836_v9 = vpop.f32.mrf.mxu1  ;;  %v3981_v17 = vpop.f32.mrf.mxu3 }
 0x40f   : > { %v3837_v16 = vadd.f32 %v3836_v9, %v3728_v61 }
 0x411   : > { %v3967_v23 = vpop.f32.mrf.mxu2  ;;  %v3987_v34 = vadd.f32 %v3981_v17, %v3837_v16 }
 0x412   : > { %v3986_v63 = vadd.f32 %v3967_v23, %v3823_v56 }
 0x414   : > { %v4118_v54 = vpop.f32.mrf.mxu0  ;;  %v4135_v43 = vadd.f32 %v4116_v37, %v3986_v63 }
 0x416   : > { %v3838_v24 = vpop.f32.mrf.mxu1  ;;  %v3983_v25 = vpop.f32.mrf.mxu3 }
 0x417   : > { %v3839_v1 = vadd.f32 %v3838_v24, %v3730_v49 }
 0x419   : > { %v3969_v13 = vpop.f32.mrf.mxu2  ;;  %v3989_v32 = vadd.f32 %v3983_v25, %v3839_v1 }
 0x41a   : > { %v3988_v48 = vadd.f32 %v3969_v13, %v3825_v28 }
 0x41c   : > { %v4137_v47 = vadd.f32 %v4118_v54, %v3988_v48 }
 0x423   : > { %v4414_v12 = vpop.f32.mrf.mxu0 }
 0x42b   : > { %v4416_v42 = vpop.f32.mrf.mxu0 }
 0x42c   : > { %v4130_v4 = vpop.f32.mrf.mxu1 }
 0x42d   : > { %v4136_v0 = vadd.f32 %v4130_v4, %v3987_v34 }
 0x42e   : > { %v4279_v5 = vpop.f32.mrf.mxu3 }
 0x42f   : > { %v4285_v22 = vadd.f32 %v4279_v5, %v4136_v0 }
 0x431   : > { %v4265_v7 = vpop.f32.mrf.mxu2 }
 0x432   : > { %v4284_v46 = vadd.f32 %v4265_v7, %v4135_v43 }
 0x434   : > { %v4132_v30 = vpop.f32.mrf.mxu1  ;;  %v4433_v6 = vadd.f32 %v4414_v12, %v4284_v46 }
 0x435   : > { %v4138_v11 = vadd.f32 %v4132_v30, %v3989_v32 }
 0x436   : > { %v4281_v58 = vpop.f32.mrf.mxu3 }
 0x437   : > { %v4287_v27 = vadd.f32 %v4281_v58, %v4138_v11 }
 0x439   : > { %v4267_v20 = vpop.f32.mrf.mxu2 }
 0x43a   : > { %v4286_v29 = vadd.f32 %v4267_v20, %v4137_v47 }
 0x43c   : > { %v4435_v50 = vadd.f32 %v4416_v42, %v4286_v29 }
 0x442   : > { %v4713_v31 = vpop.f32.mrf.mxu0 }
 0x44a   : > { %v4715_v24 = vpop.f32.mrf.mxu0 }
 0x44c   : > { %v4428_v21 = vpop.f32.mrf.mxu1 }
 0x44d   : > { %v4434_v45 = vadd.f32 %v4428_v21, %v4285_v22 }
 0x44e   : > { %v4578_v8 = vpop.f32.mrf.mxu3 }
 0x44f   : > { %v4584_v59 = vadd.f32 %v4578_v8, %v4434_v45 }
 0x451   : > { %v4564_v52 = vpop.f32.mrf.mxu2 }
 0x452   : > { %v4583_v40 = vadd.f32 %v4564_v52, %v4433_v6 }
 0x454   : > { %v4430_v39 = vpop.f32.mrf.mxu1  ;;  %v4732_v10 = vadd.f32 %v4713_v31, %v4583_v40 }
 0x455   : > { %v4436_v36 = vadd.f32 %v4430_v39, %v4287_v27 }
 0x456   : > { %v4580_v18 = vpop.f32.mrf.mxu3 }
 0x457   : > { %v4586_v57 = vadd.f32 %v4580_v18, %v4436_v36 }
 0x459   : > { %v4566_v51 = vpop.f32.mrf.mxu2 }
 0x45a   : > { %v4585_v44 = vadd.f32 %v4566_v51, %v4435_v50  ;;  %v11551_v50 = vld [vmem:[%s21233_s7 + $0x3e0] sm:$0xf] }
 0x45c   : > { %v4734_v4 = vadd.f32 %v4715_v24, %v4585_v44  ;;  %v11425_v44 = vld [vmem:[%s21233_s7 + $0x2f0] sm:$0xf0] }
 0x46c   : > { %v4727_v38 = vpop.f32.mrf.mxu1 }
 0x46d   : > { %v4733_v33 = vadd.f32 %v4727_v38, %v4584_v59 }
 0x46e   : > { %v4876_v55 = vpop.f32.mrf.mxu3 }
 0x46f   : > { %v4882_v41 = vadd.f32 %v4876_v55, %v4733_v33 }
 0x471   : > { %v4892_v35 = vadd.f32 %v4888_v15, %v4882_v41  ;;  %v4862_v62 = vpop.f32.mrf.mxu2 }
 0x472   : > { %v4881_v14 = vadd.f32 %v4862_v62, %v4732_v10 }
 0x473   : > { %v4896_v3 = vmin.f32 %v4892_v35, 0.0  ;;  %vm4916_vm9 = vcmp.gt.f32.partialorder %v4892_v35, 0.0 }
 0x474   : > { %v4891_v53 = vadd.f32 %v4887_v2, %v4881_v14  ;;  %v4729_v26 = vpop.f32.mrf.mxu1 }
 0x475   : > { %v4901_v60 = vmul.f32 1.442695, %v4896_v3  ;;  %v4735_v49 = vadd.f32 %v4729_v26, %v4586_v57  ;;  %v14366_v26 = vld [vmem:[%s21233_s7 + $0x2e4] sm:$0xf] }
 0x476   : > { %v4895_v61 = vmin.f32 %v4891_v53, 0.0  ;;  %v4878_v17 = vpop.f32.mrf.mxu3  ;;  %vm4915_vm11 = vcmp.gt.f32.partialorder %v4891_v53, 0.0 }
 0x477   : > { %14942 = vpow2.f32 %v4901_v60  ;;  %v4884_v23 = vadd.f32 %v4878_v17, %v4735_v49  ;;  %v11423_v60 = vld [vmem:[%s21233_s7 + $0x2e0] sm:$0xf] }
 0x478   : > { %v4899_v9 = vmul.f32 1.442695, %v4895_v61  ;;  %v14400_v61 = vld [vmem:[%s21233_s7 + $0x3ec] sm:$0xf0] }
 0x479   : > { %v4894_v13 = vadd.f32 %v4888_v15, %v4884_v23  ;;  %v4864_v5 = vpop.f32.mrf.mxu2  ;;  %v14398_v23 = vld [vmem:[%s21233_s7 + $0x3e4] sm:$0xf] }
 0x47a   : > { %14944 = vpow2.f32 %v4899_v9  ;;  %v4883_v30 = vadd.f32 %v4864_v5, %v4734_v4  ;;  %v11428_v5 = vor.u32 %v14366_v26, %v11425_v44 }
 0x47b   : > { %v4898_v7 = vmin.f32 %v4894_v13, 0.0  ;;  %vm4918_vm13 = vcmp.gt.f32.partialorder %v4894_v13, 0.0 }
 0x47c   : > { %v4893_v20 = vadd.f32 %v4887_v2, %v4883_v30  ;;  %5669 = vmatpush.bf16.msra.mxu2 %v11428_v5 }
 0x47d   : > { %v14943_v25 = vpop.eup %14942  ;;  %v4905_v58 = vmul.f32 1.442695, %v4898_v7 }
 0x47e   : > { %v11238_v37 = vadd.f32 -1.0, %v14943_v25  ;;  %v4897_v12 = vmin.f32 %v4893_v20, 0.0  ;;  %vm4917_vm0 = vcmp.gt.f32.partialorder %v4893_v20, 0.0 }
 0x47f   : > { %14946 = vpow2.f32 %v4905_v58 }
 0x480   : > { %v4912_v54 = vmul.f32 1.6732632, %v11238_v37  ;;  %v14945_v21 = vpop.eup %14944  ;;  %v4903_v0 = vmul.f32 1.442695, %v4897_v12  ;;  %v11552_v37 = vor.u32 %v14400_v61, %v11551_v50 }
 0x481   : > { %v11237_v8 = vadd.f32 -1.0, %v14945_v21 }
 0x482   : > { %v4920_v16 = vsel %vm4916_vm9, %v4892_v35, %v4912_v54  ;;  %14948 = vpow2.f32 %v4903_v0  ;;  %v11553_v54 = vld [vmem:[%s21233_s7 + $0x3f0] sm:$0xf0]  ;;  %5656 = vmatpush.bf16.msra.mxu1 %v11552_v37 }
 0x483   : > { %v4924_v34 = vmul.f32 1.050701, %v4920_v16  ;;  %v4911_v56 = vmul.f32 1.6732632, %v11237_v8  ;;  %v11556_v21 = vor.u32 %v14398_v23, %v11553_v54  ;;  %v14396_v54 = vld [vmem:[%s21233_s7 + $0x3cc] sm:$0xf0] }
 0x485   : > { %v4919_v52 = vsel %vm4915_vm11, %v4891_v53, %v4911_v56  ;;  %v4931_v63 = vrot.slane %v4924_v34, 6  ;;  %v14947_v22 = vpop.eup %14946  ;;  %v14368_v53 = vld [vmem:[%s21233_s7 + $0x2ec] sm:$0xf0]  ;;  %5682 = vmatpush.bf16.msra.mxu3 %v11556_v21 }
 0x486   : > { %v4923_v39 = vmul.f32 1.050701, %v4919_v52  ;;  %v11240_v42 = vadd.f32 -1.0, %v14947_v22  ;;  %v11424_v4 = vor.u32 %v14368_v53, %v11423_v60 }
 0x488   : > { %v4933_v43 = vsel %vm3268_vm7, %v4923_v39, %v4931_v63  ;;  %v4935_v18 = vsel %vm4934_vm2, %v4923_v39, %v4931_v63  ;;  %v14949_v45 = vpop.eup %14948  ;;  %v4914_v46 = vmul.f32 1.6732632, %v11240_v42  ;;  %v4938_v19 = vsel %vm4937_vm4, %v4923_v39, %v4931_v63  ;;  %5643 = vmatpush.bf16.msra.mxu0 %v11424_v4 }
 0x489   : > { %v4936_v1 = vrot.slane %v4935_v18, 2  ;;  %4949 = vst [vmem:[#allocation1] ss:$4 sm:$0xff] %v4933_v43  ;;  %v11239_v28 = vadd.f32 -1.0, %v14949_v45  ;;  %v4940_v51 = vsel %vm605_vm1, %v4931_v63, %v4923_v39  ;;  %v4939_v6 = vrot.slane %v4938_v19, 4 }
 0x48a   : > { %v4922_v32 = vsel %vm4918_vm13, %v4894_v13, %v4914_v46  ;;  %v4941_v33 = vrot.slane %v4940_v51, 6  ;;  %v5144_v51 = vld [vmem:[#allocation4 + $0x10] sm:$0x33] }
 0x48b   : > { %4953 = vst [vmem:[#allocation1 + $0x20] ss:$4 sm:$0xff] %v4936_v1  ;;  %v4913_v59 = vmul.f32 1.6732632, %v11239_v28  ;;  %v4926_v38 = vmul.f32 1.050701, %v4922_v32 }
 0x48d   : > { %v4921_v55 = vsel %vm4917_vm0, %v4893_v20, %v4913_v59  ;;  %v4932_v36 = vrot.slane %v4926_v38, 6 }
 0x48e   : > { %v4925_v3 = vmul.f32 1.050701, %v4921_v55 }
 0x490   : > { %v4950_v48 = vld.sshfl [vmem:[#allocation1] sm:$0xff pattern:$0x73625140]  ;;  %v4951_v11 = vld.sshfl [vmem:[#allocation1 + $0x8] sm:$0xff pattern:$0x73625140]  ;;  %v4943_v57 = vsel %vm4934_vm2, %v4925_v3, %v4932_v36  ;;  %v4942_v13 = vsel %vm3268_vm7, %v4925_v3, %v4932_v36  ;;  %v4945_v45 = vsel %vm4937_vm4, %v4925_v3, %v4932_v36  ;;  %v4947_v38 = vsel %vm605_vm1, %v4932_v36, %v4925_v3 }
 0x491   : > { %4956 = vst [vmem:[#allocation1] ss:$4 sm:$0xff] %v4939_v6  ;;  %v4990_v15 = vsel %vm3268_vm7, %v4950_v48, -inf  ;;  %v4997_v40 = vsel %vm3268_vm7, %v4951_v11, -inf  ;;  %v4944_v30 = vrot.slane %v4943_v57, 2 }
 0x492   : > { %v4954_v41 = vld.sshfl [vmem:[#allocation1 + $0x20] sm:$0xff pattern:$0x73625140]  ;;  %v4955_v47 = vld.sshfl [vmem:[#allocation1 + $0x28] sm:$0xff pattern:$0x73625140] }
 0x493   : > { %4959 = vst [vmem:[#allocation1 + $0x20] ss:$4 sm:$0xff] %v4941_v33  ;;  %v4991_v31 = vrot.slane %v4990_v15, 4  ;;  %v4998_v27 = vrot.slane %v4997_v40, 4  ;;  %v5004_v35 = vsel %vm3268_vm7, %v4954_v41, -inf  ;;  %v5011_v10 = vsel %vm3268_vm7, %v4955_v47, -inf }
 0x494   : > { %v5005_v2 = vrot.slane %v5004_v35, 4  ;;  %v5012_v29 = vrot.slane %v5011_v10, 4  ;;  %v5148_v47 = vrot.slane %v5144_v51, 2 }
 0x495   : > { %v4992_v62 = vmax.f32 %v4990_v15, %v4991_v31  ;;  %v4999_v14 = vmax.f32 %v4997_v40, %v4998_v27  ;;  %v11407_v40 = vld [vmem:[%s21233_s7 + $0x2c0] sm:$0xf]  ;;  %v4946_v31 = vrot.slane %v4945_v45, 4  ;;  %v14364_v27 = vld [vmem:[%s21233_s7 + $0x2cc] sm:$0xf0] }
 0x496   : > { %v5006_v9 = vmax.f32 %v5004_v35, %v5005_v2  ;;  %v5013_v17 = vmax.f32 %v5011_v10, %v5012_v29  ;;  %v5150_v37 = vsel %vm3268_vm7, %v5144_v51, %v5148_v47 }
 0x497   : > { %v4993_v49 = vrot.slane %v4992_v62, 2  ;;  %v5000_v7 = vrot.slane %v4999_v14, 2 }
 0x498   : > { %v4957_v24 = vld.sshfl [vmem:[#allocation1] sm:$0xff pattern:$0x73625140]  ;;  %v4958_v25 = vld.sshfl [vmem:[#allocation1 + $0x8] sm:$0xff pattern:$0x73625140] }
 0x499   : > { %4962 = vst [vmem:[#allocation1] ss:$4 sm:$0xff] %v4942_v13  ;;  %v5007_v16 = vrot.slane %v5006_v9, 2  ;;  %v5014_v8 = vrot.slane %v5013_v17, 2  ;;  %v5018_v12 = vsel %vm3268_vm7, %v4957_v24, -inf  ;;  %v5025_v34 = vsel %vm3268_vm7, %v4958_v25, -inf }
 0x49a   : > { %v4960_v58 = vld.sshfl [vmem:[#allocation1 + $0x20] sm:$0xff pattern:$0x73625140]  ;;  %v4961_v20 = vld.sshfl [vmem:[#allocation1 + $0x28] sm:$0xff pattern:$0x73625140]  ;;  %v4994_v52 = vmax.f32 %v4992_v62, %v4993_v49  ;;  %v5001_v63 = vmax.f32 %v4999_v14, %v5000_v7 }
 0x49b   : > { %4965 = vst [vmem:[#allocation1 + $0x20] ss:$4 sm:$0xff] %v4944_v30  ;;  %v5032_v56 = vsel %vm3268_vm7, %v4960_v58, -inf  ;;  %v5039_v0 = vsel %vm3268_vm7, %v4961_v20, -inf  ;;  %v5019_v39 = vrot.slane %v5018_v12, 4  ;;  %v5026_v22 = vrot.slane %v5025_v34, 4 }
 0x49c   : > { %v5033_v43 = vrot.slane %v5032_v56, 4  ;;  %v5040_v18 = vrot.slane %v5039_v0, 4  ;;  %v5008_v1 = vmax.f32 %v5006_v9, %v5007_v16  ;;  %v5015_v42 = vmax.f32 %v5013_v17, %v5014_v8  ;;  %v11535_v30 = vld [vmem:[%s21233_s7 + $0x3c0] sm:$0xf] }
 0x49d   : > { %v5020_v46 = vmax.f32 %v5018_v12, %v5019_v39  ;;  %v5027_v19 = vmax.f32 %v5025_v34, %v5026_v22  ;;  %v4995_v59 = vrot.slane %v4994_v52, 1  ;;  %v5002_v6 = vrot.slane %v5001_v63, 1 }
 0x49e   : > { %v5034_v28 = vmax.f32 %v5032_v56, %v5033_v43  ;;  %v5041_v32 = vmax.f32 %v5039_v0, %v5040_v18  ;;  %v5009_v55 = vrot.slane %v5008_v1, 1  ;;  %v5016_v41 = vrot.slane %v5015_v42, 1 }
 0x49f   : > { %v5021_v48 = vrot.slane %v5020_v46, 2  ;;  %v5028_v11 = vrot.slane %v5027_v19, 2  ;;  %v4996_v62 = vmax.f32 %v4994_v52, %v4995_v59  ;;  %v4948_v14 = vrot.slane %v4947_v38, 6 }
 0x4a0   : > { %v5035_v33 = vrot.slane %v5034_v28, 2  ;;  %v5042_v15 = vrot.slane %v5041_v32, 2  ;;  %v4963_v36 = vld.sshfl [vmem:[#allocation1] sm:$0xff pattern:$0x73625140]  ;;  %v5003_v26 = vmax.f32 %v5001_v63, %v5002_v6  ;;  %v5017_v44 = vmax.f32 %v5015_v42, %v5016_v41 }
 0x4a1   : > { %v5022_v35 = vmax.f32 %v5020_v46, %v5021_v48  ;;  %v5029_v10 = vmax.f32 %v5027_v19, %v5028_v11  ;;  %v4964_v3 = vld.sshfl [vmem:[#allocation1 + $0x8] sm:$0xff pattern:$0x73625140]  ;;  %v5046_v9 = vsel %vm3268_vm7, %v4963_v36, -inf  ;;  %v11408_v17 = vor.u32 %v14364_v27, %v11407_v40  ;;  %v11409_v41 = vld [vmem:[%s21233_s7 + $0x2d0] sm:$0xf0] }
 0x4a2   : > { %v5036_v2 = vmax.f32 %v5034_v28, %v5035_v33  ;;  %v5043_v29 = vmax.f32 %v5041_v32, %v5042_v15  ;;  %v4966_v60 = vld.sshfl [vmem:[#allocation1 + $0x20] sm:$0xff pattern:$0x73625140]  ;;  %4968 = vst [vmem:[#allocation1] ss:$4 sm:$0xff] %v4946_v31  ;;  %v5010_v4 = vmax.f32 %v5008_v1, %v5009_v55  ;;  %v5047_v5 = vrot.slane %v5046_v9, 4 }
 0x4a3   : > { %v5023_v53 = vrot.slane %v5022_v35, 1  ;;  %v5030_v50 = vrot.slane %v5029_v10, 1  ;;  %v4967_v49 = vld.sshfl [vmem:[#allocation1 + $0x28] sm:$0xff pattern:$0x73625140]  ;;  %v5053_v7 = vsel %vm3268_vm7, %v4964_v3, -inf  ;;  %5644 = vmatpush.bf16.msra.mxu0 %v11408_v17  ;;  %v11536_v22 = vor.u32 %v14396_v54, %v11535_v30 }
 0x4a4   : > { %v5037_v57 = vrot.slane %v5036_v2, 1  ;;  %v5044_v61 = vrot.slane %v5043_v29, 1  ;;  %4971 = vst [vmem:[#allocation1 + $0x20] ss:$4 sm:$0xff] %v4948_v14  ;;  %v5060_v16 = vsel %vm3268_vm7, %v4966_v60, -inf  ;;  %v5048_v12 = vmax.f32 %v5046_v9, %v5047_v5 }
 0x4a5   : > { %v5024_v23 = vmax.f32 %v5022_v35, %v5023_v53  ;;  %v5031_v24 = vmax.f32 %v5029_v10, %v5030_v50  ;;  %v5054_v34 = vrot.slane %v5053_v7, 4  ;;  %v5067_v56 = vsel %vm3268_vm7, %v4967_v49, -inf  ;;  %5657 = vmatpush.bf16.msra.mxu1 %v11536_v22  ;;  %v14362_v55 = vld [vmem:[%s21233_s7 + $0x2c4] sm:$0xf]  ;;  %v11391_v36 = vld [vmem:[%s21233_s7 + $0x2a0] sm:$0xf] }
 0x4a6   : > { %v5038_v25 = vmax.f32 %v5036_v2, %v5037_v57  ;;  %v5045_v13 = vmax.f32 %v5043_v29, %v5044_v61  ;;  %v5068_v39 = vrot.slane %v5067_v56, 4  ;;  %v5049_v18 = vrot.slane %v5048_v12, 2  ;;  %v14394_v2 = vld [vmem:[%s21233_s7 + $0x3c4] sm:$0xf]  ;;  %v11537_v29 = vld [vmem:[%s21233_s7 + $0x3d0] sm:$0xf0] }
 0x4a7   : > { %v5102_v58 = vmax.f32 %v4996_v62, %v5024_v23  ;;  %v5103_v20 = vmax.f32 %v5003_v26, %v5031_v24  ;;  %v5055_v1 = vmax.f32 %v5053_v7, %v5054_v34  ;;  %v5061_v42 = vrot.slane %v5060_v16, 4  ;;  %v14360_v3 = vld [vmem:[%s21233_s7 + $0x2ac] sm:$0xf0]  ;;  %v11519_v60 = vld [vmem:[%s21233_s7 + $0x3a0] sm:$0xf] }
 0x4a8   : > { %v5105_v21 = vmax.f32 %v5017_v44, %v5045_v13  ;;  %v5104_v8 = vmax.f32 %v5010_v4, %v5038_v25  ;;  %v5069_v28 = vmax.f32 %v5067_v56, %v5068_v39  ;;  %v17215_v27 = vmax.f32 %v5048_v12, %v5049_v18  ;;  %v14392_v53 = vld [vmem:[%s21233_s7 + $0x3ac] sm:$0xf0]  ;;  %v14358_v61 = vld [vmem:[%s21233_s7 + $0x2a4] sm:$0xf]  ;;  %v11393_v26 = vld [vmem:[%s21233_s7 + $0x2b0] sm:$0xf0] }
 0x4a9   : > { %v5122_v0 = vrot.slane %v5103_v20, 4  ;;  %v4969_v63 = vld.sshfl [vmem:[#allocation1] sm:$0xff pattern:$0x73625140]  ;;  %v5056_v38 = vrot.slane %v5055_v1, 2  ;;  %v5062_v35 = vmax.f32 %v5060_v16, %v5061_v42  ;;  %v11412_v17 = vor.u32 %v14362_v55, %v11409_v41 }
 0x4aa   : > { %v5123_v52 = vrot.slane %v5105_v21, 4  ;;  %v4970_v43 = vld.sshfl [vmem:[#allocation1 + $0x8] sm:$0xff pattern:$0x73625140]  ;;  %v5074_v45 = vsel %vm3268_vm7, %v4969_v63, -inf  ;;  %v5070_v15 = vrot.slane %v5069_v28, 2  ;;  %v11392_v20 = vor.u32 %v14360_v3, %v11391_v36 }
 0x4ab   : > { %v5127_v46 = vsel %vm5126_vm8, %v5102_v58, %v5122_v0  ;;  %v5075_v32 = vrot.slane %v5074_v45, 4  ;;  %5152 = vst [vmem:[#allocation1] ss:$4 sm:$0xff] %v5150_v37  ;;  %v4972_v6 = vld.sshfl [vmem:[#allocation1 + $0x20] sm:$0xff pattern:$0x73625140]  ;;  %v17236_v50 = vmax.f32 %v5055_v1, %v5056_v38  ;;  %5670 = vmatpush.bf16.msra.mxu2 %v11412_v17  ;;  %v11540_v58 = vor.u32 %v14394_v2, %v11537_v29 }
 0x4ac   : > { %v5128_v19 = vsel %vm5126_vm8, %v5104_v8, %v5123_v52  ;;  %v5131_v51 = vrot.slane %v5127_v46, 7  ;;  %v5081_v11 = vsel %vm3268_vm7, %v4970_v43, -inf  ;;  %v4973_v31 = vld.sshfl [vmem:[#allocation1 + $0x28] sm:$0xff pattern:$0x73625140]  ;;  %v5088_v14 = vsel %vm3268_vm7, %v4972_v6, -inf  ;;  %5645 = vmatpush.bf16.msra.mxu0 %v11392_v20 }
 0x4ad   : > { %v5132_v59 = vrot.slane %v5128_v19, 6  ;;  %v5076_v48 = vmax.f32 %v5074_v45, %v5075_v32  ;;  %v5082_v40 = vrot.slane %v5081_v11, 4  ;;  %v5089_v57 = vrot.slane %v5088_v14, 4  ;;  %v14390_v23 = vld [vmem:[%s21233_s7 + $0x3a4] sm:$0xf]  ;;  %5683 = vmatpush.bf16.msra.mxu3 %v11540_v58 }
 0x4ae   : > { %v17244_v44 = vmax.f32 %v5069_v28, %v5070_v15  ;;  %v5095_v9 = vsel %vm3268_vm7, %v4973_v31, -inf  ;;  %v11521_v24 = vld [vmem:[%s21233_s7 + $0x3b0] sm:$0xf0]  ;;  %v5051_v25 = vrot.slane %v17215_v27, 1  ;;  %v5063_v13 = vrot.slane %v5062_v35, 2 }
 0x4af   : > { %v5133_v33 = vsel %vm2228_vm10, %v5132_v59, %v5131_v51  ;;  %v5077_v10 = vrot.slane %v5076_v48, 2  ;;  %v5083_v62 = vmax.f32 %v5081_v11, %v5082_v40  ;;  %v5090_v37 = vmax.f32 %v5088_v14, %v5089_v57  ;;  %v11375_v5 = vld [vmem:[%s21233_s7 + $0x280] sm:$0xf]  ;;  %v14356_v7 = vld [vmem:[%s21233_s7 + $0x28c] sm:$0xf0] }
 0x4b0   : > { %v5134_v47 = vsel %vm2236_vm14, %v5132_v59, %v5133_v33  ;;  %v5096_v54 = vrot.slane %v5095_v9, 4  ;;  %v11503_v21 = vld [vmem:[%s21233_s7 + $0x380] sm:$0xf]  ;;  %v14388_v16 = vld [vmem:[%s21233_s7 + $0x38c] sm:$0xf0]  ;;  %v5058_v8 = vrot.slane %v17236_v50, 1  ;;  %v11520_v34 = vor.u32 %v14392_v53, %v11519_v60 }
 0x4b1   : > { %5142 = vst [vmem:[#allocation4] sm:$0x66] %v5134_v47  ;;  %v5084_v49 = vrot.slane %v5083_v62, 2  ;;  %v5078_v4 = vmax.f32 %v5076_v48, %v5077_v10  ;;  %v5091_v12 = vrot.slane %v5090_v37, 2  ;;  %v11396_v56 = vor.u32 %v14358_v61, %v11393_v26  ;;  %v14354_v0 = vld [vmem:[%s21233_s7 + $0x284] sm:$0xf] }
 0x4b2   : > { %v11377_v52 = vld [vmem:[%s21233_s7 + $0x290] sm:$0xf0]  ;;  %v5072_v63 = vrot.slane %v17244_v44, 1  ;;  %v5097_v22 = vmax.f32 %v5095_v9, %v5096_v54  ;;  %v11524_v43 = vor.u32 %v14390_v23, %v11521_v24  ;;  %v14386_v18 = vld [vmem:[%s21233_s7 + $0x384] sm:$0xf]  ;;  %v5064_v45 = vmax.f32 %v5062_v35, %v5063_v13  ;;  %5658 = vmatpush.bf16.msra.mxu1 %v11520_v34 }
 0x4b3   : > { %v5085_v30 = vmax.f32 %v5083_v62, %v5084_v49  ;;  %v11505_v1 = vld [vmem:[%s21233_s7 + $0x390] sm:$0xf0]  ;;  %v5092_v46 = vmax.f32 %v5090_v37, %v5091_v12  ;;  %v11376_v19 = vor.u32 %v14356_v7, %v11375_v5  ;;  %v11504_v28 = vor.u32 %v14388_v16, %v11503_v21  ;;  %v11359_v32 = vld [vmem:[%s21233_s7 + $0x260] sm:$0xf]  ;;  %v14352_v51 = vld [vmem:[%s21233_s7 + $0x26c] sm:$0xf0]  ;;  %5671 = vmatpush.bf16.msra.mxu2 %v11396_v56 }
 0x4b4   : > { %v5079_v6 = vrot.slane %v5078_v4, 1  ;;  %v5098_v38 = vrot.slane %v5097_v22, 2  ;;  %v11380_v48 = vor.u32 %v14354_v0, %v11377_v52  ;;  %v11487_v11 = vld [vmem:[%s21233_s7 + $0x360] sm:$0xf]  ;;  %v14384_v15 = vld [vmem:[%s21233_s7 + $0x36c] sm:$0xf0]  ;;  %5684 = vmatpush.bf16.msra.mxu3 %v11524_v43  ;;  %v11508_v10 = vor.u32 %v14386_v18, %v11505_v1 }
 0x4b5   : > { %v5086_v39 = vrot.slane %v5085_v30, 1  ;;  %v14350_v40 = vld [vmem:[%s21233_s7 + $0x264] sm:$0xf]  ;;  %v11361_v55 = vld [vmem:[%s21233_s7 + $0x270] sm:$0xf0]  ;;  %v5093_v31 = vrot.slane %v5092_v46, 1  ;;  %v5059_v36 = vmax.f32 %v17236_v50, %v5058_v8  ;;  %5646 = vmatpush.bf16.msra.mxu0 %v11376_v19  ;;  %v11360_v3 = vor.u32 %v14352_v51, %v11359_v32 }
 0x4b6   : > { %v17299_v47 = vld [vmem:[#allocation4 + $0x10] sm:$0x66]  ;;  %v5099_v35 = vmax.f32 %v5097_v22, %v5098_v38  ;;  %v14382_v2 = vld [vmem:[%s21233_s7 + $0x364] sm:$0xf]  ;;  %v11489_v29 = vld [vmem:[%s21233_s7 + $0x370] sm:$0xf0]  ;;  %5659 = vmatpush.bf16.msra.mxu1 %v11504_v28  ;;  %v5080_v53 = vmax.f32 %v5078_v4, %v5079_v6  ;;  %v5052_v26 = vmax.f32 %v17215_v27, %v5051_v25  ;;  %v11488_v9 = vor.u32 %v14384_v15, %v11487_v11 }
 0x4b7   : > { %v5087_v33 = vmax.f32 %v5085_v30, %v5086_v39  ;;  %v11343_v62 = vld [vmem:[%s21233_s7 + $0x240] sm:$0xf]  ;;  %v14348_v14 = vld [vmem:[%s21233_s7 + $0x24c] sm:$0xf0]  ;;  %v5065_v60 = vrot.slane %v5064_v45, 1  ;;  %5672 = vmatpush.bf16.msra.mxu2 %v11380_v48  ;;  %v11364_v17 = vor.u32 %v14350_v40, %v11361_v55  ;;  %v5073_v13 = vmax.f32 %v17244_v44, %v5072_v63 }
 0x4b8   : > { %v5145_v42 = vld [vmem:[#allocation4] sm:$0x33]  ;;  %v5100_v57 = vrot.slane %v5099_v35, 1  ;;  %v11471_v50 = vld [vmem:[%s21233_s7 + $0x340] sm:$0xf]  ;;  %v5094_v4 = vmax.f32 %v5092_v46, %v5093_v31  ;;  %5685 = vmatpush.bf16.msra.mxu3 %v11508_v10  ;;  %v11492_v5 = vor.u32 %v14382_v2, %v11489_v29  ;;  %v5229_v25 = vrot.slane %v17299_v47, 2 }
 0x4b9   : > { %v5149_v59 = vrot.slane %v5145_v42, 2  ;;  %v14380_v61 = vld [vmem:[%s21233_s7 + $0x34c] sm:$0xf0]  ;;  %v5107_v49 = vmax.f32 %v5059_v36, %v5087_v33  ;;  %v14346_v23 = vld [vmem:[%s21233_s7 + $0x244] sm:$0xf]  ;;  %5647 = vmatpush.bf16.msra.mxu0 %v11360_v3  ;;  %v11344_v30 = vor.u32 %v14348_v14, %v11343_v62  ;;  %v5066_v20 = vmax.f32 %v5064_v45, %v5065_v60 }
 0x4ba   : > { %v11345_v24 = vld [vmem:[%s21233_s7 + $0x250] sm:$0xf0]  ;;  %v5101_v37 = vmax.f32 %v5099_v35, %v5100_v57  ;;  %v14378_v27 = vld [vmem:[%s21233_s7 + $0x344] sm:$0xf]  ;;  %5660 = vmatpush.bf16.msra.mxu1 %v11488_v9  ;;  %v11472_v54 = vor.u32 %v14380_v61, %v11471_v50  ;;  %v11327_v44 = vld [vmem:[%s21233_s7 + $0x220] sm:$0xf]  ;;  %v5106_v21 = vmax.f32 %v5052_v26, %v5080_v53 }
 0x4bb   : > { %v5151_v41 = vsel %vm3268_vm7, %v5145_v42, %v5149_v59  ;;  %v5124_v7 = vrot.slane %v5107_v49, 4  ;;  %v11473_v58 = vld [vmem:[%s21233_s7 + $0x350] sm:$0xf0]  ;;  %5673 = vmatpush.bf16.msra.mxu2 %v11364_v17  ;;  %v11348_v8 = vor.u32 %v14346_v23, %v11345_v24  ;;  %v14344_v12 = vld [vmem:[%s21233_s7 + $0x22c] sm:$0xf0]  ;;  %v5108_v39 = vmax.f32 %v5066_v20, %v5094_v4 }
 0x4bc   : > { %5154 = vst [vmem:[#allocation1 + $0x1] ss:$4 sm:$0xff] %v5151_v41  ;;  %v5109_v16 = vmax.f32 %v5073_v13, %v5101_v37  ;;  %v11455_v34 = vld [vmem:[%s21233_s7 + $0x320] sm:$0xf]  ;;  %v14376_v56 = vld [vmem:[%s21233_s7 + $0x32c] sm:$0xf0]  ;;  %5686 = vmatpush.bf16.msra.mxu3 %v11492_v5  ;;  %v11476_v18 = vor.u32 %v14378_v27, %v11473_v58  ;;  %v11328_v45 = vor.u32 %v14344_v12, %v11327_v44 }
 0x4bd   : > { %v14342_v0 = vld [vmem:[%s21233_s7 + $0x224] sm:$0xf]  ;;  %v11329_v52 = vld [vmem:[%s21233_s7 + $0x230] sm:$0xf0]  ;;  %v5129_v43 = vsel %vm5126_vm8, %v5106_v21, %v5124_v7  ;;  %v11311_v42 = vld [vmem:[%s21233_s7 + $0x200] sm:$0xf]  ;;  %5648 = vmatpush.bf16.msra.mxu0 %v11344_v30  ;;  %v11456_v46 = vor.u32 %v14376_v56, %v11455_v34  ;;  %v5231_v58 = vsel %vm3268_vm7, %v17299_v47, %v5229_v25 }
 0x4be   : > { %v14374_v63 = vld [vmem:[%s21233_s7 + $0x324] sm:$0xf]  ;;  %v5125_v22 = vrot.slane %v5109_v16, 4  ;;  %v11457_v1 = vld [vmem:[%s21233_s7 + $0x330] sm:$0xf0]  ;;  %5661 = vmatpush.bf16.msra.mxu1 %v11472_v54  ;;  %v11332_v59 = vor.u32 %v14342_v0, %v11329_v52  ;;  %v5135_v11 = vrot.slane %v5129_v43, 7  ;;  %v5232_v0 = vsel %vm4934_vm2, %v17299_v47, %v5229_v25 }
 0x4bf   : > { %v14340_v19 = vld [vmem:[%s21233_s7 + $0x20c] sm:$0xf0]  ;;  %v11439_v28 = vld [vmem:[%s21233_s7 + $0x300] sm:$0xf]  ;;  %5674 = vmatpush.bf16.msra.mxu2 %v11348_v8  ;;  %v14338_v6 = vld [vmem:[%s21233_s7 + $0x204] sm:$0xf]  ;;  %v11460_v55 = vor.u32 %v14374_v63, %v11457_v1 }
 0x4c0   : > { %v14372_v32 = vld [vmem:[%s21233_s7 + $0x30c] sm:$0xf0]  ;;  %v5130_v51 = vsel %vm5126_vm8, %v5108_v39, %v5125_v22  ;;  %v11313_v38 = vld [vmem:[%s21233_s7 + $0x210] sm:$0xf0]  ;;  %v11431_v48 = vld [vmem:[%s21233_s7 + $0x2e8] sm:$0xf]  ;;  %5687 = vmatpush.bf16.msra.mxu3 %v11476_v18  ;;  %v11312_v29 = vor.u32 %v14340_v19, %v11311_v42 }
 0x4c1   : > { %v5136_v33 = vrot.slane %v5130_v51, 6  ;;  %v14369_v15 = vld [vmem:[%s21233_s7 + $0x2f4] sm:$0xf0]  ;;  %v11559_v40 = vld [vmem:[%s21233_s7 + $0x3e8] sm:$0xf]  ;;  %5649 = vmatpush.bf16.msra.mxu0 %v11328_v45  ;;  %v11440_v36 = vor.u32 %v14372_v32, %v11439_v28  ;;  %v11316_v60 = vor.u32 %v14338_v6, %v11313_v38  ;;  %v11241_v43 = vrot.slane %v5231_v58, 9 }
 0x4c2   : > { %v14401_v41 = vld [vmem:[%s21233_s7 + $0x3f4] sm:$0xf0]  ;;  %v14367_v31 = vld [vmem:[%s21233_s7 + $0x2ec] sm:$0xf]  ;;  %v11433_v35 = vld [vmem:[%s21233_s7 + $0x2f8] sm:$0xf0]  ;;  %5662 = vmatpush.bf16.msra.mxu1 %v11456_v46  ;;  %v11432_v53 = vor.u32 %v14369_v15, %v11431_v48 }
 0x4c3   : > { %v5226_v10 = vld [vmem:[#allocation4] sm:$0x66]  ;;  %v5137_v2 = vsel %vm2228_vm10, %v5136_v33, %v5135_v11  ;;  %v14370_v3 = vld [vmem:[%s21233_s7 + $0x304] sm:$0xf]  ;;  %v11441_v62 = vld [vmem:[%s21233_s7 + $0x310] sm:$0xf0]  ;;  %5675 = vmatpush.bf16.msra.mxu2 %v11332_v59  ;;  %v11560_v26 = vor.u32 %v14401_v41, %v11559_v40  ;;  %v11436_v49 = vor.u32 %v14367_v31, %v11433_v35 }
 0x4c4   : > { %v5138_v14 = vsel %vm2236_vm14, %v5136_v33, %v5137_v2  ;;  %v14399_v57 = vld [vmem:[%s21233_s7 + $0x3ec] sm:$0xf]  ;;  %v11561_v50 = vld [vmem:[%s21233_s7 + $0x3f8] sm:$0xf0]  ;;  %v11415_v61 = vld [vmem:[%s21233_s7 + $0x2c8] sm:$0xf]  ;;  %5688 = vmatpush.bf16.msra.mxu3 %v11460_v55  ;;  %v11444_v23 = vor.u32 %v14370_v3, %v11441_v62 }
 0x4c5   : > { %5143 = vst [vmem:[#allocation4 + $0x18] sm:$0x66] %v5138_v14  ;;  %v14365_v9 = vld [vmem:[%s21233_s7 + $0x2d4] sm:$0xf0]  ;;  %v11543_v17 = vld [vmem:[%s21233_s7 + $0x3c8] sm:$0xf]  ;;  %5650 = vmatpush.bf16.msra.mxu0 %v11312_v29  ;;  %v11564_v37 = vor.u32 %v14399_v57, %v11561_v50 }
 0x4c6   : > { %v14397_v24 = vld [vmem:[%s21233_s7 + $0x3d4] sm:$0xf0]  ;;  %v14363_v13 = vld [vmem:[%s21233_s7 + $0x2cc] sm:$0xf]  ;;  %v11417_v4 = vld [vmem:[%s21233_s7 + $0x2d8] sm:$0xf0]  ;;  %5663 = vmatpush.bf16.msra.mxu1 %v11440_v36  ;;  %v11416_v7 = vor.u32 %v14365_v9, %v11415_v61 }
 0x4c7   : > { %v5230_v27 = vrot.slane %v5226_v10, 2  ;;  %5676 = vmatpush.bf16.msra.mxu2 %v11316_v60  ;;  %v14395_v30 = vld [vmem:[%s21233_s7 + $0x3cc] sm:$0xf]  ;;  %v11545_v54 = vld [vmem:[%s21233_s7 + $0x3d8] sm:$0xf0]  ;;  %v11544_v44 = vor.u32 %v14397_v24, %v11543_v17  ;;  %v11420_v20 = vor.u32 %v14363_v13, %v11417_v4  ;;  %v11242_v6 = vrot.slane %v5232_v0, 9 }
 0x4c8   : > { %v11399_v21 = vld [vmem:[%s21233_s7 + $0x2a8] sm:$0xf]  ;;  %v14361_v16 = vld [vmem:[%s21233_s7 + $0x2b4] sm:$0xf0]  ;;  %5689 = vmatpush.bf16.msra.mxu3 %v11444_v23  ;;  %v14359_v34 = vld [vmem:[%s21233_s7 + $0x2ac] sm:$0xf]  ;;  %v11548_v52 = vor.u32 %v14395_v30, %v11545_v54 }
 0x4c9   : > { %5695 = vmatpush.bf16.msrb.mxu0 %v11432_v53  ;;  %v11527_v8 = vld [vmem:[%s21233_s7 + $0x3a8] sm:$0xf]  ;;  %v14393_v12 = vld [vmem:[%s21233_s7 + $0x3b4] sm:$0xf0]  ;;  %v11401_v56 = vld [vmem:[%s21233_s7 + $0x2b8] sm:$0xf0]  ;;  %v5234_v39 = vsel %vm3268_vm7, %v5226_v10, %v5230_v27  ;;  %v5235_v22 = vsel %vm4934_vm2, %v5226_v10, %v5230_v27  ;;  %v11400_v18 = vor.u32 %v14361_v16, %v11399_v21  ;;  %v5244_v62 = vsel %vm17505_vm12, %v11241_v43, %v11242_v6 }
 0x4ca   : > { %5708 = vmatpush.bf16.msrb.mxu1 %v11560_v26  ;;  %v14391_v47 = vld [vmem:[%s21233_s7 + $0x3ac] sm:$0xf]  ;;  %v11529_v25 = vld [vmem:[%s21233_s7 + $0x3b8] sm:$0xf0]  ;;  %v11528_v1 = vor.u32 %v14393_v12, %v11527_v8  ;;  %v11404_v42 = vor.u32 %v14359_v34, %v11401_v56  ;;  %v11383_v45 = vld [vmem:[%s21233_s7 + $0x288] sm:$0xf] }
 0x4cb   : > { %5721 = vmatpush.bf16.msrb.mxu2 %v11436_v49  ;;  %v14357_v46 = vld [vmem:[%s21233_s7 + $0x294] sm:$0xf0]  ;;  %v11511_v19 = vld [vmem:[%s21233_s7 + $0x388] sm:$0xf]  ;;  %v14355_v32 = vld [vmem:[%s21233_s7 + $0x28c] sm:$0xf]  ;;  %v11532_v11 = vor.u32 %v14391_v47, %v11529_v25 }
 0x4cc   : > { %5734 = vmatpush.bf16.msrb.mxu3 %v11564_v37  ;;  %v14389_v28 = vld [vmem:[%s21233_s7 + $0x394] sm:$0xf0]  ;;  %v11385_v51 = vld [vmem:[%s21233_s7 + $0x298] sm:$0xf0]  ;;  %v11243_v38 = vrot.slane %v5234_v39, 9  ;;  %v11244_v48 = vrot.slane %v5235_v22, 9  ;;  %v11384_v33 = vor.u32 %v14357_v46, %v11383_v45 }
 0x4cd   : > { %5696 = vmatpush.bf16.msrb.mxu0 %v11416_v7  ;;  %v14387_v15 = vld [vmem:[%s21233_s7 + $0x38c] sm:$0xf]  ;;  %v11513_v40 = vld [vmem:[%s21233_s7 + $0x398] sm:$0xf0]  ;;  %v11367_v55 = vld [vmem:[%s21233_s7 + $0x268] sm:$0xf]  ;;  %v11512_v41 = vor.u32 %v14389_v28, %v11511_v19  ;;  %v11388_v31 = vor.u32 %v14355_v32, %v11385_v51 }
 0x4ce   : > { %5709 = vmatpush.bf16.msrb.mxu1 %v11544_v44  ;;  %v14353_v35 = vld [vmem:[%s21233_s7 + $0x274] sm:$0xf0]  ;;  %v11495_v10 = vld [vmem:[%s21233_s7 + $0x368] sm:$0xf]  ;;  %v14351_v29 = vld [vmem:[%s21233_s7 + $0x26c] sm:$0xf]  ;;  %v11516_v14 = vor.u32 %v14387_v15, %v11513_v40  ;;  %v5248_v13 = vsel %vm17505_vm12, %v11243_v38, %v11244_v48 }
 0x4cf   : > { %5722 = vmatpush.bf16.msrb.mxu2 %v11420_v20  ;;  %v14385_v2 = vld [vmem:[%s21233_s7 + $0x374] sm:$0xf0]  ;;  %v11369_v36 = vld [vmem:[%s21233_s7 + $0x278] sm:$0xf0]  ;;  %v14383_v3 = vld [vmem:[%s21233_s7 + $0x36c] sm:$0xf]  ;;  %v11368_v50 = vor.u32 %v14353_v35, %v11367_v55 }
 0x4d0   : > { %5735 = vmatpush.bf16.msrb.mxu3 %v11548_v52  ;;  %v11497_v60 = vld [vmem:[%s21233_s7 + $0x378] sm:$0xf0]  ;;  %v11351_v53 = vld [vmem:[%s21233_s7 + $0x248] sm:$0xf]  ;;  %v14349_v57 = vld [vmem:[%s21233_s7 + $0x254] sm:$0xf0]  ;;  %v11496_v9 = vor.u32 %v14385_v2, %v11495_v10  ;;  %v11372_v17 = vor.u32 %v14351_v29, %v11369_v36 }
 0x4d1   : > { %5697 = vmatpush.bf16.msrb.mxu0 %v11400_v18  ;;  %v11479_v61 = vld [vmem:[%s21233_s7 + $0x348] sm:$0xf]  ;;  %v17550_v26 = vld.sshfl [vmem:[#allocation1] sm:$0xff pattern:$0x73625140]  ;;  %v11500_v5 = vor.u32 %v14383_v3, %v11497_v60  ;;  %v11352_v30 = vor.u32 %v14349_v57, %v11351_v53 }
 0x4d2   : > { %5710 = vmatpush.bf16.msrb.mxu1 %v11528_v1  ;;  %v6172_v49 = vld [vmem:[#allocation4] sm:$0xcc]  ;;  %v17555_v24 = vld.sshfl [vmem:[#allocation1 + $0x8] sm:$0xff pattern:$0x73625140] }
 0x4d3   : > { %5723 = vmatpush.bf16.msrb.mxu2 %v11404_v42  ;;  %v14381_v23 = vld [vmem:[%s21233_s7 + $0x354] sm:$0xf0]  ;;  %v14347_v4 = vld [vmem:[%s21233_s7 + $0x24c] sm:$0xf]  ;;  %v11353_v37 = vld [vmem:[%s21233_s7 + $0x258] sm:$0xf0] }
 0x4d4   : > { %5736 = vmatpush.bf16.msrb.mxu3 %v11532_v11  ;;  %5249 = vst [vmem:[#allocation1] ss:$4 sm:$0xff] %v5244_v62  ;;  %v14379_v27 = vld [vmem:[%s21233_s7 + $0x34c] sm:$0xf]  ;;  %v11481_v7 = vld [vmem:[%s21233_s7 + $0x358] sm:$0xf0]  ;;  %v11480_v58 = vor.u32 %v14381_v23, %v11479_v61  ;;  %v11356_v44 = vor.u32 %v14347_v4, %v11353_v37 }
 0x4d5   : > { %5698 = vmatpush.bf16.msrb.mxu0 %v11384_v33  ;;  %5251 = vst [vmem:[#allocation1 + $0x1] ss:$4 sm:$0xff] %v5248_v13  ;;  %v11335_v54 = vld [vmem:[%s21233_s7 + $0x228] sm:$0xf]  ;;  %v14345_v20 = vld [vmem:[%s21233_s7 + $0x234] sm:$0xf0]  ;;  %v11484_v0 = vor.u32 %v14379_v27, %v11481_v7 }
 0x4d6   : > { %5711 = vmatpush.bf16.msrb.mxu1 %v11512_v41  ;;  %6178 = vst.sshfl [vmem:[#allocation1 + $0x10] sm:$0xff pattern:$0x75643120] %v6172_v49  ;;  %v11463_v21 = vld [vmem:[%s21233_s7 + $0x328] sm:$0xf]  ;;  %v11336_v22 = vor.u32 %v14345_v20, %v11335_v54 }
 0x4d7   : > { %5724 = vmatpush.bf16.msrb.mxu2 %v11388_v31  ;;  %v14377_v16 = vld [vmem:[%s21233_s7 + $0x334] sm:$0xf0]  ;;  %v6171_v8 = vld [vmem:[#allocation4 + $0x10] sm:$0xcc]  ;;  %v11337_v34 = vld [vmem:[%s21233_s7 + $0x238] sm:$0xf0] }
 0x4d8   : > { %5737 = vmatpush.bf16.msrb.mxu3 %v11516_v14  ;;  %v14343_v12 = vld [vmem:[%s21233_s7 + $0x22c] sm:$0xf]  ;;  %v11465_v52 = vld [vmem:[%s21233_s7 + $0x338] sm:$0xf0]  ;;  %v11319_v63 = vld [vmem:[%s21233_s7 + $0x208] sm:$0xf]  ;;  %v11464_v1 = vor.u32 %v14377_v16, %v11463_v21 }
 0x4d9   : > { %5699 = vmatpush.bf16.msrb.mxu0 %v11368_v50  ;;  %v14375_v56 = vld [vmem:[%s21233_s7 + $0x32c] sm:$0xf]  ;;  %v14341_v39 = vld [vmem:[%s21233_s7 + $0x214] sm:$0xf0]  ;;  %v11447_v43 = vld [vmem:[%s21233_s7 + $0x308] sm:$0xf]  ;;  %v11340_v42 = vor.u32 %v14343_v12, %v11337_v34 }
 0x4da   : > { %5712 = vmatpush.bf16.msrb.mxu1 %v11496_v9  ;;  %v14373_v18 = vld [vmem:[%s21233_s7 + $0x314] sm:$0xf0]  ;;  %v14339_v47 = vld [vmem:[%s21233_s7 + $0x20c] sm:$0xf]  ;;  %v11321_v25 = vld [vmem:[%s21233_s7 + $0x218] sm:$0xf0]  ;;  %v11468_v6 = vor.u32 %v14375_v56, %v11465_v52  ;;  %v11320_v33 = vor.u32 %v14341_v39, %v11319_v63 }
 0x4db   : > { %5725 = vmatpush.bf16.msrb.mxu2 %v11372_v17  ;;  %v11679_v45 = vld [vmem:[%s21233_s7 + $0xe0] sm:$0xf]  ;;  %v14304_v46 = vld [vmem:[%s21233_s7 + $0xec] sm:$0xf0]  ;;  %v14371_v28 = vld [vmem:[%s21233_s7 + $0x30c] sm:$0xf]  ;;  %v11448_v41 = vor.u32 %v14373_v18, %v11447_v43  ;;  %v11324_v31 = vor.u32 %v14339_v47, %v11321_v25 }
 0x4dc   : > { %5738 = vmatpush.bf16.msrb.mxu3 %v11500_v5  ;;  %v11807_v19 = vld [vmem:[%s21233_s7 + $0x1e0] sm:$0xf]  ;;  %v5253_v51 = vld.sshfl [vmem:[#allocation1 + $0x8] sm:$0xff pattern:$0x73625140]  ;;  %v11680_v2 = vor.u32 %v14304_v46, %v11679_v45 }
 0x4dd   : > { %5700 = vmatpush.bf16.msrb.mxu0 %v11352_v30  ;;  %v5252_v32 = vld.sshfl [vmem:[#allocation1] sm:$0xff pattern:$0x73625140]  ;;  %v17627_v48 = vpack.c.bf16 %v5253_v51, %v5253_v51  ;;  %v14336_v11 = vld [vmem:[%s21233_s7 + $0x1ec] sm:$0xf0] }
 0x4de   : > { %5713 = vmatpush.bf16.msrb.mxu1 %v11480_v58  ;;  %v17625_v38 = vpack.c.bf16 %v5252_v32, %v5252_v32  ;;  %6175 = vst.sshfl [vmem:[#allocation1] sm:$0xff pattern:$0x75643120] %v6171_v8  ;;  %v11449_v15 = vld [vmem:[%s21233_s7 + $0x318] sm:$0xf0]  ;;  %v11808_v29 = vor.u32 %v14336_v11, %v11807_v19 }
 0x4df   : > { %5726 = vmatpush.bf16.msrb.mxu2 %v11356_v44  ;;  %v14302_v40 = vld [vmem:[%s21233_s7 + $0xe4] sm:$0xf]  ;;  %v11681_v55 = vld [vmem:[%s21233_s7 + $0xf0] sm:$0xf0]  ;;  %5664 = vmatmul.bf16.vlgmr.msra.gmra.mxu1 %v17627_v48  ;;  %v11663_v36 = vld [vmem:[%s21233_s7 + $0xc0] sm:$0xf]  ;;  %v11452_v3 = vor.u32 %v14371_v28, %v11449_v15 }
 0x4e0   : > { %5739 = vmatpush.bf16.msrb.mxu3 %v11484_v0  ;;  %v14334_v35 = vld [vmem:[%s21233_s7 + $0x1e4] sm:$0xf]  ;;  %v11809_v10 = vld [vmem:[%s21233_s7 + $0x1f0] sm:$0xf0]  ;;  %5651 = vmatmul.bf16.vlgmr.msra.gmra.mxu0 %v17625_v38  ;;  %v11684_v62 = vor.u32 %v14302_v40, %v11681_v55  ;;  %v14300_v14 = vld [vmem:[%s21233_s7 + $0xcc] sm:$0xf0] }
 0x4e1   : > { %5701 = vmatpush.bf16.msrb.mxu0 %v11336_v22  ;;  %5677 = vmatmul.bf16.vlgmr.msra.gmra.mxu2 %v17625_v38  ;;  %v11791_v60 = vld [vmem:[%s21233_s7 + $0x1c0] sm:$0xf]  ;;  %v14332_v53 = vld [vmem:[%s21233_s7 + $0x1cc] sm:$0xf0]  ;;  %v11812_v57 = vor.u32 %v14334_v35, %v11809_v10  ;;  %v14298_v50 = vld [vmem:[%s21233_s7 + $0xc4] sm:$0xf]  ;;  %v11664_v17 = vor.u32 %v14300_v14, %v11663_v36 }
 0x4e2   : > { %5714 = vmatpush.bf16.msrb.mxu1 %v11464_v1  ;;  %5690 = vmatmul.bf16.vlgmr.msra.gmra.mxu3 %v17627_v48  ;;  %v11665_v61 = vld [vmem:[%s21233_s7 + $0xd0] sm:$0xf0]  ;;  %v14330_v49 = vld [vmem:[%s21233_s7 + $0x1c4] sm:$0xf]  ;;  %v11792_v23 = vor.u32 %v14332_v53, %v11791_v60  ;;  %v11647_v13 = vld [vmem:[%s21233_s7 + $0xa0] sm:$0xf] }
 0x4e3   : > { %5727 = vmatpush.bf16.msrb.mxu2 %v11340_v42  ;;  %v11793_v9 = vld [vmem:[%s21233_s7 + $0x1d0] sm:$0xf0]  ;;  %v11668_v4 = vor.u32 %v14298_v50, %v11665_v61  ;;  %v14296_v37 = vld [vmem:[%s21233_s7 + $0xac] sm:$0xf0]  ;;  %v11775_v5 = vld [vmem:[%s21233_s7 + $0x1a0] sm:$0xf] }
 0x4e4   : > { %5740 = vmatpush.bf16.msrb.mxu3 %v11468_v6  ;;  %v14328_v27 = vld [vmem:[%s21233_s7 + $0x1ac] sm:$0xf0]  ;;  %v11796_v7 = vor.u32 %v14330_v49, %v11793_v9  ;;  %v14294_v30 = vld [vmem:[%s21233_s7 + $0xa4] sm:$0xf]  ;;  %v11649_v54 = vld [vmem:[%s21233_s7 + $0xb0] sm:$0xf0]  ;;  %v11648_v20 = vor.u32 %v14296_v37, %v11647_v13 }
 0x4e5   : > { %5702 = vmatpush.bf16.msrb.mxu0 %v11320_v33  ;;  %v14326_v58 = vld [vmem:[%s21233_s7 + $0x1a4] sm:$0xf]  ;;  %v11777_v44 = vld [vmem:[%s21233_s7 + $0x1b0] sm:$0xf0]  ;;  %v11776_v21 = vor.u32 %v14328_v27, %v11775_v5  ;;  %v11631_v16 = vld [vmem:[%s21233_s7 + $0x80] sm:$0xf]  ;;  %v11652_v8 = vor.u32 %v14294_v30, %v11649_v54 }
 0x4e6   : > { %5715 = vmatpush.bf16.msrb.mxu1 %v11448_v41  ;;  %v14292_v12 = vld [vmem:[%s21233_s7 + $0x8c] sm:$0xf0]  ;;  %v11759_v34 = vld [vmem:[%s21233_s7 + $0x180] sm:$0xf]  ;;  %v11780_v0 = vor.u32 %v14326_v58, %v11777_v44  ;;  %v14290_v52 = vld [vmem:[%s21233_s7 + $0x84] sm:$0xf] }
 0x4e7   : > { %5728 = vmatpush.bf16.msrb.mxu2 %v11324_v31  ;;  %v14324_v56 = vld [vmem:[%s21233_s7 + $0x18c] sm:$0xf0]  ;;  %v11633_v63 = vld [vmem:[%s21233_s7 + $0x90] sm:$0xf0]  ;;  %v14322_v39 = vld [vmem:[%s21233_s7 + $0x184] sm:$0xf]  ;;  %v11632_v43 = vor.u32 %v14292_v12, %v11631_v16 }
 0x4e8   : > { %5741 = vmatpush.bf16.msrb.mxu3 %v11452_v3  ;;  %v11761_v22 = vld [vmem:[%s21233_s7 + $0x190] sm:$0xf0]  ;;  %v11760_v18 = vor.u32 %v14324_v56, %v11759_v34  ;;  %v11615_v47 = vld [vmem:[%s21233_s7 + $0x60] sm:$0xf]  ;;  %v11636_v25 = vor.u32 %v14290_v52, %v11633_v63  ;;  %v14288_v1 = vld [vmem:[%s21233_s7 + $0x6c] sm:$0xf0] }
 0x4e9   : > { %6067 = vmatpush.bf16.msra.mxu0 %v11680_v2  ;;  %v11743_v42 = vld [vmem:[%s21233_s7 + $0x160] sm:$0xf]  ;;  %v14320_v45 = vld [vmem:[%s21233_s7 + $0x16c] sm:$0xf0]  ;;  %v11764_v46 = vor.u32 %v14322_v39, %v11761_v22  ;;  %v14286_v19 = vld [vmem:[%s21233_s7 + $0x64] sm:$0xf]  ;;  %v11616_v6 = vor.u32 %v14288_v1, %v11615_v47 }
 0x4ea   : > { %6080 = vmatpush.bf16.msra.mxu1 %v11808_v29  ;;  %v11617_v28 = vld [vmem:[%s21233_s7 + $0x70] sm:$0xf0]  ;;  %v14318_v32 = vld [vmem:[%s21233_s7 + $0x164] sm:$0xf]  ;;  %v11744_v11 = vor.u32 %v14320_v45, %v11743_v42  ;;  %v11599_v33 = vld [vmem:[%s21233_s7 + $0x40] sm:$0xf] }
 0x4eb   : > { %6093 = vmatpush.bf16.msra.mxu2 %v11684_v62  ;;  %v11745_v51 = vld [vmem:[%s21233_s7 + $0x170] sm:$0xf0]  ;;  %v11620_v15 = vor.u32 %v14286_v19, %v11617_v28  ;;  %v14284_v40 = vld [vmem:[%s21233_s7 + $0x4c] sm:$0xf0]  ;;  %v11727_v55 = vld [vmem:[%s21233_s7 + $0x140] sm:$0xf] }
 0x4ec   : > { %6106 = vmatpush.bf16.msra.mxu3 %v11812_v57  ;;  %v14316_v41 = vld [vmem:[%s21233_s7 + $0x14c] sm:$0xf0]  ;;  %v11748_v31 = vor.u32 %v14318_v32, %v11745_v51  ;;  %v14282_v35 = vld [vmem:[%s21233_s7 + $0x44] sm:$0xf]  ;;  %v11601_v10 = vld [vmem:[%s21233_s7 + $0x50] sm:$0xf0]  ;;  %v11600_v36 = vor.u32 %v14284_v40, %v11599_v33  ;;  %v17873_v51 = vpack.c.bf16 %v17550_v26, %v17550_v26 }
 0x4ed   : > { %6068 = vmatpush.bf16.msra.mxu0 %v11664_v17  ;;  %v14314_v2 = vld [vmem:[%s21233_s7 + $0x144] sm:$0xf]  ;;  %v11729_v29 = vld [vmem:[%s21233_s7 + $0x150] sm:$0xf0]  ;;  %v11728_v3 = vor.u32 %v14316_v41, %v11727_v55  ;;  %v11583_v62 = vld [vmem:[%s21233_s7 + $0x20] sm:$0xf] }
 0x4ee   : > { %6081 = vmatpush.bf16.msra.mxu1 %v11792_v23  ;;  %v11711_v14 = vld [vmem:[%s21233_s7 + $0x120] sm:$0xf]  ;;  %v14312_v60 = vld [vmem:[%s21233_s7 + $0x12c] sm:$0xf0]  ;;  %v11732_v53 = vor.u32 %v14314_v2, %v11729_v29  ;;  %v14278_v57 = vld [vmem:[%s21233_s7 + $0x24] sm:$0xf] }
 0x4ef   : > { %6094 = vmatpush.bf16.msra.mxu2 %v11668_v4  ;;  %5716 = vmatmul.bf16.vlgmr.msrb.gmra.mxu1 %v17627_v48  ;;  %v11585_v50 = vld [vmem:[%s21233_s7 + $0x30] sm:$0xf0]  ;;  %v14310_v61 = vld [vmem:[%s21233_s7 + $0x124] sm:$0xf]  ;;  %v11567_v9 = vld [vmem:[%s21233_s7] sm:$0xf]  ;;  %v11712_v23 = vor.u32 %v14312_v60, %v11711_v14 }
 0x4f0   : > { %6107 = vmatpush.bf16.msra.mxu3 %v11796_v7  ;;  %5703 = vmatmul.bf16.vlgmr.msrb.gmra.mxu0 %v17625_v38  ;;  %v11713_v49 = vld [vmem:[%s21233_s7 + $0x130] sm:$0xf0]  ;;  %v14276_v13 = vld [vmem:[%s21233_s7 + $0xc] sm:$0xf0]  ;;  %v11695_v4 = vld [vmem:[%s21233_s7 + $0x100] sm:$0xf]  ;;  %v11588_v5 = vor.u32 %v14278_v57, %v11585_v50 }
 0x4f1   : > { %6069 = vmatpush.bf16.msra.mxu0 %v11648_v20  ;;  %5729 = vmatmul.bf16.vlgmr.msrb.gmra.mxu2 %v17625_v38  ;;  %v11604_v38 = vor.u32 %v14282_v35, %v11601_v10  ;;  %v14308_v37 = vld [vmem:[%s21233_s7 + $0x10c] sm:$0xf0]  ;;  %v14274_v27 = vld [vmem:[%s21233_s7 + $0x4] sm:$0xf]  ;;  %v11569_v7 = vld [vmem:[%s21233_s7 + $0x10] sm:$0xf0]  ;;  %v11716_v54 = vor.u32 %v14310_v61, %v11713_v49  ;;  %v11568_v12 = vor.u32 %v14276_v13, %v11567_v9 }
 0x4f2   : > { %6082 = vmatpush.bf16.msra.mxu1 %v11776_v21  ;;  %5742 = vmatmul.bf16.vlgmr.msrb.gmra.mxu3 %v17627_v48  ;;  %v14280_v48 = vld [vmem:[%s21233_s7 + $0x2c] sm:$0xf0]  ;;  %v14306_v30 = vld [vmem:[%s21233_s7 + $0x104] sm:$0xf]  ;;  %v11697_v58 = vld [vmem:[%s21233_s7 + $0x110] sm:$0xf0]  ;;  %v11696_v34 = vor.u32 %v14308_v37, %v11695_v4  ;;  %v11572_v63 = vor.u32 %v14274_v27, %v11569_v7 }
 0x4f3   : > { %6095 = vmatpush.bf16.msra.mxu2 %v11652_v8  ;;  %v11584_v17 = vor.u32 %v14280_v48, %v11583_v62  ;;  %v11687_v44 = vld [vmem:[%s21233_s7 + $0xe8] sm:$0xf]  ;;  %v14305_v20 = vld [vmem:[%s21233_s7 + $0xf4] sm:$0xf0]  ;;  %v14303_v8 = vld [vmem:[%s21233_s7 + $0xec] sm:$0xf]  ;;  %v11700_v22 = vor.u32 %v14306_v30, %v11697_v58 }
 0x4f4   : > { %6108 = vmatpush.bf16.msra.mxu3 %v11780_v0  ;;  %v11815_v21 = vld [vmem:[%s21233_s7 + $0x1e8] sm:$0xf]  ;;  %v14337_v16 = vld [vmem:[%s21233_s7 + $0x1f4] sm:$0xf0]  ;;  %v11689_v56 = vld [vmem:[%s21233_s7 + $0xf8] sm:$0xf0]  ;;  %v11688_v39 = vor.u32 %v14305_v20, %v11687_v44 }
 0x4f5   : > { %6070 = vmatpush.bf16.msra.mxu0 %v11632_v43  ;;  %v14335_v0 = vld [vmem:[%s21233_s7 + $0x1ec] sm:$0xf]  ;;  %v11817_v52 = vld [vmem:[%s21233_s7 + $0x1f8] sm:$0xf0]  ;;  %v11816_v43 = vor.u32 %v14337_v16, %v11815_v21  ;;  %v14301_v47 = vld [vmem:[%s21233_s7 + $0xd4] sm:$0xf0] }
 0x4f6   : > { %6083 = vmatpush.bf16.msra.mxu1 %v11760_v18  ;;  %v11671_v18 = vld [vmem:[%s21233_s7 + $0xc8] sm:$0xf]  ;;  %v11820_v1 = vor.u32 %v14335_v0, %v11817_v52  ;;  %v14333_v45 = vld [vmem:[%s21233_s7 + $0x1d4] sm:$0xf0]  ;;  %v11673_v19 = vld [vmem:[%s21233_s7 + $0xd8] sm:$0xf0] }
 0x4f7   : > { %6096 = vmatpush.bf16.msra.mxu2 %v11636_v25  ;;  %v11692_v25 = vor.u32 %v14303_v8, %v11689_v56  ;;  %v11799_v42 = vld [vmem:[%s21233_s7 + $0x1c8] sm:$0xf]  ;;  %v14331_v28 = vld [vmem:[%s21233_s7 + $0x1cc] sm:$0xf]  ;;  %v11801_v32 = vld [vmem:[%s21233_s7 + $0x1d8] sm:$0xf0] }
 0x4f8   : > { %6109 = vmatpush.bf16.msra.mxu3 %v11764_v46  ;;  %v14299_v46 = vld [vmem:[%s21233_s7 + $0xcc] sm:$0xf]  ;;  %v11800_v33 = vor.u32 %v14333_v45, %v11799_v42  ;;  %v14297_v40 = vld [vmem:[%s21233_s7 + $0xb4] sm:$0xf0]  ;;  %v11804_v55 = vor.u32 %v14331_v28, %v11801_v32  ;;  %v11783_v41 = vld [vmem:[%s21233_s7 + $0x1a8] sm:$0xf] }
 0x4f9   : > { %6071 = vmatpush.bf16.msra.mxu0 %v11616_v6  ;;  %v17877_v6 = vpack.c.bf16 %v17555_v24, %v17555_v24  ;;  %v11676_v26 = vor.u32 %v14299_v46, %v11673_v19  ;;  %v14329_v24 = vld [vmem:[%s21233_s7 + $0x1b4] sm:$0xf0]  ;;  %v11657_v35 = vld [vmem:[%s21233_s7 + $0xb8] sm:$0xf0]  ;;  %v14327_v10 = vld [vmem:[%s21233_s7 + $0x1ac] sm:$0xf] }
 0x4fa   : > { %6084 = vmatpush.bf16.msra.mxu1 %v11744_v11  ;;  %v11672_v11 = vor.u32 %v14301_v47, %v11671_v18  ;;  %v11785_v2 = vld [vmem:[%s21233_s7 + $0x1b8] sm:$0xf0]  ;;  %v14293_v62 = vld [vmem:[%s21233_s7 + $0x94] sm:$0xf0]  ;;  %v11767_v14 = vld [vmem:[%s21233_s7 + $0x188] sm:$0xf] }
 0x4fb   : > { %6097 = vmatpush.bf16.msra.mxu2 %v11620_v15  ;;  %v11655_v15 = vld [vmem:[%s21233_s7 + $0xa8] sm:$0xf]  ;;  %v11788_v48 = vor.u32 %v14327_v10, %v11785_v2  ;;  %v14325_v60 = vld [vmem:[%s21233_s7 + $0x194] sm:$0xf0]  ;;  %v11641_v57 = vld [vmem:[%s21233_s7 + $0x98] sm:$0xf0] }
 0x4fc   : > { %6110 = vmatpush.bf16.msra.mxu3 %v11748_v31  ;;  %v14295_v31 = vld [vmem:[%s21233_s7 + $0xac] sm:$0xf]  ;;  %v11656_v29 = vor.u32 %v14297_v40, %v11655_v15  ;;  %v11769_v61 = vld [vmem:[%s21233_s7 + $0x198] sm:$0xf0]  ;;  %v11768_v9 = vor.u32 %v14325_v60, %v11767_v14  ;;  %v14321_v27 = vld [vmem:[%s21233_s7 + $0x174] sm:$0xf0] }
 0x4fd   : > { %6072 = vmatpush.bf16.msra.mxu0 %v11600_v36  ;;  %v11784_v36 = vor.u32 %v14329_v24, %v11783_v41  ;;  %v14323_v50 = vld [vmem:[%s21233_s7 + $0x18c] sm:$0xf]  ;;  %v11625_v30 = vld [vmem:[%s21233_s7 + $0x78] sm:$0xf0]  ;;  %v11607_v16 = vld [vmem:[%s21233_s7 + $0x48] sm:$0xf] }
 0x4fe   : > { %6085 = vmatpush.bf16.msra.mxu1 %v11728_v3  ;;  %v11639_v3 = vld [vmem:[%s21233_s7 + $0x88] sm:$0xf]  ;;  %v11772_v37 = vor.u32 %v14323_v50, %v11769_v61  ;;  %v14287_v7 = vld [vmem:[%s21233_s7 + $0x6c] sm:$0xf]  ;;  %v11753_v58 = vld [vmem:[%s21233_s7 + $0x178] sm:$0xf0] }
 0x4ff   : > { %6098 = vmatpush.bf16.msra.mxu2 %v11604_v38  ;;  %v11660_v38 = vor.u32 %v14295_v31, %v11657_v35  ;;  %v11640_v49 = vor.u32 %v14293_v62, %v11639_v3  ;;  %v6177_v13 = vld [vmem:[#allocation1 + $0x1] ss:$2 sm:$0xff]  ;;  %v6180_v44 = vld [vmem:[#allocation1 + $0x11] ss:$2 sm:$0xff] }
 0x500   : > { %6111 = vmatpush.bf16.msra.mxu3 %v11732_v53  ;;  %v14291_v53 = vld [vmem:[%s21233_s7 + $0x8c] sm:$0xf]  ;;  %6181 = vst [vmem:[#allocation1] ss:$4 sm:$0xff] %v6177_v13  ;;  %v14285_v8 = vld [vmem:[%s21233_s7 + $0x54] sm:$0xf0] }
 0x501   : > { %6073 = vmatpush.bf16.msra.mxu0 %v11584_v17  ;;  %v11623_v17 = vld [vmem:[%s21233_s7 + $0x68] sm:$0xf]  ;;  %v11644_v4 = vor.u32 %v14291_v53, %v11641_v57  ;;  %6183 = vst [vmem:[#allocation1 + $0x1] ss:$4 sm:$0xff] %v6180_v44  ;;  %v14317_v0 = vld [vmem:[%s21233_s7 + $0x154] sm:$0xf0] }
 0x502   : > { %6086 = vmatpush.bf16.msra.mxu1 %v11712_v23  ;;  %v14289_v23 = vld [vmem:[%s21233_s7 + $0x74] sm:$0xf0]  ;;  %v11735_v56 = vld [vmem:[%s21233_s7 + $0x148] sm:$0xf]  ;;  %v14283_v52 = vld [vmem:[%s21233_s7 + $0x4c] sm:$0xf] }
 0x503   : > { %6099 = vmatpush.bf16.msra.mxu2 %v11588_v5  ;;  %v11751_v5 = vld [vmem:[%s21233_s7 + $0x168] sm:$0xf]  ;;  %v11624_v20 = vor.u32 %v14289_v23, %v11623_v17  ;;  %v6683_v47 = vld [vmem:[#allocation4] sm:$0x33]  ;;  %v6684_v46 = vld [vmem:[#allocation4 + $0x18] sm:$0x33] }
 0x504   : > { %6112 = vmatpush.bf16.msra.mxu3 %v11716_v54  ;;  %v14319_v54 = vld [vmem:[%s21233_s7 + $0x16c] sm:$0xf]  ;;  %v11752_v21 = vor.u32 %v14321_v27, %v11751_v5  ;;  %v11591_v18 = vld [vmem:[%s21233_s7 + $0x28] sm:$0xf]  ;;  %v14281_v42 = vld [vmem:[%s21233_s7 + $0x34] sm:$0xf0] }
 0x505   : > { %6074 = vmatpush.bf16.msra.mxu0 %v11568_v12  ;;  %v11628_v12 = vor.u32 %v14287_v7, %v11625_v30  ;;  %v11719_v45 = vld [vmem:[%s21233_s7 + $0x128] sm:$0xf]  ;;  %v14313_v32 = vld [vmem:[%s21233_s7 + $0x134] sm:$0xf0]  ;;  %v14311_v15 = vld [vmem:[%s21233_s7 + $0x12c] sm:$0xf]  ;;  %v11592_v2 = vor.u32 %v14281_v42, %v11591_v18 }
 0x506   : > { %6087 = vmatpush.bf16.msra.mxu1 %v11696_v34  ;;  %v11756_v34 = vor.u32 %v14319_v54, %v11753_v58  ;;  %v11721_v40 = vld [vmem:[%s21233_s7 + $0x138] sm:$0xf0]  ;;  %v11575_v41 = vld [vmem:[%s21233_s7 + $0x8] sm:$0xf]  ;;  %v14277_v24 = vld [vmem:[%s21233_s7 + $0x14] sm:$0xf0] }
 0x507   : > { %6100 = vmatpush.bf16.msra.mxu2 %v11572_v63  ;;  %v11609_v63 = vld [vmem:[%s21233_s7 + $0x58] sm:$0xf0]  ;;  %v11703_v31 = vld [vmem:[%s21233_s7 + $0x108] sm:$0xf]  ;;  %v14309_v35 = vld [vmem:[%s21233_s7 + $0x114] sm:$0xf0]  ;;  %v11724_v60 = vor.u32 %v14311_v15, %v11721_v40 }
 0x508   : > { %6113 = vmatpush.bf16.msra.mxu3 %v11700_v22  ;;  %6075 = vmatmul.bf16.vlgmr.msra.gmra.mxu0 %v17873_v51  ;;  %v11737_v22 = vld [vmem:[%s21233_s7 + $0x158] sm:$0xf0]  ;;  %v11612_v19 = vor.u32 %v14283_v52, %v11609_v63  ;;  %v6688_v10 = vrot.slane %v6684_v46, 2  ;;  %v14307_v62 = vld [vmem:[%s21233_s7 + $0x10c] sm:$0xf]  ;;  %v11704_v5 = vor.u32 %v14309_v35, %v11703_v31 }
 0x509   : > { %6119 = vmatpush.bf16.msrb.mxu0 %v11688_v39  ;;  %6088 = vmatmul.bf16.vlgmr.msra.gmra.mxu1 %v17877_v6  ;;  %v14315_v39 = vld [vmem:[%s21233_s7 + $0x14c] sm:$0xf]  ;;  %v11577_v3 = vld [vmem:[%s21233_s7 + $0x18] sm:$0xf0]  ;;  %v11999_v57 = vld [vmem:[%s21233_s7 + $0x4e0] sm:$0xf] }
 0x50a   : > { %6132 = vmatpush.bf16.msrb.mxu1 %v11816_v43  ;;  %6101 = vmatmul.bf16.vlgmr.msra.gmra.mxu2 %v17873_v51  ;;  %v17979_v43 = vld [vmem:[#allocation4] sm:$0x66]  ;;  %v11740_v28 = vor.u32 %v14315_v39, %v11737_v22  ;;  %v14432_v50 = vld [vmem:[%s21233_s7 + $0x4ec] sm:$0xf0]  ;;  %v12127_v61 = vld [vmem:[%s21233_s7 + $0x5e0] sm:$0xf] }
 0x50b   : > { %6145 = vmatpush.bf16.msrb.mxu2 %v11692_v25  ;;  %6114 = vmatmul.bf16.vlgmr.msra.gmra.mxu3 %v17877_v6  ;;  %v11608_v25 = vor.u32 %v14285_v8, %v11607_v16  ;;  %v11705_v53 = vld [vmem:[%s21233_s7 + $0x118] sm:$0xf0]  ;;  %v12001_v23 = vld [vmem:[%s21233_s7 + $0x4f0] sm:$0xf0]  ;;  %v14462_v13 = vld [vmem:[%s21233_s7 + $0x5e4] sm:$0xf] }
 0x50c   : > { %6158 = vmatpush.bf16.msrb.mxu3 %v11820_v1  ;;  %v11736_v1 = vor.u32 %v14317_v0, %v11735_v56  ;;  %v12129_v27 = vld [vmem:[%s21233_s7 + $0x5f0] sm:$0xf0]  ;;  %v11708_v54 = vor.u32 %v14307_v62, %v11705_v53  ;;  %v11983_v58 = vld [vmem:[%s21233_s7 + $0x4c0] sm:$0xf]  ;;  %v14428_v16 = vld [vmem:[%s21233_s7 + $0x4cc] sm:$0xf0] }
 0x50d   : > { %6120 = vmatpush.bf16.msrb.mxu0 %v11672_v11  ;;  %v14279_v11 = vld [vmem:[%s21233_s7 + $0x2c] sm:$0xf]  ;;  %v7194_v7 = vld [vmem:[#allocation4 + $0x18] sm:$0x66]  ;;  %v12111_v8 = vld [vmem:[%s21233_s7 + $0x5c0] sm:$0xf]  ;;  %v12132_v0 = vor.u32 %v14462_v13, %v12129_v27 }
 0x50e   : > { %6133 = vmatpush.bf16.msrb.mxu1 %v11800_v33  ;;  %v11593_v33 = vld [vmem:[%s21233_s7 + $0x38] sm:$0xf0]  ;;  %v14426_v52 = vld [vmem:[%s21233_s7 + $0x4c4] sm:$0xf]  ;;  %v11985_v63 = vld [vmem:[%s21233_s7 + $0x4d0] sm:$0xf0] }
 0x50f   : > { %6146 = vmatpush.bf16.msrb.mxu2 %v11676_v26  ;;  %v6687_v26 = vrot.slane %v6683_v47, 2  ;;  %v11596_v14 = vor.u32 %v14279_v11, %v11593_v33  ;;  %v7198_v39 = vrot.slane %v7194_v7, 2  ;;  %v14458_v22 = vld [vmem:[%s21233_s7 + $0x5c4] sm:$0xf]  ;;  %v11988_v42 = vor.u32 %v14426_v52, %v11985_v63  ;;  %v11969_v40 = vld [vmem:[%s21233_s7 + $0x4b0] sm:$0xf0] }
 0x510   : > { %6159 = vmatpush.bf16.msrb.mxu3 %v11804_v55  ;;  %v7197_v55 = vrot.slane %v17979_v43, 2  ;;  %v14422_v11 = vld [vmem:[%s21233_s7 + $0x4a4] sm:$0xf]  ;;  %v12079_v31 = vld [vmem:[%s21233_s7 + $0x580] sm:$0xf] }
 0x511   : > { %6121 = vmatpush.bf16.msrb.mxu0 %v11656_v29  ;;  %v11720_v29 = vor.u32 %v14313_v32, %v11719_v45  ;;  %v6689_v17 = vsel %vm3268_vm7, %v6683_v47, %v6687_v26  ;;  %v11967_v45 = vld [vmem:[%s21233_s7 + $0x4a0] sm:$0xf]  ;;  %v14456_v32 = vld [vmem:[%s21233_s7 + $0x5ac] sm:$0xf0]  ;;  %v7202_v33 = vsel %vm3268_vm7, %v7194_v7, %v7198_v39  ;;  %v7203_v15 = vsel %vm4934_vm2, %v7194_v7, %v7198_v39  ;;  %v14454_v26 = vld [vmem:[%s21233_s7 + $0x5a4] sm:$0xf] }
 0x512   : > { %6134 = vmatpush.bf16.msrb.mxu1 %v11784_v36  ;;  %v14275_v36 = vld [vmem:[%s21233_s7 + $0xc] sm:$0xf]  ;;  %v18065_v44 = vsel %vm3268_vm7, %v17979_v43, %v7197_v55  ;;  %v14450_v53 = vld [vmem:[%s21233_s7 + $0x584] sm:$0xf]  ;;  %v11937_v7 = vld [vmem:[%s21233_s7 + $0x470] sm:$0xf0] }
 0x513   : > { %6147 = vmatpush.bf16.msrb.mxu2 %v11660_v38  ;;  %v18027_v38 = vld.sshfl [vmem:[#allocation1] sm:$0xff pattern:$0x73625140]  ;;  %v11580_v30 = vor.u32 %v14275_v36, %v11577_v3  ;;  %v12461_v18 = vrot.slane %v18065_v44, 9  ;;  %v11972_v36 = vor.u32 %v14422_v11, %v11969_v40  ;;  %v14412_v44 = vld [vmem:[%s21233_s7 + $0x44c] sm:$0xf0] }
 0x514   : > { %6160 = vmatpush.bf16.msrb.mxu3 %v11788_v48  ;;  %v18029_v48 = vld.sshfl [vmem:[#allocation1 + $0x8] sm:$0xff pattern:$0x73625140]  ;;  %v14414_v27 = vld [vmem:[%s21233_s7 + $0x464] sm:$0xf] }
 0x515   : > { %6122 = vmatpush.bf16.msrb.mxu0 %v11640_v49  ;;  %v14464_v49 = vld [vmem:[%s21233_s7 + $0x5ec] sm:$0xf0]  ;;  %6691 = vst [vmem:[#allocation1] ss:$4 sm:$0xff] %v6689_v17  ;;  %v11921_v52 = vld [vmem:[%s21233_s7 + $0x450] sm:$0xf0] }
 0x516   : > { %6135 = vmatpush.bf16.msrb.mxu1 %v11768_v9  ;;  %v14430_v9 = vld [vmem:[%s21233_s7 + $0x4e4] sm:$0xf]  ;;  %v14416_v17 = vld [vmem:[%s21233_s7 + $0x46c] sm:$0xf0]  ;;  %v12049_v39 = vld [vmem:[%s21233_s7 + $0x550] sm:$0xf0] }
 0x517   : > { %6148 = vmatpush.bf16.msrb.mxu2 %v11644_v4  ;;  %v6690_v4 = vsel %vm3268_vm7, %v6684_v46, %v6688_v10  ;;  %v12004_v56 = vor.u32 %v14430_v9, %v12001_v23  ;;  %v14424_v46 = vld [vmem:[%s21233_s7 + $0x4ac] sm:$0xf0]  ;;  %v12063_v23 = vld [vmem:[%s21233_s7 + $0x560] sm:$0xf]  ;;  %v14442_v63 = vld [vmem:[%s21233_s7 + $0x544] sm:$0xf] }
 0x518   : > { %6161 = vmatpush.bf16.msrb.mxu3 %v11772_v37  ;;  %v11576_v37 = vor.u32 %v14277_v24, %v11575_v41  ;;  %6693 = vst [vmem:[#allocation1 + $0x1] ss:$4 sm:$0xff] %v6690_v4  ;;  %v11951_v41 = vld [vmem:[%s21233_s7 + $0x480] sm:$0xf]  ;;  %v14420_v24 = vld [vmem:[%s21233_s7 + $0x48c] sm:$0xf0]  ;;  %v11968_v35 = vor.u32 %v14424_v46, %v11967_v45  ;;  %v12052_v45 = vor.u32 %v14442_v63, %v12049_v39 }
 0x519   : > { %6123 = vmatpush.bf16.msrb.mxu0 %v11624_v20  ;;  %v12000_v20 = vor.u32 %v14432_v50, %v11999_v57  ;;  %v12081_v57 = vld [vmem:[%s21233_s7 + $0x590] sm:$0xf0]  ;;  %v14406_v46 = vld [vmem:[%s21233_s7 + $0x424] sm:$0xf]  ;;  %v14404_v40 = vld [vmem:[%s21233_s7 + $0x40c] sm:$0xf0] }
 0x51a   : > { %6136 = vmatpush.bf16.msrb.mxu1 %v11752_v21  ;;  %v12128_v21 = vor.u32 %v14464_v49, %v12127_v61  ;;  %v11935_v61 = vld [vmem:[%s21233_s7 + $0x460] sm:$0xf]  ;;  %v11952_v49 = vor.u32 %v14420_v24, %v11951_v41  ;;  %v14436_v24 = vld [vmem:[%s21233_s7 + $0x50c] sm:$0xf0]  ;;  %v14486_v59 = vld [vmem:[%s21233_s7 + $0x6a4] sm:$0xf] }
 0x51b   : > { %6149 = vmatpush.bf16.msrb.mxu2 %v11628_v12  ;;  %v14460_v12 = vld [vmem:[%s21233_s7 + $0x5cc] sm:$0xf0] }
 0x51c   : > { %6162 = vmatpush.bf16.msrb.mxu3 %v11756_v34  ;;  %v7200_v34 = vsel %vm4934_vm2, %v17979_v43, %v7197_v55  ;;  %v12113_v43 = vld [vmem:[%s21233_s7 + $0x5d0] sm:$0xf0] }
 0x51d   : > { %6124 = vmatpush.bf16.msrb.mxu0 %v11608_v25  ;;  %v12462_v47 = vrot.slane %v7200_v34, 9  ;;  %v11984_v25 = vor.u32 %v14428_v16, %v11983_v58  ;;  %v12097_v55 = vld [vmem:[%s21233_s7 + $0x5b0] sm:$0xf0]  ;;  %v11919_v58 = vld [vmem:[%s21233_s7 + $0x440] sm:$0xf]  ;;  %v11940_v34 = vor.u32 %v14414_v27, %v11937_v7 }
 0x51e   : > { %6137 = vmatpush.bf16.msrb.mxu1 %v11736_v1  ;;  %v12112_v1 = vor.u32 %v14460_v12, %v12111_v8  ;;  %v12100_v3 = vor.u32 %v14454_v26, %v12097_v55  ;;  %v12047_v16 = vld [vmem:[%s21233_s7 + $0x540] sm:$0xf]  ;;  %v14444_v8 = vld [vmem:[%s21233_s7 + $0x54c] sm:$0xf0] }
 0x51f   : > { %6150 = vmatpush.bf16.msrb.mxu2 %v11612_v19  ;;  %v12116_v19 = vor.u32 %v14458_v22, %v12113_v43  ;;  %v18136_v62 = vld.sshfl [vmem:[#allocation1] sm:$0xff pattern:$0x73625140]  ;;  %v7208_v50 = vsel %vm17505_vm12, %v12461_v18, %v12462_v47  ;;  %v7716_v12 = vld [vmem:[#allocation4 + $0x18] sm:$0xcc]  ;;  %v11920_v43 = vor.u32 %v14412_v44, %v11919_v58  ;;  %v12048_v18 = vor.u32 %v14444_v8, %v12047_v16 }
 0x520   : > { %6163 = vmatpush.bf16.msrb.mxu3 %v11740_v28  ;;  %v12095_v28 = vld [vmem:[%s21233_s7 + $0x5a0] sm:$0xf]  ;;  %v14408_v47 = vld [vmem:[%s21233_s7 + $0x42c] sm:$0xf0]  ;;  %v14427_v58 = vld [vmem:[%s21233_s7 + $0x4cc] sm:$0xf]  ;;  %v18301_v16 = vpack.c.bf16 %v18027_v38, %v18027_v38 }
 0x521   : > { %6125 = vmatpush.bf16.msrb.mxu0 %v11592_v2  ;;  %v12096_v10 = vor.u32 %v14456_v32, %v12095_v28  ;;  %v12463_v2 = vrot.slane %v7202_v33, 9  ;;  %v11903_v22 = vld [vmem:[%s21233_s7 + $0x420] sm:$0xf]  ;;  %v14438_v28 = vld [vmem:[%s21233_s7 + $0x524] sm:$0xf] }
 0x522   : > { %6138 = vmatpush.bf16.msrb.mxu1 %v11720_v29  ;;  %v12464_v29 = vrot.slane %v7203_v15, 9  ;;  %v12033_v32 = vld [vmem:[%s21233_s7 + $0x530] sm:$0xf0]  ;;  %v7715_v33 = vld [vmem:[#allocation4] sm:$0xcc]  ;;  %v11904_v55 = vor.u32 %v14408_v47, %v11903_v22 }
 0x523   : > { %6151 = vmatpush.bf16.msrb.mxu2 %v11596_v14  ;;  %v18138_v14 = vld.sshfl [vmem:[#allocation1 + $0x8] sm:$0xff pattern:$0x73625140]  ;;  %v11887_v15 = vld [vmem:[%s21233_s7 + $0x400] sm:$0xf] }
 0x524   : > { %6164 = vmatpush.bf16.msrb.mxu3 %v11724_v60  ;;  %v11953_v60 = vld [vmem:[%s21233_s7 + $0x490] sm:$0xf0]  ;;  %7213 = vst [vmem:[#allocation1] ss:$4 sm:$0xff] %v7208_v50  ;;  %v7212_v13 = vsel %vm17505_vm12, %v12463_v2, %v12464_v29  ;;  %v12015_v26 = vld [vmem:[%s21233_s7 + $0x500] sm:$0xf] }
 0x525   : > { %6126 = vmatpush.bf16.msrb.mxu0 %v11576_v37  ;;  %v12084_v37 = vor.u32 %v14450_v53, %v12081_v57  ;;  %7215 = vst [vmem:[#allocation1 + $0x1] ss:$4 sm:$0xff] %v7212_v13  ;;  %v12017_v2 = vld [vmem:[%s21233_s7 + $0x510] sm:$0xf0]  ;;  %v12007_v29 = vld [vmem:[%s21233_s7 + $0x4e8] sm:$0xf]  ;;  %v11888_v57 = vor.u32 %v14404_v40, %v11887_v15  ;;  %v12016_v50 = vor.u32 %v14436_v24, %v12015_v26 }
 0x526   : > { %6139 = vmatpush.bf16.msrb.mxu1 %v11704_v5  ;;  %v14448_v5 = vld [vmem:[%s21233_s7 + $0x56c] sm:$0xf0]  ;;  %7722 = vst.sshfl [vmem:[#allocation1 + $0x10] sm:$0xff pattern:$0x75643120] %v7716_v12 }
 0x527   : > { %6152 = vmatpush.bf16.msrb.mxu2 %v11580_v30  ;;  %v14446_v30 = vld [vmem:[%s21233_s7 + $0x564] sm:$0xf]  ;;  %v14431_v53 = vld [vmem:[%s21233_s7 + $0x4ec] sm:$0xf]  ;;  %v11993_v44 = vld [vmem:[%s21233_s7 + $0x4d8] sm:$0xf0] }
 0x528   : > { %6165 = vmatpush.bf16.msrb.mxu3 %v11708_v54  ;;  %6127 = vmatmul.bf16.vlgmr.msrb.gmra.mxu0 %v17873_v51  ;;  %v12065_v54 = vld [vmem:[%s21233_s7 + $0x570] sm:$0xf0]  ;;  %v11975_v8 = vld [vmem:[%s21233_s7 + $0x4a8] sm:$0xf]  ;;  %v14425_v12 = vld [vmem:[%s21233_s7 + $0x4b4] sm:$0xf0]  ;;  %v11996_v39 = vor.u32 %v14427_v58, %v11993_v44 }
 0x529   : > { %6575 = vmatpush.bf16.msra.mxu0 %v12000_v20  ;;  %6140 = vmatmul.bf16.vlgmr.msrb.gmra.mxu1 %v17877_v6  ;;  %v11936_v20 = vor.u32 %v14416_v17, %v11935_v61  ;;  %v12009_v61 = vld [vmem:[%s21233_s7 + $0x4f8] sm:$0xf0]  ;;  %v12087_v26 = vld [vmem:[%s21233_s7 + $0x588] sm:$0xf] }
 0x52a   : > { %6588 = vmatpush.bf16.msra.mxu1 %v12128_v21  ;;  %6153 = vmatmul.bf16.vlgmr.msrb.gmra.mxu2 %v17873_v51  ;;  %v14452_v51 = vld [vmem:[%s21233_s7 + $0x58c] sm:$0xf0]  ;;  %v12064_v21 = vor.u32 %v14448_v5, %v12063_v23  ;;  %v14429_v5 = vld [vmem:[%s21233_s7 + $0x4d4] sm:$0xf0]  ;;  %v12012_v27 = vor.u32 %v14431_v53, %v12009_v61  ;;  %v11977_v47 = vld [vmem:[%s21233_s7 + $0x4b8] sm:$0xf0] }
 0x52b   : > { %6601 = vmatpush.bf16.msra.mxu2 %v12004_v56  ;;  %6166 = vmatmul.bf16.vlgmr.msrb.gmra.mxu3 %v17877_v6  ;;  %v14418_v6 = vld [vmem:[%s21233_s7 + $0x484] sm:$0xf]  ;;  %v12080_v9 = vor.u32 %v14452_v51, %v12079_v31  ;;  %v12068_v56 = vor.u32 %v14446_v30, %v12065_v54  ;;  %v12036_v51 = vor.u32 %v14438_v28, %v12033_v32  ;;  %v12119_v30 = vld [vmem:[%s21233_s7 + $0x5c8] sm:$0xf]  ;;  %v14461_v54 = vld [vmem:[%s21233_s7 + $0x5d4] sm:$0xf0] }
 0x52c   : > { %6614 = vmatpush.bf16.msra.mxu3 %v12132_v0  ;;  %v11956_v4 = vor.u32 %v14418_v6, %v11953_v60  ;;  %v14410_v0 = vld [vmem:[%s21233_s7 + $0x444] sm:$0xf]  ;;  %v14465_v60 = vld [vmem:[%s21233_s7 + $0x5f4] sm:$0xf0]  ;;  %v11959_v32 = vld [vmem:[%s21233_s7 + $0x488] sm:$0xf] }
 0x52d   : > { %6576 = vmatpush.bf16.msra.mxu0 %v11984_v25  ;;  %v12031_v25 = vld [vmem:[%s21233_s7 + $0x520] sm:$0xf]  ;;  %v14402_v31 = vld [vmem:[%s21233_s7 + $0x404] sm:$0xf]  ;;  %v11961_v24 = vld [vmem:[%s21233_s7 + $0x498] sm:$0xf0] }
 0x52e   : > { %6589 = vmatpush.bf16.msra.mxu1 %v12112_v1  ;;  %v14440_v1 = vld [vmem:[%s21233_s7 + $0x52c] sm:$0xf0]  ;;  %v18225_v11 = vld.sshfl [vmem:[#allocation1] sm:$0xff pattern:$0x73625140] }
 0x52f   : > { %6602 = vmatpush.bf16.msra.mxu2 %v11988_v42  ;;  %v11924_v42 = vor.u32 %v14410_v0, %v11921_v52  ;;  %v12032_v41 = vor.u32 %v14440_v1, %v12031_v25  ;;  %v14434_v6 = vld [vmem:[%s21233_s7 + $0x504] sm:$0xf]  ;;  %7719 = vst.sshfl [vmem:[#allocation1] sm:$0xff pattern:$0x75643120] %v7715_v33  ;;  %v12120_v0 = vor.u32 %v14461_v54, %v12119_v30 }
 0x530   : > { %6615 = vmatpush.bf16.msra.mxu3 %v12116_v19  ;;  %v11905_v19 = vld [vmem:[%s21233_s7 + $0x430] sm:$0xf0]  ;;  %v12020_v23 = vor.u32 %v14434_v6, %v12017_v2  ;;  %v18316_v63 = vld.sshfl [vmem:[#allocation1 + $0x8] sm:$0xff pattern:$0x73625140] }
 0x531   : > { %6577 = vmatpush.bf16.msra.mxu0 %v11968_v35  ;;  %v11889_v35 = vld [vmem:[%s21233_s7 + $0x410] sm:$0xf0]  ;;  %v14455_v25 = vld [vmem:[%s21233_s7 + $0x5ac] sm:$0xf]  ;;  %v12105_v1 = vld [vmem:[%s21233_s7 + $0x5b8] sm:$0xf0] }
 0x532   : > { %6590 = vmatpush.bf16.msra.mxu1 %v12096_v10  ;;  %v11908_v10 = vor.u32 %v14406_v46, %v11905_v19  ;;  %v11892_v17 = vor.u32 %v14402_v31, %v11889_v35  ;;  %v8228_v46 = vld [vmem:[#allocation4 + $0x18] sm:$0x33]  ;;  %v11976_v19 = vor.u32 %v14425_v12, %v11975_v8  ;;  %v14421_v33 = vld [vmem:[%s21233_s7 + $0x494] sm:$0xf0]  ;;  %v12108_v40 = vor.u32 %v14455_v25, %v12105_v1  ;;  %v14451_v31 = vld [vmem:[%s21233_s7 + $0x58c] sm:$0xf] }
 0x533   : > { %6603 = vmatpush.bf16.msra.mxu2 %v11972_v36  ;;  %v14433_v36 = vld [vmem:[%s21233_s7 + $0x4f4] sm:$0xf0]  ;;  %v12089_v35 = vld [vmem:[%s21233_s7 + $0x598] sm:$0xf0]  ;;  %v11960_v6 = vor.u32 %v14421_v33, %v11959_v32  ;;  %v14415_v61 = vld [vmem:[%s21233_s7 + $0x46c] sm:$0xf] }
 0x534   : > { %6616 = vmatpush.bf16.msra.mxu3 %v12100_v3  ;;  %v12135_v3 = vld [vmem:[%s21233_s7 + $0x5e8] sm:$0xf]  ;;  %v12008_v13 = vor.u32 %v14433_v36, %v12007_v29  ;;  %v14417_v36 = vld [vmem:[%s21233_s7 + $0x474] sm:$0xf0]  ;;  %v12092_v53 = vor.u32 %v14451_v31, %v12089_v35  ;;  %v14411_v30 = vld [vmem:[%s21233_s7 + $0x44c] sm:$0xf] }
 0x535   : > { %6578 = vmatpush.bf16.msra.mxu0 %v11952_v49  ;;  %v14463_v49 = vld [vmem:[%s21233_s7 + $0x5ec] sm:$0xf]  ;;  %v11943_v29 = vld [vmem:[%s21233_s7 + $0x468] sm:$0xf]  ;;  %v12057_v12 = vld [vmem:[%s21233_s7 + $0x558] sm:$0xf0] }
 0x536   : > { %6591 = vmatpush.bf16.msra.mxu1 %v12080_v9  ;;  %v12137_v9 = vld [vmem:[%s21233_s7 + $0x5f8] sm:$0xf0]  ;;  %v7721_v52 = vld [vmem:[#allocation1 + $0x1] ss:$2 sm:$0xff] }
 0x537   : > { %6604 = vmatpush.bf16.msra.mxu2 %v11956_v4  ;;  %v12136_v4 = vor.u32 %v14465_v60, %v12135_v3  ;;  %v12140_v7 = vor.u32 %v14463_v49, %v12137_v9  ;;  %7725 = vst [vmem:[#allocation1] ss:$4 sm:$0xff] %v7721_v52  ;;  %v8232_v3 = vrot.slane %v8228_v46, 2  ;;  %v11945_v49 = vld [vmem:[%s21233_s7 + $0x478] sm:$0xf0] }
 0x538   : > { %6617 = vmatpush.bf16.msra.mxu3 %v12084_v37  ;;  %v11991_v37 = vld [vmem:[%s21233_s7 + $0x4c8] sm:$0xf]  ;;  %v14447_v9 = vld [vmem:[%s21233_s7 + $0x56c] sm:$0xf]  ;;  %v11948_v54 = vor.u32 %v14415_v61, %v11945_v49 }
 0x539   : > { %6579 = vmatpush.bf16.msra.mxu0 %v11936_v20  ;;  %v14459_v20 = vld [vmem:[%s21233_s7 + $0x5cc] sm:$0xf]  ;;  %v11992_v38 = vor.u32 %v14429_v5, %v11991_v37  ;;  %v11944_v37 = vor.u32 %v14417_v36, %v11943_v29  ;;  %v8234_v52 = vsel %vm3268_vm7, %v8228_v46, %v8232_v3  ;;  %v11913_v46 = vld [vmem:[%s21233_s7 + $0x438] sm:$0xf0]  ;;  %v12319_v29 = vld [vmem:[%s21233_s7 + $0x6e0] sm:$0xf] }
 0x53a   : > { %6592 = vmatpush.bf16.msra.mxu1 %v12064_v21  ;;  %v12121_v21 = vld [vmem:[%s21233_s7 + $0x5d8] sm:$0xf0]  ;;  %v14443_v8 = vld [vmem:[%s21233_s7 + $0x54c] sm:$0xf]  ;;  %v14496_v36 = vld [vmem:[%s21233_s7 + $0x6ec] sm:$0xf0] }
 0x53b   : > { %6605 = vmatpush.bf16.msra.mxu2 %v11940_v34  ;;  %v12103_v34 = vld [vmem:[%s21233_s7 + $0x5a8] sm:$0xf]  ;;  %v12124_v22 = vor.u32 %v14459_v20, %v12121_v21  ;;  %v11929_v21 = vld [vmem:[%s21233_s7 + $0x458] sm:$0xf0]  ;;  %v12060_v1 = vor.u32 %v14443_v8, %v12057_v12  ;;  %v14490_v8 = vld [vmem:[%s21233_s7 + $0x6c4] sm:$0xf] }
 0x53c   : > { %6618 = vmatpush.bf16.msra.mxu3 %v12068_v56  ;;  %v18314_v56 = vpack.c.bf16 %v18029_v48, %v18029_v48  ;;  %v18324_v48 = vld [vmem:[#allocation4 + $0x8] sm:$0x33]  ;;  %v11932_v25 = vor.u32 %v14411_v30, %v11929_v21  ;;  %v12320_v30 = vor.u32 %v14496_v36, %v12319_v29  ;;  %v14524_v21 = vld [vmem:[%s21233_s7 + $0x7cc] sm:$0xf0]  ;;  %v12401_v36 = vld [vmem:[%s21233_s7 + $0x790] sm:$0xf0] }
 0x53d   : > { %6580 = vmatpush.bf16.msra.mxu0 %v11920_v43  ;;  %v14457_v43 = vld [vmem:[%s21233_s7 + $0x5b4] sm:$0xf0]  ;;  %v14514_v29 = vld [vmem:[%s21233_s7 + $0x784] sm:$0xf] }
 0x53e   : > { %6593 = vmatpush.bf16.msra.mxu1 %v12048_v18  ;;  %v14423_v18 = vld [vmem:[%s21233_s7 + $0x4ac] sm:$0xf]  ;;  %v12104_v28 = vor.u32 %v14457_v43, %v12103_v34 }
 0x53f   : > { %6606 = vmatpush.bf16.msra.mxu2 %v11924_v42  ;;  %v18337_v42 = vld [vmem:[#allocation4 + $0x8] sm:$0x66]  ;;  %v11980_v15 = vor.u32 %v14423_v18, %v11977_v47  ;;  %v12039_v47 = vld [vmem:[%s21233_s7 + $0x528] sm:$0xf] }
 0x540   : > { %6619 = vmatpush.bf16.msra.mxu3 %v12052_v45  ;;  %v7724_v45 = vld [vmem:[#allocation1 + $0x11] ss:$2 sm:$0xff] }
 0x541   : > { %6581 = vmatpush.bf16.msra.mxu0 %v11904_v55  ;;  %7727 = vst [vmem:[#allocation1 + $0x1] ss:$4 sm:$0xff] %v7724_v45  ;;  %v14453_v55 = vld [vmem:[%s21233_s7 + $0x594] sm:$0xf0]  ;;  %v14407_v45 = vld [vmem:[%s21233_s7 + $0x42c] sm:$0xf] }
 0x542   : > { %6594 = vmatpush.bf16.msra.mxu1 %v12032_v41  ;;  %v14419_v41 = vld [vmem:[%s21233_s7 + $0x48c] sm:$0xf]  ;;  %v12088_v2 = vor.u32 %v14453_v55, %v12087_v26  ;;  %v14405_v55 = vld [vmem:[%s21233_s7 + $0x414] sm:$0xf0]  ;;  %v11916_v31 = vor.u32 %v14407_v45, %v11913_v46  ;;  %v14520_v45 = vld [vmem:[%s21233_s7 + $0x7ac] sm:$0xf0] }
 0x543   : > { %6607 = vmatpush.bf16.msra.mxu2 %v11908_v10  ;;  %v8233_v10 = vrot.slane %v18324_v48, 2  ;;  %v11964_v60 = vor.u32 %v14419_v41, %v11961_v24  ;;  %v12023_v41 = vld [vmem:[%s21233_s7 + $0x508] sm:$0xf]  ;;  %v14437_v24 = vld [vmem:[%s21233_s7 + $0x514] sm:$0xf0] }
 0x544   : > { %6620 = vmatpush.bf16.msra.mxu3 %v12036_v51  ;;  %v8743_v51 = vrot.slane %v18337_v42, 2  ;;  %v12024_v49 = vor.u32 %v14437_v24, %v12023_v41  ;;  %v12271_v41 = vld [vmem:[%s21233_s7 + $0x680] sm:$0xf] }
 0x545   : > { %6582 = vmatpush.bf16.msra.mxu0 %v11888_v57  ;;  %v12071_v57 = vld [vmem:[%s21233_s7 + $0x568] sm:$0xf]  ;;  %v8235_v34 = vsel %vm3268_vm7, %v18324_v48, %v8233_v10  ;;  %v14409_v48 = vld [vmem:[%s21233_s7 + $0x434] sm:$0xf0]  ;;  %v14403_v10 = vld [vmem:[%s21233_s7 + $0x40c] sm:$0xf] }
 0x546   : > { %6595 = vmatpush.bf16.msra.mxu1 %v12016_v50  ;;  %v14449_v50 = vld [vmem:[%s21233_s7 + $0x574] sm:$0xf0] }
 0x547   : > { %6608 = vmatpush.bf16.msra.mxu2 %v11892_v17  ;;  %v12073_v17 = vld [vmem:[%s21233_s7 + $0x578] sm:$0xf0]  ;;  %v12072_v5 = vor.u32 %v14449_v50, %v12071_v57  ;;  %v14528_v57 = vld [vmem:[%s21233_s7 + $0x7ec] sm:$0xf0]  ;;  %v14494_v50 = vld [vmem:[%s21233_s7 + $0x6e4] sm:$0xf] }
 0x548   : > { %6621 = vmatpush.bf16.msra.mxu3 %v12020_v23  ;;  %6583 = vmatmul.bf16.vlgmr.msra.gmra.mxu0 %v18301_v16  ;;  %v11927_v23 = vld [vmem:[%s21233_s7 + $0x448] sm:$0xf]  ;;  %v12076_v58 = vor.u32 %v14447_v9, %v12073_v17  ;;  %v18406_v44 = vld.sshfl [vmem:[#allocation1] sm:$0xff pattern:$0x73625140] }
 0x549   : > { %6627 = vmatpush.bf16.msrb.mxu0 %v12008_v13  ;;  %6596 = vmatmul.bf16.vlgmr.msra.gmra.mxu1 %v18314_v56  ;;  %v14413_v13 = vld [vmem:[%s21233_s7 + $0x454] sm:$0xf0]  ;;  %v18408_v20 = vld.sshfl [vmem:[#allocation1 + $0x8] sm:$0xff pattern:$0x73625140] }
 0x54a   : > { %6640 = vmatpush.bf16.msrb.mxu1 %v12136_v4  ;;  %6609 = vmatmul.bf16.vlgmr.msra.gmra.mxu2 %v18301_v16  ;;  %v8738_v4 = vld [vmem:[#allocation4 + $0x18] sm:$0x66]  ;;  %v11928_v43 = vor.u32 %v14413_v13, %v11927_v23  ;;  %8236 = vst [vmem:[#allocation1] ss:$4 sm:$0xff] %v8234_v52  ;;  %v14526_v17 = vld [vmem:[%s21233_s7 + $0x7e4] sm:$0xf] }
 0x54b   : > { %6653 = vmatpush.bf16.msrb.mxu2 %v12012_v27  ;;  %6622 = vmatmul.bf16.vlgmr.msra.gmra.mxu3 %v18314_v56  ;;  %v12055_v27 = vld [vmem:[%s21233_s7 + $0x548] sm:$0xf]  ;;  %8238 = vst [vmem:[#allocation1 + $0x1] ss:$4 sm:$0xff] %v8235_v34  ;;  %v12321_v9 = vld [vmem:[%s21233_s7 + $0x6f0] sm:$0xf0] }
 0x54c   : > { %6666 = vmatpush.bf16.msrb.mxu3 %v12140_v7  ;;  %v14445_v7 = vld [vmem:[%s21233_s7 + $0x554] sm:$0xf0]  ;;  %v12449_v23 = vld [vmem:[%s21233_s7 + $0x7f0] sm:$0xf0]  ;;  %v12324_v12 = vor.u32 %v14494_v50, %v12321_v9  ;;  %v14480_v50 = vld [vmem:[%s21233_s7 + $0x66c] sm:$0xf0] }
 0x54d   : > { %6628 = vmatpush.bf16.msrb.mxu0 %v11992_v38  ;;  %v18423_v38 = vsel %vm3268_vm7, %v18337_v42, %v8743_v51  ;;  %v12056_v18 = vor.u32 %v14445_v7, %v12055_v27  ;;  %v12452_v34 = vor.u32 %v14526_v17, %v12449_v23  ;;  %v12404_v17 = vor.u32 %v14514_v29, %v12401_v36  ;;  %v14466_v36 = vld [vmem:[%s21233_s7 + $0x604] sm:$0xf] }
 0x54e   : > { %6641 = vmatpush.bf16.msrb.mxu1 %v12120_v0  ;;  %v11911_v0 = vld [vmem:[%s21233_s7 + $0x428] sm:$0xf]  ;;  %v13427_v32 = vrot.slane %v18423_v38, 9 }
 0x54f   : > { %6654 = vmatpush.bf16.msrb.mxu2 %v11996_v39  ;;  %v8742_v39 = vrot.slane %v8738_v4, 2 }
 0x550   : > { %6667 = vmatpush.bf16.msrb.mxu3 %v12124_v22  ;;  %v18431_v22 = vsel %vm4934_vm2, %v18337_v42, %v8743_v51  ;;  %v14441_v42 = vld [vmem:[%s21233_s7 + $0x534] sm:$0xf0]  ;;  %v11897_v51 = vld [vmem:[%s21233_s7 + $0x418] sm:$0xf0] }
 0x551   : > { %6629 = vmatpush.bf16.msrb.mxu0 %v11976_v19  ;;  %v14439_v19 = vld [vmem:[%s21233_s7 + $0x52c] sm:$0xf]  ;;  %v13428_v33 = vrot.slane %v18431_v22, 9  ;;  %v12040_v26 = vor.u32 %v14441_v42, %v12039_v47  ;;  %v8744_v3 = vsel %vm3268_vm7, %v8738_v4, %v8742_v39  ;;  %v11900_v13 = vor.u32 %v14403_v10, %v11897_v51  ;;  %v14522_v22 = vld [vmem:[%s21233_s7 + $0x7c4] sm:$0xf] }
 0x552   : > { %6642 = vmatpush.bf16.msrb.mxu1 %v12104_v28  ;;  %v12041_v28 = vld [vmem:[%s21233_s7 + $0x538] sm:$0xf0]  ;;  %v13425_v27 = vrot.slane %v8744_v3, 9  ;;  %v18521_v38 = vld.sshfl [vmem:[#allocation1] sm:$0xff pattern:$0x73625140] }
 0x553   : > { %6655 = vmatpush.bf16.msrb.mxu2 %v11980_v15  ;;  %v11895_v15 = vld [vmem:[%s21233_s7 + $0x408] sm:$0xf]  ;;  %v12044_v35 = vor.u32 %v14439_v19, %v12041_v28  ;;  %v8757_v52 = vsel %vm17505_vm12, %v13427_v32, %v13428_v33  ;;  %v12415_v42 = vld [vmem:[%s21233_s7 + $0x7a0] sm:$0xf]  ;;  %v12289_v28 = vld [vmem:[%s21233_s7 + $0x6b0] sm:$0xf0] }
 0x554   : > { %6668 = vmatpush.bf16.msrb.mxu3 %v12108_v40  ;;  %v11912_v40 = vor.u32 %v14409_v48, %v11911_v0  ;;  %v11896_v61 = vor.u32 %v14405_v55, %v11895_v15  ;;  %v18523_v0 = vld.sshfl [vmem:[#allocation1 + $0x8] sm:$0xff pattern:$0x73625140]  ;;  %v14488_v48 = vld [vmem:[%s21233_s7 + $0x6ac] sm:$0xf0] }
 0x555   : > { %6630 = vmatpush.bf16.msrb.mxu0 %v11960_v6  ;;  %v14435_v6 = vld [vmem:[%s21233_s7 + $0x50c] sm:$0xf]  ;;  %8760 = vst [vmem:[#allocation1 + $0x1] ss:$4 sm:$0xff] %v8757_v52  ;;  %v14518_v15 = vld [vmem:[%s21233_s7 + $0x7a4] sm:$0xf] }
 0x556   : > { %6643 = vmatpush.bf16.msrb.mxu1 %v12088_v2  ;;  %v12025_v2 = vld [vmem:[%s21233_s7 + $0x518] sm:$0xf0]  ;;  %v9261_v55 = vld [vmem:[#allocation4 + $0x8] sm:$0xcc] }
 0x557   : > { %6656 = vmatpush.bf16.msrb.mxu2 %v11964_v60  ;;  %v8745_v60 = vsel %vm4934_vm2, %v8738_v4, %v8742_v39  ;;  %v12028_v4 = vor.u32 %v14435_v6, %v12025_v2  ;;  %v12305_v39 = vld [vmem:[%s21233_s7 + $0x6d0] sm:$0xf0]  ;;  %v12399_v10 = vld [vmem:[%s21233_s7 + $0x780] sm:$0xf]  ;;  %v14482_v6 = vld [vmem:[%s21233_s7 + $0x684] sm:$0xf] }
 0x558   : > { %6669 = vmatpush.bf16.msrb.mxu3 %v12092_v53  ;;  %v12447_v53 = vld [vmem:[%s21233_s7 + $0x7e0] sm:$0xf]  ;;  %v13426_v7 = vrot.slane %v8745_v60, 9  ;;  %v12308_v46 = vor.u32 %v14490_v8, %v12305_v39  ;;  %v12273_v2 = vld [vmem:[%s21233_s7 + $0x690] sm:$0xf0] }
 0x559   : > { %6631 = vmatpush.bf16.msrb.mxu0 %v11944_v37  ;;  %v12303_v37 = vld [vmem:[%s21233_s7 + $0x6c0] sm:$0xf]  ;;  %v12276_v9 = vor.u32 %v14482_v6, %v12273_v2  ;;  %v14508_v39 = vld [vmem:[%s21233_s7 + $0x74c] sm:$0xf0] }
 0x55a   : > { %6644 = vmatpush.bf16.msrb.mxu1 %v12072_v5  ;;  %v14492_v5 = vld [vmem:[%s21233_s7 + $0x6cc] sm:$0xf0]  ;;  %v8753_v47 = vsel %vm17505_vm12, %v13425_v27, %v13426_v7  ;;  %v12255_v3 = vld [vmem:[%s21233_s7 + $0x660] sm:$0xf]  ;;  %v12385_v7 = vld [vmem:[%s21233_s7 + $0x770] sm:$0xf0] }
 0x55b   : > { %6657 = vmatpush.bf16.msrb.mxu2 %v11948_v54  ;;  %v12448_v54 = vor.u32 %v14528_v57, %v12447_v53  ;;  %8758 = vst [vmem:[#allocation1] ss:$4 sm:$0xff] %v8753_v47  ;;  %v12256_v8 = vor.u32 %v14480_v50, %v12255_v3  ;;  %v12367_v52 = vld [vmem:[%s21233_s7 + $0x740] sm:$0xf]  ;;  %v14506_v47 = vld [vmem:[%s21233_s7 + $0x744] sm:$0xf] }
 0x55c   : > { %6670 = vmatpush.bf16.msrb.mxu3 %v12076_v58  ;;  %v12431_v58 = vld [vmem:[%s21233_s7 + $0x7c0] sm:$0xf]  ;;  %v5665_v33 = vpop.f32.mrf.mxu1  ;;  %9267 = vst.sshfl [vmem:[#allocation1 + $0x10] sm:$0xff pattern:$0x75643120] %v9261_v55 }
 0x55d   : > { %6632 = vmatpush.bf16.msrb.mxu0 %v11928_v43  ;;  %v12433_v43 = vld [vmem:[%s21233_s7 + $0x7d0] sm:$0xf0]  ;;  %v5652_v32 = vpop.f32.mrf.mxu0 }
 0x55e   : > { %6645 = vmatpush.bf16.msrb.mxu1 %v12056_v18  ;;  %v12287_v18 = vld [vmem:[%s21233_s7 + $0x6a0] sm:$0xf]  ;;  %v12436_v19 = vor.u32 %v14522_v22, %v12433_v43  ;;  %v12225_v55 = vld [vmem:[%s21233_s7 + $0x630] sm:$0xf0] }
 0x55f   : > { %6658 = vmatpush.bf16.msrb.mxu2 %v11932_v25  ;;  %v12304_v25 = vor.u32 %v14492_v5, %v12303_v37  ;;  %v12288_v24 = vor.u32 %v14488_v48, %v12287_v18  ;;  %v14510_v37 = vld [vmem:[%s21233_s7 + $0x764] sm:$0xf]  ;;  %v12241_v48 = vld [vmem:[%s21233_s7 + $0x650] sm:$0xf0] }
 0x560   : > { %6671 = vmatpush.bf16.msrb.mxu3 %v12060_v1  ;;  %v12432_v1 = vor.u32 %v14524_v21, %v12431_v58  ;;  %v12239_v58 = vld [vmem:[%s21233_s7 + $0x640] sm:$0xf]  ;;  %v9260_v21 = vld [vmem:[#allocation4 + $0x18] sm:$0xcc]  ;;  %v12388_v43 = vor.u32 %v14510_v37, %v12385_v7  ;;  %v14474_v18 = vld [vmem:[%s21233_s7 + $0x644] sm:$0xf] }
 0x561   : > { %6633 = vmatpush.bf16.msrb.mxu0 %v11912_v40  ;;  %v12417_v40 = vld [vmem:[%s21233_s7 + $0x7b0] sm:$0xf0]  ;;  %v14495_v37 = vld [vmem:[%s21233_s7 + $0x6ec] sm:$0xf] }
 0x562   : > { %6646 = vmatpush.bf16.msrb.mxu1 %v12040_v26  ;;  %v18564_v26 = vadd.f32 %v5665_v33, %v5652_v32  ;;  %v12420_v51 = vor.u32 %v14518_v15, %v12417_v40  ;;  %v12351_v33 = vld [vmem:[%s21233_s7 + $0x720] sm:$0xf]  ;;  %v14504_v15 = vld [vmem:[%s21233_s7 + $0x72c] sm:$0xf0]  ;;  %v14470_v40 = vld [vmem:[%s21233_s7 + $0x624] sm:$0xf] }
 0x563   : > { %6659 = vmatpush.bf16.msrb.mxu2 %v11916_v31  ;;  %v12416_v31 = vor.u32 %v14520_v45, %v12415_v42  ;;  %v12368_v42 = vor.u32 %v14508_v39, %v12367_v52  ;;  %v12352_v2 = vor.u32 %v14504_v15, %v12351_v33  ;;  %v12209_v3 = vld [vmem:[%s21233_s7 + $0x610] sm:$0xf0]  ;;  %v12228_v50 = vor.u32 %v14470_v40, %v12225_v55 }
 0x564   : > { %6672 = vmatpush.bf16.msrb.mxu3 %v12044_v35  ;;  %v14484_v35 = vld [vmem:[%s21233_s7 + $0x68c] sm:$0xf0]  ;;  %v5678_v57 = vpop.f32.mrf.mxu2  ;;  %v18748_v33 = vpack.c.bf16 %v18136_v62, %v18136_v62  ;;  %v18752_v15 = vpack.c.bf16 %v18138_v14, %v18138_v14  ;;  %v14521_v14 = vld [vmem:[%s21233_s7 + $0x7b4] sm:$0xf0] }
 0x565   : > { %6634 = vmatpush.bf16.msrb.mxu0 %v11896_v61  ;;  %v12272_v60 = vor.u32 %v14484_v35, %v12271_v41  ;;  %v12383_v61 = vld [vmem:[%s21233_s7 + $0x760] sm:$0xf]  ;;  %v5691_v23 = vpop.f32.mrf.mxu3  ;;  %v5654_v5 = vpop.f32.mrf.mxu0  ;;  %v14502_v41 = vld [vmem:[%s21233_s7 + $0x724] sm:$0xf] }
 0x566   : > { %6647 = vmatpush.bf16.msrb.mxu1 %v12024_v49  ;;  %v14512_v49 = vld [vmem:[%s21233_s7 + $0x76c] sm:$0xf0]  ;;  %v18613_v27 = vadd.f32 %v5691_v23, %v5678_v57  ;;  %v18691_v57 = vld.sshfl [vmem:[#allocation1 + $0x8] sm:$0xff pattern:$0x73625140] }
 0x567   : > { %6660 = vmatpush.bf16.msrb.mxu2 %v11900_v13  ;;  %v14478_v13 = vld [vmem:[%s21233_s7 + $0x664] sm:$0xf]  ;;  %v14497_v23 = vld [vmem:[%s21233_s7 + $0x6f4] sm:$0xf0]  ;;  %v12329_v5 = vld [vmem:[%s21233_s7 + $0x6f8] sm:$0xf0] }
 0x568   : > { %6673 = vmatpush.bf16.msrb.mxu3 %v12028_v4  ;;  %6635 = vmatmul.bf16.vlgmr.msrb.gmra.mxu0 %v18301_v16  ;;  %v12257_v4 = vld [vmem:[%s21233_s7 + $0x670] sm:$0xf0] }
 0x569   : > { %7085 = vmatpush.bf16.msra.mxu0 %v12320_v30  ;;  %6648 = vmatmul.bf16.vlgmr.msrb.gmra.mxu1 %v18314_v56  ;;  %v5667_v30 = vpop.f32.mrf.mxu1  ;;  %v12260_v22 = vor.u32 %v14478_v13, %v12257_v4  ;;  %v12455_v13 = vld [vmem:[%s21233_s7 + $0x7e8] sm:$0xf]  ;;  %v14529_v4 = vld [vmem:[%s21233_s7 + $0x7f4] sm:$0xf0] }
 0x56a   : > { %7098 = vmatpush.bf16.msra.mxu1 %v12448_v54  ;;  %6661 = vmatmul.bf16.vlgmr.msrb.gmra.mxu2 %v18301_v16  ;;  %v14516_v16 = vld [vmem:[%s21233_s7 + $0x78c] sm:$0xf0]  ;;  %v18618_v54 = vld.sshfl [vmem:[#allocation1] sm:$0xff pattern:$0x73625140]  ;;  %v12456_v52 = vor.u32 %v14529_v4, %v12455_v13 }
 0x56b   : > { %7111 = vmatpush.bf16.msra.mxu2 %v12324_v12  ;;  %6674 = vmatmul.bf16.vlgmr.msrb.gmra.mxu3 %v18314_v56  ;;  %v12292_v56 = vor.u32 %v14486_v59, %v12289_v28  ;;  %v12400_v53 = vor.u32 %v14516_v16, %v12399_v10  ;;  %v12384_v12 = vor.u32 %v14512_v49, %v12383_v61  ;;  %v12207_v10 = vld [vmem:[%s21233_s7 + $0x600] sm:$0xf]  ;;  %v14468_v16 = vld [vmem:[%s21233_s7 + $0x60c] sm:$0xf0]  ;;  %v12337_v49 = vld [vmem:[%s21233_s7 + $0x710] sm:$0xf0] }
 0x56c   : > { %7124 = vmatpush.bf16.msra.mxu3 %v12452_v34  ;;  %v14476_v34 = vld [vmem:[%s21233_s7 + $0x64c] sm:$0xf0]  ;;  %9264 = vst.sshfl [vmem:[#allocation1] sm:$0xff pattern:$0x75643120] %v9260_v21  ;;  %v5680_v45 = vpop.f32.mrf.mxu2  ;;  %v12244_v59 = vor.u32 %v14474_v18, %v12241_v48  ;;  %v12208_v7 = vor.u32 %v14468_v16, %v12207_v10  ;;  %v12332_v48 = vor.u32 %v14495_v37, %v12329_v5 }
 0x56d   : > { %7086 = vmatpush.bf16.msra.mxu0 %v12304_v25  ;;  %v12369_v25 = vld [vmem:[%s21233_s7 + $0x750] sm:$0xf0]  ;;  %v5693_v32 = vpop.f32.mrf.mxu3  ;;  %v12457_v21 = vld [vmem:[%s21233_s7 + $0x7f8] sm:$0xf0]  ;;  %v14493_v18 = vld [vmem:[%s21233_s7 + $0x6d4] sm:$0xf0] }
 0x56e   : > { %7099 = vmatpush.bf16.msra.mxu1 %v12432_v1  ;;  %v12240_v1 = vor.u32 %v14476_v34, %v12239_v58  ;;  %v12372_v28 = vor.u32 %v14506_v47, %v12369_v25  ;;  %v14527_v58 = vld [vmem:[%s21233_s7 + $0x7ec] sm:$0xf]  ;;  %v12439_v45 = vld [vmem:[%s21233_s7 + $0x7c8] sm:$0xf]  ;;  %v12441_v32 = vld [vmem:[%s21233_s7 + $0x7d8] sm:$0xf0] }
 0x56f   : > { %7112 = vmatpush.bf16.msra.mxu2 %v12308_v46  ;;  %v12223_v46 = vld [vmem:[%s21233_s7 + $0x620] sm:$0xf]  ;;  %v12460_v47 = vor.u32 %v14527_v58, %v12457_v21  ;;  %v14487_v10 = vld [vmem:[%s21233_s7 + $0x6ac] sm:$0xf]  ;;  %v12297_v16 = vld [vmem:[%s21233_s7 + $0x6b8] sm:$0xf0] }
 0x570   : > { %7125 = vmatpush.bf16.msra.mxu3 %v12436_v19  ;;  %v14472_v19 = vld [vmem:[%s21233_s7 + $0x62c] sm:$0xf0]  ;;  %v14515_v13 = vld [vmem:[%s21233_s7 + $0x78c] sm:$0xf]  ;;  %v12409_v4 = vld [vmem:[%s21233_s7 + $0x798] sm:$0xf0] }
 0x571   : > { %7087 = vmatpush.bf16.msra.mxu0 %v12288_v24  ;;  %v12353_v24 = vld [vmem:[%s21233_s7 + $0x730] sm:$0xf0]  ;;  %v5717_v35 = vpop.f32.mrf.mxu1  ;;  %v12224_v6 = vor.u32 %v14472_v19, %v12223_v46  ;;  %v14525_v46 = vld [vmem:[%s21233_s7 + $0x7d4] sm:$0xf0]  ;;  %v14491_v19 = vld [vmem:[%s21233_s7 + $0x6cc] sm:$0xf] }
 0x572   : > { %7100 = vmatpush.bf16.msra.mxu1 %v12416_v31  ;;  %v5704_v31 = vpop.f32.mrf.mxu0  ;;  %v12356_v61 = vor.u32 %v14502_v41, %v12353_v24  ;;  %v12440_v55 = vor.u32 %v14525_v46, %v12439_v45  ;;  %v12295_v41 = vld [vmem:[%s21233_s7 + $0x6a8] sm:$0xf]  ;;  %v14489_v24 = vld [vmem:[%s21233_s7 + $0x6b4] sm:$0xf0] }
 0x573   : > { %7113 = vmatpush.bf16.msra.mxu2 %v12292_v56  ;;  %v12335_v56 = vld [vmem:[%s21233_s7 + $0x700] sm:$0xf]  ;;  %v18680_v29 = vadd.f32 %v5717_v35, %v5704_v31  ;;  %v12423_v35 = vld [vmem:[%s21233_s7 + $0x7a8] sm:$0xf]  ;;  %v14477_v45 = vld [vmem:[%s21233_s7 + $0x654] sm:$0xf0] }
 0x574   : > { %7126 = vmatpush.bf16.msra.mxu3 %v12420_v51  ;;  %v14500_v51 = vld [vmem:[%s21233_s7 + $0x70c] sm:$0xf0]  ;;  %v5730_v39 = vpop.f32.mrf.mxu2  ;;  %v12263_v21 = vld [vmem:[%s21233_s7 + $0x668] sm:$0xf] }
 0x575   : > { %7088 = vmatpush.bf16.msra.mxu0 %v12272_v60  ;;  %v14498_v60 = vld [vmem:[%s21233_s7 + $0x704] sm:$0xf]  ;;  %v12336_v30 = vor.u32 %v14500_v51, %v12335_v56  ;;  %v14519_v56 = vld [vmem:[%s21233_s7 + $0x7ac] sm:$0xf]  ;;  %v12425_v51 = vld [vmem:[%s21233_s7 + $0x7b8] sm:$0xf0] }
 0x576   : > { %7101 = vmatpush.bf16.msra.mxu1 %v12400_v53  ;;  %v9266_v53 = vld [vmem:[#allocation1 + $0x1] ss:$2 sm:$0xff] }
 0x577   : > { %7114 = vmatpush.bf16.msra.mxu2 %v12276_v9  ;;  %v9269_v9 = vld [vmem:[#allocation1 + $0x11] ss:$2 sm:$0xff]  ;;  %9270 = vst [vmem:[#allocation1] ss:$4 sm:$0xff] %v9266_v53 }
 0x578   : > { %7127 = vmatpush.bf16.msra.mxu3 %v12404_v17  ;;  %v12327_v17 = vld [vmem:[%s21233_s7 + $0x6e8] sm:$0xf]  ;;  %9272 = vst [vmem:[#allocation1 + $0x1] ss:$4 sm:$0xff] %v9269_v9  ;;  %v14485_v53 = vld [vmem:[%s21233_s7 + $0x694] sm:$0xf0] }
 0x579   : > { %7089 = vmatpush.bf16.msra.mxu0 %v12256_v8  ;;  %v12212_v8 = vor.u32 %v14466_v36, %v12209_v3  ;;  %v12328_v34 = vor.u32 %v14497_v23, %v12327_v17  ;;  %v14517_v9 = vld [vmem:[%s21233_s7 + $0x794] sm:$0xf0]  ;;  %v14483_v17 = vld [vmem:[%s21233_s7 + $0x68c] sm:$0xf]  ;;  %v12281_v23 = vld [vmem:[%s21233_s7 + $0x698] sm:$0xf0] }
 0x57a   : > { %7102 = vmatpush.bf16.msra.mxu1 %v12384_v12  ;;  %v12340_v12 = vor.u32 %v14498_v60, %v12337_v49  ;;  %v12279_v60 = vld [vmem:[%s21233_s7 + $0x688] sm:$0xf] }
 0x57b   : > { %7115 = vmatpush.bf16.msra.mxu2 %v12260_v22  ;;  %v5743_v22 = vpop.f32.mrf.mxu3  ;;  %v12407_v49 = vld [vmem:[%s21233_s7 + $0x788] sm:$0xf] }
 0x57c   : > { %7128 = vmatpush.bf16.msra.mxu3 %v12388_v43  ;;  %v12311_v43 = vld [vmem:[%s21233_s7 + $0x6c8] sm:$0xf]  ;;  %v18726_v25 = vadd.f32 %v5743_v22, %v5730_v39  ;;  %v5732_v36 = vpop.f32.mrf.mxu2  ;;  %v12408_v58 = vor.u32 %v14517_v9, %v12407_v49  ;;  %v14479_v39 = vld [vmem:[%s21233_s7 + $0x66c] sm:$0xf] }
 0x57d   : > { %7090 = vmatpush.bf16.msra.mxu0 %v12240_v1  ;;  %v5706_v1 = vpop.f32.mrf.mxu0  ;;  %v12312_v40 = vor.u32 %v14493_v18, %v12311_v43  ;;  %v12265_v43 = vld [vmem:[%s21233_s7 + $0x678] sm:$0xf0]  ;;  %v14511_v18 = vld [vmem:[%s21233_s7 + $0x76c] sm:$0xf]  ;;  %v12359_v36 = vld [vmem:[%s21233_s7 + $0x728] sm:$0xf] }
 0x57e   : > { %7103 = vmatpush.bf16.msra.mxu1 %v12368_v42  ;;  %v5719_v42 = vpop.f32.mrf.mxu1  ;;  %v12268_v46 = vor.u32 %v14479_v39, %v12265_v43  ;;  %v12215_v49 = vld [vmem:[%s21233_s7 + $0x608] sm:$0xf]  ;;  %v14592_v39 = vld [vmem:[%s21233_s7 + $0x9ec] sm:$0xf0]  ;;  %v14558_v43 = vld [vmem:[%s21233_s7 + $0x8e4] sm:$0xf] }
 0x57f   : > { %7116 = vmatpush.bf16.msra.mxu2 %v12244_v59  ;;  %v12313_v59 = vld [vmem:[%s21233_s7 + $0x6d8] sm:$0xf0]  ;;  %v12247_v42 = vld [vmem:[%s21233_s7 + $0x648] sm:$0xf] }
 0x580   : > { %7129 = vmatpush.bf16.msra.mxu3 %v12372_v28  ;;  %v14523_v28 = vld [vmem:[%s21233_s7 + $0x7cc] sm:$0xf]  ;;  %v12316_v62 = vor.u32 %v14491_v19, %v12313_v59  ;;  %v12375_v59 = vld [vmem:[%s21233_s7 + $0x748] sm:$0xf] }
 0x581   : > { %7091 = vmatpush.bf16.msra.mxu0 %v12224_v6  ;;  %v12444_v31 = vor.u32 %v14523_v28, %v12441_v32  ;;  %v12296_v6 = vor.u32 %v14489_v24, %v12295_v41  ;;  %v14509_v28 = vld [vmem:[%s21233_s7 + $0x754] sm:$0xf0]  ;;  %v14475_v32 = vld [vmem:[%s21233_s7 + $0x64c] sm:$0xf]  ;;  %v12249_v41 = vld [vmem:[%s21233_s7 + $0x658] sm:$0xf0] }
 0x582   : > { %7104 = vmatpush.bf16.msra.mxu1 %v12352_v2  ;;  %v12424_v2 = vor.u32 %v14521_v14, %v12423_v35  ;;  %v14507_v24 = vld [vmem:[%s21233_s7 + $0x74c] sm:$0xf] }
 0x583   : > { %7117 = vmatpush.bf16.msra.mxu2 %v12228_v50  ;;  %v5745_v3 = vpop.f32.mrf.mxu3  ;;  %v12300_v50 = vor.u32 %v14487_v10, %v12297_v16  ;;  %v12248_v10 = vor.u32 %v14477_v45, %v12247_v42  ;;  %v12376_v16 = vor.u32 %v14509_v28, %v12375_v59  ;;  %v12773_v42 = vld [vmem:[%s21233_s7 + $0x9f0] sm:$0xf0]  ;;  %v12627_v28 = vld [vmem:[%s21233_s7 + $0x8c0] sm:$0xf] }
 0x584   : > { %7130 = vmatpush.bf16.msra.mxu3 %v12356_v61  ;;  %v12428_v61 = vor.u32 %v14519_v56, %v12425_v51  ;;  %v12231_v56 = vld [vmem:[%s21233_s7 + $0x628] sm:$0xf]  ;;  %v14473_v51 = vld [vmem:[%s21233_s7 + $0x634] sm:$0xf0] }
 0x585   : > { %7092 = vmatpush.bf16.msra.mxu0 %v12208_v7  ;;  %v6076_v37 = vpop.f32.mrf.mxu0  ;;  %v14505_v3 = vld [vmem:[%s21233_s7 + $0x734] sm:$0xf0]  ;;  %v12232_v9 = vor.u32 %v14473_v51, %v12231_v56  ;;  %v12611_v56 = vld [vmem:[%s21233_s7 + $0x8a0] sm:$0xf]  ;;  %v14552_v51 = vld [vmem:[%s21233_s7 + $0x8ac] sm:$0xf0] }
 0x586   : > { %7105 = vmatpush.bf16.msra.mxu1 %v12336_v30  ;;  %v6089_v5 = vpop.f32.mrf.mxu1  ;;  %v6077_v7 = vadd.f32 %v6076_v37, %v18564_v26  ;;  %v12280_v30 = vor.u32 %v14485_v53, %v12279_v60  ;;  %v14513_v26 = vld [vmem:[%s21233_s7 + $0x774] sm:$0xf0]  ;;  %v14471_v60 = vld [vmem:[%s21233_s7 + $0x62c] sm:$0xf]  ;;  %v12233_v53 = vld [vmem:[%s21233_s7 + $0x638] sm:$0xf0] }
 0x587   : > { %7118 = vmatpush.bf16.msra.mxu2 %v12212_v8  ;;  %v14481_v8 = vld [vmem:[%s21233_s7 + $0x674] sm:$0xf0]  ;;  %v12236_v37 = vor.u32 %v14471_v60, %v12233_v53  ;;  %v14550_v60 = vld [vmem:[%s21233_s7 + $0x8a4] sm:$0xf]  ;;  %v12613_v53 = vld [vmem:[%s21233_s7 + $0x8b0] sm:$0xf0] }
 0x588   : > { %7131 = vmatpush.bf16.msra.mxu3 %v12340_v12  ;;  %7093 = vmatmul.bf16.vlgmr.msra.gmra.mxu0 %v18748_v33  ;;  %v12284_v12 = vor.u32 %v14483_v17, %v12281_v23  ;;  %v18822_v22 = vadd.f32 %v6089_v5, %v6077_v7  ;;  %v12360_v17 = vor.u32 %v14505_v3, %v12359_v36  ;;  %v14469_v23 = vld [vmem:[%s21233_s7 + $0x614] sm:$0xf0]  ;;  %v14467_v7 = vld [vmem:[%s21233_s7 + $0x60c] sm:$0xf]  ;;  %v12739_v36 = vld [vmem:[%s21233_s7 + $0x9a0] sm:$0xf] }
 0x589   : > { %7137 = vmatpush.bf16.msrb.mxu0 %v12328_v34  ;;  %7106 = vmatmul.bf16.vlgmr.msra.gmra.mxu1 %v18752_v15  ;;  %v12412_v34 = vor.u32 %v14515_v13, %v12409_v4  ;;  %v12343_v13 = vld [vmem:[%s21233_s7 + $0x708] sm:$0xf]  ;;  %v14501_v4 = vld [vmem:[%s21233_s7 + $0x714] sm:$0xf0]  ;;  %v14584_v3 = vld [vmem:[%s21233_s7 + $0x9ac] sm:$0xf0] }
 0x58a   : > { %7150 = vmatpush.bf16.msrb.mxu1 %v12456_v52  ;;  %7119 = vmatmul.bf16.vlgmr.msra.gmra.mxu2 %v18748_v33  ;;  %v12391_v52 = vld [vmem:[%s21233_s7 + $0x768] sm:$0xf] }
 0x58b   : > { %7163 = vmatpush.bf16.msrb.mxu2 %v12332_v48  ;;  %7132 = vmatmul.bf16.vlgmr.msra.gmra.mxu3 %v18752_v15  ;;  %v12393_v48 = vld [vmem:[%s21233_s7 + $0x778] sm:$0xf0]  ;;  %v12392_v1 = vor.u32 %v14513_v26, %v12391_v52  ;;  %v14560_v52 = vld [vmem:[%s21233_s7 + $0x8ec] sm:$0xf0]  ;;  %v12771_v26 = vld [vmem:[%s21233_s7 + $0x9e0] sm:$0xf] }
 0x58c   : > { %7176 = vmatpush.bf16.msrb.mxu3 %v12460_v47  ;;  %v12264_v47 = vor.u32 %v14481_v8, %v12263_v21  ;;  %v12396_v19 = vor.u32 %v14511_v18, %v12393_v48  ;;  %v12216_v18 = vor.u32 %v14469_v23, %v12215_v49  ;;  %v12344_v48 = vor.u32 %v14501_v4, %v12343_v13  ;;  %v14548_v23 = vld [vmem:[%s21233_s7 + $0x88c] sm:$0xf0] }
 0x58d   : > { %7138 = vmatpush.bf16.msrb.mxu0 %v12312_v40  ;;  %v6102_v40 = vpop.f32.mrf.mxu2  ;;  %v6078_v35 = vpop.f32.mrf.mxu0  ;;  %v12772_v59 = vor.u32 %v14592_v39, %v12771_v26  ;;  %v12612_v49 = vor.u32 %v14552_v51, %v12611_v56  ;;  %v12616_v13 = vor.u32 %v14550_v60, %v12613_v53  ;;  %v14544_v26 = vld [vmem:[%s21233_s7 + $0x86c] sm:$0xf0] }
 0x58e   : > { %7151 = vmatpush.bf16.msrb.mxu1 %v12440_v55  ;;  %v6115_v55 = vpop.f32.mrf.mxu3  ;;  %v6091_v14 = vpop.f32.mrf.mxu1  ;;  %v14586_v35 = vld [vmem:[%s21233_s7 + $0x9c4] sm:$0xf] }
 0x58f   : > { %7164 = vmatpush.bf16.msrb.mxu2 %v12316_v62  ;;  %v12377_v62 = vld [vmem:[%s21233_s7 + $0x758] sm:$0xf0]  ;;  %v12757_v14 = vld [vmem:[%s21233_s7 + $0x9d0] sm:$0xf0] }
 0x590   : > { %7177 = vmatpush.bf16.msrb.mxu3 %v12444_v31  ;;  %v6103_v31 = vadd.f32 %v6102_v40, %v18613_v27  ;;  %v12380_v27 = vor.u32 %v14507_v24, %v12377_v62  ;;  %v14588_v24 = vld [vmem:[%s21233_s7 + $0x9cc] sm:$0xf0]  ;;  %v14554_v62 = vld [vmem:[%s21233_s7 + $0x8c4] sm:$0xf] }
 0x591   : > { %7139 = vmatpush.bf16.msrb.mxu0 %v12296_v6 }
 0x592   : > { %7152 = vmatpush.bf16.msrb.mxu1 %v12424_v2  ;;  %v18864_v6 = vadd.f32 %v6115_v55, %v6103_v31  ;;  %v12252_v2 = vor.u32 %v14475_v32, %v12249_v41  ;;  %v14556_v32 = vld [vmem:[%s21233_s7 + $0x8cc] sm:$0xf0]  ;;  %v12755_v41 = vld [vmem:[%s21233_s7 + $0x9c0] sm:$0xf]  ;;  %v12629_v31 = vld [vmem:[%s21233_s7 + $0x8d0] sm:$0xf0] }
 0x593   : > { %7165 = vmatpush.bf16.msrb.mxu2 %v12300_v50  ;;  %v14503_v50 = vld [vmem:[%s21233_s7 + $0x72c] sm:$0xf] }
 0x594   : > { %7178 = vmatpush.bf16.msrb.mxu3 %v12428_v61  ;;  %v12361_v61 = vld [vmem:[%s21233_s7 + $0x738] sm:$0xf0] }
 0x595   : > { %7140 = vmatpush.bf16.msrb.mxu0 %v12280_v30  ;;  %v12364_v5 = vor.u32 %v14503_v50, %v12361_v61  ;;  %v12217_v30 = vld [vmem:[%s21233_s7 + $0x618] sm:$0xf0]  ;;  %v6104_v21 = vpop.f32.mrf.mxu2  ;;  %v14582_v50 = vld [vmem:[%s21233_s7 + $0x9a4] sm:$0xf]  ;;  %v12741_v61 = vld [vmem:[%s21233_s7 + $0x9b0] sm:$0xf0] }
 0x596   : > { %7153 = vmatpush.bf16.msrb.mxu1 %v12408_v58  ;;  %v14499_v58 = vld [vmem:[%s21233_s7 + $0x70c] sm:$0xf]  ;;  %v6117_v8 = vpop.f32.mrf.mxu3  ;;  %v12220_v45 = vor.u32 %v14467_v7, %v12217_v30  ;;  %v12744_v4 = vor.u32 %v14582_v50, %v12741_v61  ;;  %v14578_v7 = vld [vmem:[%s21233_s7 + $0x984] sm:$0xf]  ;;  %v12725_v30 = vld [vmem:[%s21233_s7 + $0x990] sm:$0xf0] }
 0x597   : > { %7166 = vmatpush.bf16.msrb.mxu2 %v12284_v12  ;;  %v12345_v12 = vld [vmem:[%s21233_s7 + $0x718] sm:$0xf0]  ;;  %v12675_v50 = vld [vmem:[%s21233_s7 + $0x920] sm:$0xf]  ;;  %v14568_v61 = vld [vmem:[%s21233_s7 + $0x92c] sm:$0xf0] }
 0x598   : > { %7179 = vmatpush.bf16.msrb.mxu3 %v12412_v34  ;;  %v12643_v34 = vld [vmem:[%s21233_s7 + $0x8e0] sm:$0xf] }
 0x599   : > { %7141 = vmatpush.bf16.msrb.mxu0 %v12264_v47  ;;  %v12645_v47 = vld [vmem:[%s21233_s7 + $0x8f0] sm:$0xf0] }
 0x59a   : > { %7154 = vmatpush.bf16.msrb.mxu1 %v12392_v1  ;;  %v14590_v1 = vld [vmem:[%s21233_s7 + $0x9e4] sm:$0xf]  ;;  %v12648_v40 = vor.u32 %v14558_v43, %v12645_v47  ;;  %v12728_v43 = vor.u32 %v14578_v7, %v12725_v30 }
 0x59b   : > { %7167 = vmatpush.bf16.msrb.mxu2 %v12268_v46  ;;  %v12348_v46 = vor.u32 %v14499_v58, %v12345_v12  ;;  %v12776_v55 = vor.u32 %v14590_v1, %v12773_v42  ;;  %v12581_v1 = vld [vmem:[%s21233_s7 + $0x870] sm:$0xf0]  ;;  %v14574_v42 = vld [vmem:[%s21233_s7 + $0x964] sm:$0xf] }
 0x59c   : > { %7180 = vmatpush.bf16.msrb.mxu3 %v12396_v19  ;;  %v12644_v19 = vor.u32 %v14560_v52, %v12643_v34  ;;  %v12579_v52 = vld [vmem:[%s21233_s7 + $0x860] sm:$0xf] }
 0x59d   : > { %7142 = vmatpush.bf16.msrb.mxu0 %v12248_v10  ;;  %v12628_v10 = vor.u32 %v14556_v32, %v12627_v28  ;;  %v14540_v28 = vld [vmem:[%s21233_s7 + $0x84c] sm:$0xf0] }
 0x59e   : > { %7155 = vmatpush.bf16.msrb.mxu1 %v12376_v16  ;;  %v12756_v16 = vor.u32 %v14588_v24, %v12755_v41  ;;  %v14572_v41 = vld [vmem:[%s21233_s7 + $0x94c] sm:$0xf0]  ;;  %v14538_v24 = vld [vmem:[%s21233_s7 + $0x844] sm:$0xf] }
 0x59f   : > { %7168 = vmatpush.bf16.msrb.mxu2 %v12252_v2  ;;  %v12632_v2 = vor.u32 %v14554_v62, %v12629_v31 }
 0x5a0   : > { %7181 = vmatpush.bf16.msrb.mxu3 %v12380_v27  ;;  %v12760_v27 = vor.u32 %v14586_v35, %v12757_v14  ;;  %v12565_v35 = vld [vmem:[%s21233_s7 + $0x850] sm:$0xf0]  ;;  %v14570_v14 = vld [vmem:[%s21233_s7 + $0x944] sm:$0xf] }
 0x5a1   : > { %7143 = vmatpush.bf16.msrb.mxu0 %v12232_v9  ;;  %v12740_v9 = vor.u32 %v14584_v3, %v12739_v36  ;;  %v12547_v36 = vld [vmem:[%s21233_s7 + $0x820] sm:$0xf]  ;;  %v14536_v3 = vld [vmem:[%s21233_s7 + $0x82c] sm:$0xf0]  ;;  %v12568_v53 = vor.u32 %v14538_v24, %v12565_v35  ;;  %v14555_v35 = vld [vmem:[%s21233_s7 + $0x8cc] sm:$0xf] }
 0x5a2   : > { %7156 = vmatpush.bf16.msrb.mxu1 %v12360_v17  ;;  %v12595_v17 = vld [vmem:[%s21233_s7 + $0x880] sm:$0xf] }
 0x5a3   : > { %7169 = vmatpush.bf16.msrb.mxu2 %v12236_v37  ;;  %v14546_v37 = vld [vmem:[%s21233_s7 + $0x884] sm:$0xf]  ;;  %v12596_v12 = vor.u32 %v14548_v23, %v12595_v17  ;;  %v12677_v23 = vld [vmem:[%s21233_s7 + $0x930] sm:$0xf0] }
 0x5a4   : > { %7182 = vmatpush.bf16.msrb.mxu3 %v12364_v5  ;;  %v12597_v5 = vld [vmem:[%s21233_s7 + $0x890] sm:$0xf0]  ;;  %v14566_v17 = vld [vmem:[%s21233_s7 + $0x924] sm:$0xf] }
 0x5a5   : > { %7144 = vmatpush.bf16.msrb.mxu0 %v12216_v18  ;;  %v6128_v58 = vpop.f32.mrf.mxu0  ;;  %v12600_v39 = vor.u32 %v14546_v37, %v12597_v5  ;;  %v12707_v18 = vld [vmem:[%s21233_s7 + $0x960] sm:$0xf]  ;;  %v14564_v5 = vld [vmem:[%s21233_s7 + $0x90c] sm:$0xf0]  ;;  %v12680_v30 = vor.u32 %v14566_v17, %v12677_v23 }
 0x5a6   : > { %7157 = vmatpush.bf16.msrb.mxu1 %v12344_v48  ;;  %v6141_v21 = vpop.f32.mrf.mxu1  ;;  %v6129_v8 = vadd.f32 %v6128_v58, %v18680_v29  ;;  %v14576_v29 = vld [vmem:[%s21233_s7 + $0x96c] sm:$0xf0]  ;;  %v14542_v48 = vld [vmem:[%s21233_s7 + $0x864] sm:$0xf]  ;;  %v12659_v37 = vld [vmem:[%s21233_s7 + $0x900] sm:$0xf] }
 0x5a7   : > { %7170 = vmatpush.bf16.msrb.mxu2 %v12220_v45  ;;  %v12709_v45 = vld [vmem:[%s21233_s7 + $0x970] sm:$0xf0]  ;;  %v12584_v32 = vor.u32 %v14542_v48, %v12581_v1  ;;  %v14530_v58 = vld [vmem:[%s21233_s7 + $0x804] sm:$0xf]  ;;  %v12660_v1 = vor.u32 %v14564_v5, %v12659_v37  ;;  %v12731_v37 = vld [vmem:[%s21233_s7 + $0x988] sm:$0xf] }
 0x5a8   : > { %7183 = vmatpush.bf16.msrb.mxu3 %v12348_v46  ;;  %7145 = vmatmul.bf16.vlgmr.msrb.gmra.mxu0 %v18748_v33  ;;  %v19024_v47 = vadd.f32 %v6141_v21, %v6129_v8  ;;  %v12580_v46 = vor.u32 %v14544_v26, %v12579_v52  ;;  %v12533_v21 = vld [vmem:[%s21233_s7 + $0x810] sm:$0xf0]  ;;  %v14562_v8 = vld [vmem:[%s21233_s7 + $0x904] sm:$0xf]  ;;  %v12651_v26 = vld [vmem:[%s21233_s7 + $0x8e8] sm:$0xf] }
 0x5a9   : > { %7607 = vmatpush.bf16.msra.mxu0 %v12644_v19  ;;  %7158 = vmatmul.bf16.vlgmr.msrb.gmra.mxu1 %v18752_v15  ;;  %v12708_v19 = vor.u32 %v14576_v29, %v12707_v18  ;;  %v12661_v52 = vld [vmem:[%s21233_s7 + $0x910] sm:$0xf0]  ;;  %v14593_v18 = vld [vmem:[%s21233_s7 + $0x9f4] sm:$0xf0]  ;;  %v14559_v29 = vld [vmem:[%s21233_s7 + $0x8ec] sm:$0xf] }
 0x5aa   : > { %7620 = vmatpush.bf16.msra.mxu1 %v12772_v59  ;;  %7171 = vmatmul.bf16.vlgmr.msrb.gmra.mxu2 %v18748_v33  ;;  %v12723_v33 = vld [vmem:[%s21233_s7 + $0x980] sm:$0xf]  ;;  %v14581_v5 = vld [vmem:[%s21233_s7 + $0x994] sm:$0xf0] }
 0x5ab   : > { %7633 = vmatpush.bf16.msra.mxu2 %v12648_v40  ;;  %7184 = vmatmul.bf16.vlgmr.msrb.gmra.mxu3 %v18752_v15  ;;  %v14580_v15 = vld [vmem:[%s21233_s7 + $0x98c] sm:$0xf0]  ;;  %v12563_v59 = vld [vmem:[%s21233_s7 + $0x840] sm:$0xf]  ;;  %v12712_v40 = vor.u32 %v14574_v42, %v12709_v45  ;;  %v12653_v42 = vld [vmem:[%s21233_s7 + $0x8f8] sm:$0xf0] }
 0x5ac   : > { %7646 = vmatpush.bf16.msra.mxu3 %v12776_v55  ;;  %v12724_v34 = vor.u32 %v14580_v15, %v12723_v33  ;;  %v12691_v55 = vld [vmem:[%s21233_s7 + $0x940] sm:$0xf]  ;;  %v12676_v33 = vor.u32 %v14568_v61, %v12675_v50  ;;  %v14532_v15 = vld [vmem:[%s21233_s7 + $0x80c] sm:$0xf0]  ;;  %v14591_v45 = vld [vmem:[%s21233_s7 + $0x9ec] sm:$0xf] }
 0x5ad   : > { %7608 = vmatpush.bf16.msra.mxu0 %v12628_v10  ;;  %v6154_v62 = vpop.f32.mrf.mxu2  ;;  %v12693_v10 = vld [vmem:[%s21233_s7 + $0x950] sm:$0xf0]  ;;  %v6130_v56 = vpop.f32.mrf.mxu0  ;;  %v14551_v50 = vld [vmem:[%s21233_s7 + $0x8ac] sm:$0xf]  ;;  %v12621_v61 = vld [vmem:[%s21233_s7 + $0x8b8] sm:$0xf0] }
 0x5ae   : > { %7621 = vmatpush.bf16.msra.mxu1 %v12756_v16  ;;  %v6167_v31 = vpop.f32.mrf.mxu3  ;;  %v6155_v16 = vadd.f32 %v6154_v62, %v18726_v25  ;;  %v6143_v51 = vpop.f32.mrf.mxu1  ;;  %v12696_v25 = vor.u32 %v14570_v14, %v12693_v10  ;;  %v12763_v62 = vld [vmem:[%s21233_s7 + $0x9c8] sm:$0xf]  ;;  %v12637_v14 = vld [vmem:[%s21233_s7 + $0x8d8] sm:$0xf0]  ;;  %v14587_v10 = vld [vmem:[%s21233_s7 + $0x9cc] sm:$0xf]  ;;  %v19160_v56 = vpack.c.bf16 %v18225_v11, %v18225_v11 }
 0x5af   : > { %7634 = vmatpush.bf16.msra.mxu2 %v12632_v2  ;;  %v12564_v2 = vor.u32 %v14540_v28, %v12563_v59  ;;  %v12664_v59 = vor.u32 %v14562_v8, %v12661_v52  ;;  %v19164_v51 = vpack.c.bf16 %v18316_v63, %v18316_v63  ;;  %v12640_v11 = vor.u32 %v14555_v35, %v12637_v14  ;;  %v14585_v63 = vld [vmem:[%s21233_s7 + $0x9b4] sm:$0xf0] }
 0x5b0   : > { %7647 = vmatpush.bf16.msra.mxu3 %v12760_v27  ;;  %v12692_v27 = vor.u32 %v14572_v41, %v12691_v55  ;;  %v19066_v60 = vadd.f32 %v6167_v31, %v6155_v16  ;;  %v14557_v55 = vld [vmem:[%s21233_s7 + $0x8d4] sm:$0xf0]  ;;  %v12656_v41 = vor.u32 %v14559_v29, %v12653_v42  ;;  %v12765_v16 = vld [vmem:[%s21233_s7 + $0x9d8] sm:$0xf0]  ;;  %v14543_v42 = vld [vmem:[%s21233_s7 + $0x86c] sm:$0xf] }
 0x5b1   : > { %7609 = vmatpush.bf16.msra.mxu0 %v12612_v49  ;;  %v14534_v49 = vld [vmem:[%s21233_s7 + $0x824] sm:$0xf]  ;;  %v14589_v31 = vld [vmem:[%s21233_s7 + $0x9d4] sm:$0xf0] }
 0x5b2   : > { %7622 = vmatpush.bf16.msra.mxu1 %v12740_v9  ;;  %v12549_v9 = vld [vmem:[%s21233_s7 + $0x830] sm:$0xf0] }
 0x5b3   : > { %7635 = vmatpush.bf16.msra.mxu2 %v12616_v13  ;;  %v12531_v13 = vld [vmem:[%s21233_s7 + $0x800] sm:$0xf]  ;;  %v12552_v7 = vor.u32 %v14534_v49, %v12549_v9  ;;  %v14583_v49 = vld [vmem:[%s21233_s7 + $0x9ac] sm:$0xf]  ;;  %v12749_v9 = vld [vmem:[%s21233_s7 + $0x9b8] sm:$0xf0] }
 0x5b4   : > { %7648 = vmatpush.bf16.msra.mxu3 %v12744_v4  ;;  %v12548_v4 = vor.u32 %v14536_v3, %v12547_v36  ;;  %v12532_v48 = vor.u32 %v14532_v15, %v12531_v13  ;;  %v12619_v36 = vld [vmem:[%s21233_s7 + $0x8a8] sm:$0xf]  ;;  %v14553_v3 = vld [vmem:[%s21233_s7 + $0x8b4] sm:$0xf0]  ;;  %v12752_v15 = vor.u32 %v14583_v49, %v12749_v9 }
 0x5b5   : > { %7610 = vmatpush.bf16.msra.mxu0 %v12596_v12  ;;  %v6156_v12 = vpop.f32.mrf.mxu2  ;;  %v12620_v17 = vor.u32 %v14553_v3, %v12619_v36  ;;  %v12603_v13 = vld [vmem:[%s21233_s7 + $0x888] sm:$0xf] }
 0x5b6   : > { %7623 = vmatpush.bf16.msra.mxu1 %v12724_v34  ;;  %v6169_v34 = vpop.f32.mrf.mxu3  ;;  %v12683_v9 = vld [vmem:[%s21233_s7 + $0x928] sm:$0xf] }
 0x5b7   : > { %7636 = vmatpush.bf16.msra.mxu2 %v12600_v39  ;;  %v14561_v39 = vld [vmem:[%s21233_s7 + $0x8f4] sm:$0xf0] }
 0x5b8   : > { %7649 = vmatpush.bf16.msra.mxu3 %v12728_v43  ;;  %v12779_v43 = vld [vmem:[%s21233_s7 + $0x9e8] sm:$0xf]  ;;  %v12652_v28 = vor.u32 %v14561_v39, %v12651_v26  ;;  %v12732_v26 = vor.u32 %v14581_v5, %v12731_v37  ;;  %v14533_v5 = vld [vmem:[%s21233_s7 + $0x814] sm:$0xf0] }
 0x5b9   : > { %7611 = vmatpush.bf16.msra.mxu0 %v12580_v46  ;;  %v12781_v46 = vld [vmem:[%s21233_s7 + $0x9f8] sm:$0xf0]  ;;  %v12587_v39 = vld [vmem:[%s21233_s7 + $0x868] sm:$0xf] }
 0x5ba   : > { %7624 = vmatpush.bf16.msra.mxu1 %v12708_v19  ;;  %v12536_v19 = vor.u32 %v14530_v58, %v12533_v21  ;;  %v12784_v24 = vor.u32 %v14591_v45, %v12781_v46  ;;  %v14579_v58 = vld [vmem:[%s21233_s7 + $0x98c] sm:$0xf]  ;;  %v12733_v21 = vld [vmem:[%s21233_s7 + $0x998] sm:$0xf0] }
 0x5bb   : > { %7637 = vmatpush.bf16.msra.mxu2 %v12584_v32  ;;  %v12780_v32 = vor.u32 %v14593_v18, %v12779_v43  ;;  %v14545_v43 = vld [vmem:[%s21233_s7 + $0x874] sm:$0xf0]  ;;  %v12736_v29 = vor.u32 %v14579_v58, %v12733_v21  ;;  %v12589_v46 = vld [vmem:[%s21233_s7 + $0x878] sm:$0xf0] }
 0x5bc   : > { %7650 = vmatpush.bf16.msra.mxu3 %v12712_v40  ;;  %v12635_v40 = vld [vmem:[%s21233_s7 + $0x8c8] sm:$0xf] }
 0x5bd   : > { %7612 = vmatpush.bf16.msra.mxu0 %v12564_v2  ;;  %v12636_v2 = vor.u32 %v14557_v55, %v12635_v40  ;;  %v14541_v40 = vld [vmem:[%s21233_s7 + $0x854] sm:$0xf0]  ;;  %v12592_v55 = vor.u32 %v14543_v42, %v12589_v46 }
 0x5be   : > { %7625 = vmatpush.bf16.msra.mxu1 %v12692_v27  ;;  %v12764_v27 = vor.u32 %v14589_v31, %v12763_v62  ;;  %v14573_v62 = vld [vmem:[%s21233_s7 + $0x954] sm:$0xf0]  ;;  %v14539_v31 = vld [vmem:[%s21233_s7 + $0x84c] sm:$0xf] }
 0x5bf   : > { %7638 = vmatpush.bf16.msra.mxu2 %v12568_v53  ;;  %v12768_v53 = vor.u32 %v14587_v10, %v12765_v16  ;;  %v12573_v10 = vld [vmem:[%s21233_s7 + $0x858] sm:$0xf0]  ;;  %v14571_v16 = vld [vmem:[%s21233_s7 + $0x94c] sm:$0xf] }
 0x5c0   : > { %7651 = vmatpush.bf16.msra.mxu3 %v12696_v25  ;;  %v12747_v25 = vld [vmem:[%s21233_s7 + $0x9a8] sm:$0xf] }
 0x5c1   : > { %7613 = vmatpush.bf16.msra.mxu0 %v12548_v4  ;;  %v12748_v23 = vor.u32 %v14585_v63, %v12747_v25  ;;  %v14549_v4 = vld [vmem:[%s21233_s7 + $0x894] sm:$0xf0]  ;;  %v12555_v25 = vld [vmem:[%s21233_s7 + $0x828] sm:$0xf] }
 0x5c2   : > { %7626 = vmatpush.bf16.msra.mxu1 %v12676_v33  ;;  %v12624_v33 = vor.u32 %v14551_v50, %v12621_v61  ;;  %v12604_v52 = vor.u32 %v14549_v4, %v12603_v13  ;;  %v14537_v63 = vld [vmem:[%s21233_s7 + $0x834] sm:$0xf0]  ;;  %v12576_v61 = vor.u32 %v14539_v31, %v12573_v10  ;;  %v12557_v13 = vld [vmem:[%s21233_s7 + $0x838] sm:$0xf0]  ;;  %v14618_v10 = vld [vmem:[%s21233_s7 + $0xac4] sm:$0xf] }
 0x5c3   : > { %7639 = vmatpush.bf16.msra.mxu2 %v12552_v7  ;;  %v14547_v7 = vld [vmem:[%s21233_s7 + $0x88c] sm:$0xf]  ;;  %v12685_v4 = vld [vmem:[%s21233_s7 + $0x938] sm:$0xf0] }
 0x5c4   : > { %7652 = vmatpush.bf16.msra.mxu3 %v12680_v30  ;;  %v12605_v30 = vld [vmem:[%s21233_s7 + $0x898] sm:$0xf0] }
 0x5c5   : > { %7614 = vmatpush.bf16.msra.mxu0 %v12532_v48  ;;  %v6584_v8 = vpop.f32.mrf.mxu0  ;;  %v12608_v18 = vor.u32 %v14547_v7, %v12605_v30  ;;  %v12715_v48 = vld [vmem:[%s21233_s7 + $0x968] sm:$0xf]  ;;  %v14565_v30 = vld [vmem:[%s21233_s7 + $0x914] sm:$0xf0] }
 0x5c6   : > { %7627 = vmatpush.bf16.msra.mxu1 %v12660_v1  ;;  %v6597_v12 = vpop.f32.mrf.mxu1  ;;  %v14577_v1 = vld [vmem:[%s21233_s7 + $0x974] sm:$0xf0]  ;;  %v12667_v7 = vld [vmem:[%s21233_s7 + $0x908] sm:$0xf] }
 0x5c7   : > { %7640 = vmatpush.bf16.msra.mxu2 %v12536_v19  ;;  %v6598_v34 = vadd.f32 %v6597_v12, %v6584_v8  ;;  %v14575_v19 = vld [vmem:[%s21233_s7 + $0x96c] sm:$0xf]  ;;  %v12541_v12 = vld [vmem:[%s21233_s7 + $0x818] sm:$0xf0]  ;;  %v12668_v46 = vor.u32 %v14565_v30, %v12667_v7  ;;  %v14610_v7 = vld [vmem:[%s21233_s7 + $0xa84] sm:$0xf] }
 0x5c8   : > { %7653 = vmatpush.bf16.msra.mxu3 %v12664_v59  ;;  %7615 = vmatmul.bf16.vlgmr.msra.gmra.mxu0 %v19160_v56  ;;  %v12717_v59 = vld [vmem:[%s21233_s7 + $0x978] sm:$0xf0]  ;;  %v14531_v8 = vld [vmem:[%s21233_s7 + $0x80c] sm:$0xf]  ;;  %v12917_v30 = vld [vmem:[%s21233_s7 + $0xa90] sm:$0xf0] }
 0x5c9   : > { %7659 = vmatpush.bf16.msrb.mxu0 %v12652_v28  ;;  %7628 = vmatmul.bf16.vlgmr.msra.gmra.mxu1 %v19164_v51  ;;  %v19234_v45 = vadd.f32 %v6598_v34, %v18822_v22  ;;  %v12588_v28 = vor.u32 %v14545_v43, %v12587_v39  ;;  %v12571_v22 = vld [vmem:[%s21233_s7 + $0x848] sm:$0xf]  ;;  %v14563_v34 = vld [vmem:[%s21233_s7 + $0x90c] sm:$0xf]  ;;  %v12669_v39 = vld [vmem:[%s21233_s7 + $0x918] sm:$0xf0] }
 0x5ca   : > { %7672 = vmatpush.bf16.msrb.mxu1 %v12780_v32  ;;  %7641 = vmatmul.bf16.vlgmr.msra.gmra.mxu2 %v19160_v56  ;;  %v12716_v32 = vor.u32 %v14577_v1, %v12715_v48  ;;  %v12963_v43 = vld [vmem:[%s21233_s7 + $0xae0] sm:$0xf]  ;;  %v14656_v48 = vld [vmem:[%s21233_s7 + $0xbec] sm:$0xf0]  ;;  %v14622_v1 = vld [vmem:[%s21233_s7 + $0xae4] sm:$0xf] }
 0x5cb   : > { %7685 = vmatpush.bf16.msrb.mxu2 %v12656_v41  ;;  %7654 = vmatmul.bf16.vlgmr.msra.gmra.mxu3 %v19164_v51  ;;  %v12720_v41 = vor.u32 %v14575_v19, %v12717_v59  ;;  %v12965_v19 = vld [vmem:[%s21233_s7 + $0xaf0] sm:$0xf0]  ;;  %v14654_v59 = vld [vmem:[%s21233_s7 + $0xbe4] sm:$0xf] }
 0x5cc   : > { %7698 = vmatpush.bf16.msrb.mxu3 %v12784_v24  ;;  %v12699_v24 = vld [vmem:[%s21233_s7 + $0x948] sm:$0xf] }
 0x5cd   : > { %7660 = vmatpush.bf16.msrb.mxu0 %v12636_v2  ;;  %v6610_v35 = vpop.f32.mrf.mxu2  ;;  %v12701_v2 = vld [vmem:[%s21233_s7 + $0x958] sm:$0xf0]  ;;  %v6586_v36 = vpop.f32.mrf.mxu0 }
 0x5ce   : > { %7673 = vmatpush.bf16.msrb.mxu1 %v12764_v27  ;;  %v6623_v14 = vpop.f32.mrf.mxu3  ;;  %v6599_v3 = vpop.f32.mrf.mxu1  ;;  %v12704_v49 = vor.u32 %v14571_v16, %v12701_v2  ;;  %v12949_v16 = vld [vmem:[%s21233_s7 + $0xad0] sm:$0xf0]  ;;  %v14650_v2 = vld [vmem:[%s21233_s7 + $0xbc4] sm:$0xf] }
 0x5cf   : > { %7686 = vmatpush.bf16.msrb.mxu2 %v12640_v11  ;;  %v6624_v27 = vadd.f32 %v6623_v14, %v6610_v35  ;;  %v12572_v11 = vor.u32 %v14541_v40, %v12571_v22  ;;  %v12672_v22 = vor.u32 %v14563_v34, %v12669_v39  ;;  %v13075_v35 = vld [vmem:[%s21233_s7 + $0xbc0] sm:$0xf]  ;;  %v14652_v14 = vld [vmem:[%s21233_s7 + $0xbcc] sm:$0xf0] }
 0x5d0   : > { %7699 = vmatpush.bf16.msrb.mxu3 %v12768_v53  ;;  %v12700_v53 = vor.u32 %v14573_v62, %v12699_v24  ;;  %v14620_v24 = vld [vmem:[%s21233_s7 + $0xacc] sm:$0xf0]  ;;  %v12968_v62 = vor.u32 %v14622_v1, %v12965_v19  ;;  %v13076_v3 = vor.u32 %v14652_v14, %v13075_v35  ;;  %v12899_v39 = vld [vmem:[%s21233_s7 + $0xa60] sm:$0xf]  ;;  %v12901_v19 = vld [vmem:[%s21233_s7 + $0xa70] sm:$0xf0] }
 0x5d1   : > { %7661 = vmatpush.bf16.msrb.mxu0 %v12620_v17  ;;  %v19276_v50 = vadd.f32 %v6624_v27, %v18864_v6  ;;  %v14569_v17 = vld [vmem:[%s21233_s7 + $0x934] sm:$0xf0]  ;;  %v14567_v6 = vld [vmem:[%s21233_s7 + $0x92c] sm:$0xf]  ;;  %v13077_v27 = vld [vmem:[%s21233_s7 + $0xbd0] sm:$0xf0] }
 0x5d2   : > { %7674 = vmatpush.bf16.msrb.mxu1 %v12748_v23  ;;  %v14535_v23 = vld [vmem:[%s21233_s7 + $0x82c] sm:$0xf]  ;;  %v12684_v37 = vor.u32 %v14569_v17, %v12683_v9  ;;  %v12688_v21 = vor.u32 %v14567_v6, %v12685_v4  ;;  %v14614_v9 = vld [vmem:[%s21233_s7 + $0xaa4] sm:$0xf]  ;;  %v12933_v17 = vld [vmem:[%s21233_s7 + $0xab0] sm:$0xf0] }
 0x5d3   : > { %7687 = vmatpush.bf16.msrb.mxu2 %v12624_v33  ;;  %v12539_v33 = vld [vmem:[%s21233_s7 + $0x808] sm:$0xf]  ;;  %v12560_v58 = vor.u32 %v14535_v23, %v12557_v13  ;;  %v14646_v23 = vld [vmem:[%s21233_s7 + $0xba4] sm:$0xf]  ;;  %v13061_v13 = vld [vmem:[%s21233_s7 + $0xbb0] sm:$0xf0] }
 0x5d4   : > { %7700 = vmatpush.bf16.msrb.mxu3 %v12752_v15  ;;  %v12556_v15 = vor.u32 %v14537_v63, %v12555_v25  ;;  %v12540_v42 = vor.u32 %v14533_v5, %v12539_v33  ;;  %v12952_v25 = vor.u32 %v14618_v10, %v12949_v16  ;;  %v13080_v63 = vor.u32 %v14650_v2, %v13077_v27  ;;  %v12915_v33 = vld [vmem:[%s21233_s7 + $0xa80] sm:$0xf]  ;;  %v14640_v1 = vld [vmem:[%s21233_s7 + $0xb6c] sm:$0xf0]  ;;  %v12885_v10 = vld [vmem:[%s21233_s7 + $0xa50] sm:$0xf0] }
 0x5d5   : > { %7662 = vmatpush.bf16.msrb.mxu0 %v12604_v52  ;;  %v6612_v52 = vpop.f32.mrf.mxu2  ;;  %v13064_v5 = vor.u32 %v14646_v23, %v13061_v13  ;;  %v14634_v16 = vld [vmem:[%s21233_s7 + $0xb44] sm:$0xf]  ;;  %v13013_v2 = vld [vmem:[%s21233_s7 + $0xb50] sm:$0xf0]  ;;  %v14632_v23 = vld [vmem:[%s21233_s7 + $0xb2c] sm:$0xf0] }
 0x5d6   : > { %7675 = vmatpush.bf16.msrb.mxu1 %v12732_v26  ;;  %v6625_v26 = vpop.f32.mrf.mxu3  ;;  %v14598_v13 = vld [vmem:[%s21233_s7 + $0xa24] sm:$0xf] }
 0x5d7   : > { %7688 = vmatpush.bf16.msrb.mxu2 %v12608_v18  ;;  %v14624_v18 = vld [vmem:[%s21233_s7 + $0xaec] sm:$0xf0] }
 0x5d8   : > { %7701 = vmatpush.bf16.msrb.mxu3 %v12736_v29  ;;  %v13091_v29 = vld [vmem:[%s21233_s7 + $0xbe0] sm:$0xf]  ;;  %v12964_v40 = vor.u32 %v14624_v18, %v12963_v43  ;;  %v14608_v43 = vld [vmem:[%s21233_s7 + $0xa6c] sm:$0xf0]  ;;  %v12920_v18 = vor.u32 %v14610_v7, %v12917_v30 }
 0x5d9   : > { %7663 = vmatpush.bf16.msrb.mxu0 %v12588_v28  ;;  %v13093_v28 = vld [vmem:[%s21233_s7 + $0xbf0] sm:$0xf0] }
 0x5da   : > { %7676 = vmatpush.bf16.msrb.mxu1 %v12716_v32  ;;  %v12544_v32 = vor.u32 %v14531_v8, %v12541_v12  ;;  %v13096_v31 = vor.u32 %v14654_v59, %v13093_v28  ;;  %v14638_v59 = vld [vmem:[%s21233_s7 + $0xb64] sm:$0xf]  ;;  %v13029_v28 = vld [vmem:[%s21233_s7 + $0xb70] sm:$0xf0] }
 0x5db   : > { %7689 = vmatpush.bf16.msrb.mxu2 %v12592_v55  ;;  %v13092_v55 = vor.u32 %v14656_v48, %v13091_v29  ;;  %v13027_v48 = vld [vmem:[%s21233_s7 + $0xb60] sm:$0xf] }
 0x5dc   : > { %7702 = vmatpush.bf16.msrb.mxu3 %v12720_v41  ;;  %v12947_v41 = vld [vmem:[%s21233_s7 + $0xac0] sm:$0xf] }
 0x5dd   : > { %7664 = vmatpush.bf16.msrb.mxu0 %v12572_v11  ;;  %v12948_v36 = vor.u32 %v14620_v24, %v12947_v41  ;;  %v12931_v11 = vld [vmem:[%s21233_s7 + $0xaa0] sm:$0xf]  ;;  %v13032_v41 = vor.u32 %v14638_v59, %v13029_v28  ;;  %v13101_v59 = vld [vmem:[%s21233_s7 + $0xbf8] sm:$0xf0] }
 0x5de   : > { %7677 = vmatpush.bf16.msrb.mxu1 %v12700_v53  ;;  %v14616_v53 = vld [vmem:[%s21233_s7 + $0xaac] sm:$0xf0]  ;;  %v13011_v24 = vld [vmem:[%s21233_s7 + $0xb40] sm:$0xf] }
 0x5df   : > { %7690 = vmatpush.bf16.msrb.mxu2 %v12576_v61  ;;  %v13059_v61 = vld [vmem:[%s21233_s7 + $0xba0] sm:$0xf]  ;;  %v12932_v6 = vor.u32 %v14616_v53, %v12931_v11 }
 0x5e0   : > { %7703 = vmatpush.bf16.msrb.mxu3 %v12704_v49  ;;  %v14648_v49 = vld [vmem:[%s21233_s7 + $0xbac] sm:$0xf0] }
 0x5e1   : > { %7665 = vmatpush.bf16.msrb.mxu0 %v12556_v15  ;;  %v13060_v4 = vor.u32 %v14648_v49, %v13059_v61  ;;  %v14612_v15 = vld [vmem:[%s21233_s7 + $0xa8c] sm:$0xf0] }
 0x5e2   : > { %7678 = vmatpush.bf16.msrb.mxu1 %v12684_v37  ;;  %v12936_v37 = vor.u32 %v14614_v9, %v12933_v17  ;;  %v12916_v52 = vor.u32 %v14612_v15, %v12915_v33  ;;  %v13016_v9 = vor.u32 %v14634_v16, %v13013_v2  ;;  %v12995_v17 = vld [vmem:[%s21233_s7 + $0xb20] sm:$0xf]  ;;  %v13085_v16 = vld [vmem:[%s21233_s7 + $0xbd8] sm:$0xf0]  ;;  %v19572_v2 = vpack.c.bf16 %v18406_v44, %v18406_v44 }
 0x5e3   : > { %7691 = vmatpush.bf16.msrb.mxu2 %v12560_v58  ;;  %v14642_v58 = vld [vmem:[%s21233_s7 + $0xb84] sm:$0xf]  ;;  %v12851_v33 = vld [vmem:[%s21233_s7 + $0xa00] sm:$0xf] }
 0x5e4   : > { %7704 = vmatpush.bf16.msrb.mxu3 %v12688_v21  ;;  %v13045_v21 = vld [vmem:[%s21233_s7 + $0xb90] sm:$0xf0] }
 0x5e5   : > { %7666 = vmatpush.bf16.msrb.mxu0 %v12540_v42  ;;  %v6636_v8 = vpop.f32.mrf.mxu0  ;;  %v13048_v29 = vor.u32 %v14642_v58, %v13045_v21  ;;  %v14606_v42 = vld [vmem:[%s21233_s7 + $0xa64] sm:$0xf]  ;;  %v12853_v21 = vld [vmem:[%s21233_s7 + $0xa10] sm:$0xf0] }
 0x5e6   : > { %7679 = vmatpush.bf16.msrb.mxu1 %v12668_v46  ;;  %v6649_v12 = vpop.f32.mrf.mxu1  ;;  %v14594_v58 = vld [vmem:[%s21233_s7 + $0xa04] sm:$0xf] }
 0x5e7   : > { %7692 = vmatpush.bf16.msrb.mxu2 %v12544_v32  ;;  %v6650_v34 = vadd.f32 %v6649_v12, %v6636_v8  ;;  %v12900_v32 = vor.u32 %v14608_v43, %v12899_v39  ;;  %v14626_v8 = vld [vmem:[%s21233_s7 + $0xb04] sm:$0xf]  ;;  %v14625_v39 = vld [vmem:[%s21233_s7 + $0xaf4] sm:$0xf0]  ;;  %v13099_v43 = vld [vmem:[%s21233_s7 + $0xbe8] sm:$0xf]  ;;  %v12856_v28 = vor.u32 %v14594_v58, %v12853_v21 }
 0x5e8   : > { %7705 = vmatpush.bf16.msrb.mxu3 %v12672_v22  ;;  %7667 = vmatmul.bf16.vlgmr.msrb.gmra.mxu0 %v19160_v56  ;;  %v13028_v22 = vor.u32 %v14640_v1, %v13027_v48 }
 0x5e9   : > { %8119 = vmatpush.bf16.msra.mxu0 %v12964_v40  ;;  %7680 = vmatmul.bf16.vlgmr.msrb.gmra.mxu1 %v19164_v51  ;;  %v19436_v46 = vadd.f32 %v6650_v34, %v19024_v47  ;;  %v12883_v47 = vld [vmem:[%s21233_s7 + $0xa40] sm:$0xf]  ;;  %v14604_v40 = vld [vmem:[%s21233_s7 + $0xa4c] sm:$0xf0] }
 0x5ea   : > { %8132 = vmatpush.bf16.msra.mxu1 %v13092_v55  ;;  %7693 = vmatmul.bf16.vlgmr.msrb.gmra.mxu2 %v19160_v56  ;;  %v13043_v56 = vld [vmem:[%s21233_s7 + $0xb80] sm:$0xf]  ;;  %v12904_v55 = vor.u32 %v14606_v42, %v12901_v19  ;;  %v12884_v11 = vor.u32 %v14604_v40, %v12883_v47  ;;  %v12973_v42 = vld [vmem:[%s21233_s7 + $0xaf8] sm:$0xf0]  ;;  %v14655_v19 = vld [vmem:[%s21233_s7 + $0xbec] sm:$0xf] }
 0x5eb   : > { %8145 = vmatpush.bf16.msra.mxu2 %v12968_v62  ;;  %7706 = vmatmul.bf16.vlgmr.msrb.gmra.mxu3 %v19164_v51  ;;  %v14644_v51 = vld [vmem:[%s21233_s7 + $0xb8c] sm:$0xf0]  ;;  %v12955_v40 = vld [vmem:[%s21233_s7 + $0xac8] sm:$0xf] }
 0x5ec   : > { %8158 = vmatpush.bf16.msra.mxu3 %v13096_v31  ;;  %v13044_v26 = vor.u32 %v14644_v51, %v13043_v56  ;;  %v14636_v62 = vld [vmem:[%s21233_s7 + $0xb4c] sm:$0xf0]  ;;  %v14602_v31 = vld [vmem:[%s21233_s7 + $0xa44] sm:$0xf]  ;;  %v12979_v56 = vld [vmem:[%s21233_s7 + $0xb00] sm:$0xf] }
 0x5ed   : > { %8120 = vmatpush.bf16.msra.mxu0 %v12948_v36  ;;  %v6662_v35 = vpop.f32.mrf.mxu2  ;;  %v6638_v36 = vpop.f32.mrf.mxu0  ;;  %v13012_v53 = vor.u32 %v14636_v62, %v13011_v24  ;;  %v12888_v49 = vor.u32 %v14602_v31, %v12885_v10  ;;  %v14628_v51 = vld [vmem:[%s21233_s7 + $0xb0c] sm:$0xf0]  ;;  %v13104_v24 = vor.u32 %v14655_v19, %v13101_v59  ;;  %v13083_v62 = vld [vmem:[%s21233_s7 + $0xbc8] sm:$0xf]  ;;  %v14653_v31 = vld [vmem:[%s21233_s7 + $0xbd4] sm:$0xf0] }
 0x5ee   : > { %8133 = vmatpush.bf16.msra.mxu1 %v13076_v3  ;;  %v6675_v14 = vpop.f32.mrf.mxu3  ;;  %v6651_v3 = vpop.f32.mrf.mxu1  ;;  %v12980_v1 = vor.u32 %v14628_v51, %v12979_v56  ;;  %v14651_v10 = vld [vmem:[%s21233_s7 + $0xbcc] sm:$0xf]  ;;  %v12925_v51 = vld [vmem:[%s21233_s7 + $0xa98] sm:$0xf0] }
 0x5ef   : > { %8146 = vmatpush.bf16.msra.mxu2 %v12952_v25  ;;  %v6676_v27 = vadd.f32 %v6675_v14, %v6662_v35  ;;  %v12867_v25 = vld [vmem:[%s21233_s7 + $0xa20] sm:$0xf]  ;;  %v14619_v35 = vld [vmem:[%s21233_s7 + $0xacc] sm:$0xf]  ;;  %v12957_v14 = vld [vmem:[%s21233_s7 + $0xad8] sm:$0xf0]  ;;  %v13084_v3 = vor.u32 %v14653_v31, %v13083_v62 }
 0x5f0   : > { %8159 = vmatpush.bf16.msra.mxu3 %v13080_v63  ;;  %v14600_v63 = vld [vmem:[%s21233_s7 + $0xa2c] sm:$0xf0]  ;;  %v12960_v44 = vor.u32 %v14619_v35, %v12957_v14  ;;  %v14611_v56 = vld [vmem:[%s21233_s7 + $0xa8c] sm:$0xf]  ;;  %v12893_v31 = vld [vmem:[%s21233_s7 + $0xa58] sm:$0xf0] }
 0x5f1   : > { %8121 = vmatpush.bf16.msra.mxu0 %v12932_v6  ;;  %v19478_v61 = vadd.f32 %v6676_v27, %v19066_v60  ;;  %v12869_v6 = vld [vmem:[%s21233_s7 + $0xa30] sm:$0xf0]  ;;  %v14630_v60 = vld [vmem:[%s21233_s7 + $0xb24] sm:$0xf]  ;;  %v12868_v15 = vor.u32 %v14600_v63, %v12867_v25  ;;  %v19576_v27 = vpack.c.bf16 %v18408_v20, %v18408_v20  ;;  %v13088_v25 = vor.u32 %v14651_v10, %v13085_v16  ;;  %v13067_v63 = vld [vmem:[%s21233_s7 + $0xba8] sm:$0xf] }
 0x5f2   : > { %8134 = vmatpush.bf16.msra.mxu1 %v13060_v4  ;;  %v12997_v4 = vld [vmem:[%s21233_s7 + $0xb30] sm:$0xf0]  ;;  %v12872_v7 = vor.u32 %v14598_v13, %v12869_v6  ;;  %v14649_v20 = vld [vmem:[%s21233_s7 + $0xbb4] sm:$0xf0]  ;;  %v14635_v35 = vld [vmem:[%s21233_s7 + $0xb4c] sm:$0xf] }
 0x5f3   : > { %8147 = vmatpush.bf16.msra.mxu2 %v12936_v37  ;;  %v12996_v37 = vor.u32 %v14632_v23, %v12995_v17  ;;  %v13000_v30 = vor.u32 %v14630_v60, %v12997_v4  ;;  %v14647_v17 = vld [vmem:[%s21233_s7 + $0xbac] sm:$0xf]  ;;  %v13069_v23 = vld [vmem:[%s21233_s7 + $0xbb8] sm:$0xf0]  ;;  %v13068_v6 = vor.u32 %v14649_v20, %v13067_v63  ;;  %v12923_v60 = vld [vmem:[%s21233_s7 + $0xa88] sm:$0xf] }
 0x5f4   : > { %8160 = vmatpush.bf16.msra.mxu3 %v13064_v5  ;;  %v14596_v5 = vld [vmem:[%s21233_s7 + $0xa0c] sm:$0xf0]  ;;  %v14613_v4 = vld [vmem:[%s21233_s7 + $0xa94] sm:$0xf0]  ;;  %v13021_v14 = vld [vmem:[%s21233_s7 + $0xb58] sm:$0xf0] }
 0x5f5   : > { %8122 = vmatpush.bf16.msra.mxu0 %v12916_v52  ;;  %v6664_v12 = vpop.f32.mrf.mxu2  ;;  %v12981_v52 = vld [vmem:[%s21233_s7 + $0xb10] sm:$0xf0]  ;;  %v12852_v48 = vor.u32 %v14596_v5, %v12851_v33  ;;  %v14645_v5 = vld [vmem:[%s21233_s7 + $0xb94] sm:$0xf0]  ;;  %v13003_v63 = vld [vmem:[%s21233_s7 + $0xb28] sm:$0xf] }
 0x5f6   : > { %8135 = vmatpush.bf16.msra.mxu1 %v13044_v26  ;;  %v6677_v34 = vpop.f32.mrf.mxu3  ;;  %v12971_v26 = vld [vmem:[%s21233_s7 + $0xae8] sm:$0xf]  ;;  %v14633_v20 = vld [vmem:[%s21233_s7 + $0xb34] sm:$0xf0] }
 0x5f7   : > { %8148 = vmatpush.bf16.msra.mxu2 %v12920_v18  ;;  %v14657_v18 = vld [vmem:[%s21233_s7 + $0xbf4] sm:$0xf0]  ;;  %v12907_v34 = vld [vmem:[%s21233_s7 + $0xa68] sm:$0xf] }
 0x5f8   : > { %8161 = vmatpush.bf16.msra.mxu3 %v13048_v29  ;;  %v14623_v29 = vld [vmem:[%s21233_s7 + $0xaec] sm:$0xf]  ;;  %v13100_v47 = vor.u32 %v14657_v18, %v13099_v43  ;;  %v13035_v43 = vld [vmem:[%s21233_s7 + $0xb68] sm:$0xf]  ;;  %v14641_v18 = vld [vmem:[%s21233_s7 + $0xb74] sm:$0xf0] }
 0x5f9   : > { %8123 = vmatpush.bf16.msra.mxu0 %v12900_v32  ;;  %v12984_v32 = vor.u32 %v14626_v8, %v12981_v52  ;;  %v12924_v8 = vor.u32 %v14613_v4, %v12923_v60  ;;  %v14609_v52 = vld [vmem:[%s21233_s7 + $0xa74] sm:$0xf0]  ;;  %v13036_v59 = vor.u32 %v14641_v18, %v13035_v43  ;;  %v13004_v60 = vor.u32 %v14633_v20, %v13003_v63  ;;  %v14686_v43 = vld [vmem:[%s21233_s7 + $0xce4] sm:$0xf]  ;;  %v13379_v63 = vld [vmem:[%s21233_s7 + $0xda0] sm:$0xf] }
 0x5fa   : > { %8136 = vmatpush.bf16.msra.mxu1 %v13028_v22  ;;  %v12972_v22 = vor.u32 %v14625_v39, %v12971_v26  ;;  %v12928_v26 = vor.u32 %v14611_v56, %v12925_v51  ;;  %v12908_v19 = vor.u32 %v14609_v52, %v12907_v34  ;;  %v14597_v4 = vld [vmem:[%s21233_s7 + $0xa14] sm:$0xf0]  ;;  %v14595_v56 = vld [vmem:[%s21233_s7 + $0xa0c] sm:$0xf]  ;;  %v12861_v51 = vld [vmem:[%s21233_s7 + $0xa18] sm:$0xf0] }
 0x5fb   : > { %8149 = vmatpush.bf16.msra.mxu2 %v12904_v55  ;;  %v14621_v55 = vld [vmem:[%s21233_s7 + $0xad4] sm:$0xf0]  ;;  %v13283_v34 = vld [vmem:[%s21233_s7 + $0xce0] sm:$0xf]  ;;  %v14688_v52 = vld [vmem:[%s21233_s7 + $0xcec] sm:$0xf0] }
 0x5fc   : > { %8162 = vmatpush.bf16.msra.mxu3 %v13032_v41  ;;  %v12976_v41 = vor.u32 %v14623_v29, %v12973_v42  ;;  %v12956_v36 = vor.u32 %v14621_v55, %v12955_v40  ;;  %v14607_v29 = vld [vmem:[%s21233_s7 + $0xa6c] sm:$0xf]  ;;  %v13037_v42 = vld [vmem:[%s21233_s7 + $0xb78] sm:$0xf0]  ;;  %v13019_v40 = vld [vmem:[%s21233_s7 + $0xb48] sm:$0xf] }
 0x5fd   : > { %8124 = vmatpush.bf16.msra.mxu0 %v12884_v11  ;;  %v12939_v11 = vld [vmem:[%s21233_s7 + $0xaa8] sm:$0xf]  ;;  %v14637_v55 = vld [vmem:[%s21233_s7 + $0xb54] sm:$0xf0]  ;;  %v14712_v20 = vld [vmem:[%s21233_s7 + $0xdac] sm:$0xf0] }
 0x5fe   : > { %8137 = vmatpush.bf16.msra.mxu1 %v13012_v53  ;;  %v14617_v53 = vld [vmem:[%s21233_s7 + $0xab4] sm:$0xf0] }
 0x5ff   : > { %8150 = vmatpush.bf16.msra.mxu2 %v12888_v49  ;;  %v14615_v49 = vld [vmem:[%s21233_s7 + $0xaac] sm:$0xf]  ;;  %v12940_v13 = vor.u32 %v14617_v53, %v12939_v11  ;;  %v12875_v11 = vld [vmem:[%s21233_s7 + $0xa28] sm:$0xf]  ;;  %v14601_v53 = vld [vmem:[%s21233_s7 + $0xa34] sm:$0xf0] }
 0x600   : > { %8163 = vmatpush.bf16.msra.mxu3 %v13016_v9  ;;  %v12941_v9 = vld [vmem:[%s21233_s7 + $0xab8] sm:$0xf0] }
 0x601   : > { %8125 = vmatpush.bf16.msra.mxu0 %v12868_v15  ;;  %v12944_v33 = vor.u32 %v14615_v49, %v12941_v9  ;;  %v13072_v15 = vor.u32 %v14647_v17, %v13069_v23  ;;  %v14599_v49 = vld [vmem:[%s21233_s7 + $0xa2c] sm:$0xf]  ;;  %v12877_v9 = vld [vmem:[%s21233_s7 + $0xa38] sm:$0xf0] }
 0x602   : > { %8138 = vmatpush.bf16.msra.mxu1 %v12996_v37  ;;  %v13051_v37 = vld [vmem:[%s21233_s7 + $0xb88] sm:$0xf]  ;;  %v14631_v17 = vld [vmem:[%s21233_s7 + $0xb2c] sm:$0xf]  ;;  %v13005_v23 = vld [vmem:[%s21233_s7 + $0xb38] sm:$0xf0] }
 0x603   : > { %8151 = vmatpush.bf16.msra.mxu2 %v12872_v7  ;;  %v14643_v7 = vld [vmem:[%s21233_s7 + $0xb8c] sm:$0xf]  ;;  %v13052_v12 = vor.u32 %v14645_v5, %v13051_v37  ;;  %v12880_v37 = vor.u32 %v14599_v49, %v12877_v9  ;;  %v13008_v5 = vor.u32 %v14631_v17, %v13005_v23  ;;  %v14678_v49 = vld [vmem:[%s21233_s7 + $0xca4] sm:$0xf]  ;;  %v13253_v9 = vld [vmem:[%s21233_s7 + $0xcb0] sm:$0xf0] }
 0x604   : > { %8164 = vmatpush.bf16.msra.mxu3 %v13000_v30  ;;  %v13053_v30 = vld [vmem:[%s21233_s7 + $0xb98] sm:$0xf0]  ;;  %v14710_v17 = vld [vmem:[%s21233_s7 + $0xda4] sm:$0xf]  ;;  %v13381_v23 = vld [vmem:[%s21233_s7 + $0xdb0] sm:$0xf0] }
 0x605   : > { %8126 = vmatpush.bf16.msra.mxu0 %v12852_v48  ;;  %v19630_v58 = vpop.f32.mrf.mxu0  ;;  %v13056_v39 = vor.u32 %v14643_v7, %v13053_v30  ;;  %v12909_v48 = vld [vmem:[%s21233_s7 + $0xa78] sm:$0xf0]  ;;  %v14627_v7 = vld [vmem:[%s21233_s7 + $0xb0c] sm:$0xf] }
 0x606   : > { %8139 = vmatpush.bf16.msra.mxu1 %v12980_v1  ;;  %v19632_v21 = vpop.f32.mrf.mxu1  ;;  %v14639_v1 = vld [vmem:[%s21233_s7 + $0xb6c] sm:$0xf] }
 0x607   : > { %8152 = vmatpush.bf16.msra.mxu2 %v12856_v28  ;;  %v12891_v28 = vld [vmem:[%s21233_s7 + $0xa48] sm:$0xf] }
 0x608   : > { %8165 = vmatpush.bf16.msra.mxu3 %v12984_v32  ;;  %8127 = vmatmul.bf16.vlgmr.msra.gmra.mxu0 %v19572_v2  ;;  %v14605_v32 = vld [vmem:[%s21233_s7 + $0xa54] sm:$0xf0] }
 0x609   : > { %8171 = vmatpush.bf16.msrb.mxu0 %v12972_v22  ;;  %8140 = vmatmul.bf16.vlgmr.msra.gmra.mxu1 %v19576_v27  ;;  %v12912_v22 = vor.u32 %v14607_v29, %v12909_v48  ;;  %v13285_v48 = vld [vmem:[%s21233_s7 + $0xcf0] sm:$0xf0] }
 0x60a   : > { %8184 = vmatpush.bf16.msrb.mxu1 %v13100_v47  ;;  %8153 = vmatmul.bf16.vlgmr.msra.gmra.mxu2 %v19572_v2  ;;  %v13040_v47 = vor.u32 %v14639_v1, %v13037_v42  ;;  %v14718_v1 = vld [vmem:[%s21233_s7 + $0xde4] sm:$0xf]  ;;  %v13413_v42 = vld [vmem:[%s21233_s7 + $0xdf0] sm:$0xf0] }
 0x60b   : > { %8197 = vmatpush.bf16.msrb.mxu2 %v12976_v41  ;;  %8166 = vmatmul.bf16.vlgmr.msra.gmra.mxu3 %v19576_v27  ;;  %v14603_v41 = vld [vmem:[%s21233_s7 + $0xa4c] sm:$0xf] }
 0x60c   : > { %8210 = vmatpush.bf16.msrb.mxu3 %v13104_v24 }
 0x60d   : > { %8172 = vmatpush.bf16.msrb.mxu0 %v12956_v36  ;;  %v19673_v24 = vpop.f32.mrf.mxu2  ;;  %v7096_v10 = vpop.f32.mrf.mxu0  ;;  %v12892_v36 = vor.u32 %v14605_v32, %v12891_v28  ;;  %v13284_v28 = vor.u32 %v14688_v52, %v13283_v34  ;;  %v13219_v52 = vld [vmem:[%s21233_s7 + $0xc60] sm:$0xf] }
 0x60e   : > { %8185 = vmatpush.bf16.msrb.mxu1 %v13084_v3  ;;  %v19675_v62 = vpop.f32.mrf.mxu3  ;;  %v7109_v16 = vpop.f32.mrf.mxu1  ;;  %v13020_v3 = vor.u32 %v14637_v55, %v13019_v40  ;;  %v13288_v40 = vor.u32 %v14686_v43, %v13285_v48  ;;  %v13416_v55 = vor.u32 %v14718_v1, %v13413_v42  ;;  %v14714_v10 = vld [vmem:[%s21233_s7 + $0xdc4] sm:$0xf]  ;;  %v13221_v42 = vld [vmem:[%s21233_s7 + $0xc70] sm:$0xf0] }
 0x60f   : > { %8198 = vmatpush.bf16.msrb.mxu2 %v12960_v44  ;;  %v12896_v44 = vor.u32 %v14603_v41, %v12893_v31  ;;  %v13395_v41 = vld [vmem:[%s21233_s7 + $0xdc0] sm:$0xf]  ;;  %v14716_v31 = vld [vmem:[%s21233_s7 + $0xdcc] sm:$0xf0]  ;;  %v13397_v16 = vld [vmem:[%s21233_s7 + $0xdd0] sm:$0xf0] }
 0x610   : > { %8211 = vmatpush.bf16.msrb.mxu3 %v13088_v25  ;;  %v13024_v25 = vor.u32 %v14635_v35, %v13021_v14  ;;  %v14682_v35 = vld [vmem:[%s21233_s7 + $0xcc4] sm:$0xf]  ;;  %v13269_v14 = vld [vmem:[%s21233_s7 + $0xcd0] sm:$0xf0] }
 0x611   : > { %8173 = vmatpush.bf16.msrb.mxu0 %v12940_v13  ;;  %v12859_v13 = vld [vmem:[%s21233_s7 + $0xa08] sm:$0xf]  ;;  %v14670_v48 = vld [vmem:[%s21233_s7 + $0xc64] sm:$0xf] }
 0x612   : > { %8186 = vmatpush.bf16.msrb.mxu1 %v13068_v6  ;;  %v12876_v6 = vor.u32 %v14601_v53, %v12875_v11  ;;  %v12860_v18 = vor.u32 %v14597_v4, %v12859_v13  ;;  %v13251_v11 = vld [vmem:[%s21233_s7 + $0xca0] sm:$0xf]  ;;  %v14680_v53 = vld [vmem:[%s21233_s7 + $0xcac] sm:$0xf0] }
 0x613   : > { %8199 = vmatpush.bf16.msrb.mxu2 %v12944_v33  ;;  %v12987_v33 = vld [vmem:[%s21233_s7 + $0xb08] sm:$0xf]  ;;  %v13252_v13 = vor.u32 %v14680_v53, %v13251_v11  ;;  %v14676_v4 = vld [vmem:[%s21233_s7 + $0xc8c] sm:$0xf0] }
 0x614   : > { %8212 = vmatpush.bf16.msrb.mxu3 %v13072_v15  ;;  %v14629_v15 = vld [vmem:[%s21233_s7 + $0xb14] sm:$0xf0] }
 0x615   : > { %8174 = vmatpush.bf16.msrb.mxu0 %v12924_v8  ;;  %v7122_v30 = vpop.f32.mrf.mxu2  ;;  %v12988_v29 = vor.u32 %v14629_v15, %v12987_v33  ;;  %v13256_v33 = vor.u32 %v14678_v49, %v13253_v9  ;;  %v13384_v15 = vor.u32 %v14710_v17, %v13381_v23  ;;  %v13315_v23 = vld [vmem:[%s21233_s7 + $0xd20] sm:$0xf] }
 0x616   : > { %8187 = vmatpush.bf16.msrb.mxu1 %v13052_v12  ;;  %v7135_v8 = vpop.f32.mrf.mxu3  ;;  %v12989_v12 = vld [vmem:[%s21233_s7 + $0xb18] sm:$0xf0] }
 0x617   : > { %8200 = vmatpush.bf16.msrb.mxu2 %v12928_v26  ;;  %v13411_v26 = vld [vmem:[%s21233_s7 + $0xde0] sm:$0xf] }
 0x618   : > { %8213 = vmatpush.bf16.msrb.mxu3 %v13056_v39  ;;  %v14720_v39 = vld [vmem:[%s21233_s7 + $0xdec] sm:$0xf0] }
 0x619   : > { %8175 = vmatpush.bf16.msrb.mxu0 %v12908_v19  ;;  %v12864_v19 = vor.u32 %v14595_v56, %v12861_v51  ;;  %v13412_v32 = vor.u32 %v14720_v39, %v13411_v26  ;;  %v14706_v56 = vld [vmem:[%s21233_s7 + $0xd84] sm:$0xf]  ;;  %v13365_v51 = vld [vmem:[%s21233_s7 + $0xd90] sm:$0xf0]  ;;  %v14672_v26 = vld [vmem:[%s21233_s7 + $0xc6c] sm:$0xf0] }
 0x61a   : > { %8188 = vmatpush.bf16.msrb.mxu1 %v13036_v59  ;;  %v12992_v59 = vor.u32 %v14627_v7, %v12989_v12  ;;  %v13368_v43 = vor.u32 %v14706_v56, %v13365_v51 }
 0x61b   : > { %8201 = vmatpush.bf16.msrb.mxu2 %v12912_v22  ;;  %v13267_v22 = vld [vmem:[%s21233_s7 + $0xcc0] sm:$0xf] }
 0x61c   : > { %8214 = vmatpush.bf16.msrb.mxu3 %v13040_v47  ;;  %v14684_v47 = vld [vmem:[%s21233_s7 + $0xccc] sm:$0xf0] }
 0x61d   : > { %8176 = vmatpush.bf16.msrb.mxu0 %v12892_v36  ;;  %v13268_v36 = vor.u32 %v14684_v47, %v13267_v22  ;;  %v14668_v22 = vld [vmem:[%s21233_s7 + $0xc4c] sm:$0xf0]  ;;  %v13224_v47 = vor.u32 %v14670_v48, %v13221_v42 }
 0x61e   : > { %8189 = vmatpush.bf16.msrb.mxu1 %v13020_v3  ;;  %v13396_v3 = vor.u32 %v14716_v31, %v13395_v41  ;;  %v14700_v41 = vld [vmem:[%s21233_s7 + $0xd4c] sm:$0xf0]  ;;  %v14666_v31 = vld [vmem:[%s21233_s7 + $0xc44] sm:$0xf] }
 0x61f   : > { %8202 = vmatpush.bf16.msrb.mxu2 %v12896_v44  ;;  %v13272_v44 = vor.u32 %v14682_v35, %v13269_v14 }
 0x620   : > { %8215 = vmatpush.bf16.msrb.mxu3 %v13024_v25  ;;  %v13400_v25 = vor.u32 %v14714_v10, %v13397_v16  ;;  %v13205_v10 = vld [vmem:[%s21233_s7 + $0xc50] sm:$0xf0]  ;;  %v14698_v16 = vld [vmem:[%s21233_s7 + $0xd44] sm:$0xf] }
 0x621   : > { %8177 = vmatpush.bf16.msrb.mxu0 %v12876_v6  ;;  %v13380_v6 = vor.u32 %v14712_v20, %v13379_v63  ;;  %v13187_v63 = vld [vmem:[%s21233_s7 + $0xc20] sm:$0xf]  ;;  %v14664_v20 = vld [vmem:[%s21233_s7 + $0xc2c] sm:$0xf0]  ;;  %v13208_v9 = vor.u32 %v14666_v31, %v13205_v10  ;;  %v14683_v10 = vld [vmem:[%s21233_s7 + $0xccc] sm:$0xf] }
 0x622   : > { %8190 = vmatpush.bf16.msrb.mxu1 %v13004_v60  ;;  %v13235_v60 = vld [vmem:[%s21233_s7 + $0xc80] sm:$0xf] }
 0x623   : > { %8203 = vmatpush.bf16.msrb.mxu2 %v12880_v37  ;;  %v14674_v37 = vld [vmem:[%s21233_s7 + $0xc84] sm:$0xf]  ;;  %v13236_v12 = vor.u32 %v14676_v4, %v13235_v60  ;;  %v13189_v60 = vld [vmem:[%s21233_s7 + $0xc30] sm:$0xf0] }
 0x624   : > { %8216 = vmatpush.bf16.msrb.mxu3 %v13008_v5  ;;  %v13237_v5 = vld [vmem:[%s21233_s7 + $0xc90] sm:$0xf0] }
 0x625   : > { %8178 = vmatpush.bf16.msrb.mxu0 %v12860_v18  ;;  %v7146_v7 = vpop.f32.mrf.mxu0  ;;  %v13240_v39 = vor.u32 %v14674_v37, %v13237_v5  ;;  %v13347_v18 = vld [vmem:[%s21233_s7 + $0xd60] sm:$0xf]  ;;  %v13317_v4 = vld [vmem:[%s21233_s7 + $0xd30] sm:$0xf0]  ;;  %v14692_v5 = vld [vmem:[%s21233_s7 + $0xd0c] sm:$0xf0] }
 0x626   : > { %8191 = vmatpush.bf16.msrb.mxu1 %v12988_v29  ;;  %v7159_v30 = vpop.f32.mrf.mxu1  ;;  %v14704_v29 = vld [vmem:[%s21233_s7 + $0xd6c] sm:$0xf0]  ;;  %v13299_v37 = vld [vmem:[%s21233_s7 + $0xd00] sm:$0xf] }
 0x627   : > { %8204 = vmatpush.bf16.msrb.mxu2 %v12864_v19  ;;  %v7160_v8 = vadd.f32 %v7159_v30, %v7146_v7  ;;  %v14702_v19 = vld [vmem:[%s21233_s7 + $0xd64] sm:$0xf]  ;;  %v13173_v30 = vld [vmem:[%s21233_s7 + $0xc10] sm:$0xf0]  ;;  %v13300_v42 = vor.u32 %v14692_v5, %v13299_v37  ;;  %v14709_v37 = vld [vmem:[%s21233_s7 + $0xd94] sm:$0xf0] }
 0x628   : > { %8217 = vmatpush.bf16.msrb.mxu3 %v12992_v59  ;;  %8179 = vmatmul.bf16.vlgmr.msrb.gmra.mxu0 %v19572_v2  ;;  %v13349_v59 = vld [vmem:[%s21233_s7 + $0xd70] sm:$0xf0]  ;;  %v14658_v7 = vld [vmem:[%s21233_s7 + $0xc04] sm:$0xf]  ;;  %v14675_v5 = vld [vmem:[%s21233_s7 + $0xc8c] sm:$0xf] }
 0x629   : > { %8630 = vmatpush.bf16.msra.mxu0 %v13284_v28  ;;  %8192 = vmatmul.bf16.vlgmr.msrb.gmra.mxu1 %v19576_v27  ;;  %v19850_v1 = vadd.f32 %v7160_v8, %v19436_v46  ;;  %v13220_v28 = vor.u32 %v14672_v26, %v13219_v52  ;;  %v13203_v46 = vld [vmem:[%s21233_s7 + $0xc40] sm:$0xf]  ;;  %v14690_v8 = vld [vmem:[%s21233_s7 + $0xd04] sm:$0xf]  ;;  %v13301_v52 = vld [vmem:[%s21233_s7 + $0xd10] sm:$0xf0] }
 0x62a   : > { %8643 = vmatpush.bf16.msra.mxu1 %v13412_v32  ;;  %8205 = vmatmul.bf16.vlgmr.msrb.gmra.mxu2 %v19572_v2  ;;  %v13363_v2 = vld [vmem:[%s21233_s7 + $0xd80] sm:$0xf]  ;;  %v13348_v32 = vor.u32 %v14704_v29, %v13347_v18  ;;  %v13291_v26 = vld [vmem:[%s21233_s7 + $0xce8] sm:$0xf]  ;;  %v14721_v18 = vld [vmem:[%s21233_s7 + $0xdf4] sm:$0xf0] }
 0x62b   : > { %8656 = vmatpush.bf16.msra.mxu2 %v13288_v40  ;;  %8218 = vmatmul.bf16.vlgmr.msrb.gmra.mxu3 %v19576_v27  ;;  %v14708_v27 = vld [vmem:[%s21233_s7 + $0xd8c] sm:$0xf0]  ;;  %v13352_v40 = vor.u32 %v14702_v19, %v13349_v59  ;;  %v14687_v29 = vld [vmem:[%s21233_s7 + $0xcec] sm:$0xf]  ;;  %v13293_v19 = vld [vmem:[%s21233_s7 + $0xcf8] sm:$0xf0] }
 0x62c   : > { %8669 = vmatpush.bf16.msra.mxu3 %v13416_v55  ;;  %v13364_v34 = vor.u32 %v14708_v27, %v13363_v2  ;;  %v13331_v55 = vld [vmem:[%s21233_s7 + $0xd40] sm:$0xf]  ;;  %v14660_v27 = vld [vmem:[%s21233_s7 + $0xc0c] sm:$0xf0]  ;;  %v14719_v59 = vld [vmem:[%s21233_s7 + $0xdec] sm:$0xf] }
 0x62d   : > { %8631 = vmatpush.bf16.msra.mxu0 %v13268_v36  ;;  %v7172_v35 = vpop.f32.mrf.mxu2  ;;  %v13333_v36 = vld [vmem:[%s21233_s7 + $0xd50] sm:$0xf0]  ;;  %v7148_v11 = vpop.f32.mrf.mxu0 }
 0x62e   : > { %8644 = vmatpush.bf16.msra.mxu1 %v13396_v3  ;;  %v7185_v14 = vpop.f32.mrf.mxu3  ;;  %v7161_v53 = vpop.f32.mrf.mxu1  ;;  %v13336_v17 = vor.u32 %v14698_v16, %v13333_v36  ;;  %v13277_v16 = vld [vmem:[%s21233_s7 + $0xcd8] sm:$0xf0]  ;;  %v14715_v36 = vld [vmem:[%s21233_s7 + $0xdcc] sm:$0xf]  ;;  %v19986_v11 = vpack.c.bf16 %v18521_v38, %v18521_v38 }
 0x62f   : > { %8657 = vmatpush.bf16.msra.mxu2 %v13272_v44  ;;  %v7186_v3 = vadd.f32 %v7185_v14, %v7172_v35  ;;  %v13204_v44 = vor.u32 %v14668_v22, %v13203_v46  ;;  %v13304_v46 = vor.u32 %v14690_v8, %v13301_v52  ;;  %v13403_v35 = vld [vmem:[%s21233_s7 + $0xdc8] sm:$0xf]  ;;  %v14717_v14 = vld [vmem:[%s21233_s7 + $0xdd4] sm:$0xf0]  ;;  %v19990_v53 = vpack.c.bf16 %v18523_v0, %v18523_v0 }
 0x630   : > { %8670 = vmatpush.bf16.msra.mxu3 %v13400_v25  ;;  %v13332_v25 = vor.u32 %v14700_v41, %v13331_v55  ;;  %v14685_v55 = vld [vmem:[%s21233_s7 + $0xcd4] sm:$0xf0]  ;;  %v13296_v41 = vor.u32 %v14687_v29, %v13293_v19  ;;  %v13280_v38 = vor.u32 %v14683_v10, %v13277_v16  ;;  %v13213_v16 = vld [vmem:[%s21233_s7 + $0xc58] sm:$0xf0] }
 0x631   : > { %8632 = vmatpush.bf16.msra.mxu0 %v13252_v13  ;;  %v19892_v49 = vadd.f32 %v7186_v3, %v19478_v61  ;;  %v14696_v13 = vld [vmem:[%s21233_s7 + $0xd2c] sm:$0xf0]  ;;  %v14694_v61 = vld [vmem:[%s21233_s7 + $0xd24] sm:$0xf]  ;;  %v13405_v3 = vld [vmem:[%s21233_s7 + $0xdd8] sm:$0xf0] }
 0x632   : > { %8645 = vmatpush.bf16.msra.mxu1 %v13380_v6  ;;  %v14662_v6 = vld [vmem:[%s21233_s7 + $0xc24] sm:$0xf]  ;;  %v13316_v2 = vor.u32 %v14696_v13, %v13315_v23  ;;  %v13320_v51 = vor.u32 %v14694_v61, %v13317_v4  ;;  %v14713_v0 = vld [vmem:[%s21233_s7 + $0xdb4] sm:$0xf0]  ;;  %v14679_v23 = vld [vmem:[%s21233_s7 + $0xcac] sm:$0xf]  ;;  %v7108_v61 = vadd.f32 %v19632_v21, %v19630_v58 }
 0x633   : > { %8658 = vmatpush.bf16.msra.mxu2 %v13256_v33  ;;  %v13171_v33 = vld [vmem:[%s21233_s7 + $0xc00] sm:$0xf]  ;;  %v13192_v56 = vor.u32 %v14662_v6, %v13189_v60  ;;  %v13261_v13 = vld [vmem:[%s21233_s7 + $0xcb8] sm:$0xf0]  ;;  %v14711_v6 = vld [vmem:[%s21233_s7 + $0xdac] sm:$0xf] }
 0x634   : > { %8671 = vmatpush.bf16.msra.mxu3 %v13384_v15  ;;  %v13188_v15 = vor.u32 %v14664_v20, %v13187_v63  ;;  %v13172_v48 = vor.u32 %v14660_v27, %v13171_v33  ;;  %v13259_v63 = vld [vmem:[%s21233_s7 + $0xca8] sm:$0xf]  ;;  %v14681_v20 = vld [vmem:[%s21233_s7 + $0xcb4] sm:$0xf0]  ;;  %v13389_v60 = vld [vmem:[%s21233_s7 + $0xdb8] sm:$0xf0]  ;;  %v13264_v27 = vor.u32 %v14679_v23, %v13261_v13 }
 0x635   : > { %8633 = vmatpush.bf16.msra.mxu0 %v13236_v12  ;;  %v7174_v12 = vpop.f32.mrf.mxu2  ;;  %v13260_v4 = vor.u32 %v14681_v20, %v13259_v63  ;;  %v13392_v58 = vor.u32 %v14711_v6, %v13389_v60  ;;  %v13371_v21 = vld [vmem:[%s21233_s7 + $0xd88] sm:$0xf]  ;;  %v14697_v60 = vld [vmem:[%s21233_s7 + $0xd34] sm:$0xf0] }
 0x636   : > { %8646 = vmatpush.bf16.msra.mxu1 %v13364_v34  ;;  %v7187_v34 = vpop.f32.mrf.mxu3  ;;  %v13323_v6 = vld [vmem:[%s21233_s7 + $0xd28] sm:$0xf] }
 0x637   : > { %8659 = vmatpush.bf16.msra.mxu2 %v13240_v39  ;;  %v14689_v39 = vld [vmem:[%s21233_s7 + $0xcf4] sm:$0xf0] }
 0x638   : > { %8672 = vmatpush.bf16.msra.mxu3 %v13368_v43  ;;  %v13419_v43 = vld [vmem:[%s21233_s7 + $0xde8] sm:$0xf]  ;;  %v13292_v22 = vor.u32 %v14689_v39, %v13291_v26  ;;  %v13372_v26 = vor.u32 %v14709_v37, %v13371_v21  ;;  %v14661_v21 = vld [vmem:[%s21233_s7 + $0xc14] sm:$0xf0] }
 0x639   : > { %8634 = vmatpush.bf16.msra.mxu0 %v13220_v28  ;;  %v13421_v28 = vld [vmem:[%s21233_s7 + $0xdf8] sm:$0xf0]  ;;  %v13227_v39 = vld [vmem:[%s21233_s7 + $0xc68] sm:$0xf] }
 0x63a   : > { %8647 = vmatpush.bf16.msra.mxu1 %v13348_v32  ;;  %v13176_v32 = vor.u32 %v14658_v7, %v13173_v30  ;;  %v13424_v31 = vor.u32 %v14719_v59, %v13421_v28  ;;  %v13373_v7 = vld [vmem:[%s21233_s7 + $0xd98] sm:$0xf0]  ;;  %v7189_v30 = vadd.f32 %v7108_v61, %v19234_v45  ;;  %v13355_v45 = vld [vmem:[%s21233_s7 + $0xd68] sm:$0xf]  ;;  %v14703_v28 = vld [vmem:[%s21233_s7 + $0xd6c] sm:$0xf] }
 0x63b   : > { %8660 = vmatpush.bf16.msra.mxu2 %v13224_v47  ;;  %v13420_v47 = vor.u32 %v14721_v18, %v13419_v43  ;;  %v14673_v43 = vld [vmem:[%s21233_s7 + $0xc74] sm:$0xf0]  ;;  %v13229_v59 = vld [vmem:[%s21233_s7 + $0xc78] sm:$0xf0]  ;;  %v14663_v61 = vld [vmem:[%s21233_s7 + $0xc2c] sm:$0xf] }
 0x63c   : > { %8673 = vmatpush.bf16.msra.mxu3 %v13352_v40  ;;  %v13275_v40 = vld [vmem:[%s21233_s7 + $0xcc8] sm:$0xf] }
 0x63d   : > { %8635 = vmatpush.bf16.msra.mxu0 %v13204_v44  ;;  %v13276_v44 = vor.u32 %v14685_v55, %v13275_v40  ;;  %v13211_v40 = vld [vmem:[%s21233_s7 + $0xc48] sm:$0xf]  ;;  %v14669_v55 = vld [vmem:[%s21233_s7 + $0xc54] sm:$0xf0] }
 0x63e   : > { %8648 = vmatpush.bf16.msra.mxu1 %v13332_v25  ;;  %v13404_v25 = vor.u32 %v14717_v14, %v13403_v35  ;;  %v14667_v35 = vld [vmem:[%s21233_s7 + $0xc4c] sm:$0xf]  ;;  %v13307_v37 = vld [vmem:[%s21233_s7 + $0xd08] sm:$0xf] }
 0x63f   : > { %8661 = vmatpush.bf16.msra.mxu2 %v13208_v9  ;;  %v13408_v9 = vor.u32 %v14715_v36, %v13405_v3  ;;  %v14699_v36 = vld [vmem:[%s21233_s7 + $0xd4c] sm:$0xf]  ;;  %v13341_v3 = vld [vmem:[%s21233_s7 + $0xd58] sm:$0xf0] }
 0x640   : > { %8674 = vmatpush.bf16.msra.mxu3 %v13336_v17  ;;  %v13387_v17 = vld [vmem:[%s21233_s7 + $0xda8] sm:$0xf]  ;;  %v13344_v13 = vor.u32 %v14699_v36, %v13341_v3 }
 0x641   : > { %8636 = vmatpush.bf16.msra.mxu0 %v13188_v15  ;;  %v13388_v33 = vor.u32 %v14713_v0, %v13387_v17  ;;  %v13243_v15 = vld [vmem:[%s21233_s7 + $0xc88] sm:$0xf]  ;;  %v14665_v0 = vld [vmem:[%s21233_s7 + $0xc34] sm:$0xf0] }
 0x642   : > { %8649 = vmatpush.bf16.msra.mxu1 %v13316_v2  ;;  %v14677_v2 = vld [vmem:[%s21233_s7 + $0xc94] sm:$0xf0]  ;;  %v13195_v17 = vld [vmem:[%s21233_s7 + $0xc28] sm:$0xf] }
 0x643   : > { %8662 = vmatpush.bf16.msra.mxu2 %v13192_v56  ;;  %v13245_v56 = vld [vmem:[%s21233_s7 + $0xc98] sm:$0xf0]  ;;  %v13244_v52 = vor.u32 %v14677_v2, %v13243_v15  ;;  %v13179_v2 = vld [vmem:[%s21233_s7 + $0xc08] sm:$0xf] }
 0x644   : > { %8675 = vmatpush.bf16.msra.mxu3 %v13320_v51  ;;  %v14707_v51 = vld [vmem:[%s21233_s7 + $0xd8c] sm:$0xf]  ;;  %v13248_v18 = vor.u32 %v14675_v5, %v13245_v56  ;;  %v13325_v15 = vld [vmem:[%s21233_s7 + $0xd38] sm:$0xf0]  ;;  %v14693_v5 = vld [vmem:[%s21233_s7 + $0xd14] sm:$0xf0] }
 0x645   : > { %8637 = vmatpush.bf16.msra.mxu0 %v13172_v48  ;;  %v7616_v8 = vpop.f32.mrf.mxu0  ;;  %v13376_v29 = vor.u32 %v14707_v51, %v13373_v7  ;;  %v14705_v48 = vld [vmem:[%s21233_s7 + $0xd74] sm:$0xf0]  ;;  %v14659_v7 = vld [vmem:[%s21233_s7 + $0xc0c] sm:$0xf] }
 0x646   : > { %8650 = vmatpush.bf16.msra.mxu1 %v13300_v42  ;;  %v7629_v12 = vpop.f32.mrf.mxu1  ;;  %v14671_v42 = vld [vmem:[%s21233_s7 + $0xc6c] sm:$0xf] }
 0x647   : > { %8663 = vmatpush.bf16.msra.mxu2 %v13176_v32  ;;  %v7630_v34 = vadd.f32 %v7629_v12, %v7616_v8  ;;  %v13357_v32 = vld [vmem:[%s21233_s7 + $0xd78] sm:$0xf0]  ;;  %v14691_v8 = vld [vmem:[%s21233_s7 + $0xd0c] sm:$0xf] }
 0x648   : > { %8676 = vmatpush.bf16.msra.mxu3 %v13304_v46  ;;  %8638 = vmatmul.bf16.vlgmr.msra.gmra.mxu0 %v19986_v11  ;;  %v7134_v46 = vadd.f32 %v19675_v62, %v19673_v24  ;;  %v13339_v24 = vld [vmem:[%s21233_s7 + $0xd48] sm:$0xf]  ;;  %v14701_v62 = vld [vmem:[%s21233_s7 + $0xd54] sm:$0xf0] }
 0x649   : > { %8682 = vmatpush.bf16.msrb.mxu0 %v13292_v22  ;;  %8651 = vmatmul.bf16.vlgmr.msra.gmra.mxu1 %v19990_v53  ;;  %v20062_v19 = vadd.f32 %v7630_v34, %v7189_v30  ;;  %v13228_v22 = vor.u32 %v14673_v43, %v13227_v39  ;;  %v13181_v30 = vld [vmem:[%s21233_s7 + $0xc18] sm:$0xf0]  ;;  %v14752_v39 = vld [vmem:[%s21233_s7 + $0xeec] sm:$0xf0]  ;;  %v13735_v43 = vld [vmem:[%s21233_s7 + $0xfe0] sm:$0xf] }
 0x64a   : > { %8695 = vmatpush.bf16.msrb.mxu1 %v13420_v47  ;;  %8664 = vmatmul.bf16.vlgmr.msra.gmra.mxu2 %v19986_v11  ;;  %v13356_v47 = vor.u32 %v14705_v48, %v13355_v45  ;;  %v13180_v45 = vor.u32 %v14661_v21, %v13179_v2  ;;  %v13308_v48 = vor.u32 %v14693_v5, %v13307_v37  ;;  %v14738_v2 = vld [vmem:[%s21233_s7 + $0xe84] sm:$0xf]  ;;  %v13689_v21 = vld [vmem:[%s21233_s7 + $0xf90] sm:$0xf0] }
 0x64b   : > { %8708 = vmatpush.bf16.msrb.mxu2 %v13296_v41  ;;  %8677 = vmatmul.bf16.vlgmr.msra.gmra.mxu3 %v19990_v53  ;;  %v13232_v41 = vor.u32 %v14671_v42, %v13229_v59  ;;  %v13609_v42 = vld [vmem:[%s21233_s7 + $0xef0] sm:$0xf0]  ;;  %v14782_v59 = vld [vmem:[%s21233_s7 + $0xfe4] sm:$0xf] }
 0x64c   : > { %8721 = vmatpush.bf16.msrb.mxu3 %v13424_v31  ;;  %v13360_v31 = vor.u32 %v14703_v28, %v13357_v32  ;;  %v13737_v28 = vld [vmem:[%s21233_s7 + $0xff0] sm:$0xf0]  ;;  %v13184_v32 = vor.u32 %v14659_v7, %v13181_v30  ;;  %v13543_v30 = vld [vmem:[%s21233_s7 + $0xe60] sm:$0xf] }
 0x64d   : > { %8683 = vmatpush.bf16.msrb.mxu0 %v13276_v44  ;;  %v7642_v14 = vpop.f32.mrf.mxu2  ;;  %v7190_v44 = vadd.f32 %v7134_v46, %v19276_v50  ;;  %v7618_v63 = vpop.f32.mrf.mxu0  ;;  %v13216_v50 = vor.u32 %v14667_v35, %v13213_v16  ;;  %v14746_v35 = vld [vmem:[%s21233_s7 + $0xec4] sm:$0xf]  ;;  %v13721_v16 = vld [vmem:[%s21233_s7 + $0xfd0] sm:$0xf0] }
 0x64e   : > { %8696 = vmatpush.bf16.msrb.mxu1 %v13404_v25  ;;  %v7655_v10 = vpop.f32.mrf.mxu3  ;;  %v7631_v20 = vpop.f32.mrf.mxu1 }
 0x64f   : > { %8709 = vmatpush.bf16.msrb.mxu2 %v13280_v38  ;;  %v7656_v25 = vadd.f32 %v7655_v10, %v7642_v14  ;;  %v13212_v38 = vor.u32 %v14669_v55, %v13211_v40  ;;  %v13591_v40 = vld [vmem:[%s21233_s7 + $0xec0] sm:$0xf]  ;;  %v14748_v55 = vld [vmem:[%s21233_s7 + $0xecc] sm:$0xf0]  ;;  %v13593_v14 = vld [vmem:[%s21233_s7 + $0xed0] sm:$0xf0] }
 0x650   : > { %8722 = vmatpush.bf16.msrb.mxu3 %v13408_v9  ;;  %v13340_v9 = vor.u32 %v14701_v62, %v13339_v24  ;;  %v13719_v24 = vld [vmem:[%s21233_s7 + $0xfc0] sm:$0xf]  ;;  %v14780_v62 = vld [vmem:[%s21233_s7 + $0xfcc] sm:$0xf0]  ;;  %v14778_v10 = vld [vmem:[%s21233_s7 + $0xfc4] sm:$0xf]  ;;  %v13592_v36 = vor.u32 %v14748_v55, %v13591_v40  ;;  %v13596_v63 = vor.u32 %v14746_v35, %v13593_v14 }
 0x651   : > { %8684 = vmatpush.bf16.msrb.mxu0 %v13260_v4  ;;  %v20106_v23 = vadd.f32 %v7656_v25, %v7190_v44  ;;  %v13197_v4 = vld [vmem:[%s21233_s7 + $0xc38] sm:$0xf0]  ;;  %v13720_v3 = vor.u32 %v14780_v62, %v13719_v24  ;;  %v13575_v44 = vld [vmem:[%s21233_s7 + $0xea0] sm:$0xf]  ;;  %v14744_v25 = vld [vmem:[%s21233_s7 + $0xeac] sm:$0xf0]  ;;  %v13724_v20 = vor.u32 %v14778_v10, %v13721_v16 }
 0x652   : > { %8697 = vmatpush.bf16.msrb.mxu1 %v13388_v33  ;;  %v14695_v33 = vld [vmem:[%s21233_s7 + $0xd2c] sm:$0xf]  ;;  %v13200_v56 = vor.u32 %v14663_v61, %v13197_v4  ;;  %v13559_v61 = vld [vmem:[%s21233_s7 + $0xe80] sm:$0xf]  ;;  %v14740_v4 = vld [vmem:[%s21233_s7 + $0xe8c] sm:$0xf0] }
 0x653   : > { %8710 = vmatpush.bf16.msrb.mxu2 %v13264_v27  ;;  %v13196_v27 = vor.u32 %v14665_v0, %v13195_v17  ;;  %v13328_v51 = vor.u32 %v14695_v33, %v13325_v15  ;;  %v14742_v17 = vld [vmem:[%s21233_s7 + $0xea4] sm:$0xf]  ;;  %v13577_v0 = vld [vmem:[%s21233_s7 + $0xeb0] sm:$0xf0] }
 0x654   : > { %8723 = vmatpush.bf16.msrb.mxu3 %v13392_v58  ;;  %v13324_v58 = vor.u32 %v14697_v60, %v13323_v6  ;;  %v13576_v6 = vor.u32 %v14744_v25, %v13575_v44  ;;  %v13580_v33 = vor.u32 %v14742_v17, %v13577_v0  ;;  %v13657_v24 = vld [vmem:[%s21233_s7 + $0xf50] sm:$0xf0] }
 0x655   : > { %8685 = vmatpush.bf16.msrb.mxu0 %v13244_v52  ;;  %v7644_v12 = vpop.f32.mrf.mxu2  ;;  %v13309_v52 = vld [vmem:[%s21233_s7 + $0xd18] sm:$0xf0]  ;;  %v13513_v17 = vld [vmem:[%s21233_s7 + $0xe30] sm:$0xf0] }
 0x656   : > { %8698 = vmatpush.bf16.msrb.mxu1 %v13372_v26  ;;  %v7657_v34 = vpop.f32.mrf.mxu3  ;;  %v13607_v26 = vld [vmem:[%s21233_s7 + $0xee0] sm:$0xf]  ;;  %v13312_v46 = vor.u32 %v14691_v8, %v13309_v52  ;;  %v14736_v8 = vld [vmem:[%s21233_s7 + $0xe6c] sm:$0xf0]  ;;  %v13641_v0 = vld [vmem:[%s21233_s7 + $0xf30] sm:$0xf0] }
 0x657   : > { %8711 = vmatpush.bf16.msrb.mxu2 %v13248_v18  ;;  %v14784_v18 = vld [vmem:[%s21233_s7 + $0xfec] sm:$0xf0]  ;;  %v13671_v52 = vld [vmem:[%s21233_s7 + $0xf60] sm:$0xf] }
 0x658   : > { %8724 = vmatpush.bf16.msrb.mxu3 %v13376_v29  ;;  %v14750_v29 = vld [vmem:[%s21233_s7 + $0xee4] sm:$0xf] }
 0x659   : > { %8686 = vmatpush.bf16.msrb.mxu0 %v13228_v22  ;;  %v13608_v22 = vor.u32 %v14752_v39, %v13607_v26  ;;  %v14768_v26 = vld [vmem:[%s21233_s7 + $0xf6c] sm:$0xf0]  ;;  %v14734_v39 = vld [vmem:[%s21233_s7 + $0xe64] sm:$0xf] }
 0x65a   : > { %8699 = vmatpush.bf16.msrb.mxu1 %v13356_v47  ;;  %v13736_v47 = vor.u32 %v14784_v18, %v13735_v43  ;;  %v13545_v18 = vld [vmem:[%s21233_s7 + $0xe70] sm:$0xf0] }
 0x65b   : > { %8712 = vmatpush.bf16.msrb.mxu2 %v13232_v41  ;;  %v13612_v41 = vor.u32 %v14750_v29, %v13609_v42  ;;  %v14766_v29 = vld [vmem:[%s21233_s7 + $0xf64] sm:$0xf]  ;;  %v13672_v42 = vor.u32 %v14768_v26, %v13671_v52  ;;  %v13745_v52 = vld [vmem:[%s21233_s7 + $0xff8] sm:$0xf0] }
 0x65c   : > { %8725 = vmatpush.bf16.msrb.mxu3 %v13360_v31  ;;  %v13740_v31 = vor.u32 %v14782_v59, %v13737_v28  ;;  %v14732_v59 = vld [vmem:[%s21233_s7 + $0xe4c] sm:$0xf0]  ;;  %v13548_v28 = vor.u32 %v14734_v39, %v13545_v18 }
 0x65d   : > { %8687 = vmatpush.bf16.msrb.mxu0 %v13212_v38  ;;  %v13703_v38 = vld [vmem:[%s21233_s7 + $0xfa0] sm:$0xf] }
 0x65e   : > { %8700 = vmatpush.bf16.msrb.mxu1 %v13340_v9  ;;  %v14776_v9 = vld [vmem:[%s21233_s7 + $0xfac] sm:$0xf0] }
 0x65f   : > { %8713 = vmatpush.bf16.msrb.mxu2 %v13216_v50  ;;  %v14774_v50 = vld [vmem:[%s21233_s7 + $0xfa4] sm:$0xf]  ;;  %v13704_v60 = vor.u32 %v14776_v9, %v13703_v38  ;;  %v14760_v38 = vld [vmem:[%s21233_s7 + $0xf2c] sm:$0xf0] }
 0x660   : > { %8726 = vmatpush.bf16.msrb.mxu3 %v13344_v13  ;;  %v13705_v13 = vld [vmem:[%s21233_s7 + $0xfb0] sm:$0xf0]  ;;  %v14726_v9 = vld [vmem:[%s21233_s7 + $0xe24] sm:$0xf] }
 0x661   : > { %8688 = vmatpush.bf16.msrb.mxu0 %v13196_v27  ;;  %v13708_v15 = vor.u32 %v14774_v50, %v13705_v13  ;;  %v13561_v27 = vld [vmem:[%s21233_s7 + $0xe90] sm:$0xf0]  ;;  %v13495_v50 = vld [vmem:[%s21233_s7 + $0xe00] sm:$0xf] }
 0x662   : > { %8701 = vmatpush.bf16.msrb.mxu1 %v13324_v58  ;;  %v14770_v58 = vld [vmem:[%s21233_s7 + $0xf84] sm:$0xf]  ;;  %v13564_v12 = vor.u32 %v14738_v2, %v13561_v27 }
 0x663   : > { %8714 = vmatpush.bf16.msrb.mxu2 %v13200_v56  ;;  %v13692_v34 = vor.u32 %v14770_v58, %v13689_v21  ;;  %v14754_v2 = vld [vmem:[%s21233_s7 + $0xf04] sm:$0xf]  ;;  %v13625_v21 = vld [vmem:[%s21233_s7 + $0xf10] sm:$0xf0] }
 0x664   : > { %8727 = vmatpush.bf16.msrb.mxu3 %v13328_v51  ;;  %v13560_v51 = vor.u32 %v14740_v4, %v13559_v61  ;;  %v13623_v61 = vld [vmem:[%s21233_s7 + $0xf00] sm:$0xf]  ;;  %v14756_v4 = vld [vmem:[%s21233_s7 + $0xf0c] sm:$0xf0]  ;;  %v13628_v39 = vor.u32 %v14754_v2, %v13625_v21  ;;  %v14737_v2 = vld [vmem:[%s21233_s7 + $0xe74] sm:$0xf0] }
 0x665   : > { %8689 = vmatpush.bf16.msrb.mxu0 %v13180_v45  ;;  %v7668_v37 = vpop.f32.mrf.mxu0  ;;  %v13673_v45 = vld [vmem:[%s21233_s7 + $0xf70] sm:$0xf0]  ;;  %v13679_v21 = vld [vmem:[%s21233_s7 + $0xf68] sm:$0xf] }
 0x666   : > { %8702 = vmatpush.bf16.msrb.mxu1 %v13308_v48  ;;  %v7681_v5 = vpop.f32.mrf.mxu1  ;;  %v13544_v48 = vor.u32 %v14736_v8, %v13543_v30  ;;  %v13624_v8 = vor.u32 %v14756_v4, %v13623_v61 }
 0x667   : > { %8715 = vmatpush.bf16.msrb.mxu2 %v13184_v32  ;;  %v7682_v56 = vadd.f32 %v7681_v5, %v7668_v37  ;;  %v13676_v32 = vor.u32 %v14766_v29, %v13673_v45  ;;  %v13615_v37 = vld [vmem:[%s21233_s7 + $0xee8] sm:$0xf]  ;;  %v14753_v5 = vld [vmem:[%s21233_s7 + $0xef4] sm:$0xf0] }
 0x668   : > { %8728 = vmatpush.bf16.msrb.mxu3 %v13312_v46  ;;  %8690 = vmatmul.bf16.vlgmr.msrb.gmra.mxu0 %v19986_v11  ;;  %v13655_v46 = vld [vmem:[%s21233_s7 + $0xf40] sm:$0xf]  ;;  %v13616_v18 = vor.u32 %v14753_v5, %v13615_v37  ;;  %v13599_v45 = vld [vmem:[%s21233_s7 + $0xec8] sm:$0xf]  ;;  %v14769_v37 = vld [vmem:[%s21233_s7 + $0xf74] sm:$0xf0] }
 0x669   : > { %9152 = vmatpush.bf16.msra.mxu0 %v13608_v22  ;;  %8703 = vmatmul.bf16.vlgmr.msrb.gmra.mxu1 %v19990_v53  ;;  %v20266_v43 = vadd.f32 %v7682_v56, %v19850_v1  ;;  %v13527_v1 = vld [vmem:[%s21233_s7 + $0xe40] sm:$0xf]  ;;  %v14764_v22 = vld [vmem:[%s21233_s7 + $0xf4c] sm:$0xf0]  ;;  %v13743_v56 = vld [vmem:[%s21233_s7 + $0xfe8] sm:$0xf] }
 0x66a   : > { %9165 = vmatpush.bf16.msra.mxu1 %v13736_v47  ;;  %8716 = vmatmul.bf16.vlgmr.msrb.gmra.mxu2 %v19986_v11  ;;  %v13687_v11 = vld [vmem:[%s21233_s7 + $0xf80] sm:$0xf]  ;;  %v14730_v47 = vld [vmem:[%s21233_s7 + $0xe44] sm:$0xf]  ;;  %v13528_v10 = vor.u32 %v14732_v59, %v13527_v1  ;;  %v13656_v16 = vor.u32 %v14764_v22, %v13655_v46  ;;  %v13727_v59 = vld [vmem:[%s21233_s7 + $0xfc8] sm:$0xf] }
 0x66b   : > { %9178 = vmatpush.bf16.msra.mxu2 %v13612_v41  ;;  %8729 = vmatmul.bf16.vlgmr.msrb.gmra.mxu3 %v19990_v53  ;;  %v14772_v53 = vld [vmem:[%s21233_s7 + $0xf8c] sm:$0xf0]  ;;  %v13529_v41 = vld [vmem:[%s21233_s7 + $0xe50] sm:$0xf0]  ;;  %v13601_v46 = vld [vmem:[%s21233_s7 + $0xed8] sm:$0xf0] }
 0x66c   : > { %9191 = vmatpush.bf16.msra.mxu3 %v13740_v31  ;;  %v13688_v7 = vor.u32 %v14772_v53, %v13687_v11  ;;  %v14762_v31 = vld [vmem:[%s21233_s7 + $0xf44] sm:$0xf]  ;;  %v13532_v25 = vor.u32 %v14730_v47, %v13529_v41  ;;  %v13497_v53 = vld [vmem:[%s21233_s7 + $0xe10] sm:$0xf0]  ;;  %v14779_v22 = vld [vmem:[%s21233_s7 + $0xfcc] sm:$0xf] }
 0x66d   : > { %9153 = vmatpush.bf16.msra.mxu0 %v13592_v36  ;;  %v7694_v40 = vpop.f32.mrf.mxu2  ;;  %v7670_v35 = vpop.f32.mrf.mxu0  ;;  %v13511_v36 = vld [vmem:[%s21233_s7 + $0xe20] sm:$0xf]  ;;  %v14722_v11 = vld [vmem:[%s21233_s7 + $0xe04] sm:$0xf]  ;;  %v13729_v47 = vld [vmem:[%s21233_s7 + $0xfd8] sm:$0xf0] }
 0x66e   : > { %9166 = vmatpush.bf16.msra.mxu1 %v13720_v3  ;;  %v7707_v55 = vpop.f32.mrf.mxu3  ;;  %v7683_v14 = vpop.f32.mrf.mxu1  ;;  %v14728_v3 = vld [vmem:[%s21233_s7 + $0xe2c] sm:$0xf0]  ;;  %v13500_v26 = vor.u32 %v14722_v11, %v13497_v53  ;;  %v13732_v35 = vor.u32 %v14779_v22, %v13729_v47  ;;  %v13551_v53 = vld [vmem:[%s21233_s7 + $0xe68] sm:$0xf]  ;;  %v14735_v5 = vld [vmem:[%s21233_s7 + $0xe6c] sm:$0xf] }
 0x66f   : > { %9179 = vmatpush.bf16.msra.mxu2 %v13596_v63  ;;  %v7708_v62 = vadd.f32 %v7707_v55, %v7694_v40  ;;  %v13660_v63 = vor.u32 %v14762_v31, %v13657_v24  ;;  %v13512_v13 = vor.u32 %v14728_v3, %v13511_v36  ;;  %v20402_v40 = vpack.c.bf16 %v18618_v54, %v18618_v54  ;;  %v13583_v24 = vld [vmem:[%s21233_s7 + $0xea8] sm:$0xf]  ;;  %v14775_v36 = vld [vmem:[%s21233_s7 + $0xfac] sm:$0xf]  ;;  %v13713_v3 = vld [vmem:[%s21233_s7 + $0xfb8] sm:$0xf0] }
 0x670   : > { %9192 = vmatpush.bf16.msra.mxu3 %v13724_v20  ;;  %v13639_v20 = vld [vmem:[%s21233_s7 + $0xf20] sm:$0xf]  ;;  %v20406_v55 = vpack.c.bf16 %v18691_v57, %v18691_v57  ;;  %v13711_v14 = vld [vmem:[%s21233_s7 + $0xfa8] sm:$0xf]  ;;  %v14777_v57 = vld [vmem:[%s21233_s7 + $0xfb4] sm:$0xf0] }
 0x671   : > { %9154 = vmatpush.bf16.msra.mxu0 %v13576_v6  ;;  %v20308_v44 = vadd.f32 %v7708_v62, %v19892_v49  ;;  %v14758_v49 = vld [vmem:[%s21233_s7 + $0xf24] sm:$0xf]  ;;  %v13640_v6 = vor.u32 %v14760_v38, %v13639_v20  ;;  %v14745_v62 = vld [vmem:[%s21233_s7 + $0xeb4] sm:$0xf0]  ;;  %v13567_v20 = vld [vmem:[%s21233_s7 + $0xe88] sm:$0xf] }
 0x672   : > { %9167 = vmatpush.bf16.msra.mxu1 %v13704_v60  ;;  %v14724_v60 = vld [vmem:[%s21233_s7 + $0xe0c] sm:$0xf0]  ;;  %v14741_v38 = vld [vmem:[%s21233_s7 + $0xe94] sm:$0xf0] }
 0x673   : > { %9180 = vmatpush.bf16.msra.mxu2 %v13580_v33  ;;  %v13516_v33 = vor.u32 %v14726_v9, %v13513_v17  ;;  %v13496_v30 = vor.u32 %v14724_v60, %v13495_v50  ;;  %v13716_v17 = vor.u32 %v14775_v36, %v13713_v3  ;;  %v14739_v50 = vld [vmem:[%s21233_s7 + $0xe8c] sm:$0xf]  ;;  %v13697_v60 = vld [vmem:[%s21233_s7 + $0xf98] sm:$0xf0]  ;;  %v13503_v36 = vld [vmem:[%s21233_s7 + $0xe08] sm:$0xf] }
 0x674   : > { %9193 = vmatpush.bf16.msra.mxu3 %v13708_v15  ;;  %v13644_v15 = vor.u32 %v14758_v49, %v13641_v0  ;;  %v13695_v49 = vld [vmem:[%s21233_s7 + $0xf88] sm:$0xf]  ;;  %v14773_v0 = vld [vmem:[%s21233_s7 + $0xf94] sm:$0xf0] }
 0x675   : > { %9155 = vmatpush.bf16.msra.mxu0 %v13560_v51  ;;  %v7696_v27 = vpop.f32.mrf.mxu2  ;;  %v14785_v51 = vld [vmem:[%s21233_s7 + $0xff4] sm:$0xf0]  ;;  %v13696_v11 = vor.u32 %v14773_v0, %v13695_v49  ;;  %v14723_v49 = vld [vmem:[%s21233_s7 + $0xe0c] sm:$0xf]  ;;  %v13505_v0 = vld [vmem:[%s21233_s7 + $0xe18] sm:$0xf0] }
 0x676   : > { %9168 = vmatpush.bf16.msra.mxu1 %v13688_v7  ;;  %v7709_v58 = vpop.f32.mrf.mxu3  ;;  %v14751_v7 = vld [vmem:[%s21233_s7 + $0xeec] sm:$0xf]  ;;  %v13744_v29 = vor.u32 %v14785_v51, %v13743_v56  ;;  %v13553_v51 = vld [vmem:[%s21233_s7 + $0xe78] sm:$0xf0] }
 0x677   : > { %9181 = vmatpush.bf16.msra.mxu2 %v13564_v12  ;;  %v13617_v12 = vld [vmem:[%s21233_s7 + $0xef8] sm:$0xf0] }
 0x678   : > { %9194 = vmatpush.bf16.msra.mxu3 %v13692_v34  ;;  %v14783_v34 = vld [vmem:[%s21233_s7 + $0xfec] sm:$0xf] }
 0x679   : > { %9156 = vmatpush.bf16.msra.mxu0 %v13544_v48  ;;  %v14749_v48 = vld [vmem:[%s21233_s7 + $0xed4] sm:$0xf0]  ;;  %v13748_v1 = vor.u32 %v14783_v34, %v13745_v52  ;;  %v13556_v52 = vor.u32 %v14735_v5, %v13553_v51 }
 0x67a   : > { %9169 = vmatpush.bf16.msra.mxu1 %v13672_v42  ;;  %v13620_v42 = vor.u32 %v14751_v7, %v13617_v12  ;;  %v13600_v41 = vor.u32 %v14749_v48, %v13599_v45  ;;  %v14767_v7 = vld [vmem:[%s21233_s7 + $0xf6c] sm:$0xf]  ;;  %v13680_v12 = vor.u32 %v14769_v37, %v13679_v21  ;;  %v14733_v34 = vld [vmem:[%s21233_s7 + $0xe54] sm:$0xf0]  ;;  %v14057_v21 = vld [vmem:[%s21233_s7 + $0x11f0] sm:$0xf0]  ;;  %v13508_v37 = vor.u32 %v14723_v49, %v13505_v0 }
 0x67b   : > { %9182 = vmatpush.bf16.msra.mxu2 %v13548_v28  ;;  %v14781_v28 = vld [vmem:[%s21233_s7 + $0xfd4] sm:$0xf0]  ;;  %v14800_v49 = vld [vmem:[%s21233_s7 + $0x106c] sm:$0xf0] }
 0x67c   : > { %9195 = vmatpush.bf16.msra.mxu3 %v13676_v32  ;;  %v14747_v32 = vld [vmem:[%s21233_s7 + $0xecc] sm:$0xf]  ;;  %v13728_v31 = vor.u32 %v14781_v28, %v13727_v59  ;;  %v13665_v59 = vld [vmem:[%s21233_s7 + $0xf58] sm:$0xf0] }
 0x67d   : > { %9157 = vmatpush.bf16.msra.mxu0 %v13528_v10  ;;  %v13604_v54 = vor.u32 %v14747_v32, %v13601_v46  ;;  %v14743_v10 = vld [vmem:[%s21233_s7 + $0xeac] sm:$0xf] }
 0x67e   : > { %9170 = vmatpush.bf16.msra.mxu1 %v13656_v16  ;;  %v13585_v16 = vld [vmem:[%s21233_s7 + $0xeb8] sm:$0xf0] }
 0x67f   : > { %9183 = vmatpush.bf16.msra.mxu2 %v13532_v25  ;;  %v13584_v25 = vor.u32 %v14745_v62, %v13583_v24  ;;  %v13588_v9 = vor.u32 %v14743_v10, %v13585_v16  ;;  %v13521_v10 = vld [vmem:[%s21233_s7 + $0xe38] sm:$0xf0] }
 0x680   : > { %9196 = vmatpush.bf16.msra.mxu3 %v13660_v63  ;;  %v13712_v63 = vor.u32 %v14777_v57, %v13711_v14  ;;  %v14761_v14 = vld [vmem:[%s21233_s7 + $0xf34] sm:$0xf0]  ;;  %v14727_v57 = vld [vmem:[%s21233_s7 + $0xe2c] sm:$0xf]  ;;  %v13649_v16 = vld [vmem:[%s21233_s7 + $0xf38] sm:$0xf0] }
 0x681   : > { %9158 = vmatpush.bf16.msra.mxu0 %v13512_v13  ;;  %v13569_v13 = vld [vmem:[%s21233_s7 + $0xe98] sm:$0xf0] }
 0x682   : > { %9171 = vmatpush.bf16.msra.mxu1 %v13640_v6  ;;  %v14771_v6 = vld [vmem:[%s21233_s7 + $0xf8c] sm:$0xf]  ;;  %v13572_v27 = vor.u32 %v14739_v50, %v13569_v13 }
 0x683   : > { %9184 = vmatpush.bf16.msra.mxu2 %v13516_v33  ;;  %v13700_v58 = vor.u32 %v14771_v6, %v13697_v60  ;;  %v14755_v50 = vld [vmem:[%s21233_s7 + $0xf0c] sm:$0xf]  ;;  %v13633_v60 = vld [vmem:[%s21233_s7 + $0xf18] sm:$0xf0] }
 0x684   : > { %9197 = vmatpush.bf16.msra.mxu3 %v13644_v15  ;;  %v13568_v15 = vor.u32 %v14741_v38, %v13567_v20  ;;  %v13631_v20 = vld [vmem:[%s21233_s7 + $0xf08] sm:$0xf]  ;;  %v14757_v38 = vld [vmem:[%s21233_s7 + $0xf14] sm:$0xf0]  ;;  %v13636_v5 = vor.u32 %v14755_v50, %v13633_v60  ;;  %v14798_v60 = vld [vmem:[%s21233_s7 + $0x1064] sm:$0xf] }
 0x685   : > { %9159 = vmatpush.bf16.msra.mxu0 %v13496_v30  ;;  %v8128_v61 = vpop.f32.mrf.mxu0  ;;  %v13681_v30 = vld [vmem:[%s21233_s7 + $0xf78] sm:$0xf0] }
 0x686   : > { %9172 = vmatpush.bf16.msra.mxu1 %v13624_v8  ;;  %v8141_v4 = vpop.f32.mrf.mxu1  ;;  %v13552_v8 = vor.u32 %v14737_v2, %v13551_v53  ;;  %v13632_v2 = vor.u32 %v14757_v38, %v13631_v20 }
 0x687   : > { %9185 = vmatpush.bf16.msra.mxu2 %v13500_v26  ;;  %v8142_v33 = vadd.f32 %v8141_v4, %v8128_v61  ;;  %v13684_v26 = vor.u32 %v14767_v7, %v13681_v30  ;;  %v13927_v61 = vld [vmem:[%s21233_s7 + $0x10e0] sm:$0xf]  ;;  %v14816_v4 = vld [vmem:[%s21233_s7 + $0x10ec] sm:$0xf0] }
 0x688   : > { %9198 = vmatpush.bf16.msra.mxu3 %v13628_v39  ;;  %9160 = vmatmul.bf16.vlgmr.msra.gmra.mxu0 %v20402_v40  ;;  %v13663_v39 = vld [vmem:[%s21233_s7 + $0xf48] sm:$0xf]  ;;  %v13928_v51 = vor.u32 %v14816_v4, %v13927_v61  ;;  %v13911_v30 = vld [vmem:[%s21233_s7 + $0x10c0] sm:$0xf]  ;;  %v13865_v4 = vld [vmem:[%s21233_s7 + $0x1070] sm:$0xf0] }
 0x689   : > { %9204 = vmatpush.bf16.msrb.mxu0 %v13616_v18  ;;  %9173 = vmatmul.bf16.vlgmr.msra.gmra.mxu1 %v20406_v55  ;;  %v20476_v56 = vadd.f32 %v8142_v33, %v20062_v19  ;;  %v13535_v19 = vld [vmem:[%s21233_s7 + $0xe48] sm:$0xf]  ;;  %v14765_v18 = vld [vmem:[%s21233_s7 + $0xf54] sm:$0xf0]  ;;  %v14055_v33 = vld [vmem:[%s21233_s7 + $0x11e0] sm:$0xf] }
 0x68a   : > { %9217 = vmatpush.bf16.msrb.mxu1 %v13744_v29  ;;  %9186 = vmatmul.bf16.vlgmr.msra.gmra.mxu2 %v20402_v40  ;;  %v14731_v29 = vld [vmem:[%s21233_s7 + $0xe4c] sm:$0xf]  ;;  %v13536_v22 = vor.u32 %v14733_v34, %v13535_v19  ;;  %v13664_v47 = vor.u32 %v14765_v18, %v13663_v39  ;;  %v14039_v34 = vld [vmem:[%s21233_s7 + $0x11c0] sm:$0xf]  ;;  %v13913_v39 = vld [vmem:[%s21233_s7 + $0x10d0] sm:$0xf0] }
 0x68b   : > { %9230 = vmatpush.bf16.msrb.mxu2 %v13620_v42  ;;  %9199 = vmatmul.bf16.vlgmr.msra.gmra.mxu3 %v20406_v55  ;;  %v13537_v42 = vld [vmem:[%s21233_s7 + $0xe58] sm:$0xf0]  ;;  %v14842_v18 = vld [vmem:[%s21233_s7 + $0x11c4] sm:$0xf] }
 0x68c   : > { %9243 = vmatpush.bf16.msrb.mxu3 %v13748_v1  ;;  %v14763_v1 = vld [vmem:[%s21233_s7 + $0xf4c] sm:$0xf]  ;;  %v13540_v62 = vor.u32 %v14731_v29, %v13537_v42  ;;  %v14041_v29 = vld [vmem:[%s21233_s7 + $0x11d0] sm:$0xf0]  ;;  %v13895_v42 = vld [vmem:[%s21233_s7 + $0x10a0] sm:$0xf] }
 0x68d   : > { %9205 = vmatpush.bf16.msrb.mxu0 %v13600_v41  ;;  %v8154_v45 = vpop.f32.mrf.mxu2  ;;  %v8130_v32 = vpop.f32.mrf.mxu0  ;;  %v13519_v41 = vld [vmem:[%s21233_s7 + $0xe28] sm:$0xf] }
 0x68e   : > { %9218 = vmatpush.bf16.msrb.mxu1 %v13728_v31  ;;  %v8167_v48 = vpop.f32.mrf.mxu3  ;;  %v8143_v46 = vpop.f32.mrf.mxu1  ;;  %v14729_v31 = vld [vmem:[%s21233_s7 + $0xe34] sm:$0xf0]  ;;  %v14023_v32 = vld [vmem:[%s21233_s7 + $0x11a0] sm:$0xf] }
 0x68f   : > { %9231 = vmatpush.bf16.msrb.mxu2 %v13604_v54  ;;  %v8168_v28 = vadd.f32 %v8167_v48, %v8154_v45  ;;  %v13668_v54 = vor.u32 %v14763_v1, %v13665_v59  ;;  %v13520_v3 = vor.u32 %v14729_v31, %v13519_v41  ;;  %v14808_v1 = vld [vmem:[%s21233_s7 + $0x10ac] sm:$0xf0]  ;;  %v14838_v41 = vld [vmem:[%s21233_s7 + $0x11a4] sm:$0xf]  ;;  %v14025_v31 = vld [vmem:[%s21233_s7 + $0x11b0] sm:$0xf0] }
 0x690   : > { %9244 = vmatpush.bf16.msrb.mxu3 %v13732_v35  ;;  %v13647_v35 = vld [vmem:[%s21233_s7 + $0xf28] sm:$0xf]  ;;  %v14840_v46 = vld [vmem:[%s21233_s7 + $0x11ac] sm:$0xf0] }
 0x691   : > { %9206 = vmatpush.bf16.msrb.mxu0 %v13584_v25  ;;  %v20518_v24 = vadd.f32 %v8168_v28, %v20106_v23  ;;  %v14759_v23 = vld [vmem:[%s21233_s7 + $0xf2c] sm:$0xf]  ;;  %v13648_v25 = vor.u32 %v14761_v14, %v13647_v35  ;;  %v14044_v28 = vor.u32 %v14842_v18, %v14041_v29  ;;  %v13879_v35 = vld [vmem:[%s21233_s7 + $0x1080] sm:$0xf]  ;;  %v14804_v14 = vld [vmem:[%s21233_s7 + $0x108c] sm:$0xf0] }
 0x692   : > { %9219 = vmatpush.bf16.msrb.mxu1 %v13712_v63  ;;  %v14725_v63 = vld [vmem:[%s21233_s7 + $0xe14] sm:$0xf0]  ;;  %v13880_v38 = vor.u32 %v14804_v14, %v13879_v35  ;;  %v13831_v18 = vld [vmem:[%s21233_s7 + $0x1020] sm:$0xf]  ;;  %v14792_v29 = vld [vmem:[%s21233_s7 + $0x102c] sm:$0xf0] }
 0x693   : > { %9232 = vmatpush.bf16.msrb.mxu2 %v13588_v9  ;;  %v13524_v9 = vor.u32 %v14727_v57, %v13521_v10  ;;  %v13504_v53 = vor.u32 %v14725_v63, %v13503_v36  ;;  %v14028_v10 = vor.u32 %v14838_v41, %v14025_v31  ;;  %v14834_v36 = vld [vmem:[%s21233_s7 + $0x1184] sm:$0xf]  ;;  %v14788_v31 = vld [vmem:[%s21233_s7 + $0x100c] sm:$0xf0] }
 0x694   : > { %9245 = vmatpush.bf16.msrb.mxu3 %v13716_v17  ;;  %v13652_v17 = vor.u32 %v14759_v23, %v13649_v16  ;;  %v14802_v23 = vld [vmem:[%s21233_s7 + $0x1084] sm:$0xf]  ;;  %v13881_v16 = vld [vmem:[%s21233_s7 + $0x1090] sm:$0xf0] }
 0x695   : > { %9207 = vmatpush.bf16.msrb.mxu0 %v13568_v15  ;;  %v8156_v13 = vpop.f32.mrf.mxu2  ;;  %v14848_v15 = vld [vmem:[%s21233_s7 + $0x11ec] sm:$0xf0]  ;;  %v13884_v0 = vor.u32 %v14802_v23, %v13881_v16  ;;  %v13945_v16 = vld [vmem:[%s21233_s7 + $0x1110] sm:$0xf0] }
 0x696   : > { %9220 = vmatpush.bf16.msrb.mxu1 %v13696_v11  ;;  %v8169_v6 = vpop.f32.mrf.mxu3  ;;  %v14814_v11 = vld [vmem:[%s21233_s7 + $0x10e4] sm:$0xf]  ;;  %v14056_v7 = vor.u32 %v14848_v15, %v14055_v33  ;;  %v13991_v13 = vld [vmem:[%s21233_s7 + $0x1160] sm:$0xf]  ;;  %v13993_v15 = vld [vmem:[%s21233_s7 + $0x1170] sm:$0xf0] }
 0x697   : > { %9233 = vmatpush.bf16.msrb.mxu2 %v13572_v27  ;;  %v13929_v27 = vld [vmem:[%s21233_s7 + $0x10f0] sm:$0xf0]  ;;  %v14832_v6 = vld [vmem:[%s21233_s7 + $0x116c] sm:$0xf0]  ;;  %v14830_v33 = vld [vmem:[%s21233_s7 + $0x1164] sm:$0xf] }
 0x698   : > { %9246 = vmatpush.bf16.msrb.mxu3 %v13700_v58  ;;  %v14846_v58 = vld [vmem:[%s21233_s7 + $0x11e4] sm:$0xf] }
 0x699   : > { %9208 = vmatpush.bf16.msrb.mxu0 %v13552_v8  ;;  %v14812_v8 = vld [vmem:[%s21233_s7 + $0x10cc] sm:$0xf0]  ;;  %v14060_v19 = vor.u32 %v14846_v58, %v14057_v21  ;;  %v13996_v58 = vor.u32 %v14830_v33, %v13993_v15  ;;  %v13975_v21 = vld [vmem:[%s21233_s7 + $0x1140] sm:$0xf]  ;;  %v13919_v15 = vld [vmem:[%s21233_s7 + $0x10c8] sm:$0xf] }
 0x69a   : > { %9221 = vmatpush.bf16.msrb.mxu1 %v13680_v12  ;;  %v13932_v12 = vor.u32 %v14814_v11, %v13929_v27  ;;  %v13912_v45 = vor.u32 %v14812_v8, %v13911_v30  ;;  %v13868_v27 = vor.u32 %v14798_v60, %v13865_v4  ;;  %v13849_v30 = vld [vmem:[%s21233_s7 + $0x1050] sm:$0xf0]  ;;  %v14826_v8 = vld [vmem:[%s21233_s7 + $0x1144] sm:$0xf] }
 0x69b   : > { %9234 = vmatpush.bf16.msrb.mxu2 %v13556_v52  ;;  %v14844_v52 = vld [vmem:[%s21233_s7 + $0x11cc] sm:$0xf0]  ;;  %v9274_v60 = vld.sshfl [vmem:[#allocation1 + $0x8] sm:$0xff pattern:$0x73625140] }
 0x69c   : > { %9247 = vmatpush.bf16.msrb.mxu3 %v13684_v26  ;;  %v14810_v26 = vld [vmem:[%s21233_s7 + $0x10c4] sm:$0xf]  ;;  %v14040_v48 = vor.u32 %v14844_v52, %v14039_v34 }
 0x69d   : > { %9209 = vmatpush.bf16.msrb.mxu0 %v13536_v22  ;;  %v13916_v59 = vor.u32 %v14810_v26, %v13913_v39  ;;  %v14806_v22 = vld [vmem:[%s21233_s7 + $0x10a4] sm:$0xf] }
 0x69e   : > { %9222 = vmatpush.bf16.msrb.mxu1 %v13664_v47  ;;  %v13897_v47 = vld [vmem:[%s21233_s7 + $0x10b0] sm:$0xf0] }
 0x69f   : > { %9235 = vmatpush.bf16.msrb.mxu2 %v13540_v62  ;;  %v13896_v62 = vor.u32 %v14808_v1, %v13895_v42  ;;  %v13900_v57 = vor.u32 %v14806_v22, %v13897_v47  ;;  %v13959_v1 = vld [vmem:[%s21233_s7 + $0x1120] sm:$0xf]  ;;  %v13832_v47 = vor.u32 %v14792_v29, %v13831_v18  ;;  %v14807_v18 = vld [vmem:[%s21233_s7 + $0x10ac] sm:$0xf]  ;;  %v13905_v29 = vld [vmem:[%s21233_s7 + $0x10b8] sm:$0xf0] }
 0x6a0   : > { %9248 = vmatpush.bf16.msrb.mxu3 %v13668_v54  ;;  %v14024_v54 = vor.u32 %v14840_v46, %v14023_v32  ;;  %v13833_v32 = vld [vmem:[%s21233_s7 + $0x1030] sm:$0xf0]  ;;  %v13815_v22 = vld [vmem:[%s21233_s7 + $0x1000] sm:$0xf] }
 0x6a1   : > { %9210 = vmatpush.bf16.msrb.mxu0 %v13520_v3  ;;  %v14009_v3 = vld [vmem:[%s21233_s7 + $0x1190] sm:$0xf0] }
 0x6a2   : > { %9223 = vmatpush.bf16.msrb.mxu1 %v13648_v25  ;;  %v14012_v50 = vor.u32 %v14834_v36, %v14009_v3  ;;  %v13961_v46 = vld [vmem:[%s21233_s7 + $0x1130] sm:$0xf0]  ;;  %v13935_v36 = vld [vmem:[%s21233_s7 + $0x10e8] sm:$0xf]  ;;  %v14817_v3 = vld [vmem:[%s21233_s7 + $0x10f4] sm:$0xf0] }
 0x6a3   : > { %9236 = vmatpush.bf16.msrb.mxu2 %v13524_v9  ;;  %v13936_v4 = vor.u32 %v14817_v3, %v13935_v36  ;;  %v13999_v3 = vld [vmem:[%s21233_s7 + $0x1168] sm:$0xf] }
 0x6a4   : > { %9249 = vmatpush.bf16.msrb.mxu3 %v13652_v17  ;;  %v13863_v17 = vld [vmem:[%s21233_s7 + $0x1060] sm:$0xf] }
 0x6a5   : > { %9211 = vmatpush.bf16.msrb.mxu0 %v13504_v53  ;;  %v8180_v25 = vpop.f32.mrf.mxu0  ;;  %v13864_v11 = vor.u32 %v14800_v49, %v13863_v17  ;;  %v13992_v53 = vor.u32 %v14832_v6, %v13991_v13  ;;  %v13937_v17 = vld [vmem:[%s21233_s7 + $0x10f8] sm:$0xf0]  ;;  %v14847_v49 = vld [vmem:[%s21233_s7 + $0x11ec] sm:$0xf] }
 0x6a6   : > { %9224 = vmatpush.bf16.msrb.mxu1 %v13632_v2  ;;  %v8193_v63 = vpop.f32.mrf.mxu1  ;;  %v14796_v2 = vld [vmem:[%s21233_s7 + $0x104c] sm:$0xf0]  ;;  %v9273_v6 = vld.sshfl [vmem:[#allocation1] sm:$0xff pattern:$0x73625140] }
 0x6a7   : > { %9237 = vmatpush.bf16.msrb.mxu2 %v13508_v37  ;;  %v8194_v20 = vadd.f32 %v8193_v63, %v8180_v25  ;;  %v14828_v37 = vld [vmem:[%s21233_s7 + $0x114c] sm:$0xf0]  ;;  %v14063_v25 = vld [vmem:[%s21233_s7 + $0x11e8] sm:$0xf]  ;;  %v14849_v63 = vld [vmem:[%s21233_s7 + $0x11f4] sm:$0xf0] }
 0x6a8   : > { %9250 = vmatpush.bf16.msrb.mxu3 %v13636_v5  ;;  %9212 = vmatmul.bf16.vlgmr.msrb.gmra.mxu0 %v20402_v40  ;;  %v14794_v5 = vld [vmem:[%s21233_s7 + $0x1044] sm:$0xf]  ;;  %v13976_v39 = vor.u32 %v14828_v37, %v13975_v21  ;;  %v14064_v33 = vor.u32 %v14849_v63, %v14063_v25  ;;  %v13921_v21 = vld [vmem:[%s21233_s7 + $0x10d8] sm:$0xf0]  ;;  %v14843_v37 = vld [vmem:[%s21233_s7 + $0x11cc] sm:$0xf] }
 0x6a9   : > { %9664 = vmatpush.bf16.msra.mxu0 %v13928_v51  ;;  %9225 = vmatmul.bf16.vlgmr.msrb.gmra.mxu1 %v20406_v55  ;;  %v20678_v61 = vadd.f32 %v8194_v20, %v20266_v43  ;;  %v13847_v43 = vld [vmem:[%s21233_s7 + $0x1040] sm:$0xf]  ;;  %v14815_v20 = vld [vmem:[%s21233_s7 + $0x10ec] sm:$0xf]  ;;  %v14833_v25 = vld [vmem:[%s21233_s7 + $0x1174] sm:$0xf0] }
 0x6aa   : > { %9677 = vmatpush.bf16.msra.mxu1 %v14056_v7  ;;  %9238 = vmatmul.bf16.vlgmr.msrb.gmra.mxu2 %v20402_v40  ;;  %v14007_v40 = vld [vmem:[%s21233_s7 + $0x1180] sm:$0xf]  ;;  %v13848_v26 = vor.u32 %v14796_v2, %v13847_v43  ;;  %v14047_v2 = vld [vmem:[%s21233_s7 + $0x11c8] sm:$0xf]  ;;  %v14799_v63 = vld [vmem:[%s21233_s7 + $0x106c] sm:$0xf] }
 0x6ab   : > { %9690 = vmatpush.bf16.msra.mxu2 %v13932_v12  ;;  %9251 = vmatmul.bf16.vlgmr.msrb.gmra.mxu3 %v20406_v55  ;;  %v14836_v55 = vld [vmem:[%s21233_s7 + $0x118c] sm:$0xf0]  ;;  %v13977_v12 = vld [vmem:[%s21233_s7 + $0x1150] sm:$0xf0] }
 0x6ac   : > { %9703 = vmatpush.bf16.msra.mxu3 %v14060_v19  ;;  %v14008_v9 = vor.u32 %v14836_v55, %v14007_v40  ;;  %v13980_v42 = vor.u32 %v14826_v8, %v13977_v12  ;;  %v14818_v40 = vld [vmem:[%s21233_s7 + $0x1104] sm:$0xf]  ;;  %v13903_v12 = vld [vmem:[%s21233_s7 + $0x10a8] sm:$0xf] }
 0x6ad   : > { %9665 = vmatpush.bf16.msra.mxu0 %v13912_v45  ;;  %v8206_v51 = vpop.f32.mrf.mxu2  ;;  %v8182_v34 = vpop.f32.mrf.mxu0  ;;  %v13948_v13 = vor.u32 %v14818_v40, %v13945_v16 }
 0x6ae   : > { %9678 = vmatpush.bf16.msra.mxu1 %v14040_v48  ;;  %v8219_v7 = vpop.f32.mrf.mxu3  ;;  %v8195_v52 = vpop.f32.mrf.mxu1  ;;  %v13852_v48 = vor.u32 %v14794_v5, %v13849_v30  ;;  %v14049_v5 = vld [vmem:[%s21233_s7 + $0x11d8] sm:$0xf0] }
 0x6af   : > { %9691 = vmatpush.bf16.msra.mxu2 %v13916_v59  ;;  %v8220_v19 = vadd.f32 %v8219_v7, %v8206_v51  ;;  %v14824_v59 = vld [vmem:[%s21233_s7 + $0x112c] sm:$0xf0]  ;;  %v20812_v51 = vpack.c.bf16 %v9273_v6, %v9273_v6  ;;  %v20814_v7 = vpack.c.bf16 %v9274_v60, %v9274_v60  ;;  %v14052_v52 = vor.u32 %v14843_v37, %v14049_v5  ;;  %v13983_v60 = vld [vmem:[%s21233_s7 + $0x1148] sm:$0xf] }
 0x6b0   : > { %9704 = vmatpush.bf16.msra.mxu3 %v14044_v28  ;;  %v14790_v28 = vld [vmem:[%s21233_s7 + $0x1024] sm:$0xf]  ;;  %v13960_v41 = vor.u32 %v14824_v59, %v13959_v1 }
 0x6b1   : > { %9666 = vmatpush.bf16.msra.mxu0 %v13896_v62  ;;  %v20720_v45 = vadd.f32 %v8220_v19, %v20308_v44  ;;  %v14822_v44 = vld [vmem:[%s21233_s7 + $0x1124] sm:$0xf]  ;;  %v13943_v62 = vld [vmem:[%s21233_s7 + $0x1100] sm:$0xf]  ;;  %v13836_v35 = vor.u32 %v14790_v28, %v13833_v32  ;;  %v14809_v19 = vld [vmem:[%s21233_s7 + $0x10b4] sm:$0xf0] }
 0x6b2   : > { %9679 = vmatpush.bf16.msra.mxu1 %v14024_v54  ;;  %v14820_v54 = vld [vmem:[%s21233_s7 + $0x110c] sm:$0xf0]  ;;  %v13964_v14 = vor.u32 %v14822_v44, %v13961_v46  ;;  %v13904_v1 = vor.u32 %v14809_v19, %v13903_v12  ;;  %v13887_v28 = vld [vmem:[%s21233_s7 + $0x1088] sm:$0xf]  ;;  %v14805_v32 = vld [vmem:[%s21233_s7 + $0x1094] sm:$0xf0]  ;;  %v13908_v44 = vor.u32 %v14807_v18, %v13905_v29 }
 0x6b3   : > { %9692 = vmatpush.bf16.msra.mxu2 %v13900_v57  ;;  %v14786_v57 = vld [vmem:[%s21233_s7 + $0x1004] sm:$0xf]  ;;  %v13841_v18 = vld [vmem:[%s21233_s7 + $0x1038] sm:$0xf0] }
 0x6b4   : > { %9705 = vmatpush.bf16.msra.mxu3 %v14028_v10  ;;  %v13817_v10 = vld [vmem:[%s21233_s7 + $0x1010] sm:$0xf0]  ;;  %v13969_v29 = vld [vmem:[%s21233_s7 + $0x1138] sm:$0xf0] }
 0x6b5   : > { %9667 = vmatpush.bf16.msra.mxu0 %v13880_v38  ;;  %v8208_v55 = vpop.f32.mrf.mxu2  ;;  %v13816_v38 = vor.u32 %v14788_v31, %v13815_v22  ;;  %v14015_v22 = vld [vmem:[%s21233_s7 + $0x1188] sm:$0xf]  ;;  %v13889_v31 = vld [vmem:[%s21233_s7 + $0x1098] sm:$0xf0] }
 0x6b6   : > { %9680 = vmatpush.bf16.msra.mxu1 %v14008_v9  ;;  %v8221_v23 = vpop.f32.mrf.mxu3  ;;  %v13944_v9 = vor.u32 %v14820_v54, %v13943_v62  ;;  %v14835_v62 = vld [vmem:[%s21233_s7 + $0x118c] sm:$0xf]  ;;  %v14017_v54 = vld [vmem:[%s21233_s7 + $0x1198] sm:$0xf0]  ;;  %v13871_v55 = vld [vmem:[%s21233_s7 + $0x1068] sm:$0xf] }
 0x6b7   : > { %9693 = vmatpush.bf16.msra.mxu2 %v13884_v0  ;;  %v14065_v0 = vld [vmem:[%s21233_s7 + $0x11f8] sm:$0xf0]  ;;  %v14801_v23 = vld [vmem:[%s21233_s7 + $0x1074] sm:$0xf0]  ;;  %v14020_v36 = vor.u32 %v14835_v62, %v14017_v54  ;;  %v14819_v62 = vld [vmem:[%s21233_s7 + $0x110c] sm:$0xf] }
 0x6b8   : > { %9706 = vmatpush.bf16.msra.mxu3 %v14012_v50  ;;  %v13820_v50 = vor.u32 %v14786_v57, %v13817_v10  ;;  %v14068_v43 = vor.u32 %v14847_v49, %v14065_v0  ;;  %v13888_v10 = vor.u32 %v14805_v32, %v13887_v28  ;;  %v13872_v49 = vor.u32 %v14801_v23, %v13871_v55  ;;  %v13953_v54 = vld [vmem:[%s21233_s7 + $0x1118] sm:$0xf0] }
 0x6b9   : > { %9668 = vmatpush.bf16.msra.mxu0 %v13864_v11  ;;  %v14813_v11 = vld [vmem:[%s21233_s7 + $0x10d4] sm:$0xf0]  ;;  %v14000_v0 = vor.u32 %v14833_v25, %v13999_v3 }
 0x6ba   : > { %9681 = vmatpush.bf16.msra.mxu1 %v13992_v53  ;;  %v13940_v53 = vor.u32 %v14815_v20, %v13937_v17  ;;  %v13920_v30 = vor.u32 %v14813_v11, %v13919_v15  ;;  %v14001_v17 = vld [vmem:[%s21233_s7 + $0x1178] sm:$0xf0] }
 0x6bb   : > { %9694 = vmatpush.bf16.msra.mxu2 %v13868_v27  ;;  %v14845_v27 = vld [vmem:[%s21233_s7 + $0x11d4] sm:$0xf0] }
 0x6bc   : > { %9707 = vmatpush.bf16.msra.mxu3 %v13996_v58  ;;  %v14811_v58 = vld [vmem:[%s21233_s7 + $0x10cc] sm:$0xf]  ;;  %v14048_v8 = vor.u32 %v14845_v27, %v14047_v2  ;;  %v13985_v2 = vld [vmem:[%s21233_s7 + $0x1158] sm:$0xf0] }
 0x6bd   : > { %9669 = vmatpush.bf16.msra.mxu0 %v13848_v26  ;;  %v13924_v34 = vor.u32 %v14811_v58, %v13921_v21  ;;  %v14031_v26 = vld [vmem:[%s21233_s7 + $0x11a8] sm:$0xf] }
 0x6be   : > { %9682 = vmatpush.bf16.msra.mxu1 %v13976_v39  ;;  %v14841_v39 = vld [vmem:[%s21233_s7 + $0x11b4] sm:$0xf0] }
 0x6bf   : > { %9695 = vmatpush.bf16.msra.mxu2 %v13852_v48  ;;  %v14839_v48 = vld [vmem:[%s21233_s7 + $0x11ac] sm:$0xf]  ;;  %v14032_v59 = vor.u32 %v14841_v39, %v14031_v26  ;;  %v14825_v26 = vld [vmem:[%s21233_s7 + $0x1134] sm:$0xf0] }
 0x6c0   : > { %9708 = vmatpush.bf16.msra.mxu3 %v13980_v42  ;;  %v14033_v42 = vld [vmem:[%s21233_s7 + $0x11b8] sm:$0xf0]  ;;  %v14791_v39 = vld [vmem:[%s21233_s7 + $0x102c] sm:$0xf] }
 0x6c1   : > { %9670 = vmatpush.bf16.msra.mxu0 %v13832_v47  ;;  %v14036_v46 = vor.u32 %v14839_v48, %v14033_v42  ;;  %v14837_v47 = vld [vmem:[%s21233_s7 + $0x1194] sm:$0xf0]  ;;  %v13844_v28 = vor.u32 %v14791_v39, %v13841_v18 }
 0x6c2   : > { %9683 = vmatpush.bf16.msra.mxu1 %v13960_v41  ;;  %v14803_v41 = vld [vmem:[%s21233_s7 + $0x108c] sm:$0xf]  ;;  %v14016_v40 = vor.u32 %v14837_v47, %v14015_v22 }
 0x6c3   : > { %9696 = vmatpush.bf16.msra.mxu2 %v13836_v35  ;;  %v13892_v16 = vor.u32 %v14803_v41, %v13889_v31  ;;  %v14787_v22 = vld [vmem:[%s21233_s7 + $0x100c] sm:$0xf]  ;;  %v13825_v31 = vld [vmem:[%s21233_s7 + $0x1018] sm:$0xf0] }
 0x6c4   : > { %9709 = vmatpush.bf16.msra.mxu3 %v13964_v14 }
 0x6c5   : > { %9671 = vmatpush.bf16.msra.mxu0 %v13816_v38  ;;  %v8639_v35 = vpop.f32.mrf.mxu0  ;;  %v13873_v38 = vld [vmem:[%s21233_s7 + $0x1078] sm:$0xf0] }
 0x6c6   : > { %9684 = vmatpush.bf16.msra.mxu1 %v13944_v9  ;;  %v8652_v14 = vpop.f32.mrf.mxu1  ;;  %v14831_v9 = vld [vmem:[%s21233_s7 + $0x116c] sm:$0xf] }
 0x6c7   : > { %9697 = vmatpush.bf16.msra.mxu2 %v13820_v50  ;;  %v8653_v57 = vadd.f32 %v8652_v14, %v8639_v35  ;;  %v14797_v50 = vld [vmem:[%s21233_s7 + $0x1054] sm:$0xf0]  ;;  %v14004_v6 = vor.u32 %v14831_v9, %v14001_v17 }
 0x6c8   : > { %9710 = vmatpush.bf16.msra.mxu3 %v13948_v13  ;;  %9672 = vmatmul.bf16.vlgmr.msra.gmra.mxu0 %v20812_v51  ;;  %v13876_v13 = vor.u32 %v14799_v63, %v13873_v38 }
 0x6c9   : > { %9716 = vmatpush.bf16.msrb.mxu0 %v13936_v4  ;;  %9685 = vmatmul.bf16.vlgmr.msra.gmra.mxu1 %v20814_v7  ;;  %v20884_v20 = vadd.f32 %v8653_v57, %v20476_v56  ;;  %v13855_v56 = vld [vmem:[%s21233_s7 + $0x1048] sm:$0xf]  ;;  %v14829_v4 = vld [vmem:[%s21233_s7 + $0x1154] sm:$0xf0]  ;;  %v13828_v57 = vor.u32 %v14787_v22, %v13825_v31 }
 0x6ca   : > { %9729 = vmatpush.bf16.msrb.mxu1 %v14064_v33  ;;  %9698 = vmatmul.bf16.vlgmr.msra.gmra.mxu2 %v20812_v51  ;;  %v14795_v33 = vld [vmem:[%s21233_s7 + $0x104c] sm:$0xf]  ;;  %v13856_v37 = vor.u32 %v14797_v50, %v13855_v56  ;;  %v13984_v5 = vor.u32 %v14829_v4, %v13983_v60 }
 0x6cb   : > { %9742 = vmatpush.bf16.msrb.mxu2 %v13940_v53  ;;  %9711 = vmatmul.bf16.vlgmr.msra.gmra.mxu3 %v20814_v7  ;;  %v13857_v53 = vld [vmem:[%s21233_s7 + $0x1058] sm:$0xf0] }
 0x6cc   : > { %9755 = vmatpush.bf16.msrb.mxu3 %v14068_v43  ;;  %v14827_v43 = vld [vmem:[%s21233_s7 + $0x114c] sm:$0xf]  ;;  %v13860_v19 = vor.u32 %v14795_v33, %v13857_v53 }
 0x6cd   : > { %9717 = vmatpush.bf16.msrb.mxu0 %v13920_v30  ;;  %v8665_v15 = vpop.f32.mrf.mxu2  ;;  %v8641_v58 = vpop.f32.mrf.mxu0  ;;  %v13839_v30 = vld [vmem:[%s21233_s7 + $0x1028] sm:$0xf] }
 0x6ce   : > { %9730 = vmatpush.bf16.msrb.mxu1 %v14048_v8  ;;  %v8678_v11 = vpop.f32.mrf.mxu3  ;;  %v8654_v21 = vpop.f32.mrf.mxu1  ;;  %v14793_v8 = vld [vmem:[%s21233_s7 + $0x1034] sm:$0xf0] }
 0x6cf   : > { %9743 = vmatpush.bf16.msrb.mxu2 %v13924_v34  ;;  %v8679_v27 = vadd.f32 %v8678_v11, %v8665_v15  ;;  %v13988_v34 = vor.u32 %v14827_v43, %v13985_v2  ;;  %v13840_v48 = vor.u32 %v14793_v8, %v13839_v30 }
 0x6d0   : > { %9756 = vmatpush.bf16.msrb.mxu3 %v14052_v52  ;;  %v13967_v52 = vld [vmem:[%s21233_s7 + $0x1128] sm:$0xf] }
 0x6d1   : > { %9718 = vmatpush.bf16.msrb.mxu0 %v13904_v1  ;;  %v20926_v12 = vadd.f32 %v8679_v27, %v20518_v24  ;;  %v14823_v24 = vld [vmem:[%s21233_s7 + $0x112c] sm:$0xf]  ;;  %v13968_v42 = vor.u32 %v14825_v26, %v13967_v52  ;;  %v13823_v1 = vld [vmem:[%s21233_s7 + $0x1008] sm:$0xf] }
 0x6d2   : > { %9731 = vmatpush.bf16.msrb.mxu1 %v14032_v59  ;;  %v14789_v59 = vld [vmem:[%s21233_s7 + $0x1014] sm:$0xf0]  ;;  %v13972_v32 = vor.u32 %v14823_v24, %v13969_v29 }
 0x6d3   : > { %9744 = vmatpush.bf16.msrb.mxu2 %v13908_v44  ;;  %v13951_v44 = vld [vmem:[%s21233_s7 + $0x1108] sm:$0xf]  ;;  %v13824_v35 = vor.u32 %v14789_v59, %v13823_v1 }
 0x6d4   : > { %9757 = vmatpush.bf16.msrb.mxu3 %v14036_v46  ;;  %v14821_v46 = vld [vmem:[%s21233_s7 + $0x1114] sm:$0xf0] }
 0x6d5   : > { %9719 = vmatpush.bf16.msrb.mxu0 %v13888_v10  ;;  %v8667_v47 = vpop.f32.mrf.mxu2  ;;  %v13952_v14 = vor.u32 %v14821_v46, %v13951_v44  ;;  %v13956_v10 = vor.u32 %v14819_v62, %v13953_v54 }
 0x6d6   : > { %9732 = vmatpush.bf16.msrb.mxu1 %v14016_v40  ;;  %v8680_v41 = vpop.f32.mrf.mxu3 }
 0x6d7   : > { %9745 = vmatpush.bf16.msrb.mxu2 %v13892_v16 }
 0x6d8   : > { %9758 = vmatpush.bf16.msrb.mxu3 %v14020_v36 }
 0x6d9   : > { %9720 = vmatpush.bf16.msrb.mxu0 %v13872_v49 }
 0x6da   : > { %9733 = vmatpush.bf16.msrb.mxu1 %v14000_v0 }
 0x6db   : > { %9746 = vmatpush.bf16.msrb.mxu2 %v13876_v13 }
 0x6dc   : > { %9759 = vmatpush.bf16.msrb.mxu3 %v14004_v6 }
 0x6dd   : > { %9721 = vmatpush.bf16.msrb.mxu0 %v13856_v37 }
 0x6de   : > { %9734 = vmatpush.bf16.msrb.mxu1 %v13984_v5 }
 0x6df   : > { %9747 = vmatpush.bf16.msrb.mxu2 %v13860_v19 }
 0x6e0   : > { %9760 = vmatpush.bf16.msrb.mxu3 %v13988_v34 }
 0x6e1   : > { %9722 = vmatpush.bf16.msrb.mxu0 %v13840_v48 }
 0x6e2   : > { %9735 = vmatpush.bf16.msrb.mxu1 %v13968_v42 }
 0x6e3   : > { %9748 = vmatpush.bf16.msrb.mxu2 %v13844_v28 }
 0x6e4   : > { %9761 = vmatpush.bf16.msrb.mxu3 %v13972_v32 }
 0x6e5   : > { %9723 = vmatpush.bf16.msrb.mxu0 %v13824_v35  ;;  %v8691_v40 = vpop.f32.mrf.mxu0 }
 0x6e6   : > { %9736 = vmatpush.bf16.msrb.mxu1 %v13952_v14  ;;  %v8704_v55 = vpop.f32.mrf.mxu1 }
 0x6e7   : > { %9749 = vmatpush.bf16.msrb.mxu2 %v13828_v57  ;;  %v8705_v23 = vadd.f32 %v8704_v55, %v8691_v40 }
 0x6e8   : > { %9762 = vmatpush.bf16.msrb.mxu3 %v13956_v10  ;;  %9724 = vmatmul.bf16.vlgmr.msrb.gmra.mxu0 %v20812_v51 }
 0x6e9   : > { %9737 = vmatmul.bf16.vlgmr.msrb.gmra.mxu1 %v20814_v7  ;;  %v8736_v16 = vadd.f32 %v8705_v23, %v20678_v61 }
 0x6ea   : > { %9750 = vmatmul.bf16.vlgmr.msrb.gmra.mxu2 %v20812_v51 }
 0x6eb   : > { %9763 = vmatmul.bf16.vlgmr.msrb.gmra.mxu3 %v20814_v7 }
 0x6ed   : > { %v8717_v36 = vpop.f32.mrf.mxu2  ;;  %v8693_v63 = vpop.f32.mrf.mxu0 }
 0x6ee   : > { %v8730_v3 = vpop.f32.mrf.mxu3  ;;  %v8706_v38 = vpop.f32.mrf.mxu1 }
 0x6ef   : > { %v8731_v25 = vadd.f32 %v8730_v3, %v8717_v36 }
 0x6f1   : > { %v20976_v9 = vadd.f32 %v8731_v25, %v20720_v45 }
 0x6f5   : > { %v8719_v17 = vpop.f32.mrf.mxu2 }
 0x6f6   : > { %v8732_v49 = vpop.f32.mrf.mxu3 }
 0x705   : > { %v9161_v0 = vpop.f32.mrf.mxu0 }
 0x706   : > { %v9174_v56 = vpop.f32.mrf.mxu1 }
 0x707   : > { %v9175_v51 = vadd.f32 %v9174_v56, %v9161_v0  ;;  %v9927_v0 = vld [vmem:[%s21235_s9 + $0x78] sm:$0xff] }
 0x708   : > { %v9943_v56 = vld [vmem:[%s21235_s9 + $0xf8] sm:$0xff]  ;;  %9977 = vmatpush.msra.mxu0 %v9927_v0 }
 0x709   : > { %v9256_v7 = vadd.f32 %v9175_v51, %v20884_v20  ;;  %v20983_v20 = vld [vmem:[%s21234_s8] sm:$0xf]  ;;  %v9959_v51 = vld [vmem:[%s21235_s9 + $0x178] sm:$0xff]  ;;  %9997 = vmatpush.msra.mxu1 %v9943_v56 }
 0x70a   : > { %v9774_v19 = vperm.slane %v20983_v20, 0  ;;  %v9775_v29 = vperm.slane %v20983_v20, 1  ;;  %10017 = vmatpush.msra.mxu2 %v9959_v51  ;;  %v9949_v51 = vld [vmem:[%s21235_s9 + $0x128] sm:$0xff] }
 0x70d   : > { %v9187_v50 = vpop.f32.mrf.mxu2  ;;  %v9163_v60 = vpop.f32.mrf.mxu0 }
 0x70e   : > { %v9200_v13 = vpop.f32.mrf.mxu3  ;;  %v9176_v61 = vpop.f32.mrf.mxu1  ;;  %v9926_v60 = vld [vmem:[%s21235_s9 + $0x70] sm:$0xff] }
 0x70f   : > { %v9201_v6 = vadd.f32 %v9200_v13, %v9187_v50  ;;  %v9942_v61 = vld [vmem:[%s21235_s9 + $0xf0] sm:$0xff]  ;;  %9978 = vmatpush.msra.mxu0 %v9926_v60  ;;  %v9964_v60 = vld [vmem:[%s21235_s9 + $0x1a0] sm:$0xff] }
 0x710   : > { %9998 = vmatpush.msra.mxu1 %v9942_v61 }
 0x711   : > { %v9257_v4 = vadd.f32 %v9201_v6, %v20926_v12  ;;  %v9975_v6 = vld [vmem:[%s21235_s9 + $0x1f8] sm:$0xff] }
 0x712   : > { %10037 = vmatpush.msra.mxu3 %v9975_v6  ;;  %v9948_v6 = vld [vmem:[%s21235_s9 + $0x120] sm:$0xff] }
 0x715   : > { %v9189_v33 = vpop.f32.mrf.mxu2 }
 0x716   : > { %v9202_v15 = vpop.f32.mrf.mxu3 }
 0x717   : > { %v9777_v15 = vperm.slane %v20983_v20, 3 }
 0x725   : > { %v9213_v11 = vpop.f32.mrf.mxu0 }
 0x726   : > { %v9226_v53 = vpop.f32.mrf.mxu1 }
 0x727   : > { %v9227_v45 = vadd.f32 %v9226_v53, %v9213_v11 }
 0x729   : > { %v9258_v43 = vadd.f32 %v9227_v45, %v8736_v16  ;;  %v9776_v16 = vperm.slane %v20983_v20, 2  ;;  %v9958_v45 = vld [vmem:[%s21235_s9 + $0x170] sm:$0xff]  ;;  %v9940_v20 = vld [vmem:[%s21235_s9 + $0xe0] sm:$0xff] }
 0x72a   : > { %10018 = vmatpush.msra.mxu2 %v9958_v45 }
 0x72d   : > { %v9239_v2 = vpop.f32.mrf.mxu2  ;;  %v9215_v58 = vpop.f32.mrf.mxu0 }
 0x72e   : > { %v9252_v27 = vpop.f32.mrf.mxu3  ;;  %v9228_v21 = vpop.f32.mrf.mxu1  ;;  %v9957_v58 = vld [vmem:[%s21235_s9 + $0x168] sm:$0xff] }
 0x72f   : > { %v9253_v63 = vadd.f32 %v9252_v27, %v9239_v2  ;;  %v9925_v2 = vld [vmem:[%s21235_s9 + $0x68] sm:$0xff]  ;;  %10019 = vmatpush.msra.mxu2 %v9957_v58 }
 0x730   : > { %v9941_v27 = vld [vmem:[%s21235_s9 + $0xe8] sm:$0xff]  ;;  %9979 = vmatpush.msra.mxu0 %v9925_v2  ;;  %v9930_v2 = vld [vmem:[%s21235_s9 + $0x90] sm:$0xff] }
 0x731   : > { %v9973_v21 = vld [vmem:[%s21235_s9 + $0x1e8] sm:$0xff]  ;;  %9999 = vmatpush.msra.mxu1 %v9941_v27  ;;  %v9962_v27 = vld [vmem:[%s21235_s9 + $0x190] sm:$0xff] }
 0x733   : > { %10000 = vmatpush.msra.mxu1 %v9940_v20  ;;  %v9945_v20 = vld [vmem:[%s21235_s9 + $0x108] sm:$0xff] }
 0x735   : > { %v9241_v37 = vpop.f32.mrf.mxu2 }
 0x736   : > { %v9254_v5 = vpop.f32.mrf.mxu3 }
 0x737   : > { %v9924_v5 = vld [vmem:[%s21235_s9 + $0x60] sm:$0xff] }
 0x738   : > { %9980 = vmatpush.msra.mxu0 %v9924_v5  ;;  %v9929_v5 = vld [vmem:[%s21235_s9 + $0x88] sm:$0xff] }
 0x745   : > { %v9673_v30 = vpop.f32.mrf.mxu0 }
 0x746   : > { %v9686_v8 = vpop.f32.mrf.mxu1 }
 0x747   : > { %v9687_v12 = vadd.f32 %v9686_v8, %v9673_v30  ;;  %v9956_v30 = vld [vmem:[%s21235_s9 + $0x160] sm:$0xff] }
 0x748   : > { %v9972_v8 = vld [vmem:[%s21235_s9 + $0x1e0] sm:$0xff]  ;;  %10020 = vmatpush.msra.mxu2 %v9956_v30  ;;  %v9961_v30 = vld [vmem:[%s21235_s9 + $0x188] sm:$0xff] }
 0x749   : > { %v9768_v34 = vadd.f32 %v9687_v12, %v9256_v7 }
 0x74b   : > { %v9782_v52 = vadd.f32 %v9774_v19, %v9768_v34  ;;  %v9923_v19 = vld [vmem:[%s21235_s9 + $0x58] sm:$0xff] }
 0x74c   : > { %v9939_v34 = vld [vmem:[%s21235_s9 + $0xd8] sm:$0xff]  ;;  %9981 = vmatpush.msra.mxu0 %v9923_v19  ;;  %v9912_v19 = vld [vmem:[%s21235_s9] sm:$0xff] }
 0x74d   : > { %v9786_v26 = vmin.f32 %v9782_v52, 0.0  ;;  %v9699_v39 = vpop.f32.mrf.mxu2  ;;  %v9675_v48 = vpop.f32.mrf.mxu0  ;;  %vm9806_vm14 = vcmp.gt.f32.partialorder %v9782_v52, 0.0  ;;  %10001 = vmatpush.msra.mxu1 %v9939_v34  ;;  %v9928_v34 = vld [vmem:[%s21235_s9 + $0x80] sm:$0xff] }
 0x74e   : > { %v9712_v18 = vpop.f32.mrf.mxu3  ;;  %v9688_v42 = vpop.f32.mrf.mxu1 }
 0x74f   : > { %v9713_v24 = vadd.f32 %v9712_v18, %v9699_v39  ;;  %v9790_v1 = vmul.f32 1.442695, %v9786_v26  ;;  %v9971_v26 = vld [vmem:[%s21235_s9 + $0x1d8] sm:$0xff]  ;;  %v9922_v18 = vld [vmem:[%s21235_s9 + $0x50] sm:$0xff] }
 0x750   : > { %v9954_v42 = vld [vmem:[%s21235_s9 + $0x150] sm:$0xff]  ;;  %9982 = vmatpush.msra.mxu0 %v9922_v18  ;;  %v9960_v18 = vld [vmem:[%s21235_s9 + $0x180] sm:$0xff] }
 0x751   : > { %v9769_v59 = vadd.f32 %v9713_v24, %v9257_v4  ;;  %14950 = vpow2.f32 %v9790_v1  ;;  %v9259_v4 = vadd.f32 %v9253_v63, %v20976_v9  ;;  %v9938_v24 = vld [vmem:[%s21235_s9 + $0xd0] sm:$0xff]  ;;  %v9933_v63 = vld [vmem:[%s21235_s9 + $0xa8] sm:$0xff] }
 0x752   : > { %v9970_v1 = vld [vmem:[%s21235_s9 + $0x1d0] sm:$0xff]  ;;  %10002 = vmatpush.msra.mxu1 %v9938_v24 }
 0x753   : > { %v9783_v28 = vadd.f32 %v9775_v29, %v9769_v59 }
 0x755   : > { %v9787_v32 = vmin.f32 %v9783_v28, 0.0  ;;  %v9701_v44 = vpop.f32.mrf.mxu2  ;;  %vm9807_vm6 = vcmp.gt.f32.partialorder %v9783_v28, 0.0 }
 0x756   : > { %v9714_v46 = vpop.f32.mrf.mxu3 }
 0x757   : > { %v9792_v22 = vmul.f32 1.442695, %v9787_v32  ;;  %v14951_v47 = vpop.eup %14950  ;;  %v9937_v32 = vld [vmem:[%s21235_s9 + $0xc8] sm:$0xff] }
 0x758   : > { %v14069_v41 = vadd.f32 -1.0, %v14951_v47  ;;  %v9953_v46 = vld [vmem:[%s21235_s9 + $0x148] sm:$0xff]  ;;  %10003 = vmatpush.msra.mxu1 %v9937_v32 }
 0x759   : > { %14952 = vpow2.f32 %v9792_v22  ;;  %v9969_v22 = vld [vmem:[%s21235_s9 + $0x1c8] sm:$0xff] }
 0x75a   : > { %v9802_v62 = vmul.f32 1.6732632, %v14069_v41  ;;  %v9920_v41 = vld [vmem:[%s21235_s9 + $0x40] sm:$0xff] }
 0x75c   : > { %v9810_v14 = vsel %vm9806_vm14, %v9782_v52, %v9802_v62  ;;  %v9955_v52 = vld [vmem:[%s21235_s9 + $0x158] sm:$0xff]  ;;  %v9952_v62 = vld [vmem:[%s21235_s9 + $0x140] sm:$0xff] }
 0x75d   : > { %v9814_v36 = vmul.f32 1.050701, %v9810_v14  ;;  %10021 = vmatpush.msra.mxu2 %v9955_v52  ;;  %v9935_v14 = vld [vmem:[%s21235_s9 + $0xb8] sm:$0xff] }
 0x75f   : > { %v14953_v31 = vpop.eup %14952  ;;  %10022 = vmatpush.msra.mxu2 %v9954_v42 }
 0x760   : > { %v14070_v54 = vadd.f32 -1.0, %v14953_v31  ;;  %v9936_v31 = vld [vmem:[%s21235_s9 + $0xc0] sm:$0xff] }
 0x761   : > { %10023 = vmatpush.msra.mxu2 %v9953_v46  ;;  %10004 = vmatpush.msra.mxu1 %v9936_v31 }
 0x762   : > { %v9803_v35 = vmul.f32 1.6732632, %v14070_v54  ;;  %v9968_v54 = vld [vmem:[%s21235_s9 + $0x1c0] sm:$0xff] }
 0x763   : > { %10024 = vmatpush.msra.mxu2 %v9952_v62  ;;  %10005 = vmatpush.msra.mxu1 %v9935_v14 }
 0x764   : > { %v9811_v57 = vsel %vm9807_vm6, %v9783_v28, %v9803_v35  ;;  %v9921_v28 = vld [vmem:[%s21235_s9 + $0x48] sm:$0xff]  ;;  %v9919_v35 = vld [vmem:[%s21235_s9 + $0x38] sm:$0xff] }
 0x765   : > { %v9725_v10 = vpop.f32.mrf.mxu0  ;;  %v9815_v55 = vmul.f32 1.050701, %v9811_v57  ;;  %9983 = vmatpush.msra.mxu0 %v9921_v28 }
 0x766   : > { %v9738_v40 = vpop.f32.mrf.mxu1 }
 0x767   : > { %v9739_v23 = vadd.f32 %v9738_v40, %v9725_v10  ;;  %v9822_v3 = vrot.slane %v9815_v55, 6  ;;  %9984 = vmatpush.msra.mxu0 %v9920_v41  ;;  %v9951_v10 = vld [vmem:[%s21235_s9 + $0x138] sm:$0xff]  ;;  %v9918_v55 = vld [vmem:[%s21235_s9 + $0x30] sm:$0xff] }
 0x768   : > { %v9967_v40 = vld [vmem:[%s21235_s9 + $0x1b8] sm:$0xff]  ;;  %10025 = vmatpush.msra.mxu2 %v9951_v10 }
 0x769   : > { %v9770_v25 = vadd.f32 %v9739_v23, %v9258_v43  ;;  %v20989_v38 = vsel %vm3268_vm7, %v9814_v36, %v9822_v3  ;;  %v20992_v17 = vsel %vm4934_vm2, %v9814_v36, %v9822_v3  ;;  %v9974_v43 = vld [vmem:[%s21235_s9 + $0x1f0] sm:$0xff]  ;;  %9985 = vmatpush.msra.mxu0 %v9919_v35  ;;  %vm9830_vm2 = vcmask 1045506  }
 0x76a   : > { %10038 = vmatpush.msra.mxu3 %v9974_v43  ;;  %v9934_v23 = vld [vmem:[%s21235_s9 + $0xb0] sm:$0xff] }
 0x76b   : > { %v20994_v49 = vadd.f32 %v9776_v16, %v9770_v25  ;;  %v9950_v16 = vld [vmem:[%s21235_s9 + $0x130] sm:$0xff]  ;;  %v9917_v25 = vld [vmem:[%s21235_s9 + $0x28] sm:$0xff]  ;;  %9986 = vmatpush.msra.mxu0 %v9918_v55  ;;  %10006 = vmatpush.msra.mxu1 %v9934_v23 }
 0x76c   : > { %10039 = vmatpush.msra.mxu3 %v9973_v21  ;;  %v9966_v36 = vld [vmem:[%s21235_s9 + $0x1b0] sm:$0xff]  ;;  %10026 = vmatpush.msra.mxu2 %v9950_v16 }
 0x76d   : > { %v9788_v7 = vmin.f32 %v20994_v49, 0.0  ;;  %v9751_v50 = vpop.f32.mrf.mxu2  ;;  %v9727_v11 = vpop.f32.mrf.mxu0  ;;  %vm9808_vm9 = vcmp.gt.f32.partialorder %v20994_v49, 0.0  ;;  %9987 = vmatpush.msra.mxu0 %v9917_v25  ;;  %10007 = vmatpush.msra.mxu1 %v9933_v63  ;;  %v9914_v43 = vld [vmem:[%s21235_s9 + $0x10] sm:$0xff] }
 0x76e   : > { %v9764_v13 = vpop.f32.mrf.mxu3  ;;  %v9740_v53 = vpop.f32.mrf.mxu1  ;;  %10040 = vmatpush.msra.mxu3 %v9972_v8  ;;  %10027 = vmatpush.msra.mxu2 %v9949_v51  ;;  %v9947_v11 = vld [vmem:[%s21235_s9 + $0x118] sm:$0xff] }
 0x76f   : > { %v9765_v33 = vadd.f32 %v9764_v13, %v9751_v50  ;;  %v9794_v9 = vmul.f32 1.442695, %v9788_v7  ;;  %v9965_v7 = vld [vmem:[%s21235_s9 + $0x1a8] sm:$0xff]  ;;  %v9916_v50 = vld [vmem:[%s21235_s9 + $0x20] sm:$0xff]  ;;  %v9963_v53 = vld [vmem:[%s21235_s9 + $0x198] sm:$0xff] }
 0x770   : > { %10041 = vmatpush.msra.mxu3 %v9971_v26  ;;  %9988 = vmatpush.msra.mxu0 %v9916_v50 }
 0x771   : > { %v9771_v37 = vadd.f32 %v9765_v33, %v9259_v4  ;;  %14954 = vpow2.f32 %v9794_v9  ;;  %v9915_v4 = vld [vmem:[%s21235_s9 + $0x18] sm:$0xff]  ;;  %10028 = vmatpush.msra.mxu2 %v9948_v6  ;;  %v9946_v9 = vld [vmem:[%s21235_s9 + $0x110] sm:$0xff] }
 0x772   : > { %10042 = vmatpush.msra.mxu3 %v9970_v1  ;;  %v9931_v33 = vld [vmem:[%s21235_s9 + $0x98] sm:$0xff]  ;;  %9989 = vmatpush.msra.mxu0 %v9915_v4 }
 0x773   : > { %v21047_v12 = vadd.f32 %v9777_v15, %v9771_v37  ;;  %10029 = vmatpush.msra.mxu2 %v9947_v11  ;;  %v9913_v37 = vld [vmem:[%s21235_s9 + $0x8] sm:$0xff] }
 0x774   : > { %10043 = vmatpush.msra.mxu3 %v9969_v22  ;;  %9990 = vmatpush.msra.mxu0 %v9914_v43 }
 0x775   : > { %v9789_v39 = vmin.f32 %v21047_v12, 0.0  ;;  %v9753_v29 = vpop.f32.mrf.mxu2  ;;  %vm9809_vm11 = vcmp.gt.f32.partialorder %v21047_v12, 0.0  ;;  %10030 = vmatpush.msra.mxu2 %v9946_v9 }
 0x776   : > { %v9766_v48 = vpop.f32.mrf.mxu3  ;;  %10044 = vmatpush.msra.mxu3 %v9968_v54  ;;  %9991 = vmatpush.msra.mxu0 %v9913_v37 }
 0x777   : > { %v9796_v59 = vmul.f32 1.442695, %v9789_v39  ;;  %v14955_v44 = vpop.eup %14954  ;;  %v9944_v39 = vld [vmem:[%s21235_s9 + $0x100] sm:$0xff]  ;;  %10031 = vmatpush.msra.mxu2 %v9945_v20 }
 0x778   : > { %v14071_v47 = vadd.f32 -1.0, %v14955_v44  ;;  %10045 = vmatpush.msra.mxu3 %v9967_v40  ;;  %9992 = vmatpush.msra.mxu0 %v9912_v19 }
 0x779   : > { %14956 = vpow2.f32 %v9796_v59  ;;  %10032 = vmatpush.msra.mxu2 %v9944_v39 }
 0x77a   : > { %v9804_v57 = vmul.f32 1.6732632, %v14071_v47  ;;  %10046 = vmatpush.msra.mxu3 %v9966_v36 }
 0x77c   : > { %v9812_v0 = vsel %vm9808_vm9, %v20994_v49, %v9804_v57  ;;  %v9932_v49 = vld [vmem:[%s21235_s9 + $0xa0] sm:$0xff]  ;;  %10047 = vmatpush.msra.mxu3 %v9965_v7 }
 0x77d   : > { %v9816_v61 = vmul.f32 1.050701, %v9812_v0  ;;  %10008 = vmatpush.msra.mxu1 %v9932_v49 }
 0x77e   : > { %10048 = vmatpush.msra.mxu3 %v9964_v60 }
 0x77f   : > { %v14957_v3 = vpop.eup %14956  ;;  %10009 = vmatpush.msra.mxu1 %v9931_v33  ;;  %v9823_v58 = vrot.slane %v9816_v61, 4 }
 0x780   : > { %v14072_v56 = vadd.f32 -1.0, %v14957_v3  ;;  %10049 = vmatpush.msra.mxu3 %v9963_v53 }
 0x781   : > { %10010 = vmatpush.msra.mxu1 %v9930_v2 }
 0x782   : > { %v9805_v13 = vmul.f32 1.6732632, %v14072_v56  ;;  %10050 = vmatpush.msra.mxu3 %v9962_v27 }
 0x783   : > { %10011 = vmatpush.msra.mxu1 %v9929_v5 }
 0x784   : > { %v9813_v15 = vsel %vm9809_vm11, %v21047_v12, %v9805_v13  ;;  %10051 = vmatpush.msra.mxu3 %v9961_v30 }
 0x785   : > { %v9817_v45 = vmul.f32 1.050701, %v9813_v15  ;;  %10012 = vmatpush.msra.mxu1 %v9928_v34 }
 0x786   : > { %10052 = vmatpush.msra.mxu3 %v9960_v18 }
 0x787   : > { %v9824_v21 = vrot.slane %v9817_v45, 2 }
 0x789   : > { %v9826_v8 = vsel %vm4937_vm4, %v9823_v58, %v9824_v21  ;;  %v9829_v12 = vsel %vm605_vm1, %v9824_v21, %v9823_v58  ;;  %vm10073_vm4 = vcmask 0  }
 0x78a   : > { %v9827_v52 = vsel %vm5126_vm8, %v20989_v38, %v9826_v8  ;;  %v9831_v26 = vsel %vm9830_vm2, %v20992_v17, %v9829_v12 }
 0x78b   : > { %v9832_v24 = vrot.slane %v9831_v26, 2  ;;  %9833 = vst [vmem:[#allocation1] ss:$4 sm:$0xff] %v9827_v52 }
 0x78d   : > { %9839 = vst [vmem:[#allocation1 + $0x20] ss:$4 sm:$0xff] %v9832_v24 }
 0x792   : > { %v9834_v38 = vld.sshfl [vmem:[#allocation1] sm:$0xff pattern:$0x73625140]  ;;  %v9835_v17 = vld.sshfl [vmem:[#allocation1 + $0x8] sm:$0xff pattern:$0x73625140] }
 0x793   : > { %v9852_v29 = vsel %vm3268_vm7, %v9834_v38, -inf  ;;  %v9859_v48 = vsel %vm3268_vm7, %v9835_v17, -inf  ;;  %v9836_v42 = vld.sshfl [vmem:[#allocation1 + $0x10] sm:$0xff pattern:$0x73625140] }
 0x794   : > { %v9840_v1 = vld.sshfl [vmem:[#allocation1 + $0x20] sm:$0xff pattern:$0x73625140]  ;;  %v9853_v59 = vrot.slane %v9852_v29, 4  ;;  %v9860_v28 = vrot.slane %v9859_v48, 4  ;;  %v9866_v32 = vsel %vm3268_vm7, %v9836_v42, -inf  ;;  %v10068_v42 = vlaneseq }
 0x795   : > { %v9880_v44 = vsel %vm3268_vm7, %v9840_v1, -inf  ;;  %v9841_v46 = vld.sshfl [vmem:[#allocation1 + $0x28] sm:$0xff pattern:$0x73625140]  ;;  %v9867_v22 = vrot.slane %v9866_v32, 4 }
 0x796   : > { %v9854_v47 = vmax.f32 %v9852_v29, %v9853_v59  ;;  %v9881_v41 = vrot.slane %v9880_v44, 4  ;;  %v9861_v31 = vmax.f32 %v9859_v48, %v9860_v28  ;;  %v9887_v62 = vsel %vm3268_vm7, %v9841_v46, -inf  ;;  %v9842_v54 = vld.sshfl [vmem:[#allocation1 + $0x30] sm:$0xff pattern:$0x73625140] }
 0x797   : > { %v9888_v35 = vrot.slane %v9887_v62, 4  ;;  %v9868_v14 = vmax.f32 %v9866_v32, %v9867_v22  ;;  %v9894_v57 = vsel %vm3268_vm7, %v9842_v54, -inf  ;;  %v9837_v10 = vld.sshfl [vmem:[#allocation1 + $0x18] sm:$0xff pattern:$0x73625140]  ;;  %vm10070_vm1 = vcmp.lt.s32.totalorder %v10068_v42, 512 }
 0x798   : > { %v9855_v40 = vrot.slane %v9854_v47, 2  ;;  %v9882_v55 = vmax.f32 %v9880_v44, %v9881_v41  ;;  %v9862_v23 = vrot.slane %v9861_v31, 2  ;;  %v9895_v16 = vrot.slane %v9894_v57, 4  ;;  %v9843_v36 = vld.sshfl [vmem:[#allocation1 + $0x38] sm:$0xff pattern:$0x73625140] }
 0x799   : > { %v9889_v3 = vmax.f32 %v9887_v62, %v9888_v35  ;;  %v9869_v25 = vrot.slane %v9868_v14, 2  ;;  %v9873_v63 = vsel %vm3268_vm7, %v9837_v10, -inf  ;;  %v9901_v0 = vsel %vm3268_vm7, %v9843_v36, -inf  ;;  %v9976_v22 = vld [vmem:[#allocation5] sm:$0x1] }
 0x79a   : > { %v9856_v56 = vmax.f32 %v9854_v47, %v9855_v40  ;;  %v9883_v51 = vrot.slane %v9882_v55, 2  ;;  %v9863_v7 = vmax.f32 %v9861_v31, %v9862_v23  ;;  %v9896_v50 = vmax.f32 %v9894_v57, %v9895_v16 }
 0x79b   : > { %v9890_v49 = vrot.slane %v9889_v3, 2  ;;  %v9870_v13 = vmax.f32 %v9868_v14, %v9869_v25  ;;  %v9874_v6 = vrot.slane %v9873_v63, 4  ;;  %v9902_v60 = vrot.slane %v9901_v0, 4 }
 0x79c   : > { %v9857_v61 = vrot.slane %v9856_v56, 1  ;;  %v9884_v4 = vmax.f32 %v9882_v55, %v9883_v51  ;;  %v9897_v33 = vrot.slane %v9896_v50, 2  ;;  %v9864_v15 = vrot.slane %v9863_v7, 1 }
 0x79d   : > { %v9891_v11 = vmax.f32 %v9889_v3, %v9890_v49  ;;  %v9875_v53 = vmax.f32 %v9873_v63, %v9874_v6  ;;  %v9903_v45 = vmax.f32 %v9901_v0, %v9902_v60  ;;  %v9871_v2 = vrot.slane %v9870_v13, 1 }
 0x79e   : > { %v9885_v43 = vrot.slane %v9884_v4, 1  ;;  %v9898_v9 = vmax.f32 %v9896_v50, %v9897_v33  ;;  %v9858_v37 = vmax.f32 %v9856_v56, %v9857_v61  ;;  %v9865_v30 = vmax.f32 %v9863_v7, %v9864_v15 }
 0x79f   : > { %v9892_v27 = vrot.slane %v9891_v11, 1  ;;  %v9876_v58 = vrot.slane %v9875_v53, 2  ;;  %v9904_v21 = vrot.slane %v9903_v45, 2  ;;  %v9872_v52 = vmax.f32 %v9870_v13, %v9871_v2 }
 0x7a0   : > { %v9886_v5 = vmax.f32 %v9884_v4, %v9885_v43  ;;  %v9899_v20 = vrot.slane %v9898_v9, 1 }
 0x7a1   : > { %v9893_v8 = vmax.f32 %v9891_v11, %v9892_v27  ;;  %v9877_v12 = vmax.f32 %v9875_v53, %v9876_v58  ;;  %v9905_v19 = vmax.f32 %v9903_v45, %v9904_v21 }
 0x7a2   : > { %v9908_v34 = vmax.f32 %v9858_v37, %v9886_v5  ;;  %v9900_v26 = vmax.f32 %v9898_v9, %v9899_v20 }
 0x7a3   : > { %v9909_v39 = vmax.f32 %v9865_v30, %v9893_v8  ;;  %v9878_v18 = vrot.slane %v9877_v12, 1  ;;  %v9906_v24 = vrot.slane %v9905_v19, 1 }
 0x7a4   : > { %9993 = vmatmul.f32.vlgmr.msra.gmra.mxu0 %v9908_v34  ;;  %v9910_v38 = vmax.f32 %v9872_v52, %v9900_v26 }
 0x7a5   : > { %10013 = vmatmul.f32.vlgmr.msra.gmra.mxu1 %v9909_v39  ;;  %v10061_v17 = vrot.slane %v9909_v39, 7  ;;  %v9879_v29 = vmax.f32 %v9877_v12, %v9878_v18  ;;  %v9907_v48 = vmax.f32 %v9905_v19, %v9906_v24 }
 0x7a6   : > { %10033 = vmatmul.f32.vlgmr.msra.gmra.mxu2 %v9910_v38  ;;  %v10062_v1 = vrot.slane %v9910_v38, 6 }
 0x7a7   : > { %v9911_v59 = vmax.f32 %v9879_v29, %v9907_v48  ;;  %v10064_v28 = vsel %vm5237_vm15, %v9908_v34, %v10061_v17 }
 0x7a9   : > { %10053 = vmatmul.f32.vlgmr.msra.gmra.mxu3 %v9911_v59  ;;  %v10063_v32 = vrot.slane %v9911_v59, 5 }
 0x7ab   : > { %v10065_v44 = vsel %vm2228_vm10, %v10062_v1, %v10063_v32 }
 0x7ac   : > { %v10066_v46 = vsel %vm3268_vm7, %v10064_v28, %v10065_v44 }
 0x7ad   : > { %10072 = vst.msk [vmem:[%s422_s18] sm:$0xf] %vm10070_vm1, %v10066_v46 }
 0x821   : > { %v9994_v47 = vpop.f32.mrf.mxu0 }
 0x822   : > { %v9995_v41 = vadd.f32 %v9994_v47, %v9976_v22  ;;  %v10014_v31 = vpop.f32.mrf.mxu1 }
 0x824   : > { %v10015_v62 = vadd.f32 %v10014_v31, %v9995_v41 }
 0x829   : > { %v10034_v54 = vpop.f32.mrf.mxu2 }
 0x82a   : > { %v10035_v35 = vadd.f32 %v10034_v54, %v10015_v62 }
 0x82c   : > { %v10054_v14 = vpop.f32.mrf.mxu3 }
 0x82d   : > { %v10055_v57 = vadd.f32 %v10054_v14, %v10035_v35 }
 0x82f   : > { %10074 = vst.msk [vmem:[%s418_s21] sm:$0x1] %vm10073_vm4, %v10055_v57 }
 0x830 PF: > { %s25_s23 = sadd.s32 1, %s14970_s23  }
 0x831   : > { %p22_p4 = scmp.ge.s32.totalorder %s25_s23, 4  }
 0x833   :  { %24 = sbr.rel (!%p22_p4) target bundleno = 3 (0x3), region = 180 }

</bundles_post_ra>
